<compile_context>
chip_gen: v7x
topology: tpu7x:2x2x1
jax: 0.10.0
libtpu: 0.0.40
codegen_flags: <defaults>
</compile_context>

<pallas_src>
import jax
import jax.numpy as jnp
from jax.experimental import pallas as pl
from jax.experimental.pallas import tpu as pltpu

EPS = 1e-5
DIRECT_MATMUL_MIN_C = 64     # channel count at/above which the im2col duplication is skipped


# ----------------------------- kernel factory --------------------------------
def _build_kernel(H, W, Hh, Wh, C_skip, C_up, Cmid, Cout, patch1, patch2):
    Cin = C_skip + C_up
    taps = [(ky, kx) for ky in range(3) for kx in range(3)]

    def kernel(x2_ref, x1_ref, w1_ref, b1_ref, w2_ref, b2_ref, o_ref,
               xpad_ref, ypad_ref, *patch_scr):
        """Fused double_conv on a block of Bt (n, d) slices.

        x2_ref : (Bt, H,  W,  C_skip)  bf16   skip-connection slices
        x1_ref : (Bt, Hh, Wh, C_up)    bf16   HALF-resolution low-res slices
        w*_ref : (9*cin, cout)         bf16   im2col weights, eval-BN scale folded in
        b*_ref : (1, cout)             f32    folded BN bias (includes conv bias)
        o_ref  : (Bt, H, W, Cout)      bf16
        xpad_ref : (Bt, H+2, W+2, Cin)  f32 scratch (padded concat input)
        ypad_ref : (Bt, H+2, W+2, Cmid) f32 scratch (padded layer-1 activation)
        patch_scr: optional (Bt, H, W, 9*max(...)) bf16 im2col scratch
        """
        patch_ref = patch_scr[0] if patch_scr else None
        Bt = x2_ref.shape[0]
        M = Bt * H * W

        # Scratch persists across grid steps (and each v7x core has its own step stream),
        # so the 1-px zero border is rewritten EVERY step -- but only the border; the
        # interior is fully overwritten below.  (Do NOT gate this on program_id == 0.)
        def zero_border(ref):
            n, hp, wp, c = ref.shape
            row = jnp.zeros((n, 1, wp, c), ref.dtype)
            col = jnp.zeros((n, hp, 1, c), ref.dtype)
            ref[:, 0:1, :, :] = row
            ref[:, hp - 1:hp, :, :] = row
            ref[:, :, 0:1, :] = col
            ref[:, :, wp - 1:wp, :] = col

        zero_border(xpad_ref)
        zero_border(ypad_ref)

        # concat([x2, nearest_up(x1)], channel) written straight into the padded tile.
        xpad_ref[:, 1:H + 1, 1:W + 1, 0:C_skip] = x2_ref[...].astype(xpad_ref.dtype)

        # In-kernel nearest (2,2) upsample of the half-res x1 block.  All reshapes keep the
        # lane (last) dim unchanged, which is the Mosaic-supported reshape class.
        x1h = x1_ref[...]                                             # (Bt, Hh, Wh, C_up)
        xh = jnp.broadcast_to(x1h.reshape(Bt * Hh, 1, Wh, C_up),
                              (Bt * Hh, 2, Wh, C_up)).reshape(Bt * H, Wh, C_up)
        xw = jnp.broadcast_to(xh.reshape(Bt * H, Wh, 1, C_up),
                              (Bt * H, Wh, 2, C_up)).reshape(Bt, H, W, C_up)
        xpad_ref[:, 1:H + 1, 1:W + 1, C_skip:Cin] = xw.astype(xpad_ref.dtype)

        def conv3x3_bias_relu(src_ref, cin, w_ref, b_ref, use_patch, store):
            """3x3 'same' conv on a pre-padded (Bt,H+2,W+2,cin) tile, + bias + ReLU.

            w_ref: (9*cin, cout) bf16 with eval-BN scale folded; b_ref: (1, cout) f32.
            MXU accumulation is f32; the result is handed to `store` as (M, cout) f32.
            """
            if use_patch:
                # Small cin: im2col into the bf16 patch buffer -> ONE matmul, K = 9*cin.
                k = 9 * cin
                for t, (ky, kx) in enumerate(taps):
                    patch_ref[:, :, :, t * cin:(t + 1) * cin] = (
                        src_ref[:, ky:ky + H, kx:kx + W, :].astype(patch_ref.dtype))
                lhs = patch_ref[...] if k == patch_ref.shape[-1] else patch_ref[:, :, :, 0:k]
                acc = jnp.dot(lhs.reshape(M, k), w_ref[...],
                              preferred_element_type=jnp.float32)
            else:
                # Large cin: skip the 9x duplication; 9 accumulating K=cin matmuls reading
                # shifted windows directly (MXU K-dim is already full at cin >= 64).
                acc = None
                for t, (ky, kx) in enumerate(taps):
                    lhs = src_ref[:, ky:ky + H, kx:kx + W, :].reshape(M, cin)
                    part = jnp.dot(lhs.astype(jnp.bfloat16),
                                   w_ref[t * cin:(t + 1) * cin, :],
                                   preferred_element_type=jnp.float32)
                    acc = part if acc is None else acc + part
            store(jnp.maximum(acc + b_ref[...], 0.0))                 # (M, cout) f32

        # Layer 1: activation goes straight into the padded VMEM tile (never touches HBM).
        def store_mid(y):
            ypad_ref[:, 1:H + 1, 1:W + 1, :] = (
                y.reshape(Bt, H, W, Cmid).astype(ypad_ref.dtype))

        # Layer 2: straight into the bf16 output block.
        def store_out(y):
            o_ref[...] = y.reshape(Bt, H, W, Cout).astype(o_ref.dtype)

        conv3x3_bias_relu(xpad_ref, Cin, w1_ref, b1_ref, patch1, store_mid)
        conv3x3_bias_relu(ypad_ref, Cmid, w2_ref, b2_ref, patch2, store_out)

    return kernel


# ------------------------------ sizing helpers --------------------------------
def _to_slices(x):
    """NCDHW -> channels-last slices (N*D, H, W, C)."""
    n, c, d, h, w = x.shape
    return jnp.transpose(x, (0, 2, 3, 4, 1)).reshape(n * d, h, w, c)


def _padded_vmem_bytes(shape, dtype):
    """Bytes once the last dim is padded to 128 lanes and the second-to-last to the
    dtype's sublane packing (8 for 4B, 16 for 2B, 32 for 1B)."""
    item = jnp.dtype(dtype).itemsize
    sub = {4: 8, 2: 16, 1: 32}.get(item, 8)
    dims = list(shape)
    dims[-1] = -(-dims[-1] // 128) * 128
    if len(dims) >= 2:
        dims[-2] = -(-dims[-2] // sub) * sub
    n = 1
    for d in dims:
        n *= d
    return n * item


def _vmem_budget_bytes():
    """~75% of physical VMEM: ~96 MiB on v5e/v6e (128 MiB), ~48 MiB on v7x (64 MiB)."""
    mib = 1024 * 1024
    try:
        phys = int(pltpu.get_tpu_info().vmem_capacity_bytes)
    except Exception:
        phys = None
    if not phys or phys <= 0:
        phys = 64 * mib                       # conservative (v7x-sized) fallback
    return min(max((phys * 3) // 4, 32 * mib), (phys * 7) // 8, 100 * mib)


def _per_step_vmem_bytes(Bt, H, W, C_skip, C_up, Cmid, Cout, patch1, patch2):
    """Estimate of per-grid-step VMEM: double-buffered pipeline blocks + scratches."""
    Cin = C_skip + C_up
    Hh, Wh = H // 2, W // 2
    bf, f32 = jnp.bfloat16, jnp.float32
    stream = (_padded_vmem_bytes((Bt, H, W, C_skip), bf)
              + _padded_vmem_bytes((Bt, Hh, Wh, C_up), bf)
              + _padded_vmem_bytes((Bt, H, W, Cout), bf)
              + _padded_vmem_bytes((9 * Cin, Cmid), bf)
              + _padded_vmem_bytes((9 * Cmid, Cout), bf)
              + _padded_vmem_bytes((1, Cmid), f32)
              + _padded_vmem_bytes((1, Cout), f32))
    scratch = (_padded_vmem_bytes((Bt, H + 2, W + 2, Cin), f32)
               + _padded_vmem_bytes((Bt, H + 2, W + 2, Cmid), f32))
    kmax = max(9 * Cin if patch1 else 0, 9 * Cmid if patch2 else 0)
    if kmax:
        scratch += _padded_vmem_bytes((Bt, H, W, kmax), bf)
    return 2 * stream + scratch               # pipeline blocks are double-buffered


def _pick_block_b(B, bytes_fn, budget):
    """Largest divisor Bt of B that fits the VMEM budget, preferring >= 4 grid steps
    (>= 2 per v7x TensorCore so the BlockSpec pipeline overlaps), then >= 2, then any."""
    divisors = [d for d in range(1, B + 1) if B % d == 0]
    feasible = [d for d in divisors if bytes_fn(d) <= budget] or [1]
    for min_steps in (4, 2, 1):
        cands = [d for d in feasible if B // d >= min_steps]
        if cands:
            return max(cands)
    return 1


# -------------------------------- wrapper --------------------------------------
def up_forward(x1, x2, p1, p2):
    """x1: (N, C_up, D, H/2, W/2), x2: (N, C_skip, D, H, W) -> (N, out_ch, D, H, W) f32."""
    N, C_up, D, Hh, Wh = x1.shape
    _, C_skip, _, H, W = x2.shape
    assert H == 2 * Hh and W == 2 * Wh, "x2 spatial dims must be 2x x1 (scale_factor=(1,2,2))"
    # (the reference module computes diffY/diffX but never uses them -> skipped)
    B = N * D
    Cin = C_skip + C_up
    Cmid = p1['w'].shape[-1]
    Cout = p2['w'].shape[-1]

    # Channels-last (N*D, H, W, C) slices in bf16 (halves HBM read traffic); x1 stays at
    # HALF resolution -- the nearest upsample happens inside the kernel.
    x2s = _to_slices(x2).astype(jnp.bfloat16)
    x1s = _to_slices(x1).astype(jnp.bfloat16)

    # Fold eval-mode BN (and conv bias) into weights/bias in f32, then cast weights to the
    # bf16 im2col layout (9*cin, cout); the in-kernel epilogue is bias + ReLU only.
    w1 = (p1['w'] * p1['scale']).reshape(9 * Cin, Cmid).astype(jnp.bfloat16)
    w2 = (p2['w'] * p2['scale']).reshape(9 * Cmid, Cout).astype(jnp.bfloat16)
    b1 = p1['bias'].reshape(1, Cmid).astype(jnp.float32)
    b2 = p2['bias'].reshape(1, Cout).astype(jnp.float32)

    patch1 = Cin < DIRECT_MATMUL_MIN_C
    patch2 = Cmid < DIRECT_MATMUL_MIN_C

    budget = _vmem_budget_bytes()
    Bt = _pick_block_b(
        B,
        lambda bt: _per_step_vmem_bytes(bt, H, W, C_skip, C_up, Cmid, Cout, patch1, patch2),
        budget)

    scratch = [
        pltpu.VMEM((Bt, H + 2, W + 2, Cin), jnp.float32),    # padded concat(x2, up(x1))
        pltpu.VMEM((Bt, H + 2, W + 2, Cmid), jnp.float32),   # padded layer-1 activation
    ]
    if patch1 or patch2:
        kmax = max(9 * Cin if patch1 else 0, 9 * Cmid if patch2 else 0)
        scratch.append(pltpu.VMEM((Bt, H, W, kmax), jnp.bfloat16))   # bf16 im2col patches

    kernel = _build_kernel(H, W, Hh, Wh, C_skip, C_up, Cmid, Cout, patch1, patch2)

    y = pl.pallas_call(
        kernel,
        out_shape=jax.ShapeDtypeStruct((B, H, W, Cout), jnp.bfloat16),
        grid=(B // Bt,),
        in_specs=[
            pl.BlockSpec((Bt, H, W, C_skip), lambda b: (b, 0, 0, 0)),   # x2 slices (bf16)
            pl.BlockSpec((Bt, Hh, Wh, C_up), lambda b: (b, 0, 0, 0)),   # half-res x1 slices
            pl.BlockSpec((9 * Cin, Cmid), lambda b: (0, 0)),            # w1 (BN folded, bf16)
            pl.BlockSpec((1, Cmid), lambda b: (0, 0)),                  # b1 (f32)
            pl.BlockSpec((9 * Cmid, Cout), lambda b: (0, 0)),           # w2
            pl.BlockSpec((1, Cout), lambda b: (0, 0)),                  # b2
        ],
        out_specs=pl.BlockSpec((Bt, H, W, Cout), lambda b: (b, 0, 0, 0)),
        scratch_shapes=scratch,
        compiler_params=pltpu.CompilerParams(
            dimension_semantics=("parallel",),   # slice-blocks independent (v7x megacore)
            vmem_limit_bytes=int(budget),
        ),
    )(x2s, x1s, w1, b1, w2, b2)

    # TODO(synk): lane-dense (B, H, W*Cout) output would avoid masked vst at Cout<128 but
    # needs a lane-dim-changing relayout that is not guaranteed to lower in Mosaic.
    return y.reshape(N, D, H, W, Cout).transpose(0, 4, 1, 2, 3).astype(jnp.float32)


# -------------------------------- params ---------------------------------------
def init_params(key, in_ch, out_ch):
    """Deterministic synthetic params for double_conv (2x: Conv3d + BN3d), eval-BN folded."""
    ks = jax.random.split(key, 12)

    def conv_bn(i, cin, cout):
        w = 0.1 * jax.random.normal(ks[i], (3, 3, cin, cout), jnp.float32)    # HWIO
        cb = 0.1 * jax.random.normal(ks[i + 1], (cout,), jnp.float32)
        gamma = 1.0 + 0.1 * jax.random.normal(ks[i + 2], (cout,), jnp.float32)
        beta = 0.1 * jax.random.normal(ks[i + 3], (cout,), jnp.float32)
        mean = 0.1 * jax.random.normal(ks[i + 4], (cout,), jnp.float32)
        var = 1.0 + 0.1 * jnp.abs(jax.random.normal(ks[i + 5], (cout,), jnp.float32))
        scale = gamma / jnp.sqrt(var + EPS)            # fold eval BN (+ conv bias)
        bias = beta + scale * (cb - mean)
        return dict(w=w, cb=cb, gamma=gamma, beta=beta, mean=mean, var=var,
                    scale=scale, bias=bias)

    return conv_bn(0, in_ch, out_ch), conv_bn(6, out_ch, out_ch)


# ------------------------------- references ------------------------------------
def ref_matched_forward(x1, x2, p1, p2):
    """Mirrors the kernel's precision exactly: bf16 inputs / BN-folded bf16 weights,
    f32 MXU accumulate + bias + ReLU, bf16 inter-layer activation, bf16 output."""
    x2s = _to_slices(x2)
    x1u = jnp.repeat(jnp.repeat(_to_slices(x1), 2, axis=1), 2, axis=2)
    y = jnp.concatenate([x2s, x1u], axis=-1).astype(jnp.bfloat16)
    for p in (p1, p2):
        w = (p['w'] * p['scale']).astype(jnp.bfloat16)
        y = jax.lax.conv_general_dilated(
            y, w, (1, 1), 'SAME',
            dimension_numbers=('NHWC', 'HWIO', 'NHWC'),
            preferred_element_type=jnp.float32) + p['bias']
        y = jnp.maximum(y, 0.0).astype(jnp.bfloat16)
    N, _, D, H, W = x2.shape
    return y.reshape(N, D, H, W, -1).transpose(0, 4, 1, 2, 3).astype(jnp.float32)


def ref_module_forward(x1, x2, p1, p2):
    """Full-f32 reference with explicit eval-mode BatchNorm (original module semantics)."""
    x2s = _to_slices(x2)
    x1u = jnp.repeat(jnp.repeat(_to_slices(x1), 2, axis=1), 2, axis=2)
    y = jnp.concatenate([x2s, x1u], axis=-1)
    for p in (p1, p2):
        y = jax.lax.conv_general_dilated(
            y, p['w'], (1, 1), 'SAME',
            dimension_numbers=('NHWC', 'HWIO', 'NHWC')) + p['cb']
        y = p['gamma'] * (y - p['mean']) / jnp.sqrt(p['var'] + EPS) + p['beta']
        y = jnp.maximum(y, 0.0)
    N, _, D, H, W = x2.shape
    return y.reshape(N, D, H, W, -1).transpose(0, 4, 1, 2, 3)


# ---------------------------------- main ----------------------------------------
if __name__ == "__main__":
    key = jax.random.PRNGKey(0)
    k1, k2, kp = jax.random.split(key, 3)

    N, D = 2, 4
    in_ch, out_ch = 16, 16        # concat of two 8-channel feature maps
    H, W = 16, 16

    x1 = jax.random.normal(k1, (N, in_ch // 2, D, H // 2, W // 2), jnp.float32)
    x2 = jax.random.normal(k2, (N, in_ch // 2, D, H, W), jnp.float32)
    p1, p2 = init_params(kp, in_ch, out_ch)

    up_fn = jax.jit(up_forward)
    out = jax.block_until_ready(up_fn(x1, x2, p1, p2))
    assert out.shape == (N, out_ch, D, H, W), out.shape

    # Primary correctness check: precision-matched reference (bf16 in / f32 acc / bf16 out).
    ref_m = jax.block_until_ready(ref_matched_forward(x1, x2, p1, p2))
    err_m = float(jnp.max(jnp.abs(out - ref_m)))
    assert jnp.allclose(out, ref_m, rtol=1e-2, atol=1e-2), \
        f"max abs diff vs precision-matched ref: {err_m}"

    # Sanity check vs full-f32 module semantics (loose tolerance for the bf16 MXU path).
    ref_f = jax.block_until_ready(ref_module_forward(x1, x2, p1, p2))
    err_f = float(jnp.max(jnp.abs(out - ref_f)))
    assert jnp.allclose(out, ref_f, rtol=5e-2, atol=2e-1), \
        f"max abs diff vs f32 module ref: {err_f}"

    print("KERNEL_OK")
</pallas_src>

<mosaic_0001>
module attributes {stable_mosaic.version = 11 : i64} {
  func.func @kernel(%arg0: i32, %arg1: memref<2x16x16x8xbf16, #tpu.memory_space<vmem>>, %arg2: memref<2x8x8x8xbf16, #tpu.memory_space<vmem>>, %arg3: memref<144x16xbf16, #tpu.memory_space<vmem>>, %arg4: memref<1x16xf32, #tpu.memory_space<vmem>>, %arg5: memref<144x16xbf16, #tpu.memory_space<vmem>>, %arg6: memref<1x16xf32, #tpu.memory_space<vmem>>, %arg7: memref<2x16x16x16xbf16, #tpu.memory_space<vmem>>, %arg8: memref<2x18x18x16xf32, #tpu.memory_space<vmem>>, %arg9: memref<2x18x18x16xf32, #tpu.memory_space<vmem>>, %arg10: memref<2x16x16x144xbf16, #tpu.memory_space<vmem>>) attributes {dimension_semantics = [#tpu.dimension_semantics<parallel>], iteration_bounds = array<i64: 4>, scalar_prefetch = 0 : i64, scratch_operands = 3 : i64, tpu.core_type = #tpu.core_type<tc>, window_params = [{transform_indices = @transform_0, window_bounds = array<i64: 2, 16, 16, 8>}, {transform_indices = @transform_1, window_bounds = array<i64: 2, 8, 8, 8>}, {pipeline_mode = #tpu.pipeline_mode<synchronous>, transform_indices = @transform_2, window_bounds = array<i64: 144, 16>}, {pipeline_mode = #tpu.pipeline_mode<synchronous>, transform_indices = @transform_3, window_bounds = array<i64: 1, 16>}, {pipeline_mode = #tpu.pipeline_mode<synchronous>, transform_indices = @transform_4, window_bounds = array<i64: 144, 16>}, {pipeline_mode = #tpu.pipeline_mode<synchronous>, transform_indices = @transform_5, window_bounds = array<i64: 1, 16>}, {transform_indices = @transform_6, window_bounds = array<i64: 2, 16, 16, 16>}]} {
    %cst = arith.constant 0.000000e+00 : f32
    %0 = vector.broadcast %cst : f32 to vector<2x1x18x16xf32>
    %cst_0 = arith.constant 0.000000e+00 : f32
    %1 = vector.broadcast %cst_0 : f32 to vector<2x18x1x16xf32>
    %c0 = arith.constant 0 : index
    %c0_1 = arith.constant 0 : index
    %c0_2 = arith.constant 0 : index
    %c0_3 = arith.constant 0 : index
    %2 = vector.load %arg8[%c0, %c0_1, %c0_2, %c0_3] : memref<2x18x18x16xf32, #tpu.memory_space<vmem>>, vector<2x1x18x16xf32>
    tpu.vector_store %arg8[%c0, %c0_1, %c0_2, %c0_3], %0 {strides = array<i32>} : memref<2x18x18x16xf32, #tpu.memory_space<vmem>>, vector<2x1x18x16xf32>,
    %c0_4 = arith.constant 0 : index
    %c17 = arith.constant 17 : index
    %c0_5 = arith.constant 0 : index
    %c0_6 = arith.constant 0 : index
    %3 = vector.load %arg8[%c0_4, %c17, %c0_5, %c0_6] : memref<2x18x18x16xf32, #tpu.memory_space<vmem>>, vector<2x1x18x16xf32>
    tpu.vector_store %arg8[%c0_4, %c17, %c0_5, %c0_6], %0 {strides = array<i32>} : memref<2x18x18x16xf32, #tpu.memory_space<vmem>>, vector<2x1x18x16xf32>,
    %c0_7 = arith.constant 0 : index
    %c0_8 = arith.constant 0 : index
    %c0_9 = arith.constant 0 : index
    %c0_10 = arith.constant 0 : index
    %4 = vector.load %arg8[%c0_7, %c0_8, %c0_9, %c0_10] : memref<2x18x18x16xf32, #tpu.memory_space<vmem>>, vector<2x18x1x16xf32>
    tpu.vector_store %arg8[%c0_7, %c0_8, %c0_9, %c0_10], %1 {strides = array<i32>} : memref<2x18x18x16xf32, #tpu.memory_space<vmem>>, vector<2x18x1x16xf32>,
    %c0_11 = arith.constant 0 : index
    %c0_12 = arith.constant 0 : index
    %c17_13 = arith.constant 17 : index
    %c0_14 = arith.constant 0 : index
    %5 = vector.load %arg8[%c0_11, %c0_12, %c17_13, %c0_14] : memref<2x18x18x16xf32, #tpu.memory_space<vmem>>, vector<2x18x1x16xf32>
    tpu.vector_store %arg8[%c0_11, %c0_12, %c17_13, %c0_14], %1 {strides = array<i32>} : memref<2x18x18x16xf32, #tpu.memory_space<vmem>>, vector<2x18x1x16xf32>,
    %cst_15 = arith.constant 0.000000e+00 : f32
    %6 = vector.broadcast %cst_15 : f32 to vector<2x1x18x16xf32>
    %cst_16 = arith.constant 0.000000e+00 : f32
    %7 = vector.broadcast %cst_16 : f32 to vector<2x18x1x16xf32>
    %c0_17 = arith.constant 0 : index
    %c0_18 = arith.constant 0 : index
    %c0_19 = arith.constant 0 : index
    %c0_20 = arith.constant 0 : index
    %8 = vector.load %arg9[%c0_17, %c0_18, %c0_19, %c0_20] : memref<2x18x18x16xf32, #tpu.memory_space<vmem>>, vector<2x1x18x16xf32>
    tpu.vector_store %arg9[%c0_17, %c0_18, %c0_19, %c0_20], %6 {strides = array<i32>} : memref<2x18x18x16xf32, #tpu.memory_space<vmem>>, vector<2x1x18x16xf32>,
    %c0_21 = arith.constant 0 : index
    %c17_22 = arith.constant 17 : index
    %c0_23 = arith.constant 0 : index
    %c0_24 = arith.constant 0 : index
    %9 = vector.load %arg9[%c0_21, %c17_22, %c0_23, %c0_24] : memref<2x18x18x16xf32, #tpu.memory_space<vmem>>, vector<2x1x18x16xf32>
    tpu.vector_store %arg9[%c0_21, %c17_22, %c0_23, %c0_24], %6 {strides = array<i32>} : memref<2x18x18x16xf32, #tpu.memory_space<vmem>>, vector<2x1x18x16xf32>,
    %c0_25 = arith.constant 0 : index
    %c0_26 = arith.constant 0 : index
    %c0_27 = arith.constant 0 : index
    %c0_28 = arith.constant 0 : index
    %10 = vector.load %arg9[%c0_25, %c0_26, %c0_27, %c0_28] : memref<2x18x18x16xf32, #tpu.memory_space<vmem>>, vector<2x18x1x16xf32>
    tpu.vector_store %arg9[%c0_25, %c0_26, %c0_27, %c0_28], %7 {strides = array<i32>} : memref<2x18x18x16xf32, #tpu.memory_space<vmem>>, vector<2x18x1x16xf32>,
    %c0_29 = arith.constant 0 : index
    %c0_30 = arith.constant 0 : index
    %c17_31 = arith.constant 17 : index
    %c0_32 = arith.constant 0 : index
    %11 = vector.load %arg9[%c0_29, %c0_30, %c17_31, %c0_32] : memref<2x18x18x16xf32, #tpu.memory_space<vmem>>, vector<2x18x1x16xf32>
    tpu.vector_store %arg9[%c0_29, %c0_30, %c17_31, %c0_32], %7 {strides = array<i32>} : memref<2x18x18x16xf32, #tpu.memory_space<vmem>>, vector<2x18x1x16xf32>,
    %c0_33 = arith.constant 0 : index
    %c0_34 = arith.constant 0 : index
    %c0_35 = arith.constant 0 : index
    %c0_36 = arith.constant 0 : index
    %12 = vector.load %arg1[%c0_33, %c0_34, %c0_35, %c0_36] : memref<2x16x16x8xbf16, #tpu.memory_space<vmem>>, vector<2x16x16x8xbf16>
    %13 = arith.extf %12 : vector<2x16x16x8xbf16> to vector<2x16x16x8xf32>
    %c0_37 = arith.constant 0 : index
    %c1 = arith.constant 1 : index
    %c1_38 = arith.constant 1 : index
    %c0_39 = arith.constant 0 : index
    %14 = vector.load %arg8[%c0_37, %c1, %c1_38, %c0_39] : memref<2x18x18x16xf32, #tpu.memory_space<vmem>>, vector<2x16x16x8xf32>
    tpu.vector_store %arg8[%c0_37, %c1, %c1_38, %c0_39], %13 {strides = array<i32>} : memref<2x18x18x16xf32, #tpu.memory_space<vmem>>, vector<2x16x16x8xf32>,
    %c0_40 = arith.constant 0 : index
    %c0_41 = arith.constant 0 : index
    %c0_42 = arith.constant 0 : index
    %c0_43 = arith.constant 0 : index
    %15 = vector.load %arg2[%c0_40, %c0_41, %c0_42, %c0_43] : memref<2x8x8x8xbf16, #tpu.memory_space<vmem>>, vector<2x8x8x8xbf16>
    %16 = vector.shape_cast %15 : vector<2x8x8x8xbf16> to vector<16x1x8x8xbf16>
    %17 = vector.shape_cast %16 : vector<16x1x8x8xbf16> to vector<16x1x8x8xbf16>
    %18 = vector.broadcast %17 : vector<16x1x8x8xbf16> to vector<16x2x8x8xbf16>
    %19 = vector.shape_cast %18 : vector<16x2x8x8xbf16> to vector<32x8x8xbf16>
    %20 = vector.shape_cast %19 : vector<32x8x8xbf16> to vector<32x8x1x8xbf16>
    %21 = vector.shape_cast %20 : vector<32x8x1x8xbf16> to vector<32x8x1x8xbf16>
    %22 = vector.broadcast %21 : vector<32x8x1x8xbf16> to vector<32x8x2x8xbf16>
    %23 = vector.shape_cast %22 : vector<32x8x2x8xbf16> to vector<2x16x16x8xbf16>
    %24 = arith.extf %23 : vector<2x16x16x8xbf16> to vector<2x16x16x8xf32>
    %c0_44 = arith.constant 0 : index
    %c1_45 = arith.constant 1 : index
    %c1_46 = arith.constant 1 : index
    %c8 = arith.constant 8 : index
    %25 = vector.load %arg8[%c0_44, %c1_45, %c1_46, %c8] : memref<2x18x18x16xf32, #tpu.memory_space<vmem>>, vector<2x16x16x8xf32>
    tpu.vector_store %arg8[%c0_44, %c1_45, %c1_46, %c8], %24 {strides = array<i32>} : memref<2x18x18x16xf32, #tpu.memory_space<vmem>>, vector<2x16x16x8xf32>,
    %c0_47 = arith.constant 0 : index
    %c0_48 = arith.constant 0 : index
    %c0_49 = arith.constant 0 : index
    %c0_50 = arith.constant 0 : index
    %26 = vector.load %arg8[%c0_47, %c0_48, %c0_49, %c0_50] : memref<2x18x18x16xf32, #tpu.memory_space<vmem>>, vector<2x16x16x16xf32>
    %27 = arith.truncf %26 : vector<2x16x16x16xf32> to vector<2x16x16x16xbf16>
    %c0_51 = arith.constant 0 : index
    %c0_52 = arith.constant 0 : index
    %c0_53 = arith.constant 0 : index
    %c0_54 = arith.constant 0 : index
    %28 = vector.load %arg10[%c0_51, %c0_52, %c0_53, %c0_54] : memref<2x16x16x144xbf16, #tpu.memory_space<vmem>>, vector<2x16x16x16xbf16>
    tpu.vector_store %arg10[%c0_51, %c0_52, %c0_53, %c0_54], %27 {strides = array<i32>} : memref<2x16x16x144xbf16, #tpu.memory_space<vmem>>, vector<2x16x16x16xbf16>,
    %c0_55 = arith.constant 0 : index
    %c0_56 = arith.constant 0 : index
    %c1_57 = arith.constant 1 : index
    %c0_58 = arith.constant 0 : index
    %29 = vector.load %arg8[%c0_55, %c0_56, %c1_57, %c0_58] : memref<2x18x18x16xf32, #tpu.memory_space<vmem>>, vector<2x16x16x16xf32>
    %30 = arith.truncf %29 : vector<2x16x16x16xf32> to vector<2x16x16x16xbf16>
    %c0_59 = arith.constant 0 : index
    %c0_60 = arith.constant 0 : index
    %c0_61 = arith.constant 0 : index
    %c16 = arith.constant 16 : index
    %31 = vector.load %arg10[%c0_59, %c0_60, %c0_61, %c16] : memref<2x16x16x144xbf16, #tpu.memory_space<vmem>>, vector<2x16x16x16xbf16>
    tpu.vector_store %arg10[%c0_59, %c0_60, %c0_61, %c16], %30 {strides = array<i32>} : memref<2x16x16x144xbf16, #tpu.memory_space<vmem>>, vector<2x16x16x16xbf16>,
    %c0_62 = arith.constant 0 : index
    %c0_63 = arith.constant 0 : index
    %c2 = arith.constant 2 : index
    %c0_64 = arith.constant 0 : index
    %32 = vector.load %arg8[%c0_62, %c0_63, %c2, %c0_64] : memref<2x18x18x16xf32, #tpu.memory_space<vmem>>, vector<2x16x16x16xf32>
    %33 = arith.truncf %32 : vector<2x16x16x16xf32> to vector<2x16x16x16xbf16>
    %c0_65 = arith.constant 0 : index
    %c0_66 = arith.constant 0 : index
    %c0_67 = arith.constant 0 : index
    %c32 = arith.constant 32 : index
    %34 = vector.load %arg10[%c0_65, %c0_66, %c0_67, %c32] : memref<2x16x16x144xbf16, #tpu.memory_space<vmem>>, vector<2x16x16x16xbf16>
    tpu.vector_store %arg10[%c0_65, %c0_66, %c0_67, %c32], %33 {strides = array<i32>} : memref<2x16x16x144xbf16, #tpu.memory_space<vmem>>, vector<2x16x16x16xbf16>,
    %c0_68 = arith.constant 0 : index
    %c1_69 = arith.constant 1 : index
    %c0_70 = arith.constant 0 : index
    %c0_71 = arith.constant 0 : index
    %35 = vector.load %arg8[%c0_68, %c1_69, %c0_70, %c0_71] : memref<2x18x18x16xf32, #tpu.memory_space<vmem>>, vector<2x16x16x16xf32>
    %36 = arith.truncf %35 : vector<2x16x16x16xf32> to vector<2x16x16x16xbf16>
    %c0_72 = arith.constant 0 : index
    %c0_73 = arith.constant 0 : index
    %c0_74 = arith.constant 0 : index
    %c48 = arith.constant 48 : index
    %37 = vector.load %arg10[%c0_72, %c0_73, %c0_74, %c48] : memref<2x16x16x144xbf16, #tpu.memory_space<vmem>>, vector<2x16x16x16xbf16>
    tpu.vector_store %arg10[%c0_72, %c0_73, %c0_74, %c48], %36 {strides = array<i32>} : memref<2x16x16x144xbf16, #tpu.memory_space<vmem>>, vector<2x16x16x16xbf16>,
    %c0_75 = arith.constant 0 : index
    %c1_76 = arith.constant 1 : index
    %c1_77 = arith.constant 1 : index
    %c0_78 = arith.constant 0 : index
    %38 = vector.load %arg8[%c0_75, %c1_76, %c1_77, %c0_78] : memref<2x18x18x16xf32, #tpu.memory_space<vmem>>, vector<2x16x16x16xf32>
    %39 = arith.truncf %38 : vector<2x16x16x16xf32> to vector<2x16x16x16xbf16>
    %c0_79 = arith.constant 0 : index
    %c0_80 = arith.constant 0 : index
    %c0_81 = arith.constant 0 : index
    %c64 = arith.constant 64 : index
    %40 = vector.load %arg10[%c0_79, %c0_80, %c0_81, %c64] : memref<2x16x16x144xbf16, #tpu.memory_space<vmem>>, vector<2x16x16x16xbf16>
    tpu.vector_store %arg10[%c0_79, %c0_80, %c0_81, %c64], %39 {strides = array<i32>} : memref<2x16x16x144xbf16, #tpu.memory_space<vmem>>, vector<2x16x16x16xbf16>,
    %c0_82 = arith.constant 0 : index
    %c1_83 = arith.constant 1 : index
    %c2_84 = arith.constant 2 : index
    %c0_85 = arith.constant 0 : index
    %41 = vector.load %arg8[%c0_82, %c1_83, %c2_84, %c0_85] : memref<2x18x18x16xf32, #tpu.memory_space<vmem>>, vector<2x16x16x16xf32>
    %42 = arith.truncf %41 : vector<2x16x16x16xf32> to vector<2x16x16x16xbf16>
    %c0_86 = arith.constant 0 : index
    %c0_87 = arith.constant 0 : index
    %c0_88 = arith.constant 0 : index
    %c80 = arith.constant 80 : index
    %43 = vector.load %arg10[%c0_86, %c0_87, %c0_88, %c80] : memref<2x16x16x144xbf16, #tpu.memory_space<vmem>>, vector<2x16x16x16xbf16>
    tpu.vector_store %arg10[%c0_86, %c0_87, %c0_88, %c80], %42 {strides = array<i32>} : memref<2x16x16x144xbf16, #tpu.memory_space<vmem>>, vector<2x16x16x16xbf16>,
    %c0_89 = arith.constant 0 : index
    %c2_90 = arith.constant 2 : index
    %c0_91 = arith.constant 0 : index
    %c0_92 = arith.constant 0 : index
    %44 = vector.load %arg8[%c0_89, %c2_90, %c0_91, %c0_92] : memref<2x18x18x16xf32, #tpu.memory_space<vmem>>, vector<2x16x16x16xf32>
    %45 = arith.truncf %44 : vector<2x16x16x16xf32> to vector<2x16x16x16xbf16>
    %c0_93 = arith.constant 0 : index
    %c0_94 = arith.constant 0 : index
    %c0_95 = arith.constant 0 : index
    %c96 = arith.constant 96 : index
    %46 = vector.load %arg10[%c0_93, %c0_94, %c0_95, %c96] : memref<2x16x16x144xbf16, #tpu.memory_space<vmem>>, vector<2x16x16x16xbf16>
    tpu.vector_store %arg10[%c0_93, %c0_94, %c0_95, %c96], %45 {strides = array<i32>} : memref<2x16x16x144xbf16, #tpu.memory_space<vmem>>, vector<2x16x16x16xbf16>,
    %c0_96 = arith.constant 0 : index
    %c2_97 = arith.constant 2 : index
    %c1_98 = arith.constant 1 : index
    %c0_99 = arith.constant 0 : index
    %47 = vector.load %arg8[%c0_96, %c2_97, %c1_98, %c0_99] : memref<2x18x18x16xf32, #tpu.memory_space<vmem>>, vector<2x16x16x16xf32>
    %48 = arith.truncf %47 : vector<2x16x16x16xf32> to vector<2x16x16x16xbf16>
    %c0_100 = arith.constant 0 : index
    %c0_101 = arith.constant 0 : index
    %c0_102 = arith.constant 0 : index
    %c112 = arith.constant 112 : index
    %49 = vector.load %arg10[%c0_100, %c0_101, %c0_102, %c112] : memref<2x16x16x144xbf16, #tpu.memory_space<vmem>>, vector<2x16x16x16xbf16>
    tpu.vector_store %arg10[%c0_100, %c0_101, %c0_102, %c112], %48 {strides = array<i32>} : memref<2x16x16x144xbf16, #tpu.memory_space<vmem>>, vector<2x16x16x16xbf16>,
    %c0_103 = arith.constant 0 : index
    %c2_104 = arith.constant 2 : index
    %c2_105 = arith.constant 2 : index
    %c0_106 = arith.constant 0 : index
    %50 = vector.load %arg8[%c0_103, %c2_104, %c2_105, %c0_106] : memref<2x18x18x16xf32, #tpu.memory_space<vmem>>, vector<2x16x16x16xf32>
    %51 = arith.truncf %50 : vector<2x16x16x16xf32> to vector<2x16x16x16xbf16>
    %c0_107 = arith.constant 0 : index
    %c0_108 = arith.constant 0 : index
    %c0_109 = arith.constant 0 : index
    %c128 = arith.constant 128 : index
    %52 = vector.load %arg10[%c0_107, %c0_108, %c0_109, %c128] : memref<2x16x16x144xbf16, #tpu.memory_space<vmem>>, vector<2x16x16x16xbf16>
    tpu.vector_store %arg10[%c0_107, %c0_108, %c0_109, %c128], %51 {strides = array<i32>} : memref<2x16x16x144xbf16, #tpu.memory_space<vmem>>, vector<2x16x16x16xbf16>,
    %c0_110 = arith.constant 0 : index
    %c0_111 = arith.constant 0 : index
    %c0_112 = arith.constant 0 : index
    %c0_113 = arith.constant 0 : index
    %53 = vector.load %arg10[%c0_110, %c0_111, %c0_112, %c0_113] : memref<2x16x16x144xbf16, #tpu.memory_space<vmem>>, vector<2x16x16x144xbf16>
    %54 = vector.shape_cast %53 : vector<2x16x16x144xbf16> to vector<512x144xbf16>
    %c0_114 = arith.constant 0 : index
    %c0_115 = arith.constant 0 : index
    %55 = vector.load %arg3[%c0_114, %c0_115] : memref<144x16xbf16, #tpu.memory_space<vmem>>, vector<144x16xbf16>
    %cst_116 = arith.constant dense<0.000000e+00> : vector<512x16xf32>
    %56 = tpu.matmul %54, %55, %cst_116 {dimension_numbers = #tpu.dot_dimension_numbers<[1], [0], [0], [1], [0, 0, 1, 1], [], []>} : vector<512x144xbf16>, vector<144x16xbf16>, vector<512x16xf32> -> vector<512x16xf32>
    %c0_117 = arith.constant 0 : index
    %c0_118 = arith.constant 0 : index
    %57 = vector.load %arg4[%c0_117, %c0_118] : memref<1x16xf32, #tpu.memory_space<vmem>>, vector<1x16xf32>
    %58 = vector.broadcast %57 : vector<1x16xf32> to vector<512x16xf32>
    %59 = arith.addf %56, %58 : vector<512x16xf32>
    %cst_119 = arith.constant 0.000000e+00 : f32
    %60 = vector.broadcast %cst_119 : f32 to vector<512x16xf32>
    %61 = arith.maximumf %59, %60 : vector<512x16xf32>
    %62 = vector.shape_cast %61 : vector<512x16xf32> to vector<2x16x16x16xf32>
    %c0_120 = arith.constant 0 : index
    %c1_121 = arith.constant 1 : index
    %c1_122 = arith.constant 1 : index
    %c0_123 = arith.constant 0 : index
    %63 = vector.load %arg9[%c0_120, %c1_121, %c1_122, %c0_123] : memref<2x18x18x16xf32, #tpu.memory_space<vmem>>, vector<2x16x16x16xf32>
    tpu.vector_store %arg9[%c0_120, %c1_121, %c1_122, %c0_123], %62 {strides = array<i32>} : memref<2x18x18x16xf32, #tpu.memory_space<vmem>>, vector<2x16x16x16xf32>,
    %c0_124 = arith.constant 0 : index
    %c0_125 = arith.constant 0 : index
    %c0_126 = arith.constant 0 : index
    %c0_127 = arith.constant 0 : index
    %64 = vector.load %arg9[%c0_124, %c0_125, %c0_126, %c0_127] : memref<2x18x18x16xf32, #tpu.memory_space<vmem>>, vector<2x16x16x16xf32>
    %65 = arith.truncf %64 : vector<2x16x16x16xf32> to vector<2x16x16x16xbf16>
    %c0_128 = arith.constant 0 : index
    %c0_129 = arith.constant 0 : index
    %c0_130 = arith.constant 0 : index
    %c0_131 = arith.constant 0 : index
    %66 = vector.load %arg10[%c0_128, %c0_129, %c0_130, %c0_131] : memref<2x16x16x144xbf16, #tpu.memory_space<vmem>>, vector<2x16x16x16xbf16>
    tpu.vector_store %arg10[%c0_128, %c0_129, %c0_130, %c0_131], %65 {strides = array<i32>} : memref<2x16x16x144xbf16, #tpu.memory_space<vmem>>, vector<2x16x16x16xbf16>,
    %c0_132 = arith.constant 0 : index
    %c0_133 = arith.constant 0 : index
    %c1_134 = arith.constant 1 : index
    %c0_135 = arith.constant 0 : index
    %67 = vector.load %arg9[%c0_132, %c0_133, %c1_134, %c0_135] : memref<2x18x18x16xf32, #tpu.memory_space<vmem>>, vector<2x16x16x16xf32>
    %68 = arith.truncf %67 : vector<2x16x16x16xf32> to vector<2x16x16x16xbf16>
    %c0_136 = arith.constant 0 : index
    %c0_137 = arith.constant 0 : index
    %c0_138 = arith.constant 0 : index
    %c16_139 = arith.constant 16 : index
    %69 = vector.load %arg10[%c0_136, %c0_137, %c0_138, %c16_139] : memref<2x16x16x144xbf16, #tpu.memory_space<vmem>>, vector<2x16x16x16xbf16>
    tpu.vector_store %arg10[%c0_136, %c0_137, %c0_138, %c16_139], %68 {strides = array<i32>} : memref<2x16x16x144xbf16, #tpu.memory_space<vmem>>, vector<2x16x16x16xbf16>,
    %c0_140 = arith.constant 0 : index
    %c0_141 = arith.constant 0 : index
    %c2_142 = arith.constant 2 : index
    %c0_143 = arith.constant 0 : index
    %70 = vector.load %arg9[%c0_140, %c0_141, %c2_142, %c0_143] : memref<2x18x18x16xf32, #tpu.memory_space<vmem>>, vector<2x16x16x16xf32>
    %71 = arith.truncf %70 : vector<2x16x16x16xf32> to vector<2x16x16x16xbf16>
    %c0_144 = arith.constant 0 : index
    %c0_145 = arith.constant 0 : index
    %c0_146 = arith.constant 0 : index
    %c32_147 = arith.constant 32 : index
    %72 = vector.load %arg10[%c0_144, %c0_145, %c0_146, %c32_147] : memref<2x16x16x144xbf16, #tpu.memory_space<vmem>>, vector<2x16x16x16xbf16>
    tpu.vector_store %arg10[%c0_144, %c0_145, %c0_146, %c32_147], %71 {strides = array<i32>} : memref<2x16x16x144xbf16, #tpu.memory_space<vmem>>, vector<2x16x16x16xbf16>,
    %c0_148 = arith.constant 0 : index
    %c1_149 = arith.constant 1 : index
    %c0_150 = arith.constant 0 : index
    %c0_151 = arith.constant 0 : index
    %73 = vector.load %arg9[%c0_148, %c1_149, %c0_150, %c0_151] : memref<2x18x18x16xf32, #tpu.memory_space<vmem>>, vector<2x16x16x16xf32>
    %74 = arith.truncf %73 : vector<2x16x16x16xf32> to vector<2x16x16x16xbf16>
    %c0_152 = arith.constant 0 : index
    %c0_153 = arith.constant 0 : index
    %c0_154 = arith.constant 0 : index
    %c48_155 = arith.constant 48 : index
    %75 = vector.load %arg10[%c0_152, %c0_153, %c0_154, %c48_155] : memref<2x16x16x144xbf16, #tpu.memory_space<vmem>>, vector<2x16x16x16xbf16>
    tpu.vector_store %arg10[%c0_152, %c0_153, %c0_154, %c48_155], %74 {strides = array<i32>} : memref<2x16x16x144xbf16, #tpu.memory_space<vmem>>, vector<2x16x16x16xbf16>,
    %c0_156 = arith.constant 0 : index
    %c1_157 = arith.constant 1 : index
    %c1_158 = arith.constant 1 : index
    %c0_159 = arith.constant 0 : index
    %76 = vector.load %arg9[%c0_156, %c1_157, %c1_158, %c0_159] : memref<2x18x18x16xf32, #tpu.memory_space<vmem>>, vector<2x16x16x16xf32>
    %77 = arith.truncf %76 : vector<2x16x16x16xf32> to vector<2x16x16x16xbf16>
    %c0_160 = arith.constant 0 : index
    %c0_161 = arith.constant 0 : index
    %c0_162 = arith.constant 0 : index
    %c64_163 = arith.constant 64 : index
    %78 = vector.load %arg10[%c0_160, %c0_161, %c0_162, %c64_163] : memref<2x16x16x144xbf16, #tpu.memory_space<vmem>>, vector<2x16x16x16xbf16>
    tpu.vector_store %arg10[%c0_160, %c0_161, %c0_162, %c64_163], %77 {strides = array<i32>} : memref<2x16x16x144xbf16, #tpu.memory_space<vmem>>, vector<2x16x16x16xbf16>,
    %c0_164 = arith.constant 0 : index
    %c1_165 = arith.constant 1 : index
    %c2_166 = arith.constant 2 : index
    %c0_167 = arith.constant 0 : index
    %79 = vector.load %arg9[%c0_164, %c1_165, %c2_166, %c0_167] : memref<2x18x18x16xf32, #tpu.memory_space<vmem>>, vector<2x16x16x16xf32>
    %80 = arith.truncf %79 : vector<2x16x16x16xf32> to vector<2x16x16x16xbf16>
    %c0_168 = arith.constant 0 : index
    %c0_169 = arith.constant 0 : index
    %c0_170 = arith.constant 0 : index
    %c80_171 = arith.constant 80 : index
    %81 = vector.load %arg10[%c0_168, %c0_169, %c0_170, %c80_171] : memref<2x16x16x144xbf16, #tpu.memory_space<vmem>>, vector<2x16x16x16xbf16>
    tpu.vector_store %arg10[%c0_168, %c0_169, %c0_170, %c80_171], %80 {strides = array<i32>} : memref<2x16x16x144xbf16, #tpu.memory_space<vmem>>, vector<2x16x16x16xbf16>,
    %c0_172 = arith.constant 0 : index
    %c2_173 = arith.constant 2 : index
    %c0_174 = arith.constant 0 : index
    %c0_175 = arith.constant 0 : index
    %82 = vector.load %arg9[%c0_172, %c2_173, %c0_174, %c0_175] : memref<2x18x18x16xf32, #tpu.memory_space<vmem>>, vector<2x16x16x16xf32>
    %83 = arith.truncf %82 : vector<2x16x16x16xf32> to vector<2x16x16x16xbf16>
    %c0_176 = arith.constant 0 : index
    %c0_177 = arith.constant 0 : index
    %c0_178 = arith.constant 0 : index
    %c96_179 = arith.constant 96 : index
    %84 = vector.load %arg10[%c0_176, %c0_177, %c0_178, %c96_179] : memref<2x16x16x144xbf16, #tpu.memory_space<vmem>>, vector<2x16x16x16xbf16>
    tpu.vector_store %arg10[%c0_176, %c0_177, %c0_178, %c96_179], %83 {strides = array<i32>} : memref<2x16x16x144xbf16, #tpu.memory_space<vmem>>, vector<2x16x16x16xbf16>,
    %c0_180 = arith.constant 0 : index
    %c2_181 = arith.constant 2 : index
    %c1_182 = arith.constant 1 : index
    %c0_183 = arith.constant 0 : index
    %85 = vector.load %arg9[%c0_180, %c2_181, %c1_182, %c0_183] : memref<2x18x18x16xf32, #tpu.memory_space<vmem>>, vector<2x16x16x16xf32>
    %86 = arith.truncf %85 : vector<2x16x16x16xf32> to vector<2x16x16x16xbf16>
    %c0_184 = arith.constant 0 : index
    %c0_185 = arith.constant 0 : index
    %c0_186 = arith.constant 0 : index
    %c112_187 = arith.constant 112 : index
    %87 = vector.load %arg10[%c0_184, %c0_185, %c0_186, %c112_187] : memref<2x16x16x144xbf16, #tpu.memory_space<vmem>>, vector<2x16x16x16xbf16>
    tpu.vector_store %arg10[%c0_184, %c0_185, %c0_186, %c112_187], %86 {strides = array<i32>} : memref<2x16x16x144xbf16, #tpu.memory_space<vmem>>, vector<2x16x16x16xbf16>,
    %c0_188 = arith.constant 0 : index
    %c2_189 = arith.constant 2 : index
    %c2_190 = arith.constant 2 : index
    %c0_191 = arith.constant 0 : index
    %88 = vector.load %arg9[%c0_188, %c2_189, %c2_190, %c0_191] : memref<2x18x18x16xf32, #tpu.memory_space<vmem>>, vector<2x16x16x16xf32>
    %89 = arith.truncf %88 : vector<2x16x16x16xf32> to vector<2x16x16x16xbf16>
    %c0_192 = arith.constant 0 : index
    %c0_193 = arith.constant 0 : index
    %c0_194 = arith.constant 0 : index
    %c128_195 = arith.constant 128 : index
    %90 = vector.load %arg10[%c0_192, %c0_193, %c0_194, %c128_195] : memref<2x16x16x144xbf16, #tpu.memory_space<vmem>>, vector<2x16x16x16xbf16>
    tpu.vector_store %arg10[%c0_192, %c0_193, %c0_194, %c128_195], %89 {strides = array<i32>} : memref<2x16x16x144xbf16, #tpu.memory_space<vmem>>, vector<2x16x16x16xbf16>,
    %c0_196 = arith.constant 0 : index
    %c0_197 = arith.constant 0 : index
    %c0_198 = arith.constant 0 : index
    %c0_199 = arith.constant 0 : index
    %91 = vector.load %arg10[%c0_196, %c0_197, %c0_198, %c0_199] : memref<2x16x16x144xbf16, #tpu.memory_space<vmem>>, vector<2x16x16x144xbf16>
    %92 = vector.shape_cast %91 : vector<2x16x16x144xbf16> to vector<512x144xbf16>
    %c0_200 = arith.constant 0 : index
    %c0_201 = arith.constant 0 : index
    %93 = vector.load %arg5[%c0_200, %c0_201] : memref<144x16xbf16, #tpu.memory_space<vmem>>, vector<144x16xbf16>
    %cst_202 = arith.constant dense<0.000000e+00> : vector<512x16xf32>
    %94 = tpu.matmul %92, %93, %cst_202 {dimension_numbers = #tpu.dot_dimension_numbers<[1], [0], [0], [1], [0, 0, 1, 1], [], []>} : vector<512x144xbf16>, vector<144x16xbf16>, vector<512x16xf32> -> vector<512x16xf32>
    %c0_203 = arith.constant 0 : index
    %c0_204 = arith.constant 0 : index
    %95 = vector.load %arg6[%c0_203, %c0_204] : memref<1x16xf32, #tpu.memory_space<vmem>>, vector<1x16xf32>
    %96 = vector.broadcast %95 : vector<1x16xf32> to vector<512x16xf32>
    %97 = arith.addf %94, %96 : vector<512x16xf32>
    %cst_205 = arith.constant 0.000000e+00 : f32
    %98 = vector.broadcast %cst_205 : f32 to vector<512x16xf32>
    %99 = arith.maximumf %97, %98 : vector<512x16xf32>
    %100 = vector.shape_cast %99 : vector<512x16xf32> to vector<2x16x16x16xf32>
    %101 = arith.truncf %100 : vector<2x16x16x16xf32> to vector<2x16x16x16xbf16>
    %c0_206 = arith.constant 0 : index
    %c0_207 = arith.constant 0 : index
    %c0_208 = arith.constant 0 : index
    %c0_209 = arith.constant 0 : index
    %102 = vector.load %arg7[%c0_206, %c0_207, %c0_208, %c0_209] : memref<2x16x16x16xbf16, #tpu.memory_space<vmem>>, vector<2x16x16x16xbf16>
    tpu.vector_store %arg7[%c0_206, %c0_207, %c0_208, %c0_209], %101 {strides = array<i32>} : memref<2x16x16x16xbf16, #tpu.memory_space<vmem>>, vector<2x16x16x16xbf16>,
    return
  }
  func.func @transform_0(%arg0: i32) -> (i32, i32, i32, i32) {
    %c0_i32 = arith.constant 0 : i32
    %c0_i32_0 = arith.constant 0 : i32
    %c0_i32_1 = arith.constant 0 : i32
    %c0_i32_2 = arith.constant 0 : i32
    return %arg0, %c0_i32, %c0_i32_0, %c0_i32_1 : i32, i32, i32, i32
  }
  func.func @transform_1(%arg0: i32) -> (i32, i32, i32, i32) {
    %c0_i32 = arith.constant 0 : i32
    %c0_i32_0 = arith.constant 0 : i32
    %c0_i32_1 = arith.constant 0 : i32
    %c0_i32_2 = arith.constant 0 : i32
    return %arg0, %c0_i32, %c0_i32_0, %c0_i32_1 : i32, i32, i32, i32
  }
  func.func @transform_2(%arg0: i32) -> (i32, i32) {
    %c0_i32 = arith.constant 0 : i32
    %c0_i32_0 = arith.constant 0 : i32
    %c0_i32_1 = arith.constant 0 : i32
    return %c0_i32, %c0_i32_0 : i32, i32
  }
  func.func @transform_3(%arg0: i32) -> (i32, i32) {
    %c0_i32 = arith.constant 0 : i32
    %c0_i32_0 = arith.constant 0 : i32
    %c0_i32_1 = arith.constant 0 : i32
    return %c0_i32, %c0_i32_0 : i32, i32
  }
  func.func @transform_4(%arg0: i32) -> (i32, i32) {
    %c0_i32 = arith.constant 0 : i32
    %c0_i32_0 = arith.constant 0 : i32
    %c0_i32_1 = arith.constant 0 : i32
    return %c0_i32, %c0_i32_0 : i32, i32
  }
  func.func @transform_5(%arg0: i32) -> (i32, i32) {
    %c0_i32 = arith.constant 0 : i32
    %c0_i32_0 = arith.constant 0 : i32
    %c0_i32_1 = arith.constant 0 : i32
    return %c0_i32, %c0_i32_0 : i32, i32
  }
  func.func @transform_6(%arg0: i32) -> (i32, i32, i32, i32) {
    %c0_i32 = arith.constant 0 : i32
    %c0_i32_0 = arith.constant 0 : i32
    %c0_i32_1 = arith.constant 0 : i32
    %c0_i32_2 = arith.constant 0 : i32
    return %arg0, %c0_i32, %c0_i32_0, %c0_i32_1 : i32, i32, i32, i32
  }
}

</mosaic_0001>

<bundles_post_ra>
// kernel: up_forward.1
= control target key start
LH: loop header
LB: loop body
LE: loop exit
PB: predicated region body
PF: predicated region fallthrough
CT: control target
= control target key end

     0   :  { %s10005_s21 = smov 0   ;;  %s13148_s0 = inlined_call_operand.vmem [shape: bf16[8,16,16,8], index: 0, kind: input, shape index: {}]   ;;  %s13149_s1 = inlined_call_operand.vmem [shape: bf16[8,8,8,8], index: 1, kind: input, shape index: {}]   ;;  %s13150_s2 = inlined_call_operand.vmem [shape: bf16[144,16], index: 2, kind: input, shape index: {}]   ;;  %s13151_s3 = inlined_call_operand.vmem [shape: f32[1,16], index: 3, kind: input, shape index: {}]   ;;  %s13152_s4 = inlined_call_operand.vmem [shape: bf16[144,16], index: 4, kind: input, shape index: {}]   ;;  %s13153_s5 = inlined_call_operand.vmem [shape: f32[1,16], index: 5, kind: input, shape index: {}]   ;;  %s13154_s6 = inlined_call_operand.vmem [shape: bf16[8,16,16,16], index: 6, kind: output, shape index: {}]  }
   0x1 LB: > { %s9439_s22 = sadd.s32 4294967295, %s9956_s21   ;;  %p9443_p0 = scmp.ge.s32.totalorder %s9956_s21, 1  ;;  %s9956_s21 = sphi %s10005_s21, %s16_s21  }
   0x2   : > { %p226_p1 = scmp.lt.s32.totalorder %s9956_s21, 5 }
   0x4   : > { %p227_p2 = pnand %p9443_p0, %p226_p1 }
   0x5   : > { %s9444_s23 = sshll.u32 (!%p227_p2), %s9439_s22, 1  ;;  %v696_v0 = vlaneseq (!%p227_p2)  ;;  %v9958_v1 = vmov (!%p227_p2), 1966171168   ;;  %v9959_v3 = vmov (!%p227_p2), 1983009808   ;;  %s9960_s28 = smov (!%p227_p2), 8  }
   0x6   : > { %230 = sbr.rel (%p227_p2) target bundleno = 1590 (0x636), region = 44  ;;  %p265_p3 = scmp.lt.s32.totalorder (!%p227_p2), %s9444_s23, 7  ;;  %v694_v2 = vunpack.c.l.s4 (!%p227_p2), %v9958_v1  ;;  %v2992_v4 = vunpack.c.l.s4 (!%p227_p2), %v9959_v3  ;;  %vm588_vm0 = vcmask (!%p227_p2), 64512   ;;  %vm3629_vm1 = vcmask (!%p227_p2), 130112  }
   0x7   : > { %v697_v5 = vshrl.u32 (!%p227_p2), %v696_v0, 7  ;;  %vm301_vm2 = vcmask (!%p227_p2), 122880   ;;  %vm286_vm3 = vcmask (!%p227_p2), 130048   ;;  %vm289_vm4 = vcmask (!%p227_p2), 123904   ;;  %s9962_s9 = smov (!%p227_p2), 16   ;;  %s9963_s10 = smov (!%p227_p2), 32  }
   0x8   : > { %v695_v6 = vunpack.c.0.s8 (!%p227_p2), %v694_v2  ;;  %v2993_v9 = vunpack.c.0.s8 (!%p227_p2), %v2992_v4  ;;  %s9965_s30 = smov (!%p227_p2), 48   ;;  %s9966_s7 = smov (!%p227_p2), 64   ;;  %vm4046_vm5 = vcmask (!%p227_p2), 261248   ;;  %vm4303_vm6 = vcmask (!%p227_p2), 392448  }
   0x9   : > { %v10018_v8 = vsub.s32 (!%p227_p2), 0, %v697_v5  ;;  %s9967_s12 = smov (!%p227_p2), 80   ;;  %s9968_s13 = smov (!%p227_p2), 96   ;;  %vm4560_vm7 = vcmask (!%p227_p2), 523648   ;;  %vm4817_vm8 = vcmask (!%p227_p2), 654848   ;;  %vm5074_vm9 = vcmask (!%p227_p2), 786048  }
   0xa   : > { %v10016_v7 = vsub.s32 (!%p227_p2), %v695_v6, %v697_v5  ;;  %v10028_v14 = vsub.s32 (!%p227_p2), %v2993_v9, %v697_v5  ;;  %s9969_s14 = smov (!%p227_p2), 112   ;;  %vm5332_vm10 = vcmask (!%p227_p2), 917248   ;;  %vm5589_vm11 = vcmask (!%p227_p2), 1048448  }
   0xb   : > { %vm9304_vm12 = vcmask (!%p227_p2), 125952  }
   0xd   : > { %s13159_s23 = smov (!%p265_p3, %s9444_s23), 7 }
   0xe   : > { %s9684_s24 = sshll.u32 %s13159_s23, 5  ;;  %s9683_s29 = sshll.u32 %s13159_s23, 7 }
   0xf   : > { %s10023_s27 = scalar_lea.vmem %s13149_s1, %s9684_s24  ;;  %s10375_s8 = scalar_lea.vmem %s13148_s0, %s9683_s29 }
  0x10   : > { %v9454_v10 = vld.sshfl [vmem:[%s10023_s27 + $0x4] sm:$0x33 pattern:$0x75316420]  ;;  %s12762_s15 = scalar_lea.vmem %s13154_s6, %s9683_s29 }
  0x11   : > { %v716_v11 = vcombine.high %v9454_v10, %v9454_v10  ;;  %v723_v12 = vrot.slane %v9454_v10, %v10016_v7  ;;  %v9453_v13 = vld.sshfl [vmem:[%s10023_s27] sm:$0x33 pattern:$0x75316420] }
  0x12   : > { %v692_v15 = vcombine.high %v9453_v13, %v9453_v13  ;;  %v10031_v16 = vrot.slane %v9453_v13, %v10016_v7  ;;  %v10034_v17 = vld.sshfl [vmem:[%s10023_s27 + $0x8] sm:$0x33 pattern:$0x75316420] }
  0x13   : > { %v730_v18 = vrot.slane %v716_v11, %v10016_v7  ;;  %v1078_v19 = vunpack.i.h.s16 %v723_v12  ;;  %v9473_v20 = vpack.i.b16 %v723_v12, %v723_v12  ;;  %v731_v21 = vcombine.high %v723_v12, %v723_v12 }
  0x14   : > { %v10038_v22 = vrot.slane %v692_v15, %v10016_v7  ;;  %v1070_v23 = vunpack.i.h.s16 %v10031_v16  ;;  %v9469_v24 = vpack.i.b16 %v10031_v16, %v10031_v16  ;;  %v740_v25 = vcombine.high %v10034_v17, %v10034_v17 }
  0x15   : > { %v1080_v26 = vunpack.i.h.s16 %v730_v18  ;;  %v1206_v27 = vpack.i.b16 %v1078_v19, %v1078_v19  ;;  %v9474_v28 = vpack.i.b16 %v730_v18, %v730_v18  ;;  %v1360_v29 = vrot.slane %v9473_v20, %v10018_v8 }
  0x16   : > { %v1072_v30 = vunpack.i.h.s16 %v10038_v22  ;;  %v1198_v31 = vpack.i.b16 %v1070_v23, %v1070_v23  ;;  %v9470_v32 = vpack.i.b16 %v10038_v22, %v10038_v22  ;;  %v1328_v33 = vrot.slane %v9469_v24, %v10018_v8 }
  0x17   : > { %v1208_v34 = vpack.i.b16 %v1080_v26, %v1080_v26  ;;  %v1364_v35 = vrot.slane %v1206_v27, %v10018_v8  ;;  %v1368_v36 = vrot.slane %v9474_v28, %v10018_v8  ;;  %v1894_v37 = vpack.i.b16 %v1360_v29, %v1360_v29 }
  0x18   : > { %v1200_v38 = vpack.i.b16 %v1072_v30, %v1072_v30  ;;  %v1332_v39 = vrot.slane %v1198_v31, %v10018_v8  ;;  %v1336_v40 = vrot.slane %v9470_v32, %v10018_v8  ;;  %v1838_v41 = vpack.i.b16 %v1328_v33, %v1328_v33 }
  0x19   : > { %v1372_v42 = vrot.slane %v1208_v34, %v10018_v8  ;;  %v1899_v43 = vrot.slane %v1894_v37, %v10018_v8  ;;  %v1901_v44 = vpack.i.b16 %v1364_v35, %v1364_v35  ;;  %v1908_v45 = vpack.i.b16 %v1368_v36, %v1368_v36 }
  0x1a   : > { %v1340_v46 = vrot.slane %v1200_v38, %v10018_v8  ;;  %v1843_v47 = vrot.slane %v1838_v41, %v10018_v8  ;;  %v1845_v48 = vpack.i.b16 %v1332_v39, %v1332_v39  ;;  %v1852_v49 = vpack.i.b16 %v1336_v40, %v1336_v40 }
  0x1b   : > { %v1906_v50 = vrot.slane %v1901_v44, %v10018_v8  ;;  %v1913_v51 = vrot.slane %v1908_v45, %v10018_v8  ;;  %v1915_v52 = vpack.i.b16 %v1372_v42, %v1372_v42  ;;  %v2741_v53 = vunpack.c.l.bf16 %v1899_v43 }
  0x1c   : > { %v1850_v54 = vrot.slane %v1845_v48, %v10018_v8  ;;  %v1857_v55 = vrot.slane %v1852_v49, %v10018_v8  ;;  %v1859_v56 = vpack.i.b16 %v1340_v46, %v1340_v46  ;;  %v2733_v57 = vunpack.c.l.bf16 %v1843_v47 }
  0x1d   : > { %v1920_v58 = vrot.slane %v1915_v52, %v10018_v8  ;;  %v2742_v59 = vunpack.c.l.bf16 %v1906_v50  ;;  %v2743_v60 = vunpack.c.l.bf16 %v1913_v51  ;;  %v732_v61 = vcombine.high %v730_v18, %v730_v18 }
  0x1e   : > { %v1864_v62 = vrot.slane %v1859_v56, %v10018_v8  ;;  %v2734_v63 = vunpack.c.l.bf16 %v1850_v54  ;;  %v2735_v0 = vunpack.c.l.bf16 %v1857_v55  ;;  %v1082_v1 = vunpack.i.h.s16 %v731_v21 }
  0x1f   : > { %v2744_v2 = vunpack.c.l.bf16 %v1920_v58  ;;  %v3023_v3 = vcombine.low %v2741_v53, %v2742_v59  ;;  %v1084_v4 = vunpack.i.h.s16 %v732_v61  ;;  %v9475_v5 = vpack.i.b16 %v731_v21, %v731_v21 }
  0x20   : > { %v2736_v6 = vunpack.c.l.bf16 %v1864_v62  ;;  %v2989_v9 = vcombine.low %v2733_v57, %v2734_v63  ;;  %v1210_v10 = vpack.i.b16 %v1082_v1, %v1082_v1  ;;  %v9476_v11 = vpack.i.b16 %v732_v61, %v732_v61 }
  0x21   : > { %v3024_v12 = vcombine.low %v2743_v60, %v2744_v2  ;;  %v3031_v13 = vrot.slane %v3023_v3, %v10028_v14  ;;  %v1212_v15 = vpack.i.b16 %v1084_v4, %v1084_v4  ;;  %v1376_v19 = vrot.slane %v9475_v5, %v10018_v8 }
  0x22   : > { %v2990_v18 = vcombine.low %v2735_v0, %v2736_v6  ;;  %v2997_v20 = vrot.slane %v2989_v9, %v10028_v14  ;;  %v1380_v23 = vrot.slane %v1210_v10, %v10018_v8  ;;  %v1384_v24 = vrot.slane %v9476_v11, %v10018_v8  ;;  %v9456_v9 = vld.sshfl [vmem:[%s10023_s27 + $0xc] sm:$0x33 pattern:$0x75316420] }
  0x23   : > { %v3038_v26 = vrot.slane %v3024_v12, %v10028_v14  ;;  %v1388_v21 = vrot.slane %v1212_v15, %v10018_v8  ;;  %v1922_v27 = vpack.i.b16 %v1376_v19, %v1376_v19  ;;  %v747_v28 = vrot.slane %v10034_v17, %v10016_v7 }
  0x24   : > { %v3004_v29 = vrot.slane %v2990_v18, %v10028_v14  ;;  %v1929_v30 = vpack.i.b16 %v1380_v23, %v1380_v23  ;;  %v1936_v31 = vpack.i.b16 %v1384_v24, %v1384_v24  ;;  %v754_v32 = vrot.slane %v740_v25, %v10016_v7 }
  0x25   : > { %v3039_v33 = vcombine.low %v3031_v13, %v3038_v26  ;;  %v1927_v34 = vrot.slane %v1922_v27, %v10018_v8  ;;  %v1943_v35 = vpack.i.b16 %v1388_v21, %v1388_v21  ;;  %v1086_v36 = vunpack.i.h.s16 %v747_v28 }
  0x26   : > { %v3005_v37 = vcombine.low %v2997_v20, %v3004_v29  ;;  %v1934_v38 = vrot.slane %v1929_v30, %v10018_v8  ;;  %v1941_v39 = vrot.slane %v1936_v31, %v10018_v8  ;;  %v1088_v40 = vunpack.i.h.s16 %v754_v32 }
  0x27   : > { %3537 = vrot.lane.b32.xlu1 %v3039_v33, %s9960_s28  ;;  %v1948_v41 = vrot.slane %v1943_v35, %v10018_v8  ;;  %v2745_v42 = vunpack.c.l.bf16 %v1927_v34  ;;  %v9477_v43 = vpack.i.b16 %v747_v28, %v747_v28  ;;  %v1214_v17 = vpack.i.b16 %v1086_v36, %v1086_v36 }
  0x28   : > { %3533 = vrot.lane.b32.xlu0 %v3005_v37, %s9960_s28  ;;  %v2746_v25 = vunpack.c.l.bf16 %v1934_v38  ;;  %v2747_v44 = vunpack.c.l.bf16 %v1941_v39  ;;  %v9478_v45 = vpack.i.b16 %v754_v32, %v754_v32  ;;  %v1216_v46 = vpack.i.b16 %v1088_v40, %v1088_v40 }
  0x29   : > { %v2748_v47 = vunpack.c.l.bf16 %v1948_v41  ;;  %v1392_v48 = vrot.slane %v9477_v43, %v10018_v8  ;;  %v1396_v49 = vrot.slane %v1214_v17, %v10018_v8  ;;  %v755_v50 = vcombine.high %v747_v28, %v747_v28 }
  0x2a   : > { %v3040_v51 = vcombine.low %v2745_v42, %v2746_v25  ;;  %v1400_v52 = vrot.slane %v9478_v45, %v10018_v8  ;;  %v1404_v53 = vrot.slane %v1216_v46, %v10018_v8  ;;  %v756_v54 = vcombine.high %v754_v32, %v754_v32 }
  0x2b   : > { %v3041_v55 = vcombine.low %v2747_v44, %v2748_v47  ;;  %v1950_v56 = vpack.i.b16 %v1392_v48, %v1392_v48  ;;  %v1957_v57 = vpack.i.b16 %v1396_v49, %v1396_v49  ;;  %v1090_v58 = vunpack.i.h.s16 %v755_v50 }
  0x2c   : > { %v3048_v59 = vrot.slane %v3040_v51, %v10028_v14  ;;  %v1964_v60 = vpack.i.b16 %v1400_v52, %v1400_v52  ;;  %v1971_v61 = vpack.i.b16 %v1404_v53, %v1404_v53  ;;  %v1092_v62 = vunpack.i.h.s16 %v756_v54 }
  0x2d   : > { %v3055_v63 = vrot.slane %v3041_v55, %v10028_v14  ;;  %v1955_v0 = vrot.slane %v1950_v56, %v10018_v8  ;;  %v1962_v1 = vrot.slane %v1957_v57, %v10018_v8  ;;  %v9479_v2 = vpack.i.b16 %v755_v50, %v755_v50 }
  0x2e   : > { %v1969_v3 = vrot.slane %v1964_v60, %v10018_v8  ;;  %v1976_v4 = vrot.slane %v1971_v61, %v10018_v8  ;;  %v1218_v5 = vpack.i.b16 %v1090_v58, %v1090_v58  ;;  %v9480_v6 = vpack.i.b16 %v756_v54, %v756_v54 }
  0x2f   : > { %v3056_v10 = vcombine.low %v3048_v59, %v3055_v63  ;;  %v2749_v11 = vunpack.c.l.bf16 %v1955_v0  ;;  %v2750_v12 = vunpack.c.l.bf16 %v1962_v1  ;;  %v1220_v13 = vpack.i.b16 %v1092_v62, %v1092_v62 }
  0x30   : > { %v2751_v15 = vunpack.c.l.bf16 %v1969_v3  ;;  %v2752_v19 = vunpack.c.l.bf16 %v1976_v4  ;;  %v1408_v18 = vrot.slane %v9479_v2, %v10018_v8  ;;  %v1412_v20 = vrot.slane %v1218_v5, %v10018_v8 }
  0x31   : > { %3539 = vrot.lane.b32.xlu1 %v3056_v10, %s9960_s28  ;;  %v3057_v23 = vcombine.low %v2749_v11, %v2750_v12  ;;  %v1416_v24 = vrot.slane %v9480_v6, %v10018_v8  ;;  %v1420_v26 = vrot.slane %v1220_v13, %v10018_v8  ;;  %v764_v21 = vcombine.high %v9456_v9, %v9456_v9  ;;  %v9457_v11 = vld.sshfl [vmem:[%s10023_s27 + $0x10] sm:$0x33 pattern:$0x75316420] }
  0x32   : > { %v3058_v27 = vcombine.low %v2751_v15, %v2752_v19  ;;  %v1978_v28 = vpack.i.b16 %v1408_v18, %v1408_v18  ;;  %v1985_v29 = vpack.i.b16 %v1412_v20, %v1412_v20  ;;  %v771_v30 = vrot.slane %v9456_v9, %v10016_v7 }
  0x33   : > { %v3065_v31 = vrot.slane %v3057_v23, %v10028_v14  ;;  %v1992_v32 = vpack.i.b16 %v1416_v24, %v1416_v24  ;;  %v1999_v33 = vpack.i.b16 %v1420_v26, %v1420_v26  ;;  %v778_v34 = vrot.slane %v764_v21, %v10016_v7 }
  0x34   : > { %v3072_v35 = vrot.slane %v3058_v27, %v10028_v14  ;;  %v1983_v36 = vrot.slane %v1978_v28, %v10018_v8  ;;  %v1990_v37 = vrot.slane %v1985_v29, %v10018_v8  ;;  %v1094_v38 = vunpack.i.h.s16 %v771_v30 }
  0x35   : > { %v1997_v39 = vrot.slane %v1992_v32, %v10018_v8  ;;  %v2004_v40 = vrot.slane %v1999_v33, %v10018_v8  ;;  %v1096_v41 = vunpack.i.h.s16 %v778_v34  ;;  %v9481_v42 = vpack.i.b16 %v771_v30, %v771_v30 }
  0x36   : > { %v3073_v43 = vcombine.low %v3065_v31, %v3072_v35  ;;  %v2753_v17 = vunpack.c.l.bf16 %v1983_v36  ;;  %v2754_v25 = vunpack.c.l.bf16 %v1990_v37  ;;  %v1222_v44 = vpack.i.b16 %v1094_v38, %v1094_v38 }
  0x37   : > { %v2755_v45 = vunpack.c.l.bf16 %v1997_v39  ;;  %v2756_v46 = vunpack.c.l.bf16 %v2004_v40  ;;  %v9482_v47 = vpack.i.b16 %v778_v34, %v778_v34  ;;  %v1224_v48 = vpack.i.b16 %v1096_v41, %v1096_v41 }
  0x38   : > { %3541 = vrot.lane.b32.xlu0 %v3073_v43, %s9960_s28  ;;  %v3074_v49 = vcombine.low %v2753_v17, %v2754_v25  ;;  %v1424_v50 = vrot.slane %v9481_v42, %v10018_v8  ;;  %v1428_v51 = vrot.slane %v1222_v44, %v10018_v8  ;;  %v779_v52 = vcombine.high %v771_v30, %v771_v30 }
  0x39   : > { %v3075_v53 = vcombine.low %v2755_v45, %v2756_v46  ;;  %v1432_v54 = vrot.slane %v9482_v47, %v10018_v8  ;;  %v1436_v55 = vrot.slane %v1224_v48, %v10018_v8  ;;  %v780_v56 = vcombine.high %v778_v34, %v778_v34 }
  0x3a   : > { %v3082_v57 = vrot.slane %v3074_v49, %v10028_v14  ;;  %v2006_v58 = vpack.i.b16 %v1424_v50, %v1424_v50  ;;  %v2013_v59 = vpack.i.b16 %v1428_v51, %v1428_v51  ;;  %v1098_v60 = vunpack.i.h.s16 %v779_v52 }
  0x3b   : > { %v3089_v61 = vrot.slane %v3075_v53, %v10028_v14  ;;  %v2020_v62 = vpack.i.b16 %v1432_v54, %v1432_v54  ;;  %v2027_v63 = vpack.i.b16 %v1436_v55, %v1436_v55  ;;  %v1100_v0 = vunpack.i.h.s16 %v780_v56 }
  0x3c   : > { %v2011_v1 = vrot.slane %v2006_v58, %v10018_v8  ;;  %v2018_v2 = vrot.slane %v2013_v59, %v10018_v8  ;;  %v9483_v3 = vpack.i.b16 %v779_v52, %v779_v52  ;;  %v1226_v4 = vpack.i.b16 %v1098_v60, %v1098_v60 }
  0x3d   : > { %v3090_v5 = vcombine.low %v3082_v57, %v3089_v61  ;;  %v2025_v6 = vrot.slane %v2020_v62, %v10018_v8  ;;  %v2032_v9 = vrot.slane %v2027_v63, %v10018_v8  ;;  %v9484_v10 = vpack.i.b16 %v780_v56, %v780_v56 }
  0x3e   : > { %v2757_v12 = vunpack.c.l.bf16 %v2011_v1  ;;  %v2758_v13 = vunpack.c.l.bf16 %v2018_v2  ;;  %v1228_v15 = vpack.i.b16 %v1100_v0, %v1100_v0  ;;  %v1440_v19 = vrot.slane %v9483_v3, %v10018_v8 }
  0x3f   : > { %3543 = vrot.lane.b32.xlu1 %v3090_v5, %s9960_s28  ;;  %v2759_v18 = vunpack.c.l.bf16 %v2025_v6  ;;  %v2760_v20 = vunpack.c.l.bf16 %v2032_v9  ;;  %v1444_v23 = vrot.slane %v1226_v4, %v10018_v8  ;;  %v1448_v24 = vrot.slane %v9484_v10, %v10018_v8  ;;  %v9458_v9 = vld.sshfl [vmem:[%s10023_s27 + $0x14] sm:$0x33 pattern:$0x75316420] }
  0x40   : > { %v3091_v26 = vcombine.low %v2757_v12, %v2758_v13  ;;  %v1452_v21 = vrot.slane %v1228_v15, %v10018_v8  ;;  %v2034_v27 = vpack.i.b16 %v1440_v19, %v1440_v19  ;;  %v788_v28 = vcombine.high %v9457_v11, %v9457_v11 }
  0x41   : > { %v3092_v29 = vcombine.low %v2759_v18, %v2760_v20  ;;  %v2041_v30 = vpack.i.b16 %v1444_v23, %v1444_v23  ;;  %v2048_v31 = vpack.i.b16 %v1448_v24, %v1448_v24  ;;  %v795_v32 = vrot.slane %v9457_v11, %v10016_v7 }
  0x42   : > { %v3099_v33 = vrot.slane %v3091_v26, %v10028_v14  ;;  %v2039_v34 = vrot.slane %v2034_v27, %v10018_v8  ;;  %v2055_v35 = vpack.i.b16 %v1452_v21, %v1452_v21  ;;  %v802_v36 = vrot.slane %v788_v28, %v10016_v7 }
  0x43   : > { %v3106_v37 = vrot.slane %v3092_v29, %v10028_v14  ;;  %v2046_v38 = vrot.slane %v2041_v30, %v10018_v8  ;;  %v2053_v39 = vrot.slane %v2048_v31, %v10018_v8  ;;  %v1102_v40 = vunpack.i.h.s16 %v795_v32 }
  0x44   : > { %v2060_v41 = vrot.slane %v2055_v35, %v10018_v8  ;;  %v2761_v42 = vunpack.c.l.bf16 %v2039_v34  ;;  %v1104_v43 = vunpack.i.h.s16 %v802_v36  ;;  %v9485_v17 = vpack.i.b16 %v795_v32, %v795_v32 }
  0x45   : > { %v3107_v25 = vcombine.low %v3099_v33, %v3106_v37  ;;  %v2762_v44 = vunpack.c.l.bf16 %v2046_v38  ;;  %v2763_v45 = vunpack.c.l.bf16 %v2053_v39  ;;  %v1230_v46 = vpack.i.b16 %v1102_v40, %v1102_v40 }
  0x46   : > { %v2764_v47 = vunpack.c.l.bf16 %v2060_v41  ;;  %v9486_v48 = vpack.i.b16 %v802_v36, %v802_v36  ;;  %v1232_v49 = vpack.i.b16 %v1104_v43, %v1104_v43  ;;  %v1456_v50 = vrot.slane %v9485_v17, %v10018_v8 }
  0x47   : > { %3545 = vrot.lane.b32.xlu0 %v3107_v25, %s9960_s28  ;;  %v3108_v51 = vcombine.low %v2761_v42, %v2762_v44  ;;  %v1460_v52 = vrot.slane %v1230_v46, %v10018_v8  ;;  %v803_v53 = vcombine.high %v795_v32, %v795_v32  ;;  %v804_v54 = vcombine.high %v802_v36, %v802_v36 }
  0x48   : > { %v3109_v55 = vcombine.low %v2763_v45, %v2764_v47  ;;  %v1464_v56 = vrot.slane %v9486_v48, %v10018_v8  ;;  %v1468_v57 = vrot.slane %v1232_v49, %v10018_v8  ;;  %v2062_v58 = vpack.i.b16 %v1456_v50, %v1456_v50 }
  0x49   : > { %v3116_v59 = vrot.slane %v3108_v51, %v10028_v14  ;;  %v2069_v60 = vpack.i.b16 %v1460_v52, %v1460_v52  ;;  %v1106_v61 = vunpack.i.h.s16 %v803_v53  ;;  %v1108_v62 = vunpack.i.h.s16 %v804_v54 }
  0x4a   : > { %v3123_v63 = vrot.slane %v3109_v55, %v10028_v14  ;;  %v2067_v0 = vrot.slane %v2062_v58, %v10018_v8  ;;  %v2076_v1 = vpack.i.b16 %v1464_v56, %v1464_v56  ;;  %v2083_v2 = vpack.i.b16 %v1468_v57, %v1468_v57 }
  0x4b   : > { %v2074_v3 = vrot.slane %v2069_v60, %v10018_v8  ;;  %v9487_v4 = vpack.i.b16 %v803_v53, %v803_v53  ;;  %v1234_v5 = vpack.i.b16 %v1106_v61, %v1106_v61  ;;  %v9488_v6 = vpack.i.b16 %v804_v54, %v804_v54 }
  0x4c   : > { %v3124_v10 = vcombine.low %v3116_v59, %v3123_v63  ;;  %v2081_v11 = vrot.slane %v2076_v1, %v10018_v8  ;;  %v2088_v12 = vrot.slane %v2083_v2, %v10018_v8  ;;  %v2765_v13 = vunpack.c.l.bf16 %v2067_v0 }
  0x4d   : > { %v2766_v15 = vunpack.c.l.bf16 %v2074_v3  ;;  %v1236_v19 = vpack.i.b16 %v1108_v62, %v1108_v62  ;;  %v1472_v18 = vrot.slane %v9487_v4, %v10018_v8  ;;  %v1476_v20 = vrot.slane %v1234_v5, %v10018_v8 }
  0x4e   : > { %3547 = vrot.lane.b32.xlu1 %v3124_v10, %s9960_s28  ;;  %v2767_v23 = vunpack.c.l.bf16 %v2081_v11  ;;  %v2768_v24 = vunpack.c.l.bf16 %v2088_v12  ;;  %v1480_v26 = vrot.slane %v9488_v6, %v10018_v8  ;;  %v812_v21 = vcombine.high %v9458_v9, %v9458_v9  ;;  %v9459_v11 = vld.sshfl [vmem:[%s10023_s27 + $0x18] sm:$0x33 pattern:$0x75316420] }
  0x4f   : > { %v3125_v27 = vcombine.low %v2765_v13, %v2766_v15  ;;  %v1484_v28 = vrot.slane %v1236_v19, %v10018_v8  ;;  %v2090_v29 = vpack.i.b16 %v1472_v18, %v1472_v18  ;;  %v2097_v30 = vpack.i.b16 %v1476_v20, %v1476_v20 }
  0x50   : > { %v3126_v31 = vcombine.low %v2767_v23, %v2768_v24  ;;  %v2104_v32 = vpack.i.b16 %v1480_v26, %v1480_v26  ;;  %v819_v33 = vrot.slane %v9458_v9, %v10016_v7  ;;  %v826_v34 = vrot.slane %v812_v21, %v10016_v7 }
  0x51   : > { %v3133_v35 = vrot.slane %v3125_v27, %v10028_v14  ;;  %v2095_v36 = vrot.slane %v2090_v29, %v10018_v8  ;;  %v2102_v37 = vrot.slane %v2097_v30, %v10018_v8  ;;  %v2111_v38 = vpack.i.b16 %v1484_v28, %v1484_v28 }
  0x52   : > { %v3140_v39 = vrot.slane %v3126_v31, %v10028_v14  ;;  %v2109_v40 = vrot.slane %v2104_v32, %v10018_v8  ;;  %v1110_v41 = vunpack.i.h.s16 %v819_v33  ;;  %v1112_v42 = vunpack.i.h.s16 %v826_v34 }
  0x53   : > { %v2116_v43 = vrot.slane %v2111_v38, %v10018_v8  ;;  %v2769_v17 = vunpack.c.l.bf16 %v2095_v36  ;;  %v2770_v25 = vunpack.c.l.bf16 %v2102_v37  ;;  %v9489_v44 = vpack.i.b16 %v819_v33, %v819_v33 }
  0x54   : > { %v3141_v45 = vcombine.low %v3133_v35, %v3140_v39  ;;  %v2771_v46 = vunpack.c.l.bf16 %v2109_v40  ;;  %v1238_v47 = vpack.i.b16 %v1110_v41, %v1110_v41  ;;  %v9490_v48 = vpack.i.b16 %v826_v34, %v826_v34 }
  0x55   : > { %v2772_v49 = vunpack.c.l.bf16 %v2116_v43  ;;  %v3142_v50 = vcombine.low %v2769_v17, %v2770_v25  ;;  %v1240_v51 = vpack.i.b16 %v1112_v42, %v1112_v42  ;;  %v1488_v52 = vrot.slane %v9489_v44, %v10018_v8 }
  0x56   : > { %3549 = vrot.lane.b32.xlu0 %v3141_v45, %s9960_s28  ;;  %v1492_v53 = vrot.slane %v1238_v47, %v10018_v8  ;;  %v1496_v54 = vrot.slane %v9490_v48, %v10018_v8  ;;  %v827_v55 = vcombine.high %v819_v33, %v819_v33  ;;  %v828_v56 = vcombine.high %v826_v34, %v826_v34 }
  0x57   : > { %v3143_v57 = vcombine.low %v2771_v46, %v2772_v49  ;;  %v3150_v58 = vrot.slane %v3142_v50, %v10028_v14  ;;  %v1500_v59 = vrot.slane %v1240_v51, %v10018_v8  ;;  %v2118_v60 = vpack.i.b16 %v1488_v52, %v1488_v52 }
  0x58   : > { %v2125_v61 = vpack.i.b16 %v1492_v53, %v1492_v53  ;;  %v2132_v62 = vpack.i.b16 %v1496_v54, %v1496_v54  ;;  %v1114_v63 = vunpack.i.h.s16 %v827_v55  ;;  %v1116_v0 = vunpack.i.h.s16 %v828_v56 }
  0x59   : > { %v3157_v1 = vrot.slane %v3143_v57, %v10028_v14  ;;  %v2123_v2 = vrot.slane %v2118_v60, %v10018_v8  ;;  %v2139_v3 = vpack.i.b16 %v1500_v59, %v1500_v59  ;;  %v9491_v4 = vpack.i.b16 %v827_v55, %v827_v55 }
  0x5a   : > { %v2130_v5 = vrot.slane %v2125_v61, %v10018_v8  ;;  %v2137_v6 = vrot.slane %v2132_v62, %v10018_v8  ;;  %v1242_v9 = vpack.i.b16 %v1114_v63, %v1114_v63  ;;  %v9492_v10 = vpack.i.b16 %v828_v56, %v828_v56 }
  0x5b   : > { %v3158_v12 = vcombine.low %v3150_v58, %v3157_v1  ;;  %v2144_v13 = vrot.slane %v2139_v3, %v10018_v8  ;;  %v2773_v15 = vunpack.c.l.bf16 %v2123_v2  ;;  %v1244_v19 = vpack.i.b16 %v1116_v0, %v1116_v0 }
  0x5c   : > { %v2774_v18 = vunpack.c.l.bf16 %v2130_v5  ;;  %v2775_v20 = vunpack.c.l.bf16 %v2137_v6  ;;  %v1504_v23 = vrot.slane %v9491_v4, %v10018_v8  ;;  %v1508_v24 = vrot.slane %v1242_v9, %v10018_v8 }
  0x5d   : > { %3551 = vrot.lane.b32.xlu1 %v3158_v12, %s9960_s28  ;;  %v2776_v26 = vunpack.c.l.bf16 %v2144_v13  ;;  %v1512_v21 = vrot.slane %v9492_v10, %v10018_v8  ;;  %v1516_v27 = vrot.slane %v1244_v19, %v10018_v8  ;;  %v836_v28 = vcombine.high %v9459_v11, %v9459_v11  ;;  %v9460_v13 = vld.sshfl [vmem:[%s10023_s27 + $0x1c] sm:$0x33 pattern:$0x75316420] }
  0x5e   : > { %v3159_v29 = vcombine.low %v2773_v15, %v2774_v18  ;;  %v2146_v30 = vpack.i.b16 %v1504_v23, %v1504_v23  ;;  %v2153_v31 = vpack.i.b16 %v1508_v24, %v1508_v24  ;;  %v843_v32 = vrot.slane %v9459_v11, %v10016_v7 }
  0x5f   : > { %v3160_v33 = vcombine.low %v2775_v20, %v2776_v26  ;;  %v2160_v34 = vpack.i.b16 %v1512_v21, %v1512_v21  ;;  %v2167_v35 = vpack.i.b16 %v1516_v27, %v1516_v27  ;;  %v850_v36 = vrot.slane %v836_v28, %v10016_v7 }
  0x60   : > { %v3167_v37 = vrot.slane %v3159_v29, %v10028_v14  ;;  %v2151_v38 = vrot.slane %v2146_v30, %v10018_v8  ;;  %v2158_v39 = vrot.slane %v2153_v31, %v10018_v8  ;;  %v1118_v40 = vunpack.i.h.s16 %v843_v32 }
  0x61   : > { %v3174_v41 = vrot.slane %v3160_v33, %v10028_v14  ;;  %v2165_v42 = vrot.slane %v2160_v34, %v10018_v8  ;;  %v2172_v43 = vrot.slane %v2167_v35, %v10018_v8  ;;  %v1120_v17 = vunpack.i.h.s16 %v850_v36 }
  0x62   : > { %v2777_v25 = vunpack.c.l.bf16 %v2151_v38  ;;  %v2778_v44 = vunpack.c.l.bf16 %v2158_v39  ;;  %v9493_v45 = vpack.i.b16 %v843_v32, %v843_v32  ;;  %v1246_v46 = vpack.i.b16 %v1118_v40, %v1118_v40 }
  0x63   : > { %v3175_v47 = vcombine.low %v3167_v37, %v3174_v41  ;;  %v2779_v48 = vunpack.c.l.bf16 %v2165_v42  ;;  %v2780_v49 = vunpack.c.l.bf16 %v2172_v43  ;;  %v9494_v50 = vpack.i.b16 %v850_v36, %v850_v36 }
  0x64   : > { %v3176_v51 = vcombine.low %v2777_v25, %v2778_v44  ;;  %v1248_v52 = vpack.i.b16 %v1120_v17, %v1120_v17  ;;  %v1520_v53 = vrot.slane %v9493_v45, %v10018_v8  ;;  %v1524_v54 = vrot.slane %v1246_v46, %v10018_v8 }
  0x65   : > { %3553 = vrot.lane.b32.xlu0 %v3175_v47, %s9960_s28  ;;  %v3177_v55 = vcombine.low %v2779_v48, %v2780_v49  ;;  %v1528_v56 = vrot.slane %v9494_v50, %v10018_v8  ;;  %v851_v57 = vcombine.high %v843_v32, %v843_v32  ;;  %v852_v58 = vcombine.high %v850_v36, %v850_v36 }
  0x66   : > { %v3184_v59 = vrot.slane %v3176_v51, %v10028_v14  ;;  %v1532_v60 = vrot.slane %v1248_v52, %v10018_v8  ;;  %v2174_v61 = vpack.i.b16 %v1520_v53, %v1520_v53  ;;  %v2181_v62 = vpack.i.b16 %v1524_v54, %v1524_v54 }
  0x67   : > { %v3191_v63 = vrot.slane %v3177_v55, %v10028_v14  ;;  %v2188_v0 = vpack.i.b16 %v1528_v56, %v1528_v56  ;;  %v1122_v1 = vunpack.i.h.s16 %v851_v57  ;;  %v1124_v2 = vunpack.i.h.s16 %v852_v58 }
  0x68   : > { %v2179_v3 = vrot.slane %v2174_v61, %v10018_v8  ;;  %v2186_v4 = vrot.slane %v2181_v62, %v10018_v8  ;;  %v2195_v5 = vpack.i.b16 %v1532_v60, %v1532_v60  ;;  %v9495_v6 = vpack.i.b16 %v851_v57, %v851_v57 }
  0x69   : > { %v3192_v9 = vcombine.low %v3184_v59, %v3191_v63  ;;  %v2193_v10 = vrot.slane %v2188_v0, %v10018_v8  ;;  %v1250_v11 = vpack.i.b16 %v1122_v1, %v1122_v1  ;;  %v9496_v12 = vpack.i.b16 %v852_v58, %v852_v58 }
  0x6a   : > { %v2200_v15 = vrot.slane %v2195_v5, %v10018_v8  ;;  %v2781_v19 = vunpack.c.l.bf16 %v2179_v3  ;;  %v2782_v18 = vunpack.c.l.bf16 %v2186_v4  ;;  %v1252_v20 = vpack.i.b16 %v1124_v2, %v1124_v2 }
  0x6b   : > { %3555 = vrot.lane.b32.xlu1 %v3192_v9, %s9960_s28  ;;  %v2783_v23 = vunpack.c.l.bf16 %v2193_v10  ;;  %v1536_v24 = vrot.slane %v9495_v6, %v10018_v8  ;;  %v1540_v26 = vrot.slane %v1250_v11, %v10018_v8  ;;  %v1544_v21 = vrot.slane %v9496_v12, %v10018_v8 }
  0x6c   : > { %v2784_v27 = vunpack.c.l.bf16 %v2200_v15  ;;  %v3193_v28 = vcombine.low %v2781_v19, %v2782_v18  ;;  %v1548_v29 = vrot.slane %v1252_v20, %v10018_v8  ;;  %v860_v30 = vcombine.high %v9460_v13, %v9460_v13  ;;  %v9461_v19 = vld.sshfl [vmem:[%s10023_s27 + $0x20] sm:$0x33 pattern:$0x75316420] }
  0x6d   : > { %v2202_v31 = vpack.i.b16 %v1536_v24, %v1536_v24  ;;  %v2209_v32 = vpack.i.b16 %v1540_v26, %v1540_v26  ;;  %v2216_v33 = vpack.i.b16 %v1544_v21, %v1544_v21  ;;  %v867_v34 = vrot.slane %v9460_v13, %v10016_v7 }
  0x6e   : > { %v3194_v35 = vcombine.low %v2783_v23, %v2784_v27  ;;  %v3201_v36 = vrot.slane %v3193_v28, %v10028_v14  ;;  %v2223_v37 = vpack.i.b16 %v1548_v29, %v1548_v29  ;;  %v874_v38 = vrot.slane %v860_v30, %v10016_v7 }
  0x6f   : > { %v2207_v39 = vrot.slane %v2202_v31, %v10018_v8  ;;  %v2214_v40 = vrot.slane %v2209_v32, %v10018_v8  ;;  %v2221_v41 = vrot.slane %v2216_v33, %v10018_v8  ;;  %v1126_v42 = vunpack.i.h.s16 %v867_v34 }
  0x70   : > { %v3208_v43 = vrot.slane %v3194_v35, %v10028_v14  ;;  %v2228_v17 = vrot.slane %v2223_v37, %v10018_v8  ;;  %v1128_v25 = vunpack.i.h.s16 %v874_v38  ;;  %v9497_v44 = vpack.i.b16 %v867_v34, %v867_v34 }
  0x71   : > { %v2785_v45 = vunpack.c.l.bf16 %v2207_v39  ;;  %v2786_v46 = vunpack.c.l.bf16 %v2214_v40  ;;  %v2787_v47 = vunpack.c.l.bf16 %v2221_v41  ;;  %v1254_v48 = vpack.i.b16 %v1126_v42, %v1126_v42 }
  0x72   : > { %v3209_v49 = vcombine.low %v3201_v36, %v3208_v43  ;;  %v2788_v50 = vunpack.c.l.bf16 %v2228_v17  ;;  %v9498_v51 = vpack.i.b16 %v874_v38, %v874_v38  ;;  %v1256_v52 = vpack.i.b16 %v1128_v25, %v1128_v25 }
  0x73   : > { %v3210_v53 = vcombine.low %v2785_v45, %v2786_v46  ;;  %v1552_v54 = vrot.slane %v9497_v44, %v10018_v8  ;;  %v1556_v55 = vrot.slane %v1254_v48, %v10018_v8  ;;  %v875_v56 = vcombine.high %v867_v34, %v867_v34 }
  0x74   : > { %3557 = vrot.lane.b32.xlu0 %v3209_v49, %s9960_s28  ;;  %v3211_v57 = vcombine.low %v2787_v47, %v2788_v50  ;;  %v1560_v58 = vrot.slane %v9498_v51, %v10018_v8  ;;  %v1564_v59 = vrot.slane %v1256_v52, %v10018_v8  ;;  %v876_v60 = vcombine.high %v874_v38, %v874_v38 }
  0x75   : > { %v3218_v61 = vrot.slane %v3210_v53, %v10028_v14  ;;  %v2230_v62 = vpack.i.b16 %v1552_v54, %v1552_v54  ;;  %v2237_v63 = vpack.i.b16 %v1556_v55, %v1556_v55  ;;  %v1130_v0 = vunpack.i.h.s16 %v875_v56 }
  0x76   : > { %v3225_v1 = vrot.slane %v3211_v57, %v10028_v14  ;;  %v2244_v2 = vpack.i.b16 %v1560_v58, %v1560_v58  ;;  %v2251_v3 = vpack.i.b16 %v1564_v59, %v1564_v59  ;;  %v1132_v4 = vunpack.i.h.s16 %v876_v60 }
  0x77   : > { %v2235_v5 = vrot.slane %v2230_v62, %v10018_v8  ;;  %v2242_v6 = vrot.slane %v2237_v63, %v10018_v8  ;;  %v9499_v9 = vpack.i.b16 %v875_v56, %v875_v56  ;;  %v1258_v10 = vpack.i.b16 %v1130_v0, %v1130_v0 }
  0x78   : > { %v3226_v11 = vcombine.low %v3218_v61, %v3225_v1  ;;  %v2249_v12 = vrot.slane %v2244_v2, %v10018_v8  ;;  %v2256_v13 = vrot.slane %v2251_v3, %v10018_v8  ;;  %v9500_v15 = vpack.i.b16 %v876_v60, %v876_v60 }
  0x79   : > { %v2789_v18 = vunpack.c.l.bf16 %v2235_v5  ;;  %v2790_v20 = vunpack.c.l.bf16 %v2242_v6  ;;  %v1260_v23 = vpack.i.b16 %v1132_v4, %v1132_v4  ;;  %v1568_v24 = vrot.slane %v9499_v9, %v10018_v8 }
  0x7a   : > { %3559 = vrot.lane.b32.xlu1 %v3226_v11, %s9960_s28  ;;  %v2791_v26 = vunpack.c.l.bf16 %v2249_v12  ;;  %v2792_v21 = vunpack.c.l.bf16 %v2256_v13  ;;  %v1572_v27 = vrot.slane %v1258_v10, %v10018_v8  ;;  %v1576_v28 = vrot.slane %v9500_v15, %v10018_v8 }
  0x7b   : > { %v3227_v29 = vcombine.low %v2789_v18, %v2790_v20  ;;  %v1580_v30 = vrot.slane %v1260_v23, %v10018_v8  ;;  %v2258_v31 = vpack.i.b16 %v1568_v24, %v1568_v24  ;;  %v884_v32 = vcombine.high %v9461_v19, %v9461_v19 }
  0x7c   : > { %v3228_v33 = vcombine.low %v2791_v26, %v2792_v21  ;;  %v2265_v34 = vpack.i.b16 %v1572_v27, %v1572_v27  ;;  %v2272_v35 = vpack.i.b16 %v1576_v28, %v1576_v28  ;;  %v891_v36 = vrot.slane %v9461_v19, %v10016_v7 }
  0x7d   : > { %v3235_v37 = vrot.slane %v3227_v29, %v10028_v14  ;;  %v2263_v38 = vrot.slane %v2258_v31, %v10018_v8  ;;  %v2279_v39 = vpack.i.b16 %v1580_v30, %v1580_v30  ;;  %v898_v40 = vrot.slane %v884_v32, %v10016_v7 }
  0x7e   : > { %v3242_v41 = vrot.slane %v3228_v33, %v10028_v14  ;;  %v2270_v42 = vrot.slane %v2265_v34, %v10018_v8  ;;  %v2277_v43 = vrot.slane %v2272_v35, %v10018_v8  ;;  %v1134_v17 = vunpack.i.h.s16 %v891_v36 }
  0x7f   : > { %v2284_v25 = vrot.slane %v2279_v39, %v10018_v8  ;;  %v2793_v44 = vunpack.c.l.bf16 %v2263_v38  ;;  %v1136_v45 = vunpack.i.h.s16 %v898_v40  ;;  %v9501_v46 = vpack.i.b16 %v891_v36, %v891_v36 }
  0x80   : > { %v3243_v47 = vcombine.low %v3235_v37, %v3242_v41  ;;  %v2794_v48 = vunpack.c.l.bf16 %v2270_v42  ;;  %v2795_v49 = vunpack.c.l.bf16 %v2277_v43  ;;  %v1262_v50 = vpack.i.b16 %v1134_v17, %v1134_v17 }
  0x81   : > { %v2796_v51 = vunpack.c.l.bf16 %v2284_v25  ;;  %v9502_v52 = vpack.i.b16 %v898_v40, %v898_v40  ;;  %v1264_v53 = vpack.i.b16 %v1136_v45, %v1136_v45  ;;  %v1584_v54 = vrot.slane %v9501_v46, %v10018_v8 }
  0x82   : > { %3561 = vrot.lane.b32.xlu0 %v3243_v47, %s9960_s28  ;;  %v3244_v55 = vcombine.low %v2793_v44, %v2794_v48  ;;  %v1588_v56 = vrot.slane %v1262_v50, %v10018_v8  ;;  %v899_v57 = vcombine.high %v891_v36, %v891_v36  ;;  %v900_v58 = vcombine.high %v898_v40, %v898_v40 }
  0x83   : > { %v3245_v59 = vcombine.low %v2795_v49, %v2796_v51  ;;  %v1592_v60 = vrot.slane %v9502_v52, %v10018_v8  ;;  %v1596_v61 = vrot.slane %v1264_v53, %v10018_v8  ;;  %v2286_v62 = vpack.i.b16 %v1584_v54, %v1584_v54 }
  0x84   : > { %v3252_v63 = vrot.slane %v3244_v55, %v10028_v14  ;;  %v2293_v0 = vpack.i.b16 %v1588_v56, %v1588_v56  ;;  %v1138_v1 = vunpack.i.h.s16 %v899_v57  ;;  %v1140_v2 = vunpack.i.h.s16 %v900_v58 }
  0x85   : > { %v3259_v3 = vrot.slane %v3245_v59, %v10028_v14  ;;  %v2291_v4 = vrot.slane %v2286_v62, %v10018_v8  ;;  %v2300_v5 = vpack.i.b16 %v1592_v60, %v1592_v60  ;;  %v2307_v6 = vpack.i.b16 %v1596_v61, %v1596_v61 }
  0x86   : > { %v2298_v9 = vrot.slane %v2293_v0, %v10018_v8  ;;  %v9503_v10 = vpack.i.b16 %v899_v57, %v899_v57  ;;  %v1266_v11 = vpack.i.b16 %v1138_v1, %v1138_v1  ;;  %v9504_v12 = vpack.i.b16 %v900_v58, %v900_v58 }
  0x87   : > { %v3260_v13 = vcombine.low %v3252_v63, %v3259_v3  ;;  %v2305_v15 = vrot.slane %v2300_v5, %v10018_v8  ;;  %v2312_v19 = vrot.slane %v2307_v6, %v10018_v8  ;;  %v2797_v18 = vunpack.c.l.bf16 %v2291_v4 }
  0x88   : > { %v2798_v20 = vunpack.c.l.bf16 %v2298_v9  ;;  %v1268_v23 = vpack.i.b16 %v1140_v2, %v1140_v2  ;;  %v1600_v24 = vrot.slane %v9503_v10, %v10018_v8  ;;  %v1604_v26 = vrot.slane %v1266_v11, %v10018_v8 }
  0x89   : > { %3563 = vrot.lane.b32.xlu1 %v3260_v13, %s9960_s28  ;;  %v2799_v21 = vunpack.c.l.bf16 %v2305_v15  ;;  %v2800_v27 = vunpack.c.l.bf16 %v2312_v19  ;;  %v1608_v28 = vrot.slane %v9504_v12, %v10018_v8  ;;  %v707_v29 = vcombine.high %v10031_v16, %v10031_v16 }
  0x8a   : > { %v3261_v30 = vcombine.low %v2797_v18, %v2798_v20  ;;  %v1612_v31 = vrot.slane %v1268_v23, %v10018_v8  ;;  %v2314_v32 = vpack.i.b16 %v1600_v24, %v1600_v24  ;;  %v2321_v33 = vpack.i.b16 %v1604_v26, %v1604_v26 }
  0x8b   : > { %v3262_v34 = vcombine.low %v2799_v21, %v2800_v27  ;;  %v2328_v35 = vpack.i.b16 %v1608_v28, %v1608_v28  ;;  %v708_v36 = vcombine.high %v10038_v22, %v10038_v22  ;;  %v1074_v37 = vunpack.i.h.s16 %v707_v29  ;;  %v9462_v22 = vld.sshfl [vmem:[%s10023_s27 + $0x24] sm:$0x33 pattern:$0x75316420] }
  0x8c   : > { %v3269_v38 = vrot.slane %v3261_v30, %v10028_v14  ;;  %v2319_v39 = vrot.slane %v2314_v32, %v10018_v8  ;;  %v2326_v40 = vrot.slane %v2321_v33, %v10018_v8  ;;  %v2335_v41 = vpack.i.b16 %v1612_v31, %v1612_v31 }
  0x8d   : > { %v3276_v16 = vrot.slane %v3262_v34, %v10028_v14  ;;  %v2333_v42 = vrot.slane %v2328_v35, %v10018_v8  ;;  %v1076_v43 = vunpack.i.h.s16 %v708_v36  ;;  %v9471_v17 = vpack.i.b16 %v707_v29, %v707_v29 }
  0x8e   : > { %v2340_v25 = vrot.slane %v2335_v41, %v10018_v8  ;;  %v2801_v44 = vunpack.c.l.bf16 %v2319_v39  ;;  %v2802_v45 = vunpack.c.l.bf16 %v2326_v40  ;;  %v1202_v46 = vpack.i.b16 %v1074_v37, %v1074_v37 }
  0x8f   : > { %v3277_v47 = vcombine.low %v3269_v38, %v3276_v16  ;;  %v2803_v48 = vunpack.c.l.bf16 %v2333_v42  ;;  %v9472_v49 = vpack.i.b16 %v708_v36, %v708_v36  ;;  %v1204_v50 = vpack.i.b16 %v1076_v43, %v1076_v43 }
  0x90   : > { %v2804_v51 = vunpack.c.l.bf16 %v2340_v25  ;;  %v3278_v52 = vcombine.low %v2801_v44, %v2802_v45  ;;  %v1344_v53 = vrot.slane %v9471_v17, %v10018_v8  ;;  %v1348_v54 = vrot.slane %v1202_v46, %v10018_v8 }
  0x91   : > { %3565 = vrot.lane.b32.xlu0 %v3277_v47, %s9960_s28  ;;  %v1352_v55 = vrot.slane %v9472_v49, %v10018_v8  ;;  %v1356_v56 = vrot.slane %v1204_v50, %v10018_v8  ;;  %v908_v57 = vcombine.high %v9462_v22, %v9462_v22  ;;  %v915_v58 = vrot.slane %v9462_v22, %v10016_v7  ;;  %v9463_v22 = vld.sshfl [vmem:[%s10023_s27 + $0x28] sm:$0x33 pattern:$0x75316420] }
  0x92   : > { %v3279_v59 = vcombine.low %v2803_v48, %v2804_v51  ;;  %v3286_v60 = vrot.slane %v3278_v52, %v10028_v14  ;;  %v1866_v61 = vpack.i.b16 %v1344_v53, %v1344_v53  ;;  %v1873_v62 = vpack.i.b16 %v1348_v54, %v1348_v54 }
  0x93   : > { %v1880_v63 = vpack.i.b16 %v1352_v55, %v1352_v55  ;;  %v1887_v0 = vpack.i.b16 %v1356_v56, %v1356_v56  ;;  %v922_v1 = vrot.slane %v908_v57, %v10016_v7  ;;  %v923_v2 = vcombine.high %v915_v58, %v915_v58 }
  0x94   : > { %v3293_v3 = vrot.slane %v3279_v59, %v10028_v14  ;;  %v1871_v4 = vrot.slane %v1866_v61, %v10018_v8  ;;  %v1878_v5 = vrot.slane %v1873_v62, %v10018_v8  ;;  %v1142_v6 = vunpack.i.h.s16 %v915_v58 }
  0x95   : > { %v1885_v9 = vrot.slane %v1880_v63, %v10018_v8  ;;  %v1892_v10 = vrot.slane %v1887_v0, %v10018_v8  ;;  %v924_v11 = vcombine.high %v922_v1, %v922_v1  ;;  %v1146_v12 = vunpack.i.h.s16 %v923_v2 }
  0x96   : > { %v3294_v13 = vcombine.low %v3286_v60, %v3293_v3  ;;  %v2737_v15 = vunpack.c.l.bf16 %v1871_v4  ;;  %v2738_v19 = vunpack.c.l.bf16 %v1878_v5  ;;  %v9507_v18 = vpack.i.b16 %v923_v2, %v923_v2 }
  0x97   : > { %v2739_v20 = vunpack.c.l.bf16 %v1885_v9  ;;  %v2740_v23 = vunpack.c.l.bf16 %v1892_v10  ;;  %v1148_v24 = vunpack.i.h.s16 %v924_v11  ;;  %v1274_v26 = vpack.i.b16 %v1146_v12, %v1146_v12 }
  0x98   : > { %3567 = vrot.lane.b32.xlu1 %v3294_v13, %s9960_s28  ;;  %v3006_v21 = vcombine.low %v2737_v15, %v2738_v19  ;;  %v9508_v27 = vpack.i.b16 %v924_v11, %v924_v11  ;;  %v1632_v28 = vrot.slane %v9507_v18, %v10018_v8  ;;  %v1144_v29 = vunpack.i.h.s16 %v922_v1 }
  0x99   : > { %v3007_v30 = vcombine.low %v2739_v20, %v2740_v23  ;;  %v1276_v31 = vpack.i.b16 %v1148_v24, %v1148_v24  ;;  %v1636_v32 = vrot.slane %v1274_v26, %v10018_v8  ;;  %v9505_v33 = vpack.i.b16 %v915_v58, %v915_v58 }
  0x9a   : > { %v3014_v34 = vrot.slane %v3006_v21, %v10028_v14  ;;  %v1640_v35 = vrot.slane %v9508_v27, %v10018_v8  ;;  %v2370_v36 = vpack.i.b16 %v1632_v28, %v1632_v28  ;;  %v1270_v37 = vpack.i.b16 %v1142_v6, %v1142_v6 }
  0x9b   : > { %v3021_v38 = vrot.slane %v3007_v30, %v10028_v14  ;;  %v1644_v39 = vrot.slane %v1276_v31, %v10018_v8  ;;  %v2377_v40 = vpack.i.b16 %v1636_v32, %v1636_v32  ;;  %v9506_v41 = vpack.i.b16 %v922_v1, %v922_v1 }
  0x9c   : > { %v2375_v16 = vrot.slane %v2370_v36, %v10018_v8  ;;  %v2384_v42 = vpack.i.b16 %v1640_v35, %v1640_v35  ;;  %v1272_v43 = vpack.i.b16 %v1144_v29, %v1144_v29  ;;  %v1616_v17 = vrot.slane %v9505_v33, %v10018_v8 }
  0x9d   : > { %v3022_v25 = vcombine.low %v3014_v34, %v3021_v38  ;;  %v2382_v44 = vrot.slane %v2377_v40, %v10018_v8  ;;  %v2391_v45 = vpack.i.b16 %v1644_v39, %v1644_v39  ;;  %v1620_v46 = vrot.slane %v1270_v37, %v10018_v8 }
  0x9e   : > { %v2389_v47 = vrot.slane %v2384_v42, %v10018_v8  ;;  %v2809_v48 = vunpack.c.l.bf16 %v2375_v16  ;;  %v1624_v49 = vrot.slane %v9506_v41, %v10018_v8  ;;  %v1628_v50 = vrot.slane %v1272_v43, %v10018_v8 }
  0x9f   : > { %3535 = vrot.lane.b32.xlu0 %v3022_v25, %s9960_s28  ;;  %v2396_v51 = vrot.slane %v2391_v45, %v10018_v8  ;;  %v2810_v52 = vunpack.c.l.bf16 %v2382_v44  ;;  %v2342_v53 = vpack.i.b16 %v1616_v17, %v1616_v17  ;;  %v2349_v54 = vpack.i.b16 %v1620_v46, %v1620_v46 }
  0xa0   : > { %v2811_v55 = vunpack.c.l.bf16 %v2389_v47  ;;  %v2356_v56 = vpack.i.b16 %v1624_v49, %v1624_v49  ;;  %v2363_v57 = vpack.i.b16 %v1628_v50, %v1628_v50  ;;  %v932_v58 = vcombine.high %v9463_v22, %v9463_v22  ;;  %v9464_v50 = vld.sshfl [vmem:[%s10023_s27 + $0x2c] sm:$0x33 pattern:$0x75316420] }
  0xa1   : > { %v2812_v59 = vunpack.c.l.bf16 %v2396_v51  ;;  %v3312_v60 = vcombine.low %v2809_v48, %v2810_v52  ;;  %v2347_v61 = vrot.slane %v2342_v53, %v10018_v8  ;;  %v2354_v62 = vrot.slane %v2349_v54, %v10018_v8 }
  0xa2   : > { %v2361_v63 = vrot.slane %v2356_v56, %v10018_v8  ;;  %v2368_v0 = vrot.slane %v2363_v57, %v10018_v8  ;;  %v939_v1 = vrot.slane %v9463_v22, %v10016_v7  ;;  %v946_v2 = vrot.slane %v932_v58, %v10016_v7 }
  0xa3   : > { %v3313_v3 = vcombine.low %v2811_v55, %v2812_v59  ;;  %v3320_v4 = vrot.slane %v3312_v60, %v10028_v14  ;;  %v2805_v5 = vunpack.c.l.bf16 %v2347_v61  ;;  %v2806_v6 = vunpack.c.l.bf16 %v2354_v62 }
  0xa4   : > { %v2807_v9 = vunpack.c.l.bf16 %v2361_v63  ;;  %v2808_v10 = vunpack.c.l.bf16 %v2368_v0  ;;  %v947_v11 = vcombine.high %v939_v1, %v939_v1  ;;  %v948_v12 = vcombine.high %v946_v2, %v946_v2 }
  0xa5   : > { %v3327_v13 = vrot.slane %v3313_v3, %v10028_v14  ;;  %v3295_v15 = vcombine.low %v2805_v5, %v2806_v6  ;;  %v1150_v19 = vunpack.i.h.s16 %v939_v1  ;;  %v1152_v18 = vunpack.i.h.s16 %v946_v2 }
  0xa6   : > { %v3296_v20 = vcombine.low %v2807_v9, %v2808_v10  ;;  %v1154_v23 = vunpack.i.h.s16 %v947_v11  ;;  %v1156_v24 = vunpack.i.h.s16 %v948_v12  ;;  %v9511_v26 = vpack.i.b16 %v947_v11, %v947_v11 }
  0xa7   : > { %v3328_v21 = vcombine.low %v3320_v4, %v3327_v13  ;;  %v3303_v27 = vrot.slane %v3295_v15, %v10028_v14  ;;  %v9512_v28 = vpack.i.b16 %v948_v12, %v948_v12  ;;  %v9509_v29 = vpack.i.b16 %v939_v1, %v939_v1 }
  0xa8   : > { %v3310_v30 = vrot.slane %v3296_v20, %v10028_v14  ;;  %v1282_v31 = vpack.i.b16 %v1154_v23, %v1154_v23  ;;  %v1284_v32 = vpack.i.b16 %v1156_v24, %v1156_v24  ;;  %v1664_v33 = vrot.slane %v9511_v26, %v10018_v8 }
  0xa9   : > { %3571 = vrot.lane.b32.xlu1 %v3328_v21, %s9960_s28  ;;  %v1672_v34 = vrot.slane %v9512_v28, %v10018_v8  ;;  %v1278_v35 = vpack.i.b16 %v1150_v19, %v1150_v19  ;;  %v9510_v36 = vpack.i.b16 %v946_v2, %v946_v2  ;;  %v1280_v37 = vpack.i.b16 %v1152_v18, %v1152_v18 }
  0xaa   : > { %v3311_v38 = vcombine.low %v3303_v27, %v3310_v30  ;;  %v1668_v39 = vrot.slane %v1282_v31, %v10018_v8  ;;  %v1676_v40 = vrot.slane %v1284_v32, %v10018_v8  ;;  %v2426_v41 = vpack.i.b16 %v1664_v33, %v1664_v33 }
  0xab   : > { %v2440_v16 = vpack.i.b16 %v1672_v34, %v1672_v34  ;;  %v1648_v42 = vrot.slane %v9509_v29, %v10018_v8  ;;  %v1652_v43 = vrot.slane %v1278_v35, %v10018_v8  ;;  %v1656_v17 = vrot.slane %v9510_v36, %v10018_v8 }
  0xac   : > { %3569 = vrot.lane.b32.xlu0 %v3311_v38, %s9960_s28  ;;  %v2431_v25 = vrot.slane %v2426_v41, %v10018_v8  ;;  %v2433_v44 = vpack.i.b16 %v1668_v39, %v1668_v39  ;;  %v2447_v45 = vpack.i.b16 %v1676_v40, %v1676_v40  ;;  %v1660_v46 = vrot.slane %v1280_v37, %v10018_v8 }
  0xad   : > { %v2445_v22 = vrot.slane %v2440_v16, %v10018_v8  ;;  %v2398_v47 = vpack.i.b16 %v1648_v42, %v1648_v42  ;;  %v2405_v48 = vpack.i.b16 %v1652_v43, %v1652_v43  ;;  %v2412_v49 = vpack.i.b16 %v1656_v17, %v1656_v17 }
  0xae   : > { %v2438_v51 = vrot.slane %v2433_v44, %v10018_v8  ;;  %v2452_v52 = vrot.slane %v2447_v45, %v10018_v8  ;;  %v2817_v53 = vunpack.c.l.bf16 %v2431_v25  ;;  %v2419_v54 = vpack.i.b16 %v1660_v46, %v1660_v46 }
  0xaf   : > { %v2819_v55 = vunpack.c.l.bf16 %v2445_v22  ;;  %v2403_v56 = vrot.slane %v2398_v47, %v10018_v8  ;;  %v2410_v57 = vrot.slane %v2405_v48, %v10018_v8  ;;  %v2417_v58 = vrot.slane %v2412_v49, %v10018_v8 }
  0xb0   : > { %v2818_v59 = vunpack.c.l.bf16 %v2438_v51  ;;  %v2820_v60 = vunpack.c.l.bf16 %v2452_v52  ;;  %v2424_v61 = vrot.slane %v2419_v54, %v10018_v8  ;;  %v956_v62 = vcombine.high %v9464_v50, %v9464_v50 }
  0xb1   : > { %v2813_v63 = vunpack.c.l.bf16 %v2403_v56  ;;  %v2814_v0 = vunpack.c.l.bf16 %v2410_v57  ;;  %v2815_v1 = vunpack.c.l.bf16 %v2417_v58  ;;  %v963_v2 = vrot.slane %v9464_v50, %v10016_v7  ;;  %v9465_v50 = vld.sshfl [vmem:[%s10023_s27 + $0x30] sm:$0x33 pattern:$0x75316420] }
  0xb2   : > { %v3346_v3 = vcombine.low %v2817_v53, %v2818_v59  ;;  %v3347_v4 = vcombine.low %v2819_v55, %v2820_v60  ;;  %v2816_v5 = vunpack.c.l.bf16 %v2424_v61  ;;  %v970_v6 = vrot.slane %v956_v62, %v10016_v7  ;;  %v10344_v59 = vpop.permute.xlu1 %3537 }
  0xb3   : > { %v3329_v9 = vcombine.low %v2813_v63, %v2814_v0  ;;  %v971_v10 = vcombine.high %v963_v2, %v963_v2  ;;  %v1158_v11 = vunpack.i.h.s16 %v963_v2  ;;  %v9513_v12 = vpack.i.b16 %v963_v2, %v963_v2  ;;  %v10346_v0 = vpop.permute.xlu0 %3533 }
  0xb4   : > { %v3354_v13 = vrot.slane %v3346_v3, %v10028_v14  ;;  %v3361_v15 = vrot.slane %v3347_v4, %v10028_v14  ;;  %v3330_v19 = vcombine.low %v2815_v1, %v2816_v5  ;;  %v972_v18 = vcombine.high %v970_v6, %v970_v6 }
  0xb5   : > { %v3337_v20 = vrot.slane %v3329_v9, %v10028_v14  ;;  %v1162_v23 = vunpack.i.h.s16 %v971_v10  ;;  %v9515_v24 = vpack.i.b16 %v971_v10, %v971_v10  ;;  %v1160_v26 = vunpack.i.h.s16 %v970_v6 }
  0xb6   : > { %v3362_v21 = vcombine.low %v3354_v13, %v3361_v15  ;;  %v3344_v27 = vrot.slane %v3330_v19, %v10028_v14  ;;  %v1164_v28 = vunpack.i.h.s16 %v972_v18  ;;  %v9516_v29 = vpack.i.b16 %v972_v18, %v972_v18 }
  0xb7   : > { %v1290_v30 = vpack.i.b16 %v1162_v23, %v1162_v23  ;;  %v1696_v31 = vrot.slane %v9515_v24, %v10018_v8  ;;  %v1286_v32 = vpack.i.b16 %v1158_v11, %v1158_v11  ;;  %v9514_v33 = vpack.i.b16 %v970_v6, %v970_v6 }
  0xb8   : > { %3575 = vrot.lane.b32.xlu1 %v3362_v21, %s9960_s28  ;;  %v3345_v34 = vcombine.low %v3337_v20, %v3344_v27  ;;  %v1292_v35 = vpack.i.b16 %v1164_v28, %v1164_v28  ;;  %v1704_v36 = vrot.slane %v9516_v29, %v10018_v8  ;;  %v1288_v37 = vpack.i.b16 %v1160_v26, %v1160_v26  ;;  %v10354_v27 = vpop.permute.xlu1 %3539 }
  0xb9   : > { %v1700_v38 = vrot.slane %v1290_v30, %v10018_v8  ;;  %v2482_v39 = vpack.i.b16 %v1696_v31, %v1696_v31  ;;  %v1680_v40 = vrot.slane %v9513_v12, %v10018_v8  ;;  %v1684_v41 = vrot.slane %v1286_v32, %v10018_v8  ;;  %v10356_v32 = vpop.permute.xlu0 %3541 }
  0xba   : > { %3573 = vrot.lane.b32.xlu0 %v3345_v34, %s9960_s28  ;;  %v1708_v16 = vrot.slane %v1292_v35, %v10018_v8  ;;  %v2496_v42 = vpack.i.b16 %v1704_v36, %v1704_v36  ;;  %v1688_v43 = vrot.slane %v9514_v33, %v10018_v8  ;;  %v1692_v17 = vrot.slane %v1288_v37, %v10018_v8 }
  0xbb   : > { %v2487_v25 = vrot.slane %v2482_v39, %v10018_v8  ;;  %v2489_v44 = vpack.i.b16 %v1700_v38, %v1700_v38  ;;  %v2454_v45 = vpack.i.b16 %v1680_v40, %v1680_v40  ;;  %v2461_v46 = vpack.i.b16 %v1684_v41, %v1684_v41 }
  0xbc   : > { %v2501_v22 = vrot.slane %v2496_v42, %v10018_v8  ;;  %v2503_v47 = vpack.i.b16 %v1708_v16, %v1708_v16  ;;  %v2468_v48 = vpack.i.b16 %v1688_v43, %v1688_v43  ;;  %v2475_v49 = vpack.i.b16 %v1692_v17, %v1692_v17 }
  0xbd   : > { %v2494_v51 = vrot.slane %v2489_v44, %v10018_v8  ;;  %v2825_v52 = vunpack.c.l.bf16 %v2487_v25  ;;  %v2459_v53 = vrot.slane %v2454_v45, %v10018_v8  ;;  %v2466_v54 = vrot.slane %v2461_v46, %v10018_v8 }
  0xbe   : > { %v2508_v55 = vrot.slane %v2503_v47, %v10018_v8  ;;  %v2827_v56 = vunpack.c.l.bf16 %v2501_v22  ;;  %v2473_v57 = vrot.slane %v2468_v48, %v10018_v8  ;;  %v2480_v58 = vrot.slane %v2475_v49, %v10018_v8  ;;  %v10377_v48 = vpop.permute.xlu1 %3543 }
  0xbf   : > { %v2826_v60 = vunpack.c.l.bf16 %v2494_v51  ;;  %v2821_v61 = vunpack.c.l.bf16 %v2459_v53  ;;  %v2822_v62 = vunpack.c.l.bf16 %v2466_v54  ;;  %v980_v63 = vcombine.high %v9465_v50, %v9465_v50  ;;  %v10381_v53 = vld [vmem:[%s10375_s8 + $0x10] sm:$0xff]   ;;  %v10383_v54 = vpop.permute.xlu0 %3545 }
  0xc0   : > { %v2828_v1 = vunpack.c.l.bf16 %v2508_v55  ;;  %v2823_v2 = vunpack.c.l.bf16 %v2473_v57  ;;  %v2824_v3 = vunpack.c.l.bf16 %v2480_v58  ;;  %v987_v4 = vrot.slane %v9465_v50, %v10016_v7 }
  0xc1   : > { %v3380_v5 = vcombine.low %v2825_v52, %v2826_v60  ;;  %v3363_v6 = vcombine.low %v2821_v61, %v2822_v62  ;;  %v994_v9 = vrot.slane %v980_v63, %v10016_v7  ;;  %v10388_v60 = vld [vmem:[%s10375_s8 + $0x18] sm:$0xff]  }
  0xc2   : > { %v3381_v10 = vcombine.low %v2827_v56, %v2828_v1  ;;  %v3364_v11 = vcombine.low %v2823_v2, %v2824_v3  ;;  %v995_v12 = vcombine.high %v987_v4, %v987_v4  ;;  %v1166_v13 = vunpack.i.h.s16 %v987_v4  ;;  %v10394_v2 = vld [vmem:[%s10375_s8] sm:$0xff]   ;;  %v10397_v3 = vld [vmem:[%s10375_s8 + $0x8] sm:$0xff]  }
  0xc3   : > { %v3388_v15 = vrot.slane %v3380_v5, %v10028_v14  ;;  %v3371_v19 = vrot.slane %v3363_v6, %v10028_v14  ;;  %v996_v18 = vcombine.high %v994_v9, %v994_v9  ;;  %v1168_v20 = vunpack.i.h.s16 %v994_v9 }
  0xc4   : > { %v3395_v23 = vrot.slane %v3381_v10, %v10028_v14  ;;  %v3378_v24 = vrot.slane %v3364_v11, %v10028_v14  ;;  %v1170_v26 = vunpack.i.h.s16 %v995_v12  ;;  %v9519_v21 = vpack.i.b16 %v995_v12, %v995_v12 }
  0xc5   : > { %v1172_v28 = vunpack.i.h.s16 %v996_v18  ;;  %v9520_v29 = vpack.i.b16 %v996_v18, %v996_v18  ;;  %v9517_v30 = vpack.i.b16 %v987_v4, %v987_v4  ;;  %v1294_v31 = vpack.i.b16 %v1166_v13, %v1166_v13 }
  0xc6   : > { %v3396_v33 = vcombine.low %v3388_v15, %v3395_v23  ;;  %v3379_v34 = vcombine.low %v3371_v19, %v3378_v24  ;;  %v1298_v35 = vpack.i.b16 %v1170_v26, %v1170_v26  ;;  %v1728_v36 = vrot.slane %v9519_v21, %v10018_v8  ;;  %v10408_v23 = vld [vmem:[%s10375_s8 + $0x20] sm:$0xff]   ;;  %v10411_v24 = vld [vmem:[%s10375_s8 + $0x28] sm:$0xff]   ;;  %v10413_v26 = vpop.permute.xlu1 %3547 }
  0xc7   : > { %v1300_v37 = vpack.i.b16 %v1172_v28, %v1172_v28  ;;  %v1736_v38 = vrot.slane %v9520_v29, %v10018_v8  ;;  %v9518_v39 = vpack.i.b16 %v994_v9, %v994_v9  ;;  %v1296_v40 = vpack.i.b16 %v1168_v20, %v1168_v20  ;;  %v10423_v29 = vld [vmem:[%s10375_s8 + $0x30] sm:$0xff]  }
  0xc8   : > { %3579 = vrot.lane.b32.xlu1 %v3396_v33, %s9960_s28  ;;  %3577 = vrot.lane.b32.xlu0 %v3379_v34, %s9960_s28  ;;  %v1732_v41 = vrot.slane %v1298_v35, %v10018_v8  ;;  %v2538_v16 = vpack.i.b16 %v1728_v36, %v1728_v36  ;;  %v1712_v42 = vrot.slane %v9517_v30, %v10018_v8  ;;  %v9760_v9 = vunpack.c.l.bf16 %v10381_v53  ;;  %v10425_v30 = vpop.permute.xlu0 %3549 }
  0xc9   : > { %v1740_v43 = vrot.slane %v1300_v37, %v10018_v8  ;;  %v2552_v17 = vpack.i.b16 %v1736_v38, %v1736_v38  ;;  %v1716_v25 = vrot.slane %v1294_v31, %v10018_v8  ;;  %v1720_v44 = vrot.slane %v9518_v39, %v10018_v8 }
  0xca   : > { %v2543_v45 = vrot.slane %v2538_v16, %v10018_v8  ;;  %v2545_v46 = vpack.i.b16 %v1732_v41, %v1732_v41  ;;  %v1724_v22 = vrot.slane %v1296_v40, %v10018_v8  ;;  %v2510_v47 = vpack.i.b16 %v1712_v42, %v1712_v42  ;;  %593 = vst.msk [vmem:[#allocation2 + $0x49] sm:$0xff] %vm588_vm0, %v9760_v9  ;;  %v9885_v41 = vld [vmem:[%s10375_s8 + $0x40] sm:$0xff]   ;;  %v9886_v16 = vld [vmem:[%s10375_s8 + $0x48] sm:$0xff]  }
  0xcb   : > { %v2557_v49 = vrot.slane %v2552_v17, %v10018_v8  ;;  %v2559_v50 = vpack.i.b16 %v1740_v43, %v1740_v43  ;;  %v2517_v51 = vpack.i.b16 %v1716_v25, %v1716_v25  ;;  %v2524_v52 = vpack.i.b16 %v1720_v44, %v1720_v44  ;;  %3634 = vst.msk [vmem:[#allocation2 + $0x49] sm:$0xff] %vm3629_vm1, %v10344_v59  ;;  %v9887_v25 = vld [vmem:[%s10375_s8 + $0x50] sm:$0xff]   ;;  %v10719_v44 = vld [vmem:[%s10375_s8 + $0x58] sm:$0xff]  }
  0xcc   : > { %v2550_v55 = vrot.slane %v2545_v46, %v10018_v8  ;;  %v2833_v56 = vunpack.c.l.bf16 %v2543_v45  ;;  %v2515_v57 = vrot.slane %v2510_v47, %v10018_v8  ;;  %v2531_v58 = vpack.i.b16 %v1724_v22, %v1724_v22 }
  0xcd   : > { %v2564_v61 = vrot.slane %v2559_v50, %v10018_v8  ;;  %v2835_v62 = vunpack.c.l.bf16 %v2557_v49  ;;  %v2522_v63 = vrot.slane %v2517_v51, %v10018_v8  ;;  %v2529_v1 = vrot.slane %v2524_v52, %v10018_v8  ;;  %v10732_v49 = vld [vmem:[%s10375_s8 + $0x60] sm:$0xff]   ;;  %v10735_v50 = vld [vmem:[%s10375_s8 + $0x68] sm:$0xff]   ;;  %v9466_v51 = vld.sshfl [vmem:[%s10023_s27 + $0x34] sm:$0x33 pattern:$0x75316420] }
  0xce   : > { %v2834_v4 = vunpack.c.l.bf16 %v2550_v55  ;;  %v2536_v5 = vrot.slane %v2531_v58, %v10018_v8  ;;  %v2829_v6 = vunpack.c.l.bf16 %v2515_v57  ;;  %v9764_v13 = vunpack.c.l.bf16 %v10388_v60  ;;  %v10746_v57 = vld [vmem:[%s10375_s8 + $0x70] sm:$0xff]  }
  0xcf   : > { %v2836_v10 = vunpack.c.l.bf16 %v2564_v61  ;;  %v2830_v11 = vunpack.c.l.bf16 %v2522_v63  ;;  %v2831_v12 = vunpack.c.l.bf16 %v2529_v1  ;;  %v9752_v18 = vunpack.c.l.bf16 %v10394_v2  ;;  %v3552_v55 = vpop.permute.xlu1 %3551  ;;  %v10760_v63 = vld [vmem:[%s10375_s8 + $0x78] sm:$0xff]  }
  0xd0   : > { %v10402_v15 = vcombine.low %v2833_v56, %v2834_v4  ;;  %v2832_v19 = vunpack.c.l.bf16 %v2536_v5  ;;  %v9756_v20 = vunpack.c.l.bf16 %v10397_v3  ;;  %595 = vst.msk [vmem:[#allocation2 + $0x61] sm:$0xff] %vm588_vm0, %v9764_v13  ;;  %v9961_v34 = vmov 0.0   ;;  %v9467_v1 = vld.sshfl [vmem:[%s10023_s27 + $0x38] sm:$0x33 pattern:$0x75316420] }
  0xd1   : > { %v10415_v21 = vcombine.low %v2835_v62, %v2836_v10  ;;  %v10417_v28 = vcombine.low %v2829_v6, %v2830_v11  ;;  %3636 = vst.msk [vmem:[#allocation2 + $0x61] sm:$0xff] %vm3629_vm1, %v10344_v59  ;;  %v9761_v35 = vunpack.c.h.bf16 %v10381_v53  ;;  %v9765_v36 = vunpack.c.h.bf16 %v10388_v60  ;;  %v9884_v59 = vld [vmem:[%s10375_s8 + $0x38] sm:$0xff]  }
  0xd2   : > { %v3422_v31 = vrot.slane %v10402_v15, %v10028_v14  ;;  %v10429_v33 = vcombine.low %v2831_v12, %v2832_v19  ;;  %589 = vst.msk [vmem:[#allocation2 + $0x19] sm:$0xff] %vm588_vm0, %v9752_v18  ;;  %591 = vst.msk [vmem:[#allocation2 + $0x31] sm:$0xff] %vm588_vm0, %v9756_v20  ;;  %v9768_v39 = vunpack.c.l.bf16 %v10408_v23  ;;  %v9772_v40 = vunpack.c.l.bf16 %v10411_v24 }
  0xd3   : > { %341 = vst.msk [vmem:[#allocation2 + $0x59] sm:$0x1] %vm301_vm2, %v9961_v34  ;;  %342 = vst.msk [vmem:[#allocation2 + $0x71] sm:$0x1] %vm301_vm2, %v9961_v34  ;;  %v3429_v37 = vrot.slane %v10415_v21, %v10028_v14  ;;  %v3405_v38 = vrot.slane %v10417_v28, %v10028_v14  ;;  %v9773_v43 = vunpack.c.h.bf16 %v10411_v24  ;;  %v9776_v17 = vunpack.c.l.bf16 %v10423_v29 }
  0xd4   : > { %303 = vst.msk [vmem:[#allocation2 + $0x18] sm:$0x1] %vm301_vm2, %v9961_v34  ;;  %304 = vst.msk [vmem:[#allocation2 + $0x30] sm:$0x1] %vm301_vm2, %v9961_v34  ;;  %v3412_v42 = vrot.slane %v10429_v33, %v10028_v14  ;;  %v9780_v46 = vunpack.c.l.bf16 %v9884_v59  ;;  %v9777_v22 = vunpack.c.h.bf16 %v10423_v29  ;;  %v9781_v47 = vunpack.c.h.bf16 %v9884_v59 }
  0xd5   : > { %305 = vst.msk [vmem:[#allocation2 + $0x48] sm:$0x1] %vm301_vm2, %v9961_v34  ;;  %306 = vst.msk [vmem:[#allocation2 + $0x60] sm:$0x1] %vm301_vm2, %v9961_v34  ;;  %v3430_v45 = vcombine.low %v3422_v31, %v3429_v37  ;;  %v9788_v53 = vunpack.c.l.bf16 %v9886_v16  ;;  %v9785_v56 = vunpack.c.h.bf16 %v9885_v41  ;;  %v9792_v60 = vunpack.c.l.bf16 %v9887_v25 }
  0xd6   : > { %307 = vst.msk [vmem:[#allocation2 + $0x78] sm:$0x1] %vm301_vm2, %v9961_v34  ;;  %308 = vst.msk [vmem:[#allocation2 + $0x90] sm:$0x1] %vm301_vm2, %v9961_v34  ;;  %v3413_v52 = vcombine.low %v3405_v38, %v3412_v42  ;;  %v9796_v61 = vunpack.c.l.bf16 %v10719_v44  ;;  %v9793_v62 = vunpack.c.h.bf16 %v9887_v25  ;;  %v9800_v4 = vunpack.c.l.bf16 %v10732_v49 }
  0xd7   : > { %309 = vst.msk [vmem:[#allocation2 + $0xa8] sm:$0x1] %vm301_vm2, %v9961_v34  ;;  %310 = vst.msk [vmem:[#allocation2 + $0xc0] sm:$0x1] %vm301_vm2, %v9961_v34  ;;  %3583 = vrot.lane.b32.xlu1 %v3430_v45, %s9960_s28  ;;  %v3554_v58 = vpop.permute.xlu0 %3553  ;;  %v9804_v5 = vunpack.c.l.bf16 %v10735_v50  ;;  %v1004_v6 = vcombine.high %v9466_v51, %v9466_v51  ;;  %v9801_v9 = vunpack.c.h.bf16 %v10732_v49  ;;  %v9805_v10 = vunpack.c.h.bf16 %v10735_v50 }
  0xd8   : > { %311 = vst.msk [vmem:[#allocation2 + $0xd8] sm:$0x1] %vm301_vm2, %v9961_v34  ;;  %312 = vst.msk [vmem:[#allocation2 + $0xf0] sm:$0x1] %vm301_vm2, %v9961_v34  ;;  %3581 = vrot.lane.b32.xlu0 %v3413_v52, %s9960_s28  ;;  %v9808_v11 = vunpack.c.l.bf16 %v10746_v57  ;;  %v9812_v13 = vunpack.c.l.bf16 %v10760_v63  ;;  %v1028_v15 = vcombine.high %v9467_v1, %v9467_v1  ;;  %v10798_v19 = vrot.slane %v9467_v1, %v10016_v7 }
  0xd9   : > { %313 = vst.msk [vmem:[#allocation2 + $0x108] sm:$0x1] %vm301_vm2, %v9961_v34  ;;  %314 = vst.msk [vmem:[#allocation2 + $0x120] sm:$0x1] %vm301_vm2, %v9961_v34  ;;  %v1018_v12 = vrot.slane %v1004_v6, %v10016_v7  ;;  %v9809_v24 = vunpack.c.h.bf16 %v10746_v57 }
  0xda   : > { %315 = vst.msk [vmem:[#allocation2 + $0x138] sm:$0x1] %vm301_vm2, %v9961_v34  ;;  %316 = vst.msk [vmem:[#allocation2 + $0x150] sm:$0x1] %vm301_vm2, %v9961_v34  ;;  %v10812_v33 = vrot.slane %v1028_v15, %v10016_v7 }
  0xdb   : > { %317 = vst.msk [vmem:[#allocation2 + $0x168] sm:$0x1] %vm301_vm2, %v9961_v34  ;;  %318 = vst.msk [vmem:[#allocation2 + $0x180] sm:$0x1] %vm301_vm2, %v9961_v34  ;;  %v1176_v29 = vunpack.i.h.s16 %v1018_v12  ;;  %v1020_v31 = vcombine.high %v1018_v12, %v1018_v12 }
  0xdc   : > { %321 = vst.msk [vmem:[#allocation2 + $0x1c8] sm:$0x1] %vm301_vm2, %v9961_v34  ;;  %322 = vst.msk [vmem:[#allocation2 + $0x1e0] sm:$0x1] %vm301_vm2, %v9961_v34 }
  0xdd   : > { %323 = vst.msk [vmem:[#allocation2 + $0x1f8] sm:$0x1] %vm301_vm2, %v9961_v34  ;;  %324 = vst.msk [vmem:[#allocation2 + $0x210] sm:$0x1] %vm301_vm2, %v9961_v34  ;;  %v3556_v59 = vpop.permute.xlu1 %3555 }
  0xde   : > { %325 = vst.msk [vmem:[#allocation2 + $0x228] sm:$0x1] %vm301_vm2, %v9961_v34  ;;  %326 = vst.msk [vmem:[#allocation2 + $0x240] sm:$0x1] %vm301_vm2, %v9961_v34 }
  0xdf   : > { %327 = vst.msk [vmem:[#allocation2 + $0x258] sm:$0x1] %vm301_vm2, %v9961_v34  ;;  %328 = vst.msk [vmem:[#allocation2 + $0x270] sm:$0x1] %vm301_vm2, %v9961_v34 }
  0xe0   : > { %329 = vst.msk [vmem:[#allocation2 + $0x288] sm:$0x1] %vm301_vm2, %v9961_v34  ;;  %330 = vst.msk [vmem:[#allocation2 + $0x2a0] sm:$0x1] %vm301_vm2, %v9961_v34 }
  0xe1   : > { %331 = vst.msk [vmem:[#allocation2 + $0x2b8] sm:$0x1] %vm301_vm2, %v9961_v34  ;;  %332 = vst.msk [vmem:[#allocation2 + $0x2d0] sm:$0x1] %vm301_vm2, %v9961_v34 }
  0xe2   : > { %333 = vst.msk [vmem:[#allocation2 + $0x2e8] sm:$0x1] %vm301_vm2, %v9961_v34  ;;  %334 = vst.msk [vmem:[#allocation2 + $0x300] sm:$0x1] %vm301_vm2, %v9961_v34 }
  0xe3   : > { %335 = vst.msk [vmem:[#allocation2 + $0x318] sm:$0x1] %vm301_vm2, %v9961_v34  ;;  %336 = vst.msk [vmem:[#allocation2 + $0x330] sm:$0x1] %vm301_vm2, %v9961_v34 }
  0xe4   : > { %339 = vst.msk [vmem:[#allocation2 + $0x29] sm:$0x1] %vm301_vm2, %v9961_v34  ;;  %340 = vst.msk [vmem:[#allocation2 + $0x41] sm:$0x1] %vm301_vm2, %v9961_v34 }
  0xe5   : > { %343 = vst.msk [vmem:[#allocation2 + $0x89] sm:$0x1] %vm301_vm2, %v9961_v34  ;;  %344 = vst.msk [vmem:[#allocation2 + $0xa1] sm:$0x1] %vm301_vm2, %v9961_v34 }
  0xe6   : > { %345 = vst.msk [vmem:[#allocation2 + $0xb9] sm:$0x1] %vm301_vm2, %v9961_v34  ;;  %346 = vst.msk [vmem:[#allocation2 + $0xd1] sm:$0x1] %vm301_vm2, %v9961_v34 }
  0xe7   : > { %347 = vst.msk [vmem:[#allocation2 + $0xe9] sm:$0x1] %vm301_vm2, %v9961_v34  ;;  %348 = vst.msk [vmem:[#allocation2 + $0x101] sm:$0x1] %vm301_vm2, %v9961_v34 }
  0xe8   : > { %349 = vst.msk [vmem:[#allocation2 + $0x119] sm:$0x1] %vm301_vm2, %v9961_v34  ;;  %350 = vst.msk [vmem:[#allocation2 + $0x131] sm:$0x1] %vm301_vm2, %v9961_v34 }
  0xe9   : > { %351 = vst.msk [vmem:[#allocation2 + $0x149] sm:$0x1] %vm301_vm2, %v9961_v34  ;;  %352 = vst.msk [vmem:[#allocation2 + $0x161] sm:$0x1] %vm301_vm2, %v9961_v34 }
  0xea   : > { %353 = vst.msk [vmem:[#allocation2 + $0x179] sm:$0x1] %vm301_vm2, %v9961_v34  ;;  %354 = vst.msk [vmem:[#allocation2 + $0x191] sm:$0x1] %vm301_vm2, %v9961_v34 }
  0xeb   : > { %357 = vst.msk [vmem:[#allocation2 + $0x1d9] sm:$0x1] %vm301_vm2, %v9961_v34  ;;  %358 = vst.msk [vmem:[#allocation2 + $0x1f1] sm:$0x1] %vm301_vm2, %v9961_v34 }
  0xec   : > { %359 = vst.msk [vmem:[#allocation2 + $0x209] sm:$0x1] %vm301_vm2, %v9961_v34  ;;  %360 = vst.msk [vmem:[#allocation2 + $0x221] sm:$0x1] %vm301_vm2, %v9961_v34 }
  0xed   : > { %361 = vst.msk [vmem:[#allocation2 + $0x239] sm:$0x1] %vm301_vm2, %v9961_v34  ;;  %362 = vst.msk [vmem:[#allocation2 + $0x251] sm:$0x1] %vm301_vm2, %v9961_v34 }
  0xee   : > { %363 = vst.msk [vmem:[#allocation2 + $0x269] sm:$0x1] %vm301_vm2, %v9961_v34  ;;  %364 = vst.msk [vmem:[#allocation2 + $0x281] sm:$0x1] %vm301_vm2, %v9961_v34 }
  0xef   : > { %365 = vst.msk [vmem:[#allocation2 + $0x299] sm:$0x1] %vm301_vm2, %v9961_v34  ;;  %366 = vst.msk [vmem:[#allocation2 + $0x2b1] sm:$0x1] %vm301_vm2, %v9961_v34 }
  0xf0   : > { %367 = vst.msk [vmem:[#allocation2 + $0x2c9] sm:$0x1] %vm301_vm2, %v9961_v34  ;;  %368 = vst.msk [vmem:[#allocation2 + $0x2e1] sm:$0x1] %vm301_vm2, %v9961_v34 }
  0xf1   : > { %369 = vst.msk [vmem:[#allocation2 + $0x2f9] sm:$0x1] %vm301_vm2, %v9961_v34  ;;  %370 = vst.msk [vmem:[#allocation2 + $0x311] sm:$0x1] %vm301_vm2, %v9961_v34 }
  0xf2   : > { %371 = vst.msk [vmem:[#allocation2 + $0x329] sm:$0x1] %vm301_vm2, %v9961_v34  ;;  %372 = vst.msk [vmem:[#allocation2 + $0x341] sm:$0x1] %vm301_vm2, %v9961_v34 }
  0xf3   : > { %388 = vst.msk [vmem:[#allocation3 + $0x18] sm:$0x1] %vm301_vm2, %v9961_v34  ;;  %389 = vst.msk [vmem:[#allocation3 + $0x30] sm:$0x1] %vm301_vm2, %v9961_v34 }
  0xf4   : > { %390 = vst.msk [vmem:[#allocation3 + $0x48] sm:$0x1] %vm301_vm2, %v9961_v34  ;;  %391 = vst.msk [vmem:[#allocation3 + $0x60] sm:$0x1] %vm301_vm2, %v9961_v34 }
  0xf5   : > { %392 = vst.msk [vmem:[#allocation3 + $0x78] sm:$0x1] %vm301_vm2, %v9961_v34  ;;  %393 = vst.msk [vmem:[#allocation3 + $0x90] sm:$0x1] %vm301_vm2, %v9961_v34 }
  0xf6   : > { %394 = vst.msk [vmem:[#allocation3 + $0xa8] sm:$0x1] %vm301_vm2, %v9961_v34  ;;  %395 = vst.msk [vmem:[#allocation3 + $0xc0] sm:$0x1] %vm301_vm2, %v9961_v34 }
  0xf7   : > { %396 = vst.msk [vmem:[#allocation3 + $0xd8] sm:$0x1] %vm301_vm2, %v9961_v34  ;;  %397 = vst.msk [vmem:[#allocation3 + $0xf0] sm:$0x1] %vm301_vm2, %v9961_v34 }
  0xf8   : > { %398 = vst.msk [vmem:[#allocation3 + $0x108] sm:$0x1] %vm301_vm2, %v9961_v34  ;;  %399 = vst.msk [vmem:[#allocation3 + $0x120] sm:$0x1] %vm301_vm2, %v9961_v34 }
  0xf9   : > { %400 = vst.msk [vmem:[#allocation3 + $0x138] sm:$0x1] %vm301_vm2, %v9961_v34  ;;  %401 = vst.msk [vmem:[#allocation3 + $0x150] sm:$0x1] %vm301_vm2, %v9961_v34 }
  0xfa   : > { %402 = vst.msk [vmem:[#allocation3 + $0x168] sm:$0x1] %vm301_vm2, %v9961_v34  ;;  %403 = vst.msk [vmem:[#allocation3 + $0x180] sm:$0x1] %vm301_vm2, %v9961_v34 }
  0xfb   : > { %406 = vst.msk [vmem:[#allocation3 + $0x1c8] sm:$0x1] %vm301_vm2, %v9961_v34  ;;  %407 = vst.msk [vmem:[#allocation3 + $0x1e0] sm:$0x1] %vm301_vm2, %v9961_v34 }
  0xfc   : > { %408 = vst.msk [vmem:[#allocation3 + $0x1f8] sm:$0x1] %vm301_vm2, %v9961_v34  ;;  %409 = vst.msk [vmem:[#allocation3 + $0x210] sm:$0x1] %vm301_vm2, %v9961_v34 }
  0xfd   : > { %410 = vst.msk [vmem:[#allocation3 + $0x228] sm:$0x1] %vm301_vm2, %v9961_v34  ;;  %411 = vst.msk [vmem:[#allocation3 + $0x240] sm:$0x1] %vm301_vm2, %v9961_v34 }
  0xfe   : > { %412 = vst.msk [vmem:[#allocation3 + $0x258] sm:$0x1] %vm301_vm2, %v9961_v34  ;;  %413 = vst.msk [vmem:[#allocation3 + $0x270] sm:$0x1] %vm301_vm2, %v9961_v34 }
  0xff   : > { %414 = vst.msk [vmem:[#allocation3 + $0x288] sm:$0x1] %vm301_vm2, %v9961_v34  ;;  %415 = vst.msk [vmem:[#allocation3 + $0x2a0] sm:$0x1] %vm301_vm2, %v9961_v34 }
 0x100   : > { %416 = vst.msk [vmem:[#allocation3 + $0x2b8] sm:$0x1] %vm301_vm2, %v9961_v34  ;;  %417 = vst.msk [vmem:[#allocation3 + $0x2d0] sm:$0x1] %vm301_vm2, %v9961_v34 }
 0x101   : > { %418 = vst.msk [vmem:[#allocation3 + $0x2e8] sm:$0x1] %vm301_vm2, %v9961_v34  ;;  %419 = vst.msk [vmem:[#allocation3 + $0x300] sm:$0x1] %vm301_vm2, %v9961_v34 }
 0x102   : > { %420 = vst.msk [vmem:[#allocation3 + $0x318] sm:$0x1] %vm301_vm2, %v9961_v34  ;;  %421 = vst.msk [vmem:[#allocation3 + $0x330] sm:$0x1] %vm301_vm2, %v9961_v34 }
 0x103   : > { %424 = vst.msk [vmem:[#allocation3 + $0x29] sm:$0x1] %vm301_vm2, %v9961_v34  ;;  %425 = vst.msk [vmem:[#allocation3 + $0x41] sm:$0x1] %vm301_vm2, %v9961_v34 }
 0x104   : > { %426 = vst.msk [vmem:[#allocation3 + $0x59] sm:$0x1] %vm301_vm2, %v9961_v34  ;;  %427 = vst.msk [vmem:[#allocation3 + $0x71] sm:$0x1] %vm301_vm2, %v9961_v34 }
 0x105   : > { %428 = vst.msk [vmem:[#allocation3 + $0x89] sm:$0x1] %vm301_vm2, %v9961_v34  ;;  %429 = vst.msk [vmem:[#allocation3 + $0xa1] sm:$0x1] %vm301_vm2, %v9961_v34 }
 0x106   : > { %430 = vst.msk [vmem:[#allocation3 + $0xb9] sm:$0x1] %vm301_vm2, %v9961_v34  ;;  %431 = vst.msk [vmem:[#allocation3 + $0xd1] sm:$0x1] %vm301_vm2, %v9961_v34 }
 0x107   : > { %432 = vst.msk [vmem:[#allocation3 + $0xe9] sm:$0x1] %vm301_vm2, %v9961_v34  ;;  %433 = vst.msk [vmem:[#allocation3 + $0x101] sm:$0x1] %vm301_vm2, %v9961_v34 }
 0x108   : > { %434 = vst.msk [vmem:[#allocation3 + $0x119] sm:$0x1] %vm301_vm2, %v9961_v34  ;;  %435 = vst.msk [vmem:[#allocation3 + $0x131] sm:$0x1] %vm301_vm2, %v9961_v34 }
 0x109   : > { %436 = vst.msk [vmem:[#allocation3 + $0x149] sm:$0x1] %vm301_vm2, %v9961_v34  ;;  %437 = vst.msk [vmem:[#allocation3 + $0x161] sm:$0x1] %vm301_vm2, %v9961_v34 }
 0x10a   : > { %438 = vst.msk [vmem:[#allocation3 + $0x179] sm:$0x1] %vm301_vm2, %v9961_v34  ;;  %439 = vst.msk [vmem:[#allocation3 + $0x191] sm:$0x1] %vm301_vm2, %v9961_v34 }
 0x10b   : > { %442 = vst.msk [vmem:[#allocation3 + $0x1d9] sm:$0x1] %vm301_vm2, %v9961_v34  ;;  %443 = vst.msk [vmem:[#allocation3 + $0x1f1] sm:$0x1] %vm301_vm2, %v9961_v34 }
 0x10c   : > { %444 = vst.msk [vmem:[#allocation3 + $0x209] sm:$0x1] %vm301_vm2, %v9961_v34  ;;  %445 = vst.msk [vmem:[#allocation3 + $0x221] sm:$0x1] %vm301_vm2, %v9961_v34 }
 0x10d   : > { %446 = vst.msk [vmem:[#allocation3 + $0x239] sm:$0x1] %vm301_vm2, %v9961_v34  ;;  %447 = vst.msk [vmem:[#allocation3 + $0x251] sm:$0x1] %vm301_vm2, %v9961_v34 }
 0x10e   : > { %448 = vst.msk [vmem:[#allocation3 + $0x269] sm:$0x1] %vm301_vm2, %v9961_v34  ;;  %449 = vst.msk [vmem:[#allocation3 + $0x281] sm:$0x1] %vm301_vm2, %v9961_v34 }
 0x10f   : > { %450 = vst.msk [vmem:[#allocation3 + $0x299] sm:$0x1] %vm301_vm2, %v9961_v34  ;;  %451 = vst.msk [vmem:[#allocation3 + $0x2b1] sm:$0x1] %vm301_vm2, %v9961_v34 }
 0x110   : > { %452 = vst.msk [vmem:[#allocation3 + $0x2c9] sm:$0x1] %vm301_vm2, %v9961_v34  ;;  %453 = vst.msk [vmem:[#allocation3 + $0x2e1] sm:$0x1] %vm301_vm2, %v9961_v34 }
 0x111   : > { %454 = vst.msk [vmem:[#allocation3 + $0x2f9] sm:$0x1] %vm301_vm2, %v9961_v34  ;;  %455 = vst.msk [vmem:[#allocation3 + $0x311] sm:$0x1] %vm301_vm2, %v9961_v34 }
 0x112   : > { %456 = vst.msk [vmem:[#allocation3 + $0x329] sm:$0x1] %vm301_vm2, %v9961_v34  ;;  %457 = vst.msk [vmem:[#allocation3 + $0x341] sm:$0x1] %vm301_vm2, %v9961_v34 }
 0x113   : > { %3630 = vst.msk [vmem:[#allocation2 + $0x19] sm:$0xff] %vm3629_vm1, %v10346_v0  ;;  %3632 = vst.msk [vmem:[#allocation2 + $0x31] sm:$0xff] %vm3629_vm1, %v10346_v0  ;;  %v9769_v0 = vunpack.c.h.bf16 %v10408_v23 }
 0x114   : > { %594 = vst.msk [vmem:[#allocation2 + $0x51] sm:$0xff] %vm588_vm0, %v9761_v35  ;;  %596 = vst.msk [vmem:[#allocation2 + $0x69] sm:$0xff] %vm588_vm0, %v9765_v36 }
 0x115   : > { %3635 = vst.msk [vmem:[#allocation2 + $0x51] sm:$0xff] %vm3629_vm1, %v10354_v27  ;;  %3637 = vst.msk [vmem:[#allocation2 + $0x69] sm:$0xff] %vm3629_vm1, %v10354_v27  ;;  %v9784_v27 = vunpack.c.l.bf16 %v9885_v41 }
 0x116   : > { %597 = vst.msk [vmem:[#allocation2 + $0x79] sm:$0xff] %vm588_vm0, %v9768_v39  ;;  %599 = vst.msk [vmem:[#allocation2 + $0x91] sm:$0xff] %vm588_vm0, %v9772_v40 }
 0x117   : > { %3638 = vst.msk [vmem:[#allocation2 + $0x79] sm:$0xff] %vm3629_vm1, %v10356_v32  ;;  %3640 = vst.msk [vmem:[#allocation2 + $0x91] sm:$0xff] %vm3629_vm1, %v10356_v32  ;;  %v9789_v32 = vunpack.c.h.bf16 %v9886_v16 }
 0x118   : > { %598 = vst.msk [vmem:[#allocation2 + $0x81] sm:$0xff] %vm588_vm0, %v9769_v0  ;;  %600 = vst.msk [vmem:[#allocation2 + $0x99] sm:$0xff] %vm588_vm0, %v9773_v43  ;;  %v1304_v0 = vpack.i.b16 %v1176_v29, %v1176_v29 }
 0x119   : > { %601 = vst.msk [vmem:[#allocation2 + $0xa9] sm:$0xff] %vm588_vm0, %v9776_v17  ;;  %603 = vst.msk [vmem:[#allocation2 + $0xc1] sm:$0xff] %vm588_vm0, %v9780_v46  ;;  %v1180_v17 = vunpack.i.h.s16 %v1020_v31 }
 0x11a   : > { %3639 = vst.msk [vmem:[#allocation2 + $0x81] sm:$0xff] %vm3629_vm1, %v10377_v48  ;;  %3641 = vst.msk [vmem:[#allocation2 + $0x99] sm:$0xff] %vm3629_vm1, %v10377_v48  ;;  %v9797_v48 = vunpack.c.h.bf16 %v10719_v44 }
 0x11b   : > { %3642 = vst.msk [vmem:[#allocation2 + $0xa9] sm:$0xff] %vm3629_vm1, %v10383_v54  ;;  %3644 = vst.msk [vmem:[#allocation2 + $0xc1] sm:$0xff] %vm3629_vm1, %v10383_v54  ;;  %v1011_v54 = vrot.slane %v9466_v51, %v10016_v7 }
 0x11c   : > { %602 = vst.msk [vmem:[#allocation2 + $0xb1] sm:$0xff] %vm588_vm0, %v9777_v22  ;;  %604 = vst.msk [vmem:[#allocation2 + $0xc9] sm:$0xff] %vm588_vm0, %v9781_v47  ;;  %v10806_v21 = vld [vmem:[#allocation2 + $0x52] sm:$0xff]  ;;  %v10808_v28 = vld [vmem:[#allocation2 + $0x62] sm:$0xff] }
 0x11d   : > { %3643 = vst.msk [vmem:[#allocation2 + $0xb1] sm:$0xff] %vm3629_vm1, %v10413_v26  ;;  %3645 = vst.msk [vmem:[#allocation2 + $0xc9] sm:$0xff] %vm3629_vm1, %v10413_v26  ;;  %v1174_v18 = vunpack.i.h.s16 %v1011_v54  ;;  %v9521_v20 = vpack.i.b16 %v1011_v54, %v1011_v54  ;;  %v1019_v23 = vcombine.high %v1011_v54, %v1011_v54  ;;  %v10804_v26 = vld [vmem:[#allocation2 + $0x4a] sm:$0xff] }
 0x11e   : > { %605 = vst.msk [vmem:[#allocation2 + $0xd9] sm:$0xff] %vm588_vm0, %v9784_v27  ;;  %607 = vst.msk [vmem:[#allocation2 + $0xf1] sm:$0xff] %vm588_vm0, %v9788_v53  ;;  %v10814_v35 = vld [vmem:[#allocation2 + $0x6a] sm:$0xff]  ;;  %v5687_v36 = vpack.c.bf16 %v10806_v21, %v10804_v26 }
 0x11f   : > { %606 = vst.msk [vmem:[#allocation2 + $0xe1] sm:$0xff] %vm588_vm0, %v9785_v56  ;;  %608 = vst.msk [vmem:[#allocation2 + $0xf9] sm:$0xff] %vm588_vm0, %v9789_v32  ;;  %v1302_v37 = vpack.i.b16 %v1174_v18, %v1174_v18  ;;  %v1744_v38 = vrot.slane %v9521_v20, %v10018_v8  ;;  %v1178_v39 = vunpack.i.h.s16 %v1019_v23  ;;  %v5688_v40 = vpack.c.bf16 %v10814_v35, %v10808_v28 }
 0x120   : > { %3646 = vst.msk [vmem:[#allocation2 + $0xd9] sm:$0xff] %vm3629_vm1, %v10425_v30  ;;  %3648 = vst.msk [vmem:[#allocation2 + $0xf1] sm:$0xff] %vm3629_vm1, %v10425_v30  ;;  %v9522_v30 = vpack.i.b16 %v1018_v12, %v1018_v12  ;;  %v9523_v49 = vpack.i.b16 %v1019_v23, %v1019_v23 }
 0x121   : > { %3647 = vst.msk [vmem:[#allocation2 + $0xe1] sm:$0xff] %vm3629_vm1, %v3552_v55  ;;  %3649 = vst.msk [vmem:[#allocation2 + $0xf9] sm:$0xff] %vm3629_vm1, %v3552_v55  ;;  %v10822_v41 = vld [vmem:[#allocation2 + $0x7a] sm:$0xff]  ;;  %v10824_v16 = vld [vmem:[#allocation2 + $0x82] sm:$0xff]  ;;  %v1748_v22 = vrot.slane %v1302_v37, %v10018_v8  ;;  %v2566_v47 = vpack.i.b16 %v1744_v38, %v1744_v38  ;;  %v1756_v55 = vrot.slane %v1304_v0, %v10018_v8 }
 0x122   : > { %609 = vst.msk [vmem:[#allocation2 + $0x109] sm:$0xff] %vm588_vm0, %v9792_v60  ;;  %611 = vst.msk [vmem:[#allocation2 + $0x121] sm:$0xff] %vm588_vm0, %v9796_v61  ;;  %v10826_v42 = vld [vmem:[#allocation2 + $0x92] sm:$0xff]  ;;  %v1752_v43 = vrot.slane %v9522_v30, %v10018_v8  ;;  %v10831_v25 = vld [vmem:[#allocation2 + $0x9a] sm:$0xff]  ;;  %v5689_v44 = vpack.c.bf16 %v10824_v16, %v10822_v41  ;;  %v1306_v1 = vpack.i.b16 %v1178_v39, %v1178_v39  ;;  %v3558_v39 = vpop.permute.xlu0 %3557 }
 0x123   : > { %610 = vst.msk [vmem:[#allocation2 + $0x111] sm:$0xff] %vm588_vm0, %v9793_v62  ;;  %612 = vst.msk [vmem:[#allocation2 + $0x129] sm:$0xff] %vm588_vm0, %v9797_v48  ;;  %v5690_v50 = vpack.c.bf16 %v10831_v25, %v10826_v42  ;;  %v2571_v61 = vrot.slane %v2566_v47, %v10018_v8  ;;  %v2573_v62 = vpack.i.b16 %v1748_v22, %v1748_v22 }
 0x124   : > { %3650 = vst.msk [vmem:[#allocation2 + $0x109] sm:$0xff] %vm3629_vm1, %v3554_v58  ;;  %3652 = vst.msk [vmem:[#allocation2 + $0x121] sm:$0xff] %vm3629_vm1, %v3554_v58  ;;  %v10835_v45 = vld [vmem:[#allocation2 + $0xaa] sm:$0xff]  ;;  %v10837_v46 = vld [vmem:[#allocation2 + $0xb2] sm:$0xff]  ;;  %v2580_v56 = vpack.i.b16 %v1752_v43, %v1752_v43  ;;  %v2587_v6 = vpack.i.b16 %v1756_v55, %v1756_v55  ;;  %v1760_v15 = vrot.slane %v9523_v49, %v10018_v8 }
 0x125   : > { %613 = vst.msk [vmem:[#allocation2 + $0x139] sm:$0xff] %vm588_vm0, %v9800_v4  ;;  %615 = vst.msk [vmem:[#allocation2 + $0x151] sm:$0xff] %vm588_vm0, %v9804_v5  ;;  %v10842_v51 = vld [vmem:[#allocation2 + $0xc2] sm:$0xff]  ;;  %v10844_v52 = vld [vmem:[#allocation2 + $0xca] sm:$0xff]  ;;  %v5691_v27 = vpack.c.bf16 %v10837_v46, %v10835_v45  ;;  %v2578_v54 = vrot.slane %v2573_v62, %v10018_v8  ;;  %v1764_v18 = vrot.slane %v1306_v1, %v10018_v8  ;;  %v1184_v1 = vunpack.i.h.s16 %v10812_v33 }
 0x126   : > { %614 = vst.msk [vmem:[#allocation2 + $0x141] sm:$0xff] %vm588_vm0, %v9801_v9  ;;  %616 = vst.msk [vmem:[#allocation2 + $0x159] sm:$0xff] %vm588_vm0, %v9805_v10  ;;  %v5692_v57 = vpack.c.bf16 %v10844_v52, %v10842_v51  ;;  %v2585_v5 = vrot.slane %v2580_v56, %v10018_v8  ;;  %v2837_v9 = vunpack.c.l.bf16 %v2571_v61  ;;  %v9524_v10 = vpack.i.b16 %v1020_v31, %v1020_v31 }
 0x127   : > { %617 = vst.msk [vmem:[#allocation2 + $0x169] sm:$0xff] %vm588_vm0, %v9808_v11  ;;  %619 = vst.msk [vmem:[#allocation2 + $0x181] sm:$0xff] %vm588_vm0, %v9812_v13  ;;  %v1308_v11 = vpack.i.b16 %v1180_v17, %v1180_v17  ;;  %v2592_v12 = vrot.slane %v2587_v6, %v10018_v8  ;;  %v2838_v29 = vunpack.c.l.bf16 %v2578_v54  ;;  %v1182_v31 = vunpack.i.h.s16 %v10798_v19 }
 0x128   : > { %618 = vst.msk [vmem:[#allocation2 + $0x171] sm:$0xff] %vm588_vm0, %v9809_v24  ;;  %v10848_v53 = vld [vmem:[#allocation2 + $0xda] sm:$0xff]  ;;  %v10853_v32 = vld [vmem:[#allocation2 + $0xe2] sm:$0xff]  ;;  %v10855_v58 = vld [vmem:[#allocation2 + $0xf2] sm:$0xff]  ;;  %v2839_v13 = vunpack.c.l.bf16 %v2585_v5  ;;  %v1768_v30 = vrot.slane %v9524_v10, %v10018_v8  ;;  %v2594_v43 = vpack.i.b16 %v1760_v15, %v1760_v15  ;;  %v2601_v17 = vpack.i.b16 %v1764_v18, %v1764_v18 }
 0x129   : > { %3651 = vst.msk [vmem:[#allocation2 + $0x111] sm:$0xff] %vm3629_vm1, %v3556_v59  ;;  %3653 = vst.msk [vmem:[#allocation2 + $0x129] sm:$0xff] %vm3629_vm1, %v3556_v59  ;;  %v10857_v60 = vld [vmem:[#allocation2 + $0xfa] sm:$0xff]  ;;  %v5693_v48 = vpack.c.bf16 %v10853_v32, %v10848_v53  ;;  %v1772_v59 = vrot.slane %v1308_v11, %v10018_v8  ;;  %v2840_v0 = vunpack.c.l.bf16 %v2592_v12  ;;  %v3431_v47 = vcombine.low %v2837_v9, %v2838_v29 }
 0x12a   : > { %v5694_v4 = vpack.c.bf16 %v10857_v60, %v10855_v58  ;;  %3654 = vst.msk [vmem:[#allocation2 + $0x139] sm:$0xff] %vm3629_vm1, %v3558_v39  ;;  %3656 = vst.msk [vmem:[#allocation2 + $0x151] sm:$0xff] %vm3629_vm1, %v3558_v39  ;;  %v2608_v49 = vpack.i.b16 %v1768_v30, %v1768_v30  ;;  %v2599_v61 = vrot.slane %v2594_v43, %v10018_v8 }
 0x12b   : > { %v2615_v55 = vpack.i.b16 %v1772_v59, %v1772_v59  ;;  %v3432_v56 = vcombine.low %v2839_v13, %v2840_v0  ;;  %v2606_v62 = vrot.slane %v2601_v17, %v10018_v8  ;;  %v3439_v5 = vrot.slane %v3431_v47, %v10028_v14  ;;  %v10898_v59 = vld [vmem:[%s10375_s8 + $0x80] sm:$0xff]   ;;  %v3560_v0 = vpop.permute.xlu1 %3559  ;;  %287 = vst.msk [vmem:[#allocation2] sm:$0xff] %vm286_vm3, %v9961_v34 }
 0x12c   : > { %v2613_v6 = vrot.slane %v2608_v49, %v10018_v8  ;;  %v9525_v9 = vpack.i.b16 %v10798_v19, %v10798_v19  ;;  %v2841_v11 = vunpack.c.l.bf16 %v2599_v61  ;;  %v1310_v13 = vpack.i.b16 %v1182_v31, %v1182_v31  ;;  %v10903_v49 = vld [vmem:[%s10375_s8 + $0x88] sm:$0xff]   ;;  %3655 = vst.msk [vmem:[#allocation2 + $0x141] sm:$0xff] %vm3629_vm1, %v3560_v0  ;;  %3657 = vst.msk [vmem:[#allocation2 + $0x159] sm:$0xff] %vm3629_vm1, %v3560_v0 }
 0x12d   : > { %v2620_v54 = vrot.slane %v2615_v55, %v10018_v8  ;;  %v3446_v10 = vrot.slane %v3432_v56, %v10028_v14  ;;  %v2842_v12 = vunpack.c.l.bf16 %v2606_v62  ;;  %v9526_v29 = vpack.i.b16 %v10812_v33, %v10812_v33  ;;  %288 = vst.msk [vmem:[#allocation2 + $0x8] sm:$0xff] %vm286_vm3, %v9961_v34  ;;  %291 = vst.msk [vmem:[#allocation2 + $0x1b0] sm:$0xff] %vm286_vm3, %v9961_v34 }
 0x12e   : > { %v2843_v15 = vunpack.c.l.bf16 %v2613_v6  ;;  %v1312_v30 = vpack.i.b16 %v1184_v1, %v1184_v1  ;;  %v1776_v17 = vrot.slane %v9525_v9, %v10018_v8  ;;  %v1780_v47 = vrot.slane %v1310_v13, %v10018_v8  ;;  %292 = vst.msk [vmem:[#allocation2 + $0x1b8] sm:$0xff] %vm286_vm3, %v9961_v34  ;;  %295 = vst.msk [vmem:[#allocation2 + $0x198] sm:$0xff] %vm286_vm3, %v9961_v34 }
 0x12f   : > { %v2844_v18 = vunpack.c.l.bf16 %v2620_v54  ;;  %v3447_v39 = vcombine.low %v3439_v5, %v3446_v10  ;;  %v3448_v43 = vcombine.low %v2841_v11, %v2842_v12  ;;  %v1784_v55 = vrot.slane %v9526_v29, %v10018_v8  ;;  %v9468_v54 = vld.sshfl [vmem:[%s10023_s27 + $0x3c] sm:$0x33 pattern:$0x75316420]  ;;  %296 = vst.msk [vmem:[#allocation2 + $0x1a0] sm:$0xff] %vm286_vm3, %v9961_v34  ;;  %298 = vst.msk [vmem:[#allocation2 + $0x348] sm:$0xff] %vm286_vm3, %v9961_v34 }
 0x130   : > { %v10869_v20 = vld [vmem:[#allocation2 + $0x10a] sm:$0xff]  ;;  %v10871_v23 = vld [vmem:[#allocation2 + $0x112] sm:$0xff]  ;;  %v10873_v24 = vld [vmem:[#allocation2 + $0x122] sm:$0xff]  ;;  %v1788_v56 = vrot.slane %v1312_v30, %v10018_v8  ;;  %v9813_v61 = vunpack.c.h.bf16 %v10760_v63  ;;  %v2622_v1 = vpack.i.b16 %v1776_v17, %v1776_v17  ;;  %v2629_v5 = vpack.i.b16 %v1780_v47, %v1780_v47  ;;  %299 = vst.msk [vmem:[#allocation2 + $0x350] sm:$0xff] %vm286_vm3, %v9961_v34 }
 0x131   : > { %v10878_v37 = vld [vmem:[#allocation2 + $0x12a] sm:$0xff]  ;;  %v5695_v38 = vpack.c.bf16 %v10871_v23, %v10869_v20  ;;  %v3449_v31 = vcombine.low %v2843_v15, %v2844_v18  ;;  %3585 = vrot.lane.b32.xlu0 %v3447_v39, %s9960_s28  ;;  %v3456_v62 = vrot.slane %v3448_v43, %v10028_v14  ;;  %v9816_v6 = vunpack.c.l.bf16 %v10898_v59  ;;  %374 = vst.msk [vmem:[#allocation3] sm:$0xff] %vm286_vm3, %v9961_v34 }
 0x132   : > { %v2636_v10 = vpack.i.b16 %v1784_v55, %v1784_v55  ;;  %v2643_v11 = vpack.i.b16 %v1788_v56, %v1788_v56  ;;  %620 = vst.msk [vmem:[#allocation2 + $0x189] sm:$0xff] %vm588_vm0, %v9813_v61  ;;  %v9820_v12 = vunpack.c.l.bf16 %v10903_v49  ;;  %v2627_v13 = vrot.slane %v2622_v1, %v10018_v8 }
 0x133   : > { %v3463_v9 = vrot.slane %v3449_v31, %v10028_v14  ;;  %v2634_v63 = vrot.slane %v2629_v5, %v10018_v8  ;;  %621 = vst.msk [vmem:[#allocation2 + $0x1c9] sm:$0xff] %vm588_vm0, %v9816_v6  ;;  %v1043_v15 = vcombine.high %v10798_v19, %v10798_v19  ;;  %v1044_v18 = vcombine.high %v10812_v33, %v10812_v33  ;;  %v10928_v1 = vld [vmem:[#allocation2 + $0x13a] sm:$0xff]  ;;  %v10930_v33 = vld [vmem:[#allocation2 + $0x142] sm:$0xff]  ;;  %v3562_v5 = vpop.permute.xlu0 %3561 }
 0x134   : > { %v2641_v30 = vrot.slane %v2636_v10, %v10018_v8  ;;  %v2648_v39 = vrot.slane %v2643_v11, %v10018_v8  ;;  %623 = vst.msk [vmem:[#allocation2 + $0x1e1] sm:$0xff] %vm588_vm0, %v9820_v12  ;;  %v1052_v0 = vcombine.high %v9468_v54, %v9468_v54  ;;  %v2845_v43 = vunpack.c.l.bf16 %v2627_v13  ;;  %v10935_v12 = vld [vmem:[#allocation2 + $0x15a] sm:$0xff] }
 0x135   : > { %v3464_v29 = vcombine.low %v3456_v62, %v3463_v9  ;;  %v2846_v17 = vunpack.c.l.bf16 %v2634_v63  ;;  %v1186_v47 = vunpack.i.h.s16 %v1043_v15  ;;  %v1188_v31 = vunpack.i.h.s16 %v1044_v18  ;;  %v10932_v62 = vld [vmem:[#allocation2 + $0x152] sm:$0xff]  ;;  %3658 = vst.msk [vmem:[#allocation2 + $0x169] sm:$0xff] %vm3629_vm1, %v3562_v5  ;;  %3660 = vst.msk [vmem:[#allocation2 + $0x181] sm:$0xff] %vm3629_vm1, %v3562_v5  ;;  %v3822_v23 = vld [vmem:[#allocation2 + $0x1] sm:$0xff] }
 0x136   : > { %v2847_v55 = vunpack.c.l.bf16 %v2641_v30  ;;  %v2848_v56 = vunpack.c.l.bf16 %v2648_v39  ;;  %v9527_v19 = vpack.i.b16 %v1043_v15, %v1043_v15  ;;  %v9528_v61 = vpack.i.b16 %v1044_v18, %v1044_v18  ;;  %375 = vst.msk [vmem:[#allocation3 + $0x8] sm:$0xff] %vm286_vm3, %v9961_v34  ;;  %377 = vst.msk [vmem:[#allocation3 + $0x1b0] sm:$0xff] %vm286_vm3, %v9961_v34 }
 0x137   : > { %3587 = vrot.lane.b32.xlu1 %v3464_v29, %s9960_s28  ;;  %v3465_v6 = vcombine.low %v2845_v43, %v2846_v17  ;;  %v1314_v9 = vpack.i.b16 %v1186_v47, %v1186_v47  ;;  %v1316_v10 = vpack.i.b16 %v1188_v31, %v1188_v31  ;;  %v1059_v11 = vrot.slane %v9468_v54, %v10016_v7 }
 0x138   : > { %v3466_v63 = vcombine.low %v2847_v55, %v2848_v56  ;;  %v1792_v15 = vrot.slane %v9527_v19, %v10018_v8  ;;  %v1800_v18 = vrot.slane %v9528_v61, %v10018_v8  ;;  %v1066_v31 = vrot.slane %v1052_v0, %v10016_v7  ;;  %378 = vst.msk [vmem:[#allocation3 + $0x1b8] sm:$0xff] %vm286_vm3, %v9961_v34 }
 0x139   : > { %v3473_v30 = vrot.slane %v3465_v6, %v10028_v14  ;;  %v1796_v54 = vrot.slane %v1314_v9, %v10018_v8  ;;  %v1804_v39 = vrot.slane %v1316_v10, %v10018_v8  ;;  %v1190_v19 = vunpack.i.h.s16 %v1059_v11  ;;  %381 = vst.msk [vmem:[#allocation3 + $0x198] sm:$0xff] %vm286_vm3, %v9961_v34  ;;  %382 = vst.msk [vmem:[#allocation3 + $0x1a0] sm:$0xff] %vm286_vm3, %v9961_v34 }
 0x13a   : > { %v3480_v43 = vrot.slane %v3466_v63, %v10028_v14  ;;  %v2650_v17 = vpack.i.b16 %v1792_v15, %v1792_v15  ;;  %v2664_v47 = vpack.i.b16 %v1800_v18, %v1800_v18  ;;  %v9529_v5 = vpack.i.b16 %v1059_v11, %v1059_v11  ;;  %v3564_v15 = vpop.permute.xlu1 %3563  ;;  %384 = vst.msk [vmem:[#allocation3 + $0x348] sm:$0xff] %vm286_vm3, %v9961_v34 }
 0x13b   : > { %v2657_v55 = vpack.i.b16 %v1796_v54, %v1796_v54  ;;  %v2671_v56 = vpack.i.b16 %v1804_v39, %v1804_v39  ;;  %v1192_v6 = vunpack.i.h.s16 %v1066_v31  ;;  %v1318_v22 = vpack.i.b16 %v1190_v19, %v1190_v19  ;;  %3659 = vst.msk [vmem:[#allocation2 + $0x171] sm:$0xff] %vm3629_vm1, %v3564_v15  ;;  %3661 = vst.msk [vmem:[#allocation2 + $0x189] sm:$0xff] %vm3629_vm1, %v3564_v15 }
 0x13c   : > { %v3481_v61 = vcombine.low %v3473_v30, %v3480_v43  ;;  %v2655_v13 = vrot.slane %v2650_v17, %v10018_v8  ;;  %v2669_v29 = vrot.slane %v2664_v47, %v10018_v8  ;;  %v9530_v63 = vpack.i.b16 %v1066_v31, %v1066_v31  ;;  %385 = vst.msk [vmem:[#allocation3 + $0x350] sm:$0xff] %vm286_vm3, %v9961_v34 }
 0x13d   : > { %v2662_v9 = vrot.slane %v2657_v55, %v10018_v8  ;;  %v2676_v10 = vrot.slane %v2671_v56, %v10018_v8  ;;  %v1320_v18 = vpack.i.b16 %v1192_v6, %v1192_v6  ;;  %v1808_v54 = vrot.slane %v9529_v5, %v10018_v8  ;;  %5719 = vst.msk [vmem:[#allocation4 + $0x18] sm:$0xff] %vm286_vm3, %v5687_v36 }
 0x13e   : > { %3589 = vrot.lane.b32.xlu0 %v3481_v61, %s9960_s28  ;;  %v2849_v7 = vunpack.c.l.bf16 %v2655_v13  ;;  %v2851_v0 = vunpack.c.l.bf16 %v2669_v29  ;;  %v1812_v43 = vrot.slane %v1318_v22, %v10018_v8  ;;  %v1816_v17 = vrot.slane %v9530_v63, %v10018_v8  ;;  %5720 = vst.msk [vmem:[#allocation4 + $0x28] sm:$0xff] %vm286_vm3, %v5688_v40  ;;  %5721 = vst.msk [vmem:[#allocation4 + $0x38] sm:$0xff] %vm286_vm3, %v5689_v44 }
 0x13f   : > { %v2850_v30 = vunpack.c.l.bf16 %v2662_v9  ;;  %v2852_v39 = vunpack.c.l.bf16 %v2676_v10  ;;  %v1820_v47 = vrot.slane %v1320_v18, %v10018_v8  ;;  %v2678_v55 = vpack.i.b16 %v1808_v54, %v1808_v54  ;;  %5722 = vst.msk [vmem:[#allocation4 + $0x48] sm:$0xff] %vm286_vm3, %v5690_v50  ;;  %5723 = vst.msk [vmem:[#allocation4 + $0x58] sm:$0xff] %vm286_vm3, %v5691_v27 }
 0x140   : > { %v9817_v56 = vunpack.c.h.bf16 %v10898_v59  ;;  %v9821_v13 = vunpack.c.h.bf16 %v10903_v49  ;;  %v2685_v5 = vpack.i.b16 %v1812_v43, %v1812_v43  ;;  %v2692_v61 = vpack.i.b16 %v1816_v17, %v1816_v17  ;;  %5724 = vst.msk [vmem:[#allocation4 + $0x68] sm:$0xff] %vm286_vm3, %v5692_v57  ;;  %5725 = vst.msk [vmem:[#allocation4 + $0x78] sm:$0xff] %vm286_vm3, %v5693_v48  ;;  %v9895_v48 = vld [vmem:[%s10375_s8 + $0x90] sm:$0xff]  }
 0x141   : > { %v3482_v29 = vcombine.low %v2849_v7, %v2850_v30  ;;  %v3483_v19 = vcombine.low %v2851_v0, %v2852_v39  ;;  %v2683_v6 = vrot.slane %v2678_v55, %v10018_v8  ;;  %v2699_v15 = vpack.i.b16 %v1820_v47, %v1820_v47  ;;  %v3566_v47 = vpop.permute.xlu0 %3565  ;;  %5726 = vst.msk [vmem:[#allocation4 + $0x88] sm:$0xff] %vm286_vm3, %v5694_v4  ;;  %v3568_v4 = vpop.permute.xlu1 %3567 }
 0x142   : > { %622 = vst.msk [vmem:[#allocation2 + $0x1d1] sm:$0xff] %vm588_vm0, %v9817_v56  ;;  %624 = vst.msk [vmem:[#allocation2 + $0x1e9] sm:$0xff] %vm588_vm0, %v9821_v13  ;;  %v9753_v22 = vunpack.c.h.bf16 %v10394_v2  ;;  %v9757_v9 = vunpack.c.h.bf16 %v10397_v3  ;;  %v2690_v49 = vrot.slane %v2685_v5, %v10018_v8  ;;  %v10972_v63 = vrot.slane %v2692_v61, %v10018_v8  ;;  %v10984_v39 = vld [vmem:[#allocation2 + $0x16a] sm:$0xff]  ;;  %v10986_v43 = vld [vmem:[#allocation2 + $0x172] sm:$0xff] }
 0x143   : > { %v3490_v10 = vrot.slane %v3482_v29, %v10028_v14  ;;  %v3497_v59 = vrot.slane %v3483_v19, %v10028_v14  ;;  %v10975_v7 = vrot.slane %v2699_v15, %v10018_v8  ;;  %v2853_v0 = vunpack.c.l.bf16 %v2683_v6  ;;  %v10988_v17 = vld [vmem:[#allocation2 + $0x182] sm:$0xff]  ;;  %5727 = vst.msk [vmem:[#allocation4 + $0x98] sm:$0xff] %vm286_vm3, %v5695_v38  ;;  %v5651_v35 = vld [vmem:[#allocation2 + $0x18a] sm:$0xff]  ;;  %v9896_v38 = vld [vmem:[%s10375_s8 + $0x98] sm:$0xff]  }
 0x144   : > { %590 = vst.msk [vmem:[#allocation2 + $0x21] sm:$0xff] %vm588_vm0, %v9753_v22  ;;  %592 = vst.msk [vmem:[#allocation2 + $0x39] sm:$0xff] %vm588_vm0, %v9757_v9  ;;  %v10979_v2 = vcombine.high %v1059_v11, %v1059_v11  ;;  %v10981_v3 = vcombine.high %v1066_v31, %v1066_v31  ;;  %v2854_v54 = vunpack.c.l.bf16 %v2690_v49  ;;  %v2855_v30 = vunpack.c.l.bf16 %v10972_v63  ;;  %v9897_v6 = vld [vmem:[%s10375_s8 + $0xa0] sm:$0xff]   ;;  %v9898_v15 = vld [vmem:[%s10375_s8 + $0xa8] sm:$0xff]  }
 0x145   : > { %v3498_v18 = vcombine.low %v3490_v10, %v3497_v59  ;;  %v2856_v55 = vunpack.c.l.bf16 %v10975_v7  ;;  %v13155_v26 = vpack.c.bf16 %v10878_v37, %v10873_v24  ;;  %v13156_v21 = vpack.c.bf16 %v10930_v33, %v10928_v1  ;;  %3662 = vst.msk [vmem:[#allocation2 + $0x1c9] sm:$0xff] %vm3629_vm1, %v3566_v47  ;;  %3664 = vst.msk [vmem:[#allocation2 + $0x1e1] sm:$0xff] %vm3629_vm1, %v3566_v47  ;;  %v9899_v10 = vld [vmem:[%s10375_s8 + $0xb0] sm:$0xff]   ;;  %v9900_v7 = vld [vmem:[%s10375_s8 + $0xb8] sm:$0xff]   ;;  %v3536_v47 = vpop.permute.xlu0 %3535 }
 0x146   : > { %v1194_v56 = vunpack.i.h.s16 %v10979_v2  ;;  %v1196_v11 = vunpack.i.h.s16 %v10981_v3  ;;  %v9531_v31 = vpack.i.b16 %v10979_v2, %v10979_v2  ;;  %v13157_v28 = vpack.c.bf16 %v10935_v12, %v10932_v62  ;;  %302 = vst.msk [vmem:[#allocation2] sm:$0x1] %vm301_vm2, %v9961_v34  ;;  %319 = vst.msk [vmem:[#allocation2 + $0x198] sm:$0x1] %vm301_vm2, %v9961_v34  ;;  %v3854_v12 = vld [vmem:[#allocation2 + $0x1b1] sm:$0xff]  ;;  %v9902_v2 = vld [vmem:[%s10375_s8 + $0xc8] sm:$0xff]  }
 0x147   : > { %5728 = vst.msk [vmem:[#allocation4 + $0xa8] sm:$0xff] %vm286_vm3, %v13155_v26  ;;  %5729 = vst.msk [vmem:[#allocation4 + $0xb8] sm:$0xff] %vm286_vm3, %v13156_v21  ;;  %v5699_v36 = vpack.c.bf16 %v10986_v43, %v10984_v39  ;;  %3591 = vrot.lane.b32.xlu1 %v3498_v18, %s9960_s28  ;;  %v3499_v40 = vcombine.low %v2853_v0, %v2854_v54  ;;  %v9532_v41 = vpack.i.b16 %v10981_v3, %v10981_v3  ;;  %v9901_v0 = vld [vmem:[%s10375_s8 + $0xc0] sm:$0xff]   ;;  %v5110_v39 = vld [vmem:[#allocation2 + $0x48] sm:$0xff] }
 0x148   : > { %5730 = vst.msk [vmem:[#allocation4 + $0xc8] sm:$0xff] %vm286_vm3, %v13157_v28  ;;  %v5700_v16 = vpack.c.bf16 %v5651_v35, %v10988_v17  ;;  %v3500_v42 = vcombine.low %v2855_v30, %v2856_v55  ;;  %v1322_v25 = vpack.i.b16 %v1194_v56, %v1194_v56  ;;  %v1324_v44 = vpack.i.b16 %v1196_v11, %v1196_v11  ;;  %v5111_v43 = vld [vmem:[#allocation2 + $0x50] sm:$0xff]  ;;  %v5112_v17 = vld [vmem:[#allocation2 + $0x60] sm:$0xff]  ;;  %v5113_v26 = vld [vmem:[#allocation2 + $0x68] sm:$0xff] }
 0x149   : > { %320 = vst.msk [vmem:[#allocation2 + $0x1b0] sm:$0x1] %vm301_vm2, %v9961_v34  ;;  %337 = vst.msk [vmem:[#allocation2 + $0x348] sm:$0x1] %vm301_vm2, %v9961_v34  ;;  %v3507_v45 = vrot.slane %v3499_v40, %v10028_v14  ;;  %v1824_v46 = vrot.slane %v9531_v31, %v10018_v8  ;;  %v1832_v50 = vrot.slane %v9532_v41, %v10018_v8  ;;  %v9825_v29 = vunpack.c.h.bf16 %v9895_v48  ;;  %v11161_v11 = vld [vmem:[#allocation2 + $0x2] sm:$0xff] }
 0x14a   : > { %387 = vst.msk [vmem:[#allocation3] sm:$0x1] %vm301_vm2, %v9961_v34  ;;  %404 = vst.msk [vmem:[#allocation3 + $0x198] sm:$0x1] %vm301_vm2, %v9961_v34  ;;  %v3514_v51 = vrot.slane %v3500_v42, %v10028_v14  ;;  %v1828_v52 = vrot.slane %v1322_v25, %v10018_v8  ;;  %v1836_v27 = vrot.slane %v1324_v44, %v10018_v8  ;;  %v9829_v22 = vunpack.c.h.bf16 %v9896_v38  ;;  %v5115_v21 = vld [vmem:[#allocation2 + $0x80] sm:$0xff] }
 0x14b   : > { %405 = vst.msk [vmem:[#allocation3 + $0x1b0] sm:$0x1] %vm301_vm2, %v9961_v34  ;;  %422 = vst.msk [vmem:[#allocation3 + $0x348] sm:$0x1] %vm301_vm2, %v9961_v34  ;;  %v2706_v53 = vpack.i.b16 %v1824_v46, %v1824_v46  ;;  %v2720_v57 = vpack.i.b16 %v1832_v50, %v1832_v50  ;;  %v9828_v9 = vunpack.c.l.bf16 %v9896_v38  ;;  %v9833_v3 = vunpack.c.h.bf16 %v9897_v6  ;;  %v9904_v46 = vld [vmem:[%s10375_s8 + $0xd8] sm:$0xff]  }
 0x14c   : > { %290 = vst.msk [vmem:[#allocation2 + $0x10] sm:$0x3] %vm289_vm4, %v9961_v34  ;;  %293 = vst.msk [vmem:[#allocation2 + $0x1c0] sm:$0x3] %vm289_vm4, %v9961_v34  ;;  %v3515_v32 = vcombine.low %v3507_v45, %v3514_v51  ;;  %v2713_v58 = vpack.i.b16 %v1828_v52, %v1828_v52  ;;  %v2727_v60 = vpack.i.b16 %v1836_v27, %v1836_v27  ;;  %v9837_v18 = vunpack.c.h.bf16 %v9898_v15  ;;  %v9903_v45 = vld [vmem:[%s10375_s8 + $0xd0] sm:$0xff]   ;;  %v5114_v27 = vld [vmem:[#allocation2 + $0x78] sm:$0xff] }
 0x14d   : > { %297 = vst.msk [vmem:[#allocation2 + $0x1a8] sm:$0x3] %vm289_vm4, %v9961_v34  ;;  %300 = vst.msk [vmem:[#allocation2 + $0x358] sm:$0x3] %vm289_vm4, %v9961_v34  ;;  %v2711_v20 = vrot.slane %v2706_v53, %v10018_v8  ;;  %v9832_v54 = vunpack.c.l.bf16 %v9897_v6  ;;  %v9836_v30 = vunpack.c.l.bf16 %v9898_v15  ;;  %v9841_v31 = vunpack.c.h.bf16 %v9899_v10  ;;  %v9905_v53 = vld [vmem:[%s10375_s8 + $0xe0] sm:$0xff]   ;;  %v11213_v6 = vld [vmem:[#allocation2 + $0x1b8] sm:$0xff] }
 0x14e   : > { %376 = vst.msk [vmem:[#allocation3 + $0x10] sm:$0x3] %vm289_vm4, %v9961_v34  ;;  %379 = vst.msk [vmem:[#allocation3 + $0x1c0] sm:$0x3] %vm289_vm4, %v9961_v34  ;;  %3593 = vrot.lane.b32.xlu0 %v3515_v32, %s9960_s28  ;;  %v2718_v24 = vrot.slane %v2713_v58, %v10018_v8  ;;  %v2732_v37 = vrot.slane %v2727_v60, %v10018_v8  ;;  %v9840_v40 = vunpack.c.l.bf16 %v9899_v10  ;;  %v9844_v41 = vunpack.c.l.bf16 %v9900_v7  ;;  %v3711_v15 = vld [vmem:[#allocation2 + $0xc8] sm:$0xff] }
 0x14f   : > { %383 = vst.msk [vmem:[#allocation3 + $0x1a8] sm:$0x3] %vm289_vm4, %v9961_v34  ;;  %386 = vst.msk [vmem:[#allocation3 + $0x358] sm:$0x3] %vm289_vm4, %v9961_v34  ;;  %v2857_v1 = vunpack.c.l.bf16 %v2711_v20  ;;  %v9853_v44 = vunpack.c.h.bf16 %v9902_v2  ;;  %v9848_v50 = vunpack.c.l.bf16 %v9901_v0  ;;  %v9852_v51 = vunpack.c.l.bf16 %v9902_v2  ;;  %v5116_v20 = vld [vmem:[#allocation2 + $0x90] sm:$0xff] }
 0x150   : > { %338 = vst.msk [vmem:[#allocation2 + $0x11] sm:$0x1] %vm301_vm2, %v9961_v34  ;;  %355 = vst.msk [vmem:[#allocation2 + $0x1a9] sm:$0x1] %vm301_vm2, %v9961_v34  ;;  %v2858_v19 = vunpack.c.l.bf16 %v2718_v24  ;;  %v2860_v5 = vunpack.c.l.bf16 %v2732_v37  ;;  %v11179_v52 = vpack.c.bf16 %v5111_v43, %v5110_v39  ;;  %v11190_v58 = vpack.c.bf16 %v5113_v26, %v5112_v17  ;;  %v5108_v39 = vld [vmem:[#allocation2 + $0x30] sm:$0xff] }
 0x151   : > { %5731 = vst.msk [vmem:[#allocation4 + $0xd8] sm:$0xff] %vm286_vm3, %v5699_v36  ;;  %5732 = vst.msk [vmem:[#allocation4 + $0xe8] sm:$0xff] %vm286_vm3, %v5700_v16  ;;  %v9849_v16 = vunpack.c.h.bf16 %v9901_v0  ;;  %v11192_v60 = vpack.c.bf16 %v5115_v21, %v5114_v27  ;;  %v9860_v24 = vunpack.c.l.bf16 %v9904_v46  ;;  %v9857_v37 = vunpack.c.h.bf16 %v9903_v45  ;;  %v3719_v0 = vld [vmem:[#allocation2 + $0x128] sm:$0xff]  ;;  %v3829_v26 = vld [vmem:[#allocation2 + $0x51] sm:$0xff] }
 0x152   : > { %356 = vst.msk [vmem:[#allocation2 + $0x1c1] sm:$0x1] %vm301_vm2, %v9961_v34  ;;  %373 = vst.msk [vmem:[#allocation2 + $0x359] sm:$0x1] %vm301_vm2, %v9961_v34  ;;  %v3516_v59 = vcombine.low %v2857_v1, %v2858_v19  ;;  %v9861_v38 = vunpack.c.h.bf16 %v9904_v46  ;;  %v11202_v1 = vld [vmem:[#allocation2] sm:$0xff] }
 0x153   : > { %423 = vst.msk [vmem:[#allocation3 + $0x11] sm:$0x1] %vm301_vm2, %v9961_v34  ;;  %440 = vst.msk [vmem:[#allocation3 + $0x1a9] sm:$0x1] %vm301_vm2, %v9961_v34  ;;  %v3823_v62 = vld [vmem:[#allocation2 + $0x9] sm:$0xff]  ;;  %v3855_v13 = vld [vmem:[#allocation2 + $0x1b9] sm:$0xff] }
 0x154   : > { %441 = vst.msk [vmem:[#allocation3 + $0x1c1] sm:$0x1] %vm301_vm2, %v9961_v34  ;;  %458 = vst.msk [vmem:[#allocation3 + $0x359] sm:$0x1] %vm301_vm2, %v9961_v34  ;;  %v2725_v34 = vrot.slane %v2720_v57, %v10018_v8  ;;  %v3886_v61 = vpack.c.bf16 %v3823_v62, %v3822_v23  ;;  %v9824_v8 = vunpack.c.l.bf16 %v9895_v48  ;;  %v3902_v63 = vpack.c.bf16 %v3855_v13, %v3854_v12  ;;  %v11183_v57 = vld [vmem:[%s10375_s8 + $0xe8] sm:$0xff]   ;;  %v11195_v48 = vld [vmem:[%s10375_s8 + $0xf0] sm:$0xff]  }
 0x155   : > { %3663 = vst.msk [vmem:[#allocation2 + $0x1d1] sm:$0xff] %vm3629_vm1, %v3568_v4  ;;  %3665 = vst.msk [vmem:[#allocation2 + $0x1e9] sm:$0xff] %vm3629_vm1, %v3568_v4  ;;  %v3524_v55 = vrot.slane %v3516_v59, %v10028_v14  ;;  %v11198_v4 = vld [vmem:[%s10375_s8 + $0xf8] sm:$0xff]   ;;  %v9856_v23 = vunpack.c.l.bf16 %v9903_v45  ;;  %v11206_v62 = vld [vmem:[#allocation2 + $0xb0] sm:$0xff]  ;;  %v9868_v19 = vunpack.c.l.bf16 %v11183_v57  ;;  %v9873_v43 = vunpack.c.h.bf16 %v11195_v48 }
 0x156   : > { %v2859_v33 = vunpack.c.l.bf16 %v2725_v34  ;;  %626 = vst.msk [vmem:[#allocation2 + $0x201] sm:$0xff] %vm588_vm0, %v9825_v29  ;;  %3950 = vrot.lane.b32.xlu0 %v3886_v61, %s9962_s9  ;;  %628 = vst.msk [vmem:[#allocation2 + $0x219] sm:$0xff] %vm588_vm0, %v9829_v22  ;;  %v5117_v34 = vld [vmem:[#allocation2 + $0x98] sm:$0xff]  ;;  %v9864_v29 = vunpack.c.l.bf16 %v9905_v53  ;;  %v11211_v61 = vld [vmem:[#allocation2 + $0x1b0] sm:$0xff]  ;;  %v9876_v10 = vunpack.c.l.bf16 %v11198_v4  ;;  %v9877_v17 = vunpack.c.h.bf16 %v11198_v4 }
 0x157   : > { %625 = vst.msk [vmem:[#allocation2 + $0x1f9] sm:$0xff] %vm588_vm0, %v9824_v8  ;;  %627 = vst.msk [vmem:[#allocation2 + $0x211] sm:$0xff] %vm588_vm0, %v9828_v9  ;;  %v11165_v36 = vld [vmem:[#allocation2 + $0xa] sm:$0xff]  ;;  %v3824_v13 = vld [vmem:[#allocation2 + $0x19] sm:$0xff]  ;;  %v9869_v8 = vunpack.c.h.bf16 %v11183_v57  ;;  %v9872_v9 = vunpack.c.l.bf16 %v11195_v48  ;;  %v11226_v59 = vpack.c.bf16 %v5117_v34, %v5116_v20 }
 0x158   : > { %v3517_v49 = vcombine.low %v2859_v33, %v2860_v5  ;;  %3631 = vst.msk [vmem:[#allocation2 + $0x21] sm:$0xff] %vm3629_vm1, %v3536_v47  ;;  %3633 = vst.msk [vmem:[#allocation2 + $0x39] sm:$0xff] %vm3629_vm1, %v3536_v47  ;;  %v4143_v32 = vpack.c.bf16 %v11165_v36, %v11161_v11  ;;  %v11204_v33 = vld [vmem:[#allocation2 + $0x8] sm:$0xff]  ;;  %v3826_v12 = vld [vmem:[#allocation2 + $0x31] sm:$0xff]  ;;  %v9865_v5 = vunpack.c.h.bf16 %v9905_v53 }
 0x159   : > { %630 = vst.msk [vmem:[#allocation2 + $0x231] sm:$0xff] %vm588_vm0, %v9833_v3  ;;  %632 = vst.msk [vmem:[#allocation2 + $0x249] sm:$0xff] %vm588_vm0, %v9837_v18  ;;  %v4336_v22 = vld [vmem:[#allocation2 + $0x18] sm:$0xff]  ;;  %v3830_v18 = vld [vmem:[#allocation2 + $0x61] sm:$0xff]  ;;  %v3758_v47 = vpack.c.bf16 %v11204_v33, %v11202_v1  ;;  %v3570_v1 = vpop.permute.xlu0 %3569 }
 0x15a   : > { %v3531_v56 = vrot.slane %v3517_v49, %v10028_v14  ;;  %629 = vst.msk [vmem:[#allocation2 + $0x229] sm:$0xff] %vm588_vm0, %v9832_v54  ;;  %631 = vst.msk [vmem:[#allocation2 + $0x241] sm:$0xff] %vm588_vm0, %v9836_v30  ;;  %v9845_v14 = vunpack.c.h.bf16 %v9900_v7  ;;  %3982 = vrot.lane.b32.xlu0 %v3902_v63, %s9962_s9  ;;  %v5118_v49 = vld [vmem:[#allocation2 + $0xa8] sm:$0xff]  ;;  %v3715_v63 = vld [vmem:[#allocation2 + $0xf8] sm:$0xff] }
 0x15b   : > { %634 = vst.msk [vmem:[#allocation2 + $0x261] sm:$0xff] %vm588_vm0, %v9841_v31  ;;  %633 = vst.msk [vmem:[#allocation2 + $0x259] sm:$0xff] %vm588_vm0, %v9840_v40  ;;  %v3713_v7 = vld [vmem:[#allocation2 + $0xe0] sm:$0xff]  ;;  %v3831_v54 = vld [vmem:[#allocation2 + $0x69] sm:$0xff]  ;;  %v11255_v46 = vpack.c.bf16 %v11206_v62, %v5118_v49 }
 0x15c   : > { %v5654_v28 = vld [vmem:[#allocation2 + $0x1e2] sm:$0xff]  ;;  %v5655_v35 = vld [vmem:[#allocation2 + $0x1ea] sm:$0xff]  ;;  %v3532_v25 = vcombine.low %v3524_v55, %v3531_v56  ;;  %636 = vst.msk [vmem:[#allocation2 + $0x279] sm:$0xff] %vm588_vm0, %v9845_v14  ;;  %635 = vst.msk [vmem:[#allocation2 + $0x271] sm:$0xff] %vm588_vm0, %v9844_v41 }
 0x15d   : > { %v5702_v42 = vpack.c.bf16 %v5655_v35, %v5654_v28  ;;  %638 = vst.msk [vmem:[#allocation2 + $0x291] sm:$0xff] %vm588_vm0, %v9849_v16  ;;  %640 = vst.msk [vmem:[#allocation2 + $0x2a9] sm:$0xff] %vm588_vm0, %v9853_v44  ;;  %v3710_v55 = vld [vmem:[#allocation2 + $0xc0] sm:$0xff]  ;;  %v3828_v31 = vld [vmem:[#allocation2 + $0x49] sm:$0xff]  ;;  %v3774_v35 = vpack.c.bf16 %v11213_v6, %v11211_v61 }
 0x15e   : > { %3595 = vrot.lane.b32.xlu1 %v3532_v25, %s9960_s28  ;;  %637 = vst.msk [vmem:[#allocation2 + $0x289] sm:$0xff] %vm588_vm0, %v9848_v50  ;;  %639 = vst.msk [vmem:[#allocation2 + $0x2a1] sm:$0xff] %vm588_vm0, %v9852_v51  ;;  %v3714_v36 = vld [vmem:[#allocation2 + $0xf0] sm:$0xff]  ;;  %v3712_v14 = vld [vmem:[#allocation2 + $0xd8] sm:$0xff]  ;;  %v3572_v25 = vpop.permute.xlu1 %3571  ;;  %v11264_v53 = vpack.c.bf16 %v3711_v15, %v3710_v55 }
 0x15f   : > { %5734 = vst.msk [vmem:[#allocation4 + $0x108] sm:$0xff] %vm286_vm3, %v5702_v42  ;;  %3793 = vst.msk [vmem:[#allocation4 + $0x30] sm:$0xff] %vm286_vm3, %v11179_v52  ;;  %v3827_v2 = vld [vmem:[#allocation2 + $0x39] sm:$0xff]  ;;  %v3825_v3 = vld [vmem:[#allocation2 + $0x21] sm:$0xff]  ;;  %v11274_v4 = vpack.c.bf16 %v3715_v63, %v3714_v36  ;;  %v11276_v20 = vpack.c.bf16 %v3713_v7, %v3712_v14 }
 0x160   : > { %3794 = vst.msk [vmem:[#allocation4 + $0x40] sm:$0xff] %vm286_vm3, %v11190_v58  ;;  %3795 = vst.msk [vmem:[#allocation4 + $0x50] sm:$0xff] %vm286_vm3, %v11192_v60  ;;  %v5622_v30 = vld [vmem:[#allocation2 + $0x32] sm:$0xff]  ;;  %v11236_v56 = vpack.c.bf16 %v3827_v2, %v3826_v12  ;;  %v11238_v11 = vpack.c.bf16 %v3825_v3, %v3824_v13  ;;  %v5623_v21 = vld [vmem:[#allocation2 + $0x3a] sm:$0xff] }
 0x161   : > { %641 = vst.msk [vmem:[#allocation2 + $0x2b9] sm:$0xff] %vm588_vm0, %v9856_v23  ;;  %643 = vst.msk [vmem:[#allocation2 + $0x2d1] sm:$0xff] %vm588_vm0, %v9860_v24  ;;  %v4337_v28 = vld [vmem:[#allocation2 + $0x20] sm:$0xff]  ;;  %v3716_v41 = vld [vmem:[#allocation2 + $0x108] sm:$0xff]  ;;  %v11247_v42 = vpack.c.bf16 %v5623_v21, %v5622_v30 }
 0x162   : > { %642 = vst.msk [vmem:[#allocation2 + $0x2c1] sm:$0xff] %vm588_vm0, %v9857_v37  ;;  %644 = vst.msk [vmem:[#allocation2 + $0x2d9] sm:$0xff] %vm588_vm0, %v9861_v38  ;;  %4207 = vrot.lane.b32.xlu1 %v4143_v32, %s9963_s10  ;;  %v3718_v40 = vld [vmem:[#allocation2 + $0x120] sm:$0xff]  ;;  %v3717_v16 = vld [vmem:[#allocation2 + $0x110] sm:$0xff]  ;;  %v11249_v44 = vpack.c.bf16 %v4337_v28, %v4336_v22  ;;  %3954 = vrot.lane.b32.xlu0 %v11236_v56, %s9962_s9  ;;  %v11282_v38 = vpack.c.bf16 %v3831_v54, %v3830_v18 }
 0x163   : > { %645 = vst.msk [vmem:[#allocation2 + $0x2e9] sm:$0xff] %vm588_vm0, %v9864_v29  ;;  %647 = vst.msk [vmem:[#allocation2 + $0x301] sm:$0xff] %vm588_vm0, %v9868_v19  ;;  %v5109_v45 = vld [vmem:[#allocation2 + $0x38] sm:$0xff]  ;;  %v3721_v51 = vld [vmem:[#allocation2 + $0x140] sm:$0xff]  ;;  %v11278_v34 = vpack.c.bf16 %v3719_v0, %v3718_v40  ;;  %v11280_v23 = vpack.c.bf16 %v3717_v16, %v3716_v41  ;;  %v11292_v19 = vpack.c.bf16 %v3829_v26, %v3828_v31 }
 0x164   : > { %646 = vst.msk [vmem:[#allocation2 + $0x2f1] sm:$0xff] %vm588_vm0, %v9865_v5  ;;  %648 = vst.msk [vmem:[#allocation2 + $0x309] sm:$0xff] %vm588_vm0, %v9869_v8  ;;  %v3723_v50 = vld [vmem:[#allocation2 + $0x158] sm:$0xff]  ;;  %v11261_v27 = vpack.c.bf16 %v5109_v45, %v5108_v39  ;;  %v3731_v57 = vld [vmem:[#allocation2 + $0x1e8] sm:$0xff]  ;;  %v3576_v45 = vpop.permute.xlu1 %3575 }
 0x165   : > { %649 = vst.msk [vmem:[#allocation2 + $0x319] sm:$0xff] %vm588_vm0, %v9872_v9  ;;  %651 = vst.msk [vmem:[#allocation2 + $0x331] sm:$0xff] %vm588_vm0, %v9876_v10  ;;  %v3725_v32 = vld [vmem:[#allocation2 + $0x170] sm:$0xff]  ;;  %v3720_v37 = vld [vmem:[#allocation2 + $0x138] sm:$0xff] }
 0x166   : > { %3796 = vst.msk [vmem:[#allocation4 + $0x60] sm:$0xff] %vm286_vm3, %v11226_v59  ;;  %3790 = vst.msk [vmem:[#allocation4] sm:$0xff] %vm286_vm3, %v3758_v47  ;;  %v3729_v48 = vld [vmem:[#allocation2 + $0x1d0] sm:$0xff]  ;;  %3952 = vrot.lane.b32.xlu1 %v11238_v11, %s9962_s9  ;;  %v11290_v62 = vpack.c.bf16 %v3721_v51, %v3720_v37  ;;  %v3730_v12 = vld [vmem:[#allocation2 + $0x1e0] sm:$0xff]  ;;  %3958 = vrot.lane.b32.xlu0 %v11282_v38, %s9962_s9 }
 0x167   : > { %650 = vst.msk [vmem:[#allocation2 + $0x321] sm:$0xff] %vm588_vm0, %v9873_v43  ;;  %652 = vst.msk [vmem:[#allocation2 + $0x339] sm:$0xff] %vm588_vm0, %v9877_v17  ;;  %v3722_v24 = vld [vmem:[#allocation2 + $0x150] sm:$0xff]  ;;  %v3724_v13 = vld [vmem:[#allocation2 + $0x168] sm:$0xff]  ;;  %v11304_v61 = vpack.c.bf16 %v3731_v57, %v3730_v12 }
 0x168   : > { %3667 = vst.msk [vmem:[#allocation2 + $0x201] sm:$0xff] %vm3629_vm1, %v3572_v25  ;;  %3669 = vst.msk [vmem:[#allocation2 + $0x219] sm:$0xff] %vm3629_vm1, %v3572_v25  ;;  %v11288_v33 = vpack.c.bf16 %v3723_v50, %v3722_v24  ;;  %v3728_v29 = vld [vmem:[#allocation2 + $0x1c8] sm:$0xff]  ;;  %v3835_v5 = vld [vmem:[#allocation2 + $0x99] sm:$0xff]  ;;  %v11306_v6 = vpack.c.bf16 %v3725_v32, %v3724_v13  ;;  %v3574_v32 = vpop.permute.xlu0 %3573 }
 0x169   : > { %3806 = vst.msk [vmem:[#allocation4 + $0x100] sm:$0xff] %vm286_vm3, %v3774_v35  ;;  %5718 = vst.msk [vmem:[#allocation4 + $0x8] sm:$0xff] %vm286_vm3, %v11247_v42  ;;  %v11308_v15 = vpack.c.bf16 %v3729_v48, %v3728_v29  ;;  %v3833_v22 = vld [vmem:[#allocation2 + $0x81] sm:$0xff]  ;;  %v3834_v8 = vld [vmem:[#allocation2 + $0x91] sm:$0xff] }
 0x16a   : > { %3791 = vst.msk [vmem:[#allocation4 + $0x10] sm:$0xff] %vm286_vm3, %v11249_v44  ;;  %3797 = vst.msk [vmem:[#allocation4 + $0x70] sm:$0xff] %vm286_vm3, %v11255_v46  ;;  %3956 = vrot.lane.b32.xlu1 %v11292_v19, %s9962_s9  ;;  %v11324_v9 = vpack.c.bf16 %v3835_v5, %v3834_v8  ;;  %v3832_v10 = vld [vmem:[#allocation2 + $0x79] sm:$0xff]  ;;  %v3839_v63 = vld [vmem:[#allocation2 + $0xc9] sm:$0xff] }
 0x16b   : > { %3792 = vst.msk [vmem:[#allocation4 + $0x20] sm:$0xff] %vm286_vm3, %v11261_v27  ;;  %3798 = vst.msk [vmem:[#allocation4 + $0x80] sm:$0xff] %vm286_vm3, %v11264_v53  ;;  %v11326_v49 = vpack.c.bf16 %v3833_v22, %v3832_v10  ;;  %v3837_v7 = vld [vmem:[#allocation2 + $0xb1] sm:$0xff]  ;;  %v3838_v18 = vld [vmem:[#allocation2 + $0xc1] sm:$0xff] }
 0x16c   : > { %3666 = vst.msk [vmem:[#allocation2 + $0x1f9] sm:$0xff] %vm3629_vm1, %v3570_v1  ;;  %3668 = vst.msk [vmem:[#allocation2 + $0x211] sm:$0xff] %vm3629_vm1, %v3570_v1  ;;  %3962 = vrot.lane.b32.xlu0 %v11324_v9, %s9962_s9  ;;  %v11333_v54 = vpack.c.bf16 %v3839_v63, %v3838_v18  ;;  %v3836_v30 = vld [vmem:[#allocation2 + $0xa9] sm:$0xff]  ;;  %v3843_v47 = vld [vmem:[#allocation2 + $0xf9] sm:$0xff] }
 0x16d   : > { %3800 = vst.msk [vmem:[#allocation4 + $0xa0] sm:$0xff] %vm286_vm3, %v11274_v4  ;;  %3799 = vst.msk [vmem:[#allocation4 + $0x90] sm:$0xff] %vm286_vm3, %v11276_v20  ;;  %v11335_v17 = vpack.c.bf16 %v3837_v7, %v3836_v30  ;;  %v3841_v28 = vld [vmem:[#allocation2 + $0xe1] sm:$0xff]  ;;  %v3842_v40 = vld [vmem:[#allocation2 + $0xf1] sm:$0xff] }
 0x16e   : > { %3802 = vst.msk [vmem:[#allocation4 + $0xc0] sm:$0xff] %vm286_vm3, %v11278_v34  ;;  %3801 = vst.msk [vmem:[#allocation4 + $0xb0] sm:$0xff] %vm286_vm3, %v11280_v23  ;;  %3960 = vrot.lane.b32.xlu1 %v11326_v49, %s9962_s9  ;;  %v3896_v16 = vpack.c.bf16 %v3843_v47, %v3842_v40  ;;  %v3840_v25 = vld [vmem:[#allocation2 + $0xd9] sm:$0xff]  ;;  %v3847_v51 = vld [vmem:[#allocation2 + $0x129] sm:$0xff] }
 0x16f   : > { %3804 = vst.msk [vmem:[#allocation4 + $0xe0] sm:$0xff] %vm286_vm3, %v11288_v33  ;;  %3803 = vst.msk [vmem:[#allocation4 + $0xd0] sm:$0xff] %vm286_vm3, %v11290_v62  ;;  %v5657_v2 = vld [vmem:[#allocation2 + $0x202] sm:$0xff]  ;;  %v5659_v3 = vld [vmem:[#allocation2 + $0x21a] sm:$0xff]  ;;  %v3895_v50 = vpack.c.bf16 %v3841_v28, %v3840_v25  ;;  %v9964_v28 = vmov 0  }
 0x170   : > { %3808 = vst.msk [vmem:[#allocation4 + $0x120] sm:$0xff] %vm286_vm3, %v11304_v61  ;;  %3805 = vst.msk [vmem:[#allocation4 + $0xf0] sm:$0xff] %vm286_vm3, %v11306_v6  ;;  %v5751_v0 = vld [vmem:[#allocation4 + $0x8] sm:$0xff]  ;;  %3966 = vrot.lane.b32.xlu0 %v11333_v54, %s9962_s9  ;;  %v3845_v57 = vld [vmem:[#allocation2 + $0x111] sm:$0xff]  ;;  %5989 = vmatprep.subr.bf16.mxu0 %v9964_v28 }
 0x171   : > { %3807 = vst.msk [vmem:[#allocation4 + $0x110] sm:$0xff] %vm286_vm3, %v11308_v15  ;;  %9543 = vmatprep.mubr.msk.bf16.mxu0 %vm286_vm3, %v5751_v0  ;;  %v3846_v48 = vld [vmem:[#allocation2 + $0x121] sm:$0xff]  ;;  %v3844_v37 = vld [vmem:[#allocation2 + $0x109] sm:$0xff]  ;;  %v3851_v12 = vld [vmem:[#allocation2 + $0x159] sm:$0xff]  ;;  %8695 = vmatprep.subr.bf16.mxu1 %v9964_v28 }
 0x172   : > { %3964 = vrot.lane.b32.xlu1 %v11335_v17, %s9962_s9  ;;  %3671 = vst.msk [vmem:[#allocation2 + $0x231] sm:$0xff] %vm3629_vm1, %v3576_v45  ;;  %3673 = vst.msk [vmem:[#allocation2 + $0x249] sm:$0xff] %vm3629_vm1, %v3576_v45  ;;  %v3898_v24 = vpack.c.bf16 %v3847_v51, %v3846_v48  ;;  %v3897_v1 = vpack.c.bf16 %v3845_v57, %v3844_v37  ;;  %v3849_v13 = vld [vmem:[#allocation2 + $0x141] sm:$0xff]  ;;  %v3850_v29 = vld [vmem:[#allocation2 + $0x151] sm:$0xff]  ;;  %v3580_v48 = vpop.permute.xlu1 %3579 }
 0x173   : > { %v5656_v39 = vld [vmem:[#allocation2 + $0x1fa] sm:$0xff]  ;;  %v5658_v43 = vld [vmem:[#allocation2 + $0x212] sm:$0xff]  ;;  %3670 = vst.msk [vmem:[#allocation2 + $0x229] sm:$0xff] %vm3629_vm1, %v3574_v32  ;;  %3672 = vst.msk [vmem:[#allocation2 + $0x241] sm:$0xff] %vm3629_vm1, %v3574_v32  ;;  %v3900_v5 = vpack.c.bf16 %v3851_v12, %v3850_v29 }
 0x174   : > { %v5703_v55 = vpack.c.bf16 %v5657_v2, %v5656_v39  ;;  %v5704_v31 = vpack.c.bf16 %v5659_v3, %v5658_v43  ;;  %v3734_v26 = vld [vmem:[#allocation2 + $0x210] sm:$0xff]  ;;  %v3735_v21 = vld [vmem:[#allocation2 + $0x218] sm:$0xff]  ;;  %v3733_v14 = vld [vmem:[#allocation2 + $0x200] sm:$0xff]  ;;  %3970 = vrot.lane.b32.xlu0 %v3896_v16, %s9962_s9  ;;  %3675 = vst.msk [vmem:[#allocation2 + $0x261] sm:$0xff] %vm3629_vm1, %v3580_v48 }
 0x175   : > { %v11339_v35 = vpack.c.bf16 %v3735_v21, %v3734_v26  ;;  %v3732_v36 = vld [vmem:[#allocation2 + $0x1f8] sm:$0xff]  ;;  %v3858_v7 = vld [vmem:[#allocation2 + $0x1e1] sm:$0xff]  ;;  %v3859_v0 = vld [vmem:[#allocation2 + $0x1e9] sm:$0xff]  ;;  %3677 = vst.msk [vmem:[#allocation2 + $0x279] sm:$0xff] %vm3629_vm1, %v3580_v48 }
 0x176   : > { %5735 = vst.msk [vmem:[#allocation4 + $0x118] sm:$0xff] %vm286_vm3, %v5703_v55  ;;  %5736 = vst.msk [vmem:[#allocation4 + $0x128] sm:$0xff] %vm286_vm3, %v5704_v31  ;;  %v11345_v41 = vpack.c.bf16 %v3733_v14, %v3732_v36  ;;  %3968 = vrot.lane.b32.xlu1 %v3895_v50, %s9962_s9  ;;  %v3848_v22 = vld [vmem:[#allocation2 + $0x139] sm:$0xff]  ;;  %v3853_v2 = vld [vmem:[#allocation2 + $0x171] sm:$0xff]  ;;  %v3904_v26 = vpack.c.bf16 %v3859_v0, %v3858_v7 }
 0x177   : > { %3810 = vst.msk [vmem:[#allocation4 + $0x140] sm:$0xff] %vm286_vm3, %v11339_v35  ;;  %v3899_v63 = vpack.c.bf16 %v3849_v13, %v3848_v22  ;;  %v3863_v30 = vld [vmem:[#allocation2 + $0x219] sm:$0xff]  ;;  %v3862_v47 = vld [vmem:[#allocation2 + $0x211] sm:$0xff]  ;;  %v3852_v21 = vld [vmem:[#allocation2 + $0x169] sm:$0xff] }
 0x178   : > { %3809 = vst.msk [vmem:[#allocation4 + $0x130] sm:$0xff] %vm286_vm3, %v11345_v41  ;;  %3974 = vrot.lane.b32.xlu0 %v3898_v24, %s9962_s9  ;;  %v3901_v16 = vpack.c.bf16 %v3853_v2, %v3852_v21  ;;  %v3906_v45 = vpack.c.bf16 %v3863_v30, %v3862_v47  ;;  %v3857_v50 = vld [vmem:[#allocation2 + $0x1d1] sm:$0xff]  ;;  %v9929_v32 = vld [vmem:[%s13150_s2] sm:$0xff]   ;;  %v3578_v24 = vpop.permute.xlu0 %3577  ;;  %v3856_v37 = vld [vmem:[#allocation2 + $0x1c9] sm:$0xff] }
 0x179   : > { %v5661_v8 = vld [vmem:[#allocation2 + $0x232] sm:$0xff]  ;;  %v5663_v10 = vld [vmem:[#allocation2 + $0x24a] sm:$0xff]  ;;  %v3861_v12 = vld [vmem:[#allocation2 + $0x201] sm:$0xff]  ;;  %3674 = vst.msk [vmem:[#allocation2 + $0x259] sm:$0xff] %vm3629_vm1, %v3578_v24  ;;  %v3903_v13 = vpack.c.bf16 %v3857_v50, %v3856_v37  ;;  %5990 = vmatpush1.bf16.msra.mxu0 %v9929_v32 }
 0x17a   : > { %3972 = vrot.lane.b32.xlu1 %v3897_v1, %s9962_s9  ;;  %v5660_v3 = vld [vmem:[#allocation2 + $0x22a] sm:$0xff]  ;;  %v5662_v18 = vld [vmem:[#allocation2 + $0x242] sm:$0xff]  ;;  %v3860_v1 = vld [vmem:[#allocation2 + $0x1f9] sm:$0xff]  ;;  %3676 = vst.msk [vmem:[#allocation2 + $0x271] sm:$0xff] %vm3629_vm1, %v3578_v24  ;;  %5991 = vmatprep.subr.bf16.mxu0 %v9964_v28 }
 0x17b   : > { %v5705_v39 = vpack.c.bf16 %v5661_v8, %v5660_v3  ;;  %v5706_v43 = vpack.c.bf16 %v5663_v10, %v5662_v18  ;;  %v3738_v55 = vld [vmem:[#allocation2 + $0x240] sm:$0xff]  ;;  %v3739_v31 = vld [vmem:[#allocation2 + $0x248] sm:$0xff]  ;;  %v3737_v40 = vld [vmem:[#allocation2 + $0x230] sm:$0xff] }
 0x17c   : > { %3978 = vrot.lane.b32.xlu0 %v3900_v5, %s9962_s9  ;;  %v3780_v36 = vpack.c.bf16 %v3739_v31, %v3738_v55  ;;  %v3736_v14 = vld [vmem:[#allocation2 + $0x228] sm:$0xff]  ;;  %v3905_v5 = vpack.c.bf16 %v3861_v12, %v3860_v1  ;;  %v3865_v10 = vld [vmem:[#allocation2 + $0x231] sm:$0xff]  ;;  %v5667_v2 = vld [vmem:[#allocation2 + $0x27a] sm:$0xff]  ;;  %v3582_v48 = vpop.permute.xlu0 %3581 }
 0x17d   : > { %5737 = vst.msk [vmem:[#allocation4 + $0x138] sm:$0xff] %vm286_vm3, %v5705_v39  ;;  %5738 = vst.msk [vmem:[#allocation4 + $0x148] sm:$0xff] %vm286_vm3, %v5706_v43  ;;  %v11365_v25 = vpack.c.bf16 %v3737_v40, %v3736_v14  ;;  %v3866_v51 = vld [vmem:[#allocation2 + $0x241] sm:$0xff]  ;;  %v3867_v57 = vld [vmem:[#allocation2 + $0x249] sm:$0xff] }
 0x17e   : > { %3976 = vrot.lane.b32.xlu1 %v3899_v63, %s9962_s9  ;;  %3812 = vst.msk [vmem:[#allocation4 + $0x160] sm:$0xff] %vm286_vm3, %v3780_v36  ;;  %v3908_v29 = vpack.c.bf16 %v3867_v57, %v3866_v51  ;;  %v9930_v22 = vld [vmem:[%s13150_s2 + $0x8] sm:$0xff]   ;;  %v9931_v7 = vld [vmem:[%s13150_s2 + $0x10] sm:$0xff]   ;;  %v3871_v43 = vld [vmem:[#allocation2 + $0x279] sm:$0xff]  ;;  %v3584_v57 = vpop.permute.xlu1 %3583 }
 0x17f   : > { %3811 = vst.msk [vmem:[#allocation4 + $0x150] sm:$0xff] %vm286_vm3, %v11365_v25  ;;  %v3864_v8 = vld [vmem:[#allocation2 + $0x229] sm:$0xff]  ;;  %5992 = vmatpush1.bf16.msra.mxu0 %v9930_v22  ;;  %v9932_v40 = vld [vmem:[%s13150_s2 + $0x18] sm:$0xff]   ;;  %v9933_v32 = vld [vmem:[%s13150_s2 + $0x20] sm:$0xff]  }
 0x180   : > { %3986 = vrot.lane.b32.xlu0 %v3904_v26, %s9962_s9  ;;  %5993 = vmatprep.subr.bf16.mxu0 %v9964_v28  ;;  %v3907_v63 = vpack.c.bf16 %v3865_v10, %v3864_v8  ;;  %v5665_v0 = vld [vmem:[#allocation2 + $0x262] sm:$0xff]  ;;  %v5664_v3 = vld [vmem:[#allocation2 + $0x25a] sm:$0xff]  ;;  %3679 = vst.msk [vmem:[#allocation2 + $0x291] sm:$0xff] %vm3629_vm1, %v3584_v57  ;;  %3681 = vst.msk [vmem:[#allocation2 + $0x2a9] sm:$0xff] %vm3629_vm1, %v3584_v57 }
 0x181   : > { %v5666_v18 = vld [vmem:[#allocation2 + $0x272] sm:$0xff]  ;;  %v5707_v30 = vpack.c.bf16 %v5665_v0, %v5664_v3  ;;  %v3869_v26 = vld [vmem:[#allocation2 + $0x261] sm:$0xff]  ;;  %3678 = vst.msk [vmem:[#allocation2 + $0x289] sm:$0xff] %vm3629_vm1, %v3582_v48  ;;  %3680 = vst.msk [vmem:[#allocation2 + $0x2a1] sm:$0xff] %vm3629_vm1, %v3582_v48 }
 0x182   : > { %3980 = vrot.lane.b32.xlu1 %v3901_v16, %s9962_s9  ;;  %v3870_v39 = vld [vmem:[#allocation2 + $0x271] sm:$0xff]  ;;  %v5708_v47 = vpack.c.bf16 %v5667_v2, %v5666_v18  ;;  %v3868_v31 = vld [vmem:[#allocation2 + $0x259] sm:$0xff]  ;;  %v9934_v24 = vld [vmem:[%s13150_s2 + $0x28] sm:$0xff]  }
 0x183   : > { %5994 = vmatpush1.bf16.msra.mxu0 %v9931_v7  ;;  %v3910_v55 = vpack.c.bf16 %v3871_v43, %v3870_v39  ;;  %v3742_v21 = vld [vmem:[#allocation2 + $0x270] sm:$0xff]  ;;  %5739 = vst.msk [vmem:[#allocation4 + $0x158] sm:$0xff] %vm286_vm3, %v5707_v30  ;;  %v3909_v36 = vpack.c.bf16 %v3869_v26, %v3868_v31  ;;  %v3743_v14 = vld [vmem:[#allocation2 + $0x278] sm:$0xff]  ;;  %v3741_v50 = vld [vmem:[#allocation2 + $0x260] sm:$0xff] }
 0x184   : > { %3990 = vrot.lane.b32.xlu0 %v3906_v45, %s9962_s9  ;;  %5995 = vmatprep.subr.bf16.mxu0 %v9964_v28  ;;  %v3740_v16 = vld [vmem:[#allocation2 + $0x258] sm:$0xff]  ;;  %5740 = vst.msk [vmem:[#allocation4 + $0x168] sm:$0xff] %vm286_vm3, %v5708_v47  ;;  %v3782_v45 = vpack.c.bf16 %v3743_v14, %v3742_v21  ;;  %v9935_v47 = vld [vmem:[%s13150_s2 + $0x30] sm:$0xff]   ;;  %v4851_v26 = vld [vmem:[#allocation2 + $0x22] sm:$0xff] }
 0x185   : > { %v3781_v51 = vpack.c.bf16 %v3741_v50, %v3740_v16  ;;  %v4850_v31 = vld [vmem:[#allocation2 + $0x1a] sm:$0xff]  ;;  %v4855_v48 = vld [vmem:[#allocation2 + $0x52] sm:$0xff] }
 0x186   : > { %3984 = vrot.lane.b32.xlu1 %v3903_v13, %s9962_s9  ;;  %3814 = vst.msk [vmem:[#allocation4 + $0x180] sm:$0xff] %vm286_vm3, %v3782_v45  ;;  %v4914_v21 = vpack.c.bf16 %v4851_v26, %v4850_v31  ;;  %v4859_v31 = vld [vmem:[#allocation2 + $0x82] sm:$0xff] }
 0x187   : > { %5996 = vmatpush1.bf16.msra.mxu0 %v9932_v40  ;;  %3813 = vst.msk [vmem:[#allocation4 + $0x170] sm:$0xff] %vm286_vm3, %v3781_v51  ;;  %v5669_v37 = vld [vmem:[#allocation2 + $0x292] sm:$0xff]  ;;  %v5671_v1 = vld [vmem:[#allocation2 + $0x2aa] sm:$0xff] }
 0x188   : > { %3994 = vrot.lane.b32.xlu0 %v3908_v29, %s9962_s9  ;;  %5997 = vmatprep.subr.bf16.mxu0 %v9964_v28  ;;  %v3875_v12 = vld [vmem:[#allocation2 + $0x2a9] sm:$0xff]  ;;  %v3873_v7 = vld [vmem:[#allocation2 + $0x291] sm:$0xff]  ;;  %v3746_v0 = vld [vmem:[#allocation2 + $0x2a0] sm:$0xff] }
 0x189   : > { %v5668_v13 = vld [vmem:[#allocation2 + $0x28a] sm:$0xff]  ;;  %v5670_v29 = vld [vmem:[#allocation2 + $0x2a2] sm:$0xff] }
 0x18a   : > { %3988 = vrot.lane.b32.xlu1 %v3905_v5, %s9962_s9  ;;  %v3874_v5 = vld [vmem:[#allocation2 + $0x2a1] sm:$0xff]  ;;  %v5709_v22 = vpack.c.bf16 %v5669_v37, %v5668_v13  ;;  %v5710_v8 = vpack.c.bf16 %v5671_v1, %v5670_v29  ;;  %v3745_v30 = vld [vmem:[#allocation2 + $0x290] sm:$0xff] }
 0x18b   : > { %5998 = vmatpush1.bf16.msra.mxu0 %v9933_v32  ;;  %v3912_v10 = vpack.c.bf16 %v3875_v12, %v3874_v5  ;;  %v3747_v3 = vld [vmem:[#allocation2 + $0x2a8] sm:$0xff] }
 0x18c   : > { %3998 = vrot.lane.b32.xlu0 %v3910_v55, %s9962_s9  ;;  %5999 = vmatprep.subr.bf16.mxu0 %v9964_v28  ;;  %v3744_v18 = vld [vmem:[#allocation2 + $0x288] sm:$0xff]  ;;  %5741 = vst.msk [vmem:[#allocation4 + $0x178] sm:$0xff] %vm286_vm3, %v5709_v22  ;;  %5742 = vst.msk [vmem:[#allocation4 + $0x188] sm:$0xff] %vm286_vm3, %v5710_v8  ;;  %v3784_v39 = vpack.c.bf16 %v3747_v3, %v3746_v0  ;;  %v9936_v55 = vld [vmem:[%s13150_s2 + $0x38] sm:$0xff]  }
 0x18d   : > { %v3783_v43 = vpack.c.bf16 %v3745_v30, %v3744_v18  ;;  %v4854_v32 = vld [vmem:[#allocation2 + $0x4a] sm:$0xff] }
 0x18e   : > { %3992 = vrot.lane.b32.xlu1 %v3907_v63, %s9962_s9  ;;  %v3872_v63 = vld [vmem:[#allocation2 + $0x289] sm:$0xff]  ;;  %3816 = vst.msk [vmem:[#allocation4 + $0x1a0] sm:$0xff] %vm286_vm3, %v3784_v39  ;;  %v4916_v12 = vpack.c.bf16 %v4855_v48, %v4854_v32 }
 0x18f   : > { %6000 = vmatpush1.bf16.msra.mxu0 %v9934_v24  ;;  %v3911_v2 = vpack.c.bf16 %v3873_v7, %v3872_v63  ;;  %3815 = vst.msk [vmem:[#allocation4 + $0x190] sm:$0xff] %vm286_vm3, %v3783_v43  ;;  %v4857_v13 = vld [vmem:[#allocation2 + $0x6a] sm:$0xff] }
 0x190   : > { %6001 = vmatprep.subr.bf16.mxu0 %v9964_v28  ;;  %4002 = vrot.lane.b32.xlu0 %v3912_v10, %s9962_s9 }
 0x192   : > { %3996 = vrot.lane.b32.xlu1 %v3909_v36, %s9962_s9  ;;  %v9937_v36 = vld [vmem:[%s13150_s2 + $0x40] sm:$0xff]  }
 0x193   : > { %6002 = vmatpush1.bf16.msra.mxu0 %v9935_v47 }
 0x194   : > { %6003 = vmatprep.subr.bf16.mxu0 %v9964_v28  ;;  %4464 = vrot.lane.b32.xlu0 %v11249_v44, %s9965_s30 }
 0x196   : > { %4000 = vrot.lane.b32.xlu1 %v3911_v2, %s9962_s9 }
 0x197   : > { %6004 = vmatpush1.bf16.msra.mxu0 %v9936_v55  ;;  %v4858_v55 = vld [vmem:[#allocation2 + $0x7a] sm:$0xff] }
 0x198   : > { %6005 = vmatprep.subr.bf16.mxu0 %v9964_v28  ;;  %4978 = vrot.lane.b32.xlu0 %v4914_v21, %s9967_s12  ;;  %v4918_v26 = vpack.c.bf16 %v4859_v31, %v4858_v55 }
 0x19a   : > { %4721 = vrot.lane.b32.xlu1 %v11238_v11, %s9966_s7 }
 0x19b   : > { %6006 = vmatpush1.bf16.msra.mxu0 %v9937_v36 }
 0x19c   : > { %5493 = vrot.lane.b32.xlu0 %v11236_v56, %s9969_s14 }
 0x19e   : > { %5236 = vrot.lane.b32.xlu1 %v11261_v27, %s9968_s13 }
 0x1a0   : > { %4466 = vrot.lane.b32.xlu0 %v11261_v27, %s9965_s30 }
 0x1a2   : > { %4209 = vrot.lane.b32.xlu1 %v4914_v21, %s9963_s10 }
 0x1a3   : > { %v3586_v44 = vpop.permute.xlu0 %3585 }
 0x1a4   : > { %3682 = vst.msk [vmem:[#allocation2 + $0x2b9] sm:$0xff] %vm3629_vm1, %v3586_v44  ;;  %3684 = vst.msk [vmem:[#allocation2 + $0x2d1] sm:$0xff] %vm3629_vm1, %v3586_v44  ;;  %4980 = vrot.lane.b32.xlu0 %v11247_v42, %s9967_s12 }
 0x1a6   : > { %4723 = vrot.lane.b32.xlu1 %v11236_v56, %s9966_s7 }
 0x1a8   : > { %5495 = vrot.lane.b32.xlu0 %v11292_v19, %s9969_s14 }
 0x1a9   : > { %v3588_v11 = vpop.permute.xlu1 %3587 }
 0x1aa   : > { %3683 = vst.msk [vmem:[#allocation2 + $0x2c1] sm:$0xff] %vm3629_vm1, %v3588_v11  ;;  %3685 = vst.msk [vmem:[#allocation2 + $0x2d9] sm:$0xff] %vm3629_vm1, %v3588_v11  ;;  %5238 = vrot.lane.b32.xlu1 %v11179_v52, %s9968_s13 }
 0x1ab   : > { %v3748_v51 = vld [vmem:[#allocation2 + $0x2b8] sm:$0xff]  ;;  %v3750_v57 = vld [vmem:[#allocation2 + $0x2d0] sm:$0xff] }
 0x1ac   : > { %4468 = vrot.lane.b32.xlu0 %v11179_v52, %s9965_s30 }
 0x1ae   : > { %4211 = vrot.lane.b32.xlu1 %v11247_v42, %s9963_s10 }
 0x1b0   : > { %v3590_v16 = vpop.permute.xlu0 %3589  ;;  %4982 = vrot.lane.b32.xlu0 %v4916_v12, %s9967_s12 }
 0x1b1   : > { %v5672_v14 = vld [vmem:[#allocation2 + $0x2ba] sm:$0xff]  ;;  %v5673_v40 = vld [vmem:[#allocation2 + $0x2c2] sm:$0xff]  ;;  %v5674_v27 = vld [vmem:[#allocation2 + $0x2d2] sm:$0xff]  ;;  %3686 = vst.msk [vmem:[#allocation2 + $0x2e9] sm:$0xff] %vm3629_vm1, %v3590_v16 }
 0x1b2   : > { %v5675_v56 = vld [vmem:[#allocation2 + $0x2da] sm:$0xff]  ;;  %v5711_v45 = vpack.c.bf16 %v5673_v40, %v5672_v14  ;;  %3688 = vst.msk [vmem:[#allocation2 + $0x301] sm:$0xff] %vm3629_vm1, %v3590_v16  ;;  %4725 = vrot.lane.b32.xlu1 %v11292_v19, %s9966_s7  ;;  %v4856_v19 = vld [vmem:[#allocation2 + $0x62] sm:$0xff] }
 0x1b3   : > { %v5712_v50 = vpack.c.bf16 %v5675_v56, %v5674_v27  ;;  %v3749_v24 = vld [vmem:[#allocation2 + $0x2c0] sm:$0xff]  ;;  %v3751_v42 = vld [vmem:[#allocation2 + $0x2d8] sm:$0xff]  ;;  %v4917_v10 = vpack.c.bf16 %v4857_v13, %v4856_v19 }
 0x1b4   : > { %5743 = vst.msk [vmem:[#allocation4 + $0x198] sm:$0xff] %vm286_vm3, %v5711_v45  ;;  %v3785_v37 = vpack.c.bf16 %v3749_v24, %v3748_v51  ;;  %v3786_v1 = vpack.c.bf16 %v3751_v42, %v3750_v57  ;;  %5497 = vrot.lane.b32.xlu0 %v11282_v38, %s9969_s14  ;;  %v4860_v51 = vld [vmem:[#allocation2 + $0x92] sm:$0xff]  ;;  %v4861_v57 = vld [vmem:[#allocation2 + $0x9a] sm:$0xff] }
 0x1b5   : > { %5744 = vst.msk [vmem:[#allocation4 + $0x1a8] sm:$0xff] %vm286_vm3, %v5712_v50  ;;  %v4919_v24 = vpack.c.bf16 %v4861_v57, %v4860_v51  ;;  %v4870_v51 = vld [vmem:[#allocation2 + $0x10a] sm:$0xff]  ;;  %v4871_v57 = vld [vmem:[#allocation2 + $0x112] sm:$0xff] }
 0x1b6   : > { %3817 = vst.msk [vmem:[#allocation4 + $0x1b0] sm:$0xff] %vm286_vm3, %v3785_v37  ;;  %3818 = vst.msk [vmem:[#allocation4 + $0x1c0] sm:$0xff] %vm286_vm3, %v3786_v1  ;;  %5240 = vrot.lane.b32.xlu1 %v11190_v58, %s9968_s13 }
 0x1b8   : > { %4470 = vrot.lane.b32.xlu0 %v11190_v58, %s9965_s30  ;;  %v3752_v2 = vld [vmem:[#allocation2 + $0x2e8] sm:$0xff] }
 0x1b9   : > { %v3592_v52 = vpop.permute.xlu1 %3591  ;;  %v3754_v3 = vld [vmem:[#allocation2 + $0x300] sm:$0xff] }
 0x1ba   : > { %3687 = vst.msk [vmem:[#allocation2 + $0x2f1] sm:$0xff] %vm3629_vm1, %v3592_v52  ;;  %3689 = vst.msk [vmem:[#allocation2 + $0x309] sm:$0xff] %vm3629_vm1, %v3592_v52  ;;  %4213 = vrot.lane.b32.xlu1 %v4916_v12, %s9963_s10  ;;  %v4862_v12 = vld [vmem:[#allocation2 + $0xaa] sm:$0xff]  ;;  %v4863_v52 = vld [vmem:[#allocation2 + $0xb2] sm:$0xff] }
 0x1bb   : > { %v4920_v13 = vpack.c.bf16 %v4863_v52, %v4862_v12  ;;  %v5753_v52 = vld [vmem:[#allocation4 + $0x18] sm:$0xff] }
 0x1bc   : > { %4984 = vrot.lane.b32.xlu0 %v4917_v10, %s9967_s12 }
 0x1be   : > { %4727 = vrot.lane.b32.xlu1 %v11282_v38, %s9966_s7 }
 0x1c0   : > { %v3594_v29 = vpop.permute.xlu0 %3593  ;;  %5499 = vrot.lane.b32.xlu0 %v11326_v49, %s9969_s14 }
 0x1c1   : > { %v5676_v5 = vld [vmem:[#allocation2 + $0x2ea] sm:$0xff]  ;;  %v5677_v22 = vld [vmem:[#allocation2 + $0x2f2] sm:$0xff]  ;;  %v5678_v8 = vld [vmem:[#allocation2 + $0x302] sm:$0xff]  ;;  %3690 = vst.msk [vmem:[#allocation2 + $0x319] sm:$0xff] %vm3629_vm1, %v3594_v29 }
 0x1c2   : > { %3692 = vst.msk [vmem:[#allocation2 + $0x331] sm:$0xff] %vm3629_vm1, %v3594_v29  ;;  %v5679_v63 = vld [vmem:[#allocation2 + $0x30a] sm:$0xff]  ;;  %v5713_v7 = vpack.c.bf16 %v5677_v22, %v5676_v5  ;;  %5242 = vrot.lane.b32.xlu1 %v11192_v60, %s9968_s13 }
 0x1c3   : > { %v5714_v0 = vpack.c.bf16 %v5679_v63, %v5678_v8  ;;  %v3753_v38 = vld [vmem:[#allocation2 + $0x2f0] sm:$0xff]  ;;  %v3755_v18 = vld [vmem:[#allocation2 + $0x308] sm:$0xff] }
 0x1c4   : > { %5745 = vst.msk [vmem:[#allocation4 + $0x1b8] sm:$0xff] %vm286_vm3, %v5713_v7  ;;  %v3787_v30 = vpack.c.bf16 %v3753_v38, %v3752_v2  ;;  %v3788_v39 = vpack.c.bf16 %v3755_v18, %v3754_v3  ;;  %4472 = vrot.lane.b32.xlu0 %v11192_v60, %s9965_s30  ;;  %v4607_v8 = vld [vmem:[#allocation2 + $0xc1] sm:$0xff]  ;;  %v4865_v7 = vld [vmem:[#allocation2 + $0xca] sm:$0xff]  ;;  %v5379_v38 = vld [vmem:[#allocation2 + $0xd9] sm:$0xff] }
 0x1c5   : > { %5746 = vst.msk [vmem:[#allocation4 + $0x1c8] sm:$0xff] %vm286_vm3, %v5714_v0  ;;  %v4864_v63 = vld [vmem:[#allocation2 + $0xc2] sm:$0xff] }
 0x1c6   : > { %3819 = vst.msk [vmem:[#allocation4 + $0x1d0] sm:$0xff] %vm286_vm3, %v3787_v30  ;;  %3820 = vst.msk [vmem:[#allocation4 + $0x1e0] sm:$0xff] %vm286_vm3, %v3788_v39  ;;  %4215 = vrot.lane.b32.xlu1 %v4917_v10, %s9963_s10 }
 0x1c8   : > { %v3951_v58 = vpop.permute.xlu0 %3950  ;;  %4986 = vrot.lane.b32.xlu0 %v4918_v26, %s9967_s12  ;;  %v3756_v16 = vld [vmem:[#allocation2 + $0x318] sm:$0xff] }
 0x1c9   : > { %4047 = vst.msk [vmem:[#allocation4] sm:$0xff] %vm4046_vm5, %v3951_v58  ;;  %v5380_v58 = vld [vmem:[#allocation2 + $0xe1] sm:$0xff] }
 0x1ca   : > { %4729 = vrot.lane.b32.xlu1 %v11326_v49, %s9966_s7  ;;  %v5436_v30 = vpack.c.bf16 %v5380_v58, %v5379_v38  ;;  %v4875_v58 = vld [vmem:[#allocation2 + $0x142] sm:$0xff] }
 0x1cc   : > { %v3983_v43 = vpop.permute.xlu0 %3982  ;;  %5501 = vrot.lane.b32.xlu0 %v11324_v9, %s9969_s14 }
 0x1cd   : > { %4063 = vst.msk [vmem:[#allocation4 + $0x100] sm:$0xff] %vm4046_vm5, %v3983_v43  ;;  %v4866_v43 = vld [vmem:[#allocation2 + $0xda] sm:$0xff] }
 0x1ce   : > { %5244 = vrot.lane.b32.xlu1 %v11226_v59, %s9968_s13 }
 0x1d0   : > { %v3596_v47 = vpop.permute.xlu1 %3595  ;;  %4474 = vrot.lane.b32.xlu0 %v11226_v59, %s9965_s30 }
 0x1d1   : > { %3691 = vst.msk [vmem:[#allocation2 + $0x321] sm:$0xff] %vm3629_vm1, %v3596_v47  ;;  %3693 = vst.msk [vmem:[#allocation2 + $0x339] sm:$0xff] %vm3629_vm1, %v3596_v47  ;;  %v4867_v47 = vld [vmem:[#allocation2 + $0xe2] sm:$0xff] }
 0x1d2   : > { %4217 = vrot.lane.b32.xlu1 %v4918_v26, %s9963_s10  ;;  %v4922_v31 = vpack.c.bf16 %v4867_v47, %v4866_v43 }
 0x1d4   : > { %v4208_v21 = vpop.permute.xlu1 %4207  ;;  %v3955_v36 = vpop.permute.xlu0 %3954  ;;  %4988 = vrot.lane.b32.xlu0 %v4919_v24, %s9967_s12 }
 0x1d5   : > { %4304 = vst.msk [vmem:[#allocation4] sm:$0xff] %vm4303_vm6, %v4208_v21  ;;  %v5382_v21 = vld [vmem:[#allocation2 + $0xf9] sm:$0xff] }
 0x1d6   : > { %4049 = vst.msk [vmem:[#allocation4 + $0x20] sm:$0xff] %vm4046_vm5, %v3955_v36  ;;  %4731 = vrot.lane.b32.xlu1 %v11324_v9, %s9966_s7  ;;  %v5381_v36 = vld [vmem:[#allocation2 + $0xf1] sm:$0xff] }
 0x1d8   : > { %v5680_v44 = vld [vmem:[#allocation2 + $0x31a] sm:$0xff]  ;;  %v5681_v11 = vld [vmem:[#allocation2 + $0x322] sm:$0xff]  ;;  %v5682_v14 = vld [vmem:[#allocation2 + $0x332] sm:$0xff]  ;;  %v3953_v60 = vpop.permute.xlu1 %3952  ;;  %v3959_v56 = vpop.permute.xlu0 %3958  ;;  %5503 = vrot.lane.b32.xlu0 %v11335_v17, %s9969_s14 }
 0x1d9   : > { %v5683_v40 = vld [vmem:[#allocation2 + $0x33a] sm:$0xff]  ;;  %v5715_v27 = vpack.c.bf16 %v5681_v11, %v5680_v44  ;;  %4048 = vst.msk [vmem:[#allocation4 + $0x10] sm:$0xff] %vm4046_vm5, %v3953_v60  ;;  %4051 = vst.msk [vmem:[#allocation4 + $0x40] sm:$0xff] %vm4046_vm5, %v3959_v56  ;;  %v5437_v44 = vpack.c.bf16 %v5382_v21, %v5381_v36  ;;  %v4876_v36 = vld [vmem:[#allocation2 + $0x152] sm:$0xff] }
 0x1da   : > { %v5716_v49 = vpack.c.bf16 %v5683_v40, %v5682_v14  ;;  %v3757_v50 = vld [vmem:[#allocation2 + $0x320] sm:$0xff]  ;;  %5246 = vrot.lane.b32.xlu1 %v11255_v46, %s9968_s13 }
 0x1db   : > { %5747 = vst.msk [vmem:[#allocation4 + $0x1d8] sm:$0xff] %vm286_vm3, %v5715_v27  ;;  %v3789_v32 = vpack.c.bf16 %v3757_v50, %v3756_v16  ;;  %v4869_v11 = vld [vmem:[#allocation2 + $0xfa] sm:$0xff]  ;;  %v5384_v27 = vld [vmem:[#allocation2 + $0x111] sm:$0xff] }
 0x1dc   : > { %5748 = vst.msk [vmem:[#allocation4 + $0x1e8] sm:$0xff] %vm286_vm3, %v5716_v49  ;;  %v3957_v45 = vpop.permute.xlu1 %3956  ;;  %4476 = vrot.lane.b32.xlu0 %v11255_v46, %s9965_s30  ;;  %v4608_v46 = vld [vmem:[#allocation2 + $0xc9] sm:$0xff] }
 0x1dd   : > { %4050 = vst.msk [vmem:[#allocation4 + $0x30] sm:$0xff] %vm4046_vm5, %v3957_v45  ;;  %v4664_v0 = vpack.c.bf16 %v4608_v46, %v4607_v8  ;;  %v5383_v49 = vld [vmem:[#allocation2 + $0x109] sm:$0xff]  ;;  %v5387_v8 = vld [vmem:[#allocation2 + $0x139] sm:$0xff] }
 0x1de   : > { %v3963_v48 = vpop.permute.xlu0 %3962  ;;  %3821 = vst.msk [vmem:[#allocation4 + $0x1f0] sm:$0xff] %vm286_vm3, %v3789_v32  ;;  %4219 = vrot.lane.b32.xlu1 %v4919_v24, %s9963_s10 }
 0x1df   : > { %4053 = vst.msk [vmem:[#allocation4 + $0x60] sm:$0xff] %vm4046_vm5, %v3963_v48  ;;  %v4924_v48 = vpack.c.bf16 %v4871_v57, %v4870_v51  ;;  %v4879_v51 = vld [vmem:[#allocation2 + $0x172] sm:$0xff]  ;;  %v5137_v57 = vld [vmem:[#allocation2 + $0x188] sm:$0xff] }
 0x1e0   : > { %v3961_v42 = vpop.permute.xlu1 %3960  ;;  %4990 = vrot.lane.b32.xlu0 %v4920_v13, %s9967_s12 }
 0x1e1   : > { %4052 = vst.msk [vmem:[#allocation4 + $0x50] sm:$0xff] %vm4046_vm5, %v3961_v42  ;;  %v5386_v42 = vld [vmem:[#allocation2 + $0x129] sm:$0xff] }
 0x1e2   : > { %v3967_v37 = vpop.permute.xlu0 %3966  ;;  %4733 = vrot.lane.b32.xlu1 %v11335_v17, %s9966_s7 }
 0x1e3   : > { %4055 = vst.msk [vmem:[#allocation4 + $0x80] sm:$0xff] %vm4046_vm5, %v3967_v37  ;;  %v5385_v37 = vld [vmem:[#allocation2 + $0x121] sm:$0xff] }
 0x1e4   : > { %v3965_v59 = vpop.permute.xlu1 %3964  ;;  %5505 = vrot.lane.b32.xlu0 %v11333_v54, %s9969_s14  ;;  %v4921_v54 = vpack.c.bf16 %v4865_v7, %v4864_v63 }
 0x1e5   : > { %4054 = vst.msk [vmem:[#allocation4 + $0x70] sm:$0xff] %vm4046_vm5, %v3965_v59  ;;  %v5439_v59 = vpack.c.bf16 %v5386_v42, %v5385_v37  ;;  %v5394_v37 = vld [vmem:[#allocation2 + $0x189] sm:$0xff] }
 0x1e6   : > { %v3971_v9 = vpop.permute.xlu0 %3970  ;;  %5248 = vrot.lane.b32.xlu1 %v11264_v53, %s9968_s13 }
 0x1e7   : > { %4057 = vst.msk [vmem:[#allocation4 + $0xa0] sm:$0xff] %vm4046_vm5, %v3971_v9 }
 0x1e8   : > { %v3969_v1 = vpop.permute.xlu1 %3968  ;;  %4478 = vrot.lane.b32.xlu0 %v11264_v53, %s9965_s30 }
 0x1e9   : > { %4056 = vst.msk [vmem:[#allocation4 + $0x90] sm:$0xff] %vm4046_vm5, %v3969_v1 }
 0x1ea   : > { %v3975_v19 = vpop.permute.xlu0 %3974  ;;  %4221 = vrot.lane.b32.xlu1 %v4920_v13, %s9963_s10  ;;  %v4872_v13 = vld [vmem:[#allocation2 + $0x122] sm:$0xff] }
 0x1eb   : > { %4059 = vst.msk [vmem:[#allocation4 + $0xc0] sm:$0xff] %vm4046_vm5, %v3975_v19 }
 0x1ec   : > { %v3973_v29 = vpop.permute.xlu1 %3972  ;;  %4992 = vrot.lane.b32.xlu0 %v4921_v54, %s9967_s12 }
 0x1ed   : > { %4058 = vst.msk [vmem:[#allocation4 + $0xb0] sm:$0xff] %vm4046_vm5, %v3973_v29  ;;  %v4873_v29 = vld [vmem:[#allocation2 + $0x12a] sm:$0xff] }
 0x1ee   : > { %v3979_v5 = vpop.permute.xlu0 %3978  ;;  %4735 = vrot.lane.b32.xlu1 %v4664_v0, %s9966_s7 }
 0x1ef   : > { %4061 = vst.msk [vmem:[#allocation4 + $0xe0] sm:$0xff] %vm4046_vm5, %v3979_v5 }
 0x1f0   : > { %v3977_v22 = vpop.permute.xlu1 %3976  ;;  %5507 = vrot.lane.b32.xlu0 %v5436_v30, %s9969_s14 }
 0x1f1   : > { %4060 = vst.msk [vmem:[#allocation4 + $0xd0] sm:$0xff] %vm4046_vm5, %v3977_v22  ;;  %v4925_v22 = vpack.c.bf16 %v4873_v29, %v4872_v13  ;;  %v5139_v13 = vld [vmem:[#allocation2 + $0x1a0] sm:$0xff]  ;;  %v5761_v29 = vld [vmem:[#allocation4 + $0x58] sm:$0xff] }
 0x1f2   : > { %v3987_v17 = vpop.permute.xlu0 %3986  ;;  %5250 = vrot.lane.b32.xlu1 %v11276_v20, %s9968_s13 }
 0x1f3   : > { %4065 = vst.msk [vmem:[#allocation4 + $0x120] sm:$0xff] %vm4046_vm5, %v3987_v17  ;;  %v5388_v17 = vld [vmem:[#allocation2 + $0x141] sm:$0xff] }
 0x1f4   : > { %v3981_v10 = vpop.permute.xlu1 %3980  ;;  %4480 = vrot.lane.b32.xlu0 %v11276_v20, %s9965_s30  ;;  %v4868_v20 = vld [vmem:[#allocation2 + $0xf2] sm:$0xff] }
 0x1f5   : > { %4062 = vst.msk [vmem:[#allocation4 + $0xf0] sm:$0xff] %vm4046_vm5, %v3981_v10  ;;  %v4923_v60 = vpack.c.bf16 %v4869_v11, %v4868_v20  ;;  %v5440_v10 = vpack.c.bf16 %v5388_v17, %v5387_v8  ;;  %v5395_v17 = vld [vmem:[#allocation2 + $0x199] sm:$0xff]  ;;  %v5396_v8 = vld [vmem:[#allocation2 + $0x1a1] sm:$0xff] }
 0x1f6   : > { %v3991_v2 = vpop.permute.xlu0 %3990  ;;  %4223 = vrot.lane.b32.xlu1 %v4921_v54, %s9963_s10 }
 0x1f7   : > { %4067 = vst.msk [vmem:[#allocation4 + $0x140] sm:$0xff] %vm4046_vm5, %v3991_v2  ;;  %v5755_v2 = vld [vmem:[#allocation4 + $0x28] sm:$0xff] }
 0x1f8   : > { %v3985_v3 = vpop.permute.xlu1 %3984  ;;  %4994 = vrot.lane.b32.xlu0 %v4922_v31, %s9967_s12 }
 0x1f9   : > { %4064 = vst.msk [vmem:[#allocation4 + $0x110] sm:$0xff] %vm4046_vm5, %v3985_v3  ;;  %v4874_v3 = vld [vmem:[#allocation2 + $0x13a] sm:$0xff] }
 0x1fa   : > { %v3995_v18 = vpop.permute.xlu0 %3994  ;;  %4737 = vrot.lane.b32.xlu1 %v5436_v30, %s9966_s7 }
 0x1fb   : > { %4069 = vst.msk [vmem:[#allocation4 + $0x160] sm:$0xff] %vm4046_vm5, %v3995_v18  ;;  %v4926_v18 = vpack.c.bf16 %v4875_v58, %v4874_v3  ;;  %v5653_v3 = vld [vmem:[#allocation2 + $0x1a2] sm:$0xff]  ;;  %v5444_v58 = vpack.c.bf16 %v5396_v8, %v5395_v17  ;;  %v5402_v17 = vld [vmem:[#allocation2 + $0x219] sm:$0xff] }
 0x1fc   : > { %v3989_v53 = vpop.permute.xlu1 %3988  ;;  %5509 = vrot.lane.b32.xlu0 %v5437_v44, %s9969_s14 }
 0x1fd   : > { %4066 = vst.msk [vmem:[#allocation4 + $0x130] sm:$0xff] %vm4046_vm5, %v3989_v53  ;;  %v5390_v53 = vld [vmem:[#allocation2 + $0x159] sm:$0xff] }
 0x1fe   : > { %v3999_v55 = vpop.permute.xlu0 %3998  ;;  %5252 = vrot.lane.b32.xlu1 %v11274_v4, %s9968_s13 }
 0x1ff   : > { %4071 = vst.msk [vmem:[#allocation4 + $0x180] sm:$0xff] %vm4046_vm5, %v3999_v55 }
 0x200   : > { %v3993_v39 = vpop.permute.xlu1 %3992  ;;  %4482 = vrot.lane.b32.xlu0 %v11274_v4, %s9965_s30  ;;  %v5438_v4 = vpack.c.bf16 %v5384_v27, %v5383_v49 }
 0x201   : > { %4068 = vst.msk [vmem:[#allocation4 + $0x150] sm:$0xff] %vm4046_vm5, %v3993_v39  ;;  %v5389_v39 = vld [vmem:[#allocation2 + $0x151] sm:$0xff] }
 0x202   : > { %4225 = vrot.lane.b32.xlu1 %v4922_v31, %s9963_s10  ;;  %v4003_v14 = vpop.permute.xlu0 %4002  ;;  %v5441_v43 = vpack.c.bf16 %v5390_v53, %v5389_v39  ;;  %v8358_v39 = vld [vmem:[#allocation3 + $0x19a] sm:$0xff] }
 0x203   : > { %4073 = vst.msk [vmem:[#allocation4 + $0x1a0] sm:$0xff] %vm4046_vm5, %v4003_v14 }
 0x204   : > { %v3997_v26 = vpop.permute.xlu1 %3996  ;;  %4996 = vrot.lane.b32.xlu0 %v4923_v60, %s9967_s12 }
 0x205   : > { %4070 = vst.msk [vmem:[#allocation4 + $0x170] sm:$0xff] %vm4046_vm5, %v3997_v26  ;;  %v5757_v26 = vld [vmem:[#allocation4 + $0x38] sm:$0xff] }
 0x206   : > { %4739 = vrot.lane.b32.xlu1 %v5437_v44, %s9966_s7  ;;  %v4465_v16 = vpop.permute.xlu0 %4464  ;;  %v4877_v44 = vld [vmem:[#allocation2 + $0x15a] sm:$0xff] }
 0x207   : > { %4561 = vst.msk [vmem:[#allocation4] sm:$0xff] %vm4560_vm7, %v4465_v16  ;;  %v4927_v11 = vpack.c.bf16 %v4877_v44, %v4876_v36  ;;  %v4882_v44 = vld [vmem:[#allocation2 + $0x1ca] sm:$0xff] }
 0x208   : > { %v4001_v40 = vpop.permute.xlu1 %4000  ;;  %5511 = vrot.lane.b32.xlu0 %v5438_v4, %s9969_s14 }
 0x209   : > { %4072 = vst.msk [vmem:[#allocation4 + $0x190] sm:$0xff] %vm4046_vm5, %v4001_v40  ;;  %v5391_v40 = vld [vmem:[#allocation2 + $0x169] sm:$0xff] }
 0x20a   : > { %5254 = vrot.lane.b32.xlu1 %v11280_v23, %s9968_s13  ;;  %v4979_v45 = vpop.permute.xlu0 %4978 }
 0x20c   : > { %v4722_v56 = vpop.permute.xlu1 %4721  ;;  %4484 = vrot.lane.b32.xlu0 %v11280_v23, %s9965_s30 }
 0x20d   : > { %4818 = vst.msk [vmem:[#allocation4] sm:$0xff] %vm4817_vm8, %v4722_v56  ;;  %v5759_v56 = vld [vmem:[#allocation4 + $0x48] sm:$0xff] }
 0x20e   : > { %4227 = vrot.lane.b32.xlu1 %v4923_v60, %s9963_s10  ;;  %5075 = vst.msk [vmem:[#allocation4] sm:$0xff] %vm5074_vm9, %v4979_v45  ;;  %v5494_v32 = vpop.permute.xlu0 %5493  ;;  %v5392_v60 = vld [vmem:[#allocation2 + $0x171] sm:$0xff] }
 0x20f   : > { %v5442_v27 = vpack.c.bf16 %v5392_v60, %v5391_v40 }
 0x210   : > { %v5237_v50 = vpop.permute.xlu1 %5236  ;;  %4998 = vrot.lane.b32.xlu0 %v4924_v48, %s9967_s12 }
 0x211   : > { %5333 = vst.msk [vmem:[#allocation4] sm:$0xff] %vm5332_vm10, %v5237_v50  ;;  %v4878_v50 = vld [vmem:[#allocation2 + $0x16a] sm:$0xff] }
 0x212   : > { %4741 = vrot.lane.b32.xlu1 %v5438_v4, %s9966_s7  ;;  %5590 = vst.msk [vmem:[#allocation4] sm:$0xff] %vm5589_vm11, %v5494_v32  ;;  %v4467_v23 = vpop.permute.xlu0 %4466 }
 0x214   : > { %v4210_v24 = vpop.permute.xlu1 %4209  ;;  %5513 = vrot.lane.b32.xlu0 %v5439_v59, %s9969_s14 }
 0x215   : > { %4305 = vst.msk [vmem:[#allocation4 + $0x10] sm:$0xff] %vm4303_vm6, %v4210_v24  ;;  %v5136_v24 = vld [vmem:[#allocation2 + $0x180] sm:$0xff] }
 0x216   : > { %5256 = vrot.lane.b32.xlu1 %v11278_v34, %s9968_s13  ;;  %4562 = vst.msk [vmem:[#allocation4 + $0x10] sm:$0xff] %vm4560_vm7, %v4467_v23  ;;  %v4981_v1 = vpop.permute.xlu0 %4980  ;;  %v5186_v23 = vpack.c.bf16 %v5137_v57, %v5136_v24  ;;  %v4884_v57 = vld [vmem:[#allocation2 + $0x1e2] sm:$0xff] }
 0x218   : > { %v4724_v9 = vpop.permute.xlu1 %4723  ;;  %4486 = vrot.lane.b32.xlu0 %v11278_v34, %s9965_s30 }
 0x219   : > { %4819 = vst.msk [vmem:[#allocation4 + $0x10] sm:$0xff] %vm4817_vm8, %v4724_v9  ;;  %v5750_v12 = vld [vmem:[#allocation4] sm:$0xff] }
 0x21a   : > { %4229 = vrot.lane.b32.xlu1 %v4924_v48, %s9963_s10  ;;  %5076 = vst.msk [vmem:[#allocation4 + $0x10] sm:$0xff] %vm5074_vm9, %v4981_v1  ;;  %6022 = vmatmul.mubr.bf16.vlgmr.msra.gmra.mrb[0].mxu0 %v5750_v12  ;;  %v5496_v5 = vpop.permute.xlu0 %5495  ;;  %v4928_v48 = vpack.c.bf16 %v4879_v51, %v4878_v50  ;;  %v5765_v50 = vld [vmem:[#allocation4 + $0x78] sm:$0xff] }
 0x21b   : > { %9544 = vmatprep.mubr.msk.bf16.mxu0 %vm286_vm3, %v5753_v52 }
 0x21c   : > { %v5239_v19 = vpop.permute.xlu1 %5238  ;;  %5000 = vrot.lane.b32.xlu0 %v4925_v22, %s9967_s12 }
 0x21d   : > { %5334 = vst.msk [vmem:[#allocation4 + $0x10] sm:$0xff] %vm5332_vm10, %v5239_v19  ;;  %v5138_v19 = vld [vmem:[#allocation2 + $0x198] sm:$0xff] }
 0x21e   : > { %4743 = vrot.lane.b32.xlu1 %v5439_v59, %s9966_s7  ;;  %5591 = vst.msk [vmem:[#allocation4 + $0x10] sm:$0xff] %vm5589_vm11, %v5496_v5  ;;  %v4469_v34 = vpop.permute.xlu0 %4468 }
 0x220   : > { %v4212_v46 = vpop.permute.xlu1 %4211  ;;  %5515 = vrot.lane.b32.xlu0 %v5440_v10, %s9969_s14 }
 0x221   : > { %4306 = vst.msk [vmem:[#allocation4 + $0x20] sm:$0xff] %vm4303_vm6, %v4212_v46  ;;  %v4881_v46 = vld [vmem:[#allocation2 + $0x18a] sm:$0xff] }
 0x222   : > { %5258 = vrot.lane.b32.xlu1 %v11290_v62, %s9968_s13  ;;  %4563 = vst.msk [vmem:[#allocation4 + $0x20] sm:$0xff] %vm4560_vm7, %v4469_v34  ;;  %v4983_v7 = vpop.permute.xlu0 %4982  ;;  %v5187_v34 = vpack.c.bf16 %v5139_v13, %v5138_v19  ;;  %v4886_v19 = vld [vmem:[#allocation2 + $0x1fa] sm:$0xff]  ;;  %v4887_v13 = vld [vmem:[#allocation2 + $0x202] sm:$0xff] }
 0x224   : > { %v4726_v63 = vpop.permute.xlu1 %4725  ;;  %4488 = vrot.lane.b32.xlu0 %v11290_v62, %s9965_s30 }
 0x225   : > { %4820 = vst.msk [vmem:[#allocation4 + $0x20] sm:$0xff] %vm4817_vm8, %v4726_v63  ;;  %v5752_v0 = vld [vmem:[#allocation4 + $0x10] sm:$0xff] }
 0x226   : > { %4231 = vrot.lane.b32.xlu1 %v4925_v22, %s9963_s10  ;;  %5077 = vst.msk [vmem:[#allocation4 + $0x20] sm:$0xff] %vm5074_vm9, %v4983_v7  ;;  %6030 = vmatmul.mubr.bf16.gmra.mrb[4].mxu0 %v5752_v0  ;;  %v5498_v38 = vpop.permute.xlu0 %5497  ;;  %v4880_v22 = vld [vmem:[#allocation2 + $0x182] sm:$0xff]  ;;  %v4111_v7 = vld [vmem:[#allocation2 + $0x1b2] sm:$0xff]  ;;  %v4112_v0 = vld [vmem:[#allocation2 + $0x1ba] sm:$0xff] }
 0x227   : > { %9545 = vmatprep.mubr.msk.bf16.mxu0 %vm286_vm3, %v5755_v2  ;;  %v4929_v63 = vpack.c.bf16 %v4881_v46, %v4880_v22  ;;  %v5401_v46 = vld [vmem:[#allocation2 + $0x211] sm:$0xff] }
 0x228   : > { %v5241_v54 = vpop.permute.xlu1 %5240  ;;  %5002 = vrot.lane.b32.xlu0 %v4926_v18, %s9967_s12  ;;  %v5447_v8 = vpack.c.bf16 %v5402_v17, %v5401_v46 }
 0x229   : > { %5335 = vst.msk [vmem:[#allocation4 + $0x20] sm:$0xff] %vm5332_vm10, %v5241_v54  ;;  %v5652_v54 = vld [vmem:[#allocation2 + $0x19a] sm:$0xff] }
 0x22a   : > { %4745 = vrot.lane.b32.xlu1 %v5440_v10, %s9966_s7  ;;  %5592 = vst.msk [vmem:[#allocation4 + $0x20] sm:$0xff] %vm5589_vm11, %v5498_v38  ;;  %v4471_v62 = vpop.permute.xlu0 %4470  ;;  %v5701_v38 = vpack.c.bf16 %v5653_v3, %v5652_v54  ;;  %v4889_v54 = vld [vmem:[#allocation2 + $0x21a] sm:$0xff] }
 0x22c   : > { %v4214_v30 = vpop.permute.xlu1 %4213  ;;  %5517 = vrot.lane.b32.xlu0 %v5441_v43, %s9969_s14  ;;  %5733 = vst.msk [vmem:[#allocation4 + $0xf8] sm:$0xff] %vm286_vm3, %v5701_v38 }
 0x22d   : > { %4307 = vst.msk [vmem:[#allocation4 + $0x30] sm:$0xff] %vm4303_vm6, %v4214_v30 }
 0x22e   : > { %5260 = vrot.lane.b32.xlu1 %v11288_v33, %s9968_s13  ;;  %4564 = vst.msk [vmem:[#allocation4 + $0x30] sm:$0xff] %vm4560_vm7, %v4471_v62  ;;  %v4985_v55 = vpop.permute.xlu0 %4984  ;;  %v8359_v62 = vld [vmem:[#allocation3 + $0x1a2] sm:$0xff] }
 0x230   : > { %v4728_v47 = vpop.permute.xlu1 %4727  ;;  %4490 = vrot.lane.b32.xlu0 %v11288_v33, %s9965_s30 }
 0x231   : > { %4821 = vst.msk [vmem:[#allocation4 + $0x30] sm:$0xff] %vm4817_vm8, %v4728_v47  ;;  %v5754_v31 = vld [vmem:[#allocation4 + $0x20] sm:$0xff] }
 0x232   : > { %4233 = vrot.lane.b32.xlu1 %v4926_v18, %s9963_s10  ;;  %5078 = vst.msk [vmem:[#allocation4 + $0x30] sm:$0xff] %vm5074_vm9, %v4985_v55  ;;  %6038 = vmatmul.mubr.bf16.gmra.mrb[8].mxu0 %v5754_v31  ;;  %v5500_v20 = vpop.permute.xlu0 %5499  ;;  %v4159_v18 = vpack.c.bf16 %v4112_v0, %v4111_v7  ;;  %v4625_v31 = vld [vmem:[#allocation2 + $0x1c9] sm:$0xff]  ;;  %v5769_v7 = vld [vmem:[#allocation4 + $0x98] sm:$0xff] }
 0x233   : > { %9546 = vmatprep.mubr.msk.bf16.mxu0 %vm286_vm3, %v5757_v26  ;;  %v8407_v26 = vpack.c.bf16 %v8359_v62, %v8358_v39 }
 0x234   : > { %v5243_v21 = vpop.permute.xlu1 %5242  ;;  %5004 = vrot.lane.b32.xlu0 %v4927_v11, %s9967_s12 }
 0x235   : > { %5336 = vst.msk [vmem:[#allocation4 + $0x30] sm:$0xff] %vm5332_vm10, %v5243_v21  ;;  %v5763_v21 = vld [vmem:[#allocation4 + $0x68] sm:$0xff] }
 0x236   : > { %4747 = vrot.lane.b32.xlu1 %v5441_v43, %s9966_s7  ;;  %5593 = vst.msk [vmem:[#allocation4 + $0x30] sm:$0xff] %vm5589_vm11, %v5500_v20  ;;  %v4473_v33 = vpop.permute.xlu0 %4472  ;;  %v4626_v43 = vld [vmem:[#allocation2 + $0x1d1] sm:$0xff] }
 0x237   : > { %v4883_v20 = vld [vmem:[#allocation2 + $0x1d2] sm:$0xff] }
 0x238   : > { %v4216_v14 = vpop.permute.xlu1 %4215  ;;  %5519 = vrot.lane.b32.xlu0 %v5442_v27, %s9969_s14  ;;  %v4930_v40 = vpack.c.bf16 %v4883_v20, %v4882_v44 }
 0x239   : > { %4308 = vst.msk [vmem:[#allocation4 + $0x40] sm:$0xff] %vm4303_vm6, %v4216_v14  ;;  %v11674_v14 = vld [vmem:[#allocation4 + $0xf8] sm:$0xff] }
 0x23a   : > { %5262 = vrot.lane.b32.xlu1 %v11306_v6, %s9968_s13  ;;  %4565 = vst.msk [vmem:[#allocation4 + $0x40] sm:$0xff] %vm4560_vm7, %v4473_v33  ;;  %v4987_v16 = vpop.permute.xlu0 %4986 }
 0x23b   : > { %8439 = vst.msk [vmem:[#allocation4 + $0xf8] sm:$0xff] %vm286_vm3, %v8407_v26  ;;  %v4891_v26 = vld [vmem:[#allocation2 + $0x232] sm:$0xff] }
 0x23c   : > { %v4730_v49 = vpop.permute.xlu1 %4729  ;;  %4492 = vrot.lane.b32.xlu0 %v11306_v6, %s9965_s30  ;;  %v5393_v6 = vld [vmem:[#allocation2 + $0x181] sm:$0xff] }
 0x23d   : > { %4822 = vst.msk [vmem:[#allocation4 + $0x40] sm:$0xff] %vm4817_vm8, %v4730_v49  ;;  %v5756_v4 = vld [vmem:[#allocation4 + $0x30] sm:$0xff]  ;;  %v5443_v9 = vpack.c.bf16 %v5394_v37, %v5393_v6  ;;  %v5399_v37 = vld [vmem:[#allocation2 + $0x1f9] sm:$0xff] }
 0x23e   : > { %4235 = vrot.lane.b32.xlu1 %v4927_v11, %s9963_s10  ;;  %5079 = vst.msk [vmem:[#allocation4 + $0x40] sm:$0xff] %vm5074_vm9, %v4987_v16  ;;  %6046 = vmatmul.mubr.bf16.gmra.mrb[12].mxu0 %v5756_v4  ;;  %v5502_v32 = vpop.permute.xlu0 %5501  ;;  %v4673_v11 = vpack.c.bf16 %v4626_v43, %v4625_v31  ;;  %v4890_v31 = vld [vmem:[#allocation2 + $0x22a] sm:$0xff] }
 0x23f   : > { %9547 = vmatprep.mubr.msk.bf16.mxu0 %vm286_vm3, %v5759_v56  ;;  %v4934_v20 = vpack.c.bf16 %v4891_v26, %v4890_v31 }
 0x240   : > { %v5245_v45 = vpop.permute.xlu1 %5244  ;;  %5006 = vrot.lane.b32.xlu0 %v4928_v48, %s9967_s12 }
 0x241   : > { %5337 = vst.msk [vmem:[#allocation4 + $0x40] sm:$0xff] %vm5332_vm10, %v5245_v45 }
 0x242   : > { %4749 = vrot.lane.b32.xlu1 %v5442_v27, %s9966_s7  ;;  %5594 = vst.msk [vmem:[#allocation4 + $0x40] sm:$0xff] %vm5589_vm11, %v5502_v32  ;;  %v4475_v59 = vpop.permute.xlu0 %4474  ;;  %v5398_v27 = vld [vmem:[#allocation2 + $0x1e9] sm:$0xff] }
 0x243   : > { %v4885_v32 = vld [vmem:[#allocation2 + $0x1ea] sm:$0xff] }
 0x244   : > { %v4218_v42 = vpop.permute.xlu1 %4217  ;;  %5521 = vrot.lane.b32.xlu0 %v5443_v9, %s9969_s14  ;;  %v4931_v24 = vpack.c.bf16 %v4885_v32, %v4884_v57  ;;  %v5151_v57 = vld [vmem:[#allocation2 + $0x260] sm:$0xff] }
 0x245   : > { %4309 = vst.msk [vmem:[#allocation4 + $0x50] sm:$0xff] %vm4303_vm6, %v4218_v42 }
 0x246   : > { %5264 = vrot.lane.b32.xlu1 %v5186_v23, %s9968_s13  ;;  %4566 = vst.msk [vmem:[#allocation4 + $0x50] sm:$0xff] %vm4560_vm7, %v4475_v59  ;;  %v4989_v12 = vpop.permute.xlu0 %4988 }
 0x248   : > { %v4732_v1 = vpop.permute.xlu1 %4731  ;;  %4494 = vrot.lane.b32.xlu0 %v5186_v23, %s9965_s30  ;;  %v5400_v23 = vld [vmem:[#allocation2 + $0x201] sm:$0xff] }
 0x249   : > { %4823 = vst.msk [vmem:[#allocation4 + $0x50] sm:$0xff] %vm4817_vm8, %v4732_v1  ;;  %v5758_v52 = vld [vmem:[#allocation4 + $0x40] sm:$0xff]  ;;  %v5446_v6 = vpack.c.bf16 %v5400_v23, %v5399_v37 }
 0x24a   : > { %4237 = vrot.lane.b32.xlu1 %v4928_v48, %s9963_s10  ;;  %5080 = vst.msk [vmem:[#allocation4 + $0x50] sm:$0xff] %vm5074_vm9, %v4989_v12  ;;  %6054 = vmatmul.mubr.bf16.gmra.mrb[16].mxu0 %v5758_v52  ;;  %v5504_v10 = vpop.permute.xlu0 %5503  ;;  %v5767_v12 = vld [vmem:[#allocation4 + $0x88] sm:$0xff] }
 0x24b   : > { %9548 = vmatprep.mubr.msk.bf16.mxu0 %vm286_vm3, %v5761_v29  ;;  %v5408_v37 = vld [vmem:[#allocation2 + $0x261] sm:$0xff] }
 0x24c   : > { %v5247_v5 = vpop.permute.xlu1 %5246  ;;  %5008 = vrot.lane.b32.xlu0 %v4929_v63, %s9967_s12 }
 0x24d   : > { %5338 = vst.msk [vmem:[#allocation4 + $0x50] sm:$0xff] %vm5332_vm10, %v5247_v5  ;;  %v4932_v5 = vpack.c.bf16 %v4887_v13, %v4886_v19  ;;  %v4894_v19 = vld [vmem:[#allocation2 + $0x25a] sm:$0xff]  ;;  %v4895_v13 = vld [vmem:[#allocation2 + $0x262] sm:$0xff] }
 0x24e   : > { %4751 = vrot.lane.b32.xlu1 %v5443_v9, %s9966_s7  ;;  %5595 = vst.msk [vmem:[#allocation4 + $0x50] sm:$0xff] %vm5589_vm11, %v5504_v10  ;;  %v4477_v30 = vpop.permute.xlu0 %4476  ;;  %v4936_v46 = vpack.c.bf16 %v4895_v13, %v4894_v19 }
 0x250   : > { %v4220_v2 = vpop.permute.xlu1 %4219  ;;  %5523 = vrot.lane.b32.xlu0 %v5444_v58, %s9969_s14 }
 0x251   : > { %4310 = vst.msk [vmem:[#allocation4 + $0x60] sm:$0xff] %vm4303_vm6, %v4220_v2  ;;  %v4888_v2 = vld [vmem:[#allocation2 + $0x212] sm:$0xff] }
 0x252   : > { %5266 = vrot.lane.b32.xlu1 %v5187_v34, %s9968_s13  ;;  %4567 = vst.msk [vmem:[#allocation4 + $0x60] sm:$0xff] %vm4560_vm7, %v4477_v30  ;;  %v4991_v47 = vpop.permute.xlu0 %4990  ;;  %v4933_v58 = vpack.c.bf16 %v4889_v54, %v4888_v2  ;;  %v5404_v30 = vld [vmem:[#allocation2 + $0x231] sm:$0xff] }
 0x253   : > { %v5777_v54 = vld [vmem:[#allocation4 + $0xd8] sm:$0xff] }
 0x254   : > { %v4734_v53 = vpop.permute.xlu1 %4733  ;;  %4496 = vrot.lane.b32.xlu0 %v11308_v15, %s9965_s30  ;;  %v5397_v15 = vld [vmem:[#allocation2 + $0x1e1] sm:$0xff] }
 0x255   : > { %4824 = vst.msk [vmem:[#allocation4 + $0x60] sm:$0xff] %vm4817_vm8, %v4734_v53  ;;  %v5760_v55 = vld [vmem:[#allocation4 + $0x50] sm:$0xff]  ;;  %v5445_v16 = vpack.c.bf16 %v5398_v27, %v5397_v15 }
 0x256   : > { %4239 = vrot.lane.b32.xlu1 %v4159_v18, %s9963_s10  ;;  %5081 = vst.msk [vmem:[#allocation4 + $0x60] sm:$0xff] %vm5074_vm9, %v4991_v47  ;;  %6062 = vmatmul.mubr.bf16.gmra.mrb[20].mxu0 %v5760_v55  ;;  %v5506_v60 = vpop.permute.xlu0 %5505  ;;  %v5403_v18 = vld [vmem:[#allocation2 + $0x229] sm:$0xff] }
 0x257   : > { %9549 = vmatprep.mubr.msk.bf16.mxu0 %vm286_vm3, %v5763_v21  ;;  %v5448_v53 = vpack.c.bf16 %v5404_v30, %v5403_v18  ;;  %v5771_v47 = vld [vmem:[#allocation4 + $0xa8] sm:$0xff]  ;;  %v5148_v21 = vld [vmem:[#allocation2 + $0x240] sm:$0xff]  ;;  %v5155_v30 = vld [vmem:[#allocation2 + $0x290] sm:$0xff] }
 0x258   : > { %v5249_v36 = vpop.permute.xlu1 %5248  ;;  %5010 = vrot.lane.b32.xlu0 %v4930_v40, %s9967_s12  ;;  %v5154_v18 = vld [vmem:[#allocation2 + $0x288] sm:$0xff] }
 0x259   : > { %5339 = vst.msk [vmem:[#allocation4 + $0x60] sm:$0xff] %vm5332_vm10, %v5249_v36  ;;  %v5149_v36 = vld [vmem:[#allocation2 + $0x248] sm:$0xff] }
 0x25a   : > { %4753 = vrot.lane.b32.xlu1 %v4673_v11, %s9966_s7  ;;  %5596 = vst.msk [vmem:[#allocation4 + $0x60] sm:$0xff] %vm5589_vm11, %v5506_v60  ;;  %v4479_v49 = vpop.permute.xlu0 %4478  ;;  %v5405_v60 = vld [vmem:[#allocation2 + $0x241] sm:$0xff] }
 0x25c   : > { %v4222_v33 = vpop.permute.xlu1 %4221  ;;  %5525 = vrot.lane.b32.xlu0 %v5445_v16, %s9969_s14 }
 0x25d   : > { %4311 = vst.msk [vmem:[#allocation4 + $0x70] sm:$0xff] %vm4303_vm6, %v4222_v33  ;;  %v5192_v33 = vpack.c.bf16 %v5149_v36, %v5148_v21 }
 0x25e   : > { %5268 = vrot.lane.b32.xlu1 %v11304_v61, %s9968_s13  ;;  %4568 = vst.msk [vmem:[#allocation4 + $0x70] sm:$0xff] %vm4560_vm7, %v4479_v49  ;;  %v4993_v56 = vpop.permute.xlu0 %4992 }
 0x260   : > { %v4736_v4 = vpop.permute.xlu1 %4735  ;;  %4498 = vrot.lane.b32.xlu0 %v11304_v61, %s9965_s30 }
 0x261   : > { %4825 = vst.msk [vmem:[#allocation4 + $0x70] sm:$0xff] %vm4817_vm8, %v4736_v4  ;;  %v5762_v45 = vld [vmem:[#allocation4 + $0x60] sm:$0xff]  ;;  %v5773_v4 = vld [vmem:[#allocation4 + $0xb8] sm:$0xff] }
 0x262   : > { %4241 = vrot.lane.b32.xlu1 %v4930_v40, %s9963_s10  ;;  %5082 = vst.msk [vmem:[#allocation4 + $0x70] sm:$0xff] %vm5074_vm9, %v4993_v56  ;;  %6070 = vmatmul.mubr.bf16.gmra.mrb[24].mxu0 %v5762_v45  ;;  %v5508_v48 = vpop.permute.xlu0 %5507  ;;  %v5406_v40 = vld [vmem:[#allocation2 + $0x249] sm:$0xff] }
 0x263   : > { %9550 = vmatprep.mubr.msk.bf16.mxu0 %vm286_vm3, %v5765_v50  ;;  %v5449_v27 = vpack.c.bf16 %v5406_v40, %v5405_v60  ;;  %v4892_v45 = vld [vmem:[#allocation2 + $0x242] sm:$0xff]  ;;  %v4893_v50 = vld [vmem:[#allocation2 + $0x24a] sm:$0xff]  ;;  %v4899_v60 = vld [vmem:[#allocation2 + $0x292] sm:$0xff] }
 0x264   : > { %v5251_v51 = vpop.permute.xlu1 %5250  ;;  %5012 = vrot.lane.b32.xlu0 %v4931_v24, %s9967_s12  ;;  %v5156_v40 = vld [vmem:[#allocation2 + $0x2a0] sm:$0xff] }
 0x265   : > { %5340 = vst.msk [vmem:[#allocation4 + $0x70] sm:$0xff] %vm5332_vm10, %v5251_v51  ;;  %v5150_v51 = vld [vmem:[#allocation2 + $0x258] sm:$0xff] }
 0x266   : > { %4755 = vrot.lane.b32.xlu1 %v5445_v16, %s9966_s7  ;;  %5597 = vst.msk [vmem:[#allocation4 + $0x70] sm:$0xff] %vm5589_vm11, %v5508_v48  ;;  %v4481_v61 = vpop.permute.xlu0 %4480  ;;  %v4935_v48 = vpack.c.bf16 %v4893_v50, %v4892_v45  ;;  %v5193_v23 = vpack.c.bf16 %v5151_v57, %v5150_v51 }
 0x268   : > { %v4224_v42 = vpop.permute.xlu1 %4223  ;;  %5527 = vrot.lane.b32.xlu0 %v5446_v6, %s9969_s14 }
 0x269   : > { %4312 = vst.msk [vmem:[#allocation4 + $0x80] sm:$0xff] %vm4303_vm6, %v4224_v42  ;;  %v5407_v42 = vld [vmem:[#allocation2 + $0x259] sm:$0xff] }
 0x26a   : > { %5270 = vrot.lane.b32.xlu1 %v11345_v41, %s9968_s13  ;;  %4569 = vst.msk [vmem:[#allocation4 + $0x80] sm:$0xff] %vm4560_vm7, %v4481_v61  ;;  %v4995_v9 = vpop.permute.xlu0 %4994 }
 0x26c   : > { %v4738_v59 = vpop.permute.xlu1 %4737  ;;  %4500 = vrot.lane.b32.xlu0 %v11345_v41, %s9965_s30 }
 0x26d   : > { %4826 = vst.msk [vmem:[#allocation4 + $0x80] sm:$0xff] %vm4817_vm8, %v4738_v59  ;;  %v5764_v1 = vld [vmem:[#allocation4 + $0x70] sm:$0xff] }
 0x26e   : > { %4243 = vrot.lane.b32.xlu1 %v4931_v24, %s9963_s10  ;;  %5083 = vst.msk [vmem:[#allocation4 + $0x80] sm:$0xff] %vm5074_vm9, %v4995_v9  ;;  %6078 = vmatmul.mubr.bf16.gmra.mrb[28].mxu0 %v5764_v1  ;;  %v5510_v29 = vpop.permute.xlu0 %5509 }
 0x26f   : > { %9551 = vmatprep.mubr.msk.bf16.mxu0 %vm286_vm3, %v5767_v12  ;;  %v5775_v12 = vld [vmem:[#allocation4 + $0xc8] sm:$0xff] }
 0x270   : > { %v5253_v52 = vpop.permute.xlu1 %5252  ;;  %5014 = vrot.lane.b32.xlu0 %v4932_v5, %s9967_s12 }
 0x271   : > { %5341 = vst.msk [vmem:[#allocation4 + $0x80] sm:$0xff] %vm5332_vm10, %v5253_v52 }
 0x272   : > { %4757 = vrot.lane.b32.xlu1 %v5446_v6, %s9966_s7  ;;  %5598 = vst.msk [vmem:[#allocation4 + $0x80] sm:$0xff] %vm5589_vm11, %v5510_v29  ;;  %v4483_v41 = vpop.permute.xlu0 %4482  ;;  %v5450_v6 = vpack.c.bf16 %v5408_v37, %v5407_v42  ;;  %v5152_v29 = vld [vmem:[#allocation2 + $0x270] sm:$0xff]  ;;  %v5158_v42 = vld [vmem:[#allocation2 + $0x2b8] sm:$0xff]  ;;  %v5159_v37 = vld [vmem:[#allocation2 + $0x2c0] sm:$0xff] }
 0x274   : > { %v4226_v22 = vpop.permute.xlu1 %4225  ;;  %5529 = vrot.lane.b32.xlu0 %v5447_v8, %s9969_s14 }
 0x275   : > { %4313 = vst.msk [vmem:[#allocation4 + $0x90] sm:$0xff] %vm4303_vm6, %v4226_v22 }
 0x276   : > { %5272 = vrot.lane.b32.xlu1 %v11339_v35, %s9968_s13  ;;  %4570 = vst.msk [vmem:[#allocation4 + $0x90] sm:$0xff] %vm4560_vm7, %v4483_v41  ;;  %v4997_v10 = vpop.permute.xlu0 %4996  ;;  %v5409_v41 = vld [vmem:[#allocation2 + $0x271] sm:$0xff] }
 0x278   : > { %v4740_v34 = vpop.permute.xlu1 %4739  ;;  %4502 = vrot.lane.b32.xlu0 %v11339_v35, %s9965_s30 }
 0x279   : > { %4827 = vst.msk [vmem:[#allocation4 + $0x90] sm:$0xff] %vm4817_vm8, %v4740_v34  ;;  %v5766_v63 = vld [vmem:[#allocation4 + $0x80] sm:$0xff] }
 0x27a   : > { %4245 = vrot.lane.b32.xlu1 %v4932_v5, %s9963_s10  ;;  %5084 = vst.msk [vmem:[#allocation4 + $0x90] sm:$0xff] %vm5074_vm9, %v4997_v10  ;;  %6086 = vmatmul.mubr.bf16.gmra.mrb[32].mxu0 %v5766_v63  ;;  %v5512_v3 = vpop.permute.xlu0 %5511  ;;  %v5153_v5 = vld [vmem:[#allocation2 + $0x278] sm:$0xff] }
 0x27b   : > { %9552 = vmatprep.mubr.msk.bf16.mxu0 %vm286_vm3, %v5769_v7  ;;  %v5194_v34 = vpack.c.bf16 %v5153_v5, %v5152_v29  ;;  %v5783_v29 = vld [vmem:[#allocation4 + $0x108] sm:$0xff] }
 0x27c   : > { %v5255_v0 = vpop.permute.xlu1 %5254  ;;  %5016 = vrot.lane.b32.xlu0 %v4933_v58, %s9967_s12 }
 0x27d   : > { %5342 = vst.msk [vmem:[#allocation4 + $0x90] sm:$0xff] %vm5332_vm10, %v5255_v0 }
 0x27e   : > { %4759 = vrot.lane.b32.xlu1 %v5447_v8, %s9966_s7  ;;  %5599 = vst.msk [vmem:[#allocation4 + $0x90] sm:$0xff] %vm5589_vm11, %v5512_v3  ;;  %v4485_v35 = vpop.permute.xlu0 %4484  ;;  %v5410_v8 = vld [vmem:[#allocation2 + $0x279] sm:$0xff] }
 0x27f   : > { %v5451_v63 = vpack.c.bf16 %v5410_v8, %v5409_v41  ;;  %v5161_v41 = vld [vmem:[#allocation2 + $0x2d8] sm:$0xff] }
 0x280   : > { %v4228_v38 = vpop.permute.xlu1 %4227  ;;  %5531 = vrot.lane.b32.xlu0 %v5448_v53, %s9969_s14 }
 0x281   : > { %4314 = vst.msk [vmem:[#allocation4 + $0xa0] sm:$0xff] %vm4303_vm6, %v4228_v38  ;;  %v4897_v38 = vld [vmem:[#allocation2 + $0x27a] sm:$0xff] }
 0x282   : > { %5274 = vrot.lane.b32.xlu1 %v11365_v25, %s9968_s13  ;;  %4571 = vst.msk [vmem:[#allocation4 + $0xa0] sm:$0xff] %vm4560_vm7, %v4485_v35  ;;  %v4999_v62 = vpop.permute.xlu0 %4998 }
 0x284   : > { %v4742_v39 = vpop.permute.xlu1 %4741  ;;  %4504 = vrot.lane.b32.xlu0 %v11365_v25, %s9965_s30 }
 0x285   : > { %4828 = vst.msk [vmem:[#allocation4 + $0xa0] sm:$0xff] %vm4817_vm8, %v4742_v39  ;;  %v5768_v43 = vld [vmem:[#allocation4 + $0x90] sm:$0xff] }
 0x286   : > { %4247 = vrot.lane.b32.xlu1 %v4933_v58, %s9963_s10  ;;  %5085 = vst.msk [vmem:[#allocation4 + $0xa0] sm:$0xff] %vm5074_vm9, %v4999_v62  ;;  %6094 = vmatmul.mubr.bf16.gmra.mrb[36].mxu0 %v5768_v43  ;;  %v5514_v44 = vpop.permute.xlu0 %5513  ;;  %v4896_v58 = vld [vmem:[#allocation2 + $0x272] sm:$0xff]  ;;  %v5411_v62 = vld [vmem:[#allocation2 + $0x289] sm:$0xff] }
 0x287   : > { %9553 = vmatprep.mubr.msk.bf16.mxu0 %vm286_vm3, %v5771_v47  ;;  %v5412_v43 = vld [vmem:[#allocation2 + $0x291] sm:$0xff]  ;;  %v5195_v47 = vpack.c.bf16 %v5155_v30, %v5154_v18 }
 0x288   : > { %v5257_v55 = vpop.permute.xlu1 %5256  ;;  %5018 = vrot.lane.b32.xlu0 %v4934_v20, %s9967_s12  ;;  %v5452_v31 = vpack.c.bf16 %v5412_v43, %v5411_v62  ;;  %v5785_v18 = vld [vmem:[#allocation4 + $0x118] sm:$0xff]  ;;  %v5162_v43 = vld [vmem:[#allocation2 + $0x2e8] sm:$0xff] }
 0x289   : > { %5343 = vst.msk [vmem:[#allocation4 + $0xa0] sm:$0xff] %vm5332_vm10, %v5257_v55 }
 0x28a   : > { %4761 = vrot.lane.b32.xlu1 %v5448_v53, %s9966_s7  ;;  %5600 = vst.msk [vmem:[#allocation4 + $0xa0] sm:$0xff] %vm5589_vm11, %v5514_v44  ;;  %v4487_v25 = vpop.permute.xlu0 %4486  ;;  %v4937_v53 = vpack.c.bf16 %v4897_v38, %v4896_v58  ;;  %v5779_v44 = vld [vmem:[#allocation4 + $0xe8] sm:$0xff] }
 0x28c   : > { %v4230_v11 = vpop.permute.xlu1 %4229  ;;  %5533 = vrot.lane.b32.xlu0 %v5449_v27, %s9969_s14 }
 0x28d   : > { %4315 = vst.msk [vmem:[#allocation4 + $0xb0] sm:$0xff] %vm4303_vm6, %v4230_v11  ;;  %v4898_v11 = vld [vmem:[#allocation2 + $0x28a] sm:$0xff] }
 0x28e   : > { %5276 = vrot.lane.b32.xlu1 %v5192_v33, %s9968_s13  ;;  %4572 = vst.msk [vmem:[#allocation4 + $0xb0] sm:$0xff] %vm4560_vm7, %v4487_v25  ;;  %v5001_v49 = vpop.permute.xlu0 %5000 }
 0x290   : > { %v4744_v15 = vpop.permute.xlu1 %4743  ;;  %4506 = vrot.lane.b32.xlu0 %v5192_v33, %s9965_s30  ;;  %v5157_v33 = vld [vmem:[#allocation2 + $0x2a8] sm:$0xff] }
 0x291   : > { %4829 = vst.msk [vmem:[#allocation4 + $0xb0] sm:$0xff] %vm4817_vm8, %v4744_v15  ;;  %v5770_v16 = vld [vmem:[#allocation4 + $0xa0] sm:$0xff] }
 0x292   : > { %4249 = vrot.lane.b32.xlu1 %v4934_v20, %s9963_s10  ;;  %5086 = vst.msk [vmem:[#allocation4 + $0xb0] sm:$0xff] %vm5074_vm9, %v5001_v49  ;;  %6102 = vmatmul.mubr.bf16.gmra.mrb[40].mxu0 %v5770_v16  ;;  %v5516_v32 = vpop.permute.xlu0 %5515  ;;  %v5413_v49 = vld [vmem:[#allocation2 + $0x2a1] sm:$0xff]  ;;  %v5414_v16 = vld [vmem:[#allocation2 + $0x2a9] sm:$0xff] }
 0x293   : > { %9554 = vmatprep.mubr.msk.bf16.mxu0 %vm286_vm3, %v5773_v4  ;;  %v5196_v4 = vpack.c.bf16 %v5157_v33, %v5156_v40  ;;  %v5453_v45 = vpack.c.bf16 %v5414_v16, %v5413_v49  ;;  %v5787_v40 = vld [vmem:[#allocation4 + $0x128] sm:$0xff]  ;;  %v4907_v49 = vld [vmem:[#allocation2 + $0x2f2] sm:$0xff]  ;;  %v11848_v16 = vld [vmem:[%s13151_s3] ss:$0 sm:$0xff] }
 0x294   : > { %v5259_v56 = vpop.permute.xlu1 %5258  ;;  %5020 = vrot.lane.b32.xlu0 %v4935_v48, %s9967_s12 }
 0x295   : > { %5344 = vst.msk [vmem:[#allocation4 + $0xb0] sm:$0xff] %vm5332_vm10, %v5259_v56 }
 0x296   : > { %4763 = vrot.lane.b32.xlu1 %v5449_v27, %s9966_s7  ;;  %5601 = vst.msk [vmem:[#allocation4 + $0xb0] sm:$0xff] %vm5589_vm11, %v5516_v32  ;;  %v4489_v61 = vpop.permute.xlu0 %4488  ;;  %v4938_v27 = vpack.c.bf16 %v4899_v60, %v4898_v11 }
 0x298   : > { %v4232_v24 = vpop.permute.xlu1 %4231  ;;  %5535 = vrot.lane.b32.xlu0 %v5450_v6, %s9969_s14 }
 0x299   : > { %4316 = vst.msk [vmem:[#allocation4 + $0xc0] sm:$0xff] %vm4303_vm6, %v4232_v24  ;;  %v4901_v24 = vld [vmem:[#allocation2 + $0x2aa] sm:$0xff] }
 0x29a   : > { %5278 = vrot.lane.b32.xlu1 %v5193_v23, %s9968_s13  ;;  %4573 = vst.msk [vmem:[#allocation4 + $0xc0] sm:$0xff] %vm4560_vm7, %v4489_v61  ;;  %v5003_v9 = vpop.permute.xlu0 %5002 }
 0x29c   : > { %v4746_v59 = vpop.permute.xlu1 %4745  ;;  %4508 = vrot.lane.b32.xlu0 %v5193_v23, %s9965_s30 }
 0x29d   : > { %4830 = vst.msk [vmem:[#allocation4 + $0xc0] sm:$0xff] %vm4817_vm8, %v4746_v59  ;;  %v5772_v1 = vld [vmem:[#allocation4 + $0xb0] sm:$0xff]  ;;  %v5415_v59 = vld [vmem:[#allocation2 + $0x2b9] sm:$0xff] }
 0x29e   : > { %4251 = vrot.lane.b32.xlu1 %v4935_v48, %s9963_s10  ;;  %5087 = vst.msk [vmem:[#allocation4 + $0xc0] sm:$0xff] %vm5074_vm9, %v5003_v9  ;;  %6110 = vmatmul.mubr.bf16.gmra.mrb[44].mxu0 %v5772_v1  ;;  %v5518_v22 = vpop.permute.xlu0 %5517  ;;  %v4900_v48 = vld [vmem:[#allocation2 + $0x2a2] sm:$0xff]  ;;  %v5197_v1 = vpack.c.bf16 %v5159_v37, %v5158_v42 }
 0x29f   : > { %9555 = vmatprep.mubr.msk.bf16.mxu0 %vm286_vm3, %v5775_v12  ;;  %v4939_v61 = vpack.c.bf16 %v4901_v24, %v4900_v48  ;;  %v5416_v9 = vld [vmem:[#allocation2 + $0x2c1] sm:$0xff]  ;;  %v5422_v42 = vld [vmem:[#allocation2 + $0x309] sm:$0xff] }
 0x2a0   : > { %v5261_v52 = vpop.permute.xlu1 %5260  ;;  %5022 = vrot.lane.b32.xlu0 %v4936_v46, %s9967_s12  ;;  %v5421_v24 = vld [vmem:[#allocation2 + $0x301] sm:$0xff] }
 0x2a1   : > { %5345 = vst.msk [vmem:[#allocation4 + $0xc0] sm:$0xff] %vm5332_vm10, %v5261_v52  ;;  %v5454_v52 = vpack.c.bf16 %v5416_v9, %v5415_v59 }
 0x2a2   : > { %4765 = vrot.lane.b32.xlu1 %v5450_v6, %s9966_s7  ;;  %5602 = vst.msk [vmem:[#allocation4 + $0xc0] sm:$0xff] %vm5589_vm11, %v5518_v22  ;;  %v4491_v10 = vpop.permute.xlu0 %4490  ;;  %v4902_v22 = vld [vmem:[#allocation2 + $0x2ba] sm:$0xff] }
 0x2a4   : > { %v4234_v17 = vpop.permute.xlu1 %4233  ;;  %5537 = vrot.lane.b32.xlu0 %v5451_v63, %s9969_s14 }
 0x2a5   : > { %4317 = vst.msk [vmem:[#allocation4 + $0xd0] sm:$0xff] %vm4303_vm6, %v4234_v17  ;;  %v5160_v17 = vld [vmem:[#allocation2 + $0x2d0] sm:$0xff] }
 0x2a6   : > { %5280 = vrot.lane.b32.xlu1 %v5194_v34, %s9968_s13  ;;  %4574 = vst.msk [vmem:[#allocation4 + $0xd0] sm:$0xff] %vm4560_vm7, %v4491_v10  ;;  %v5005_v0 = vpop.permute.xlu0 %5004 }
 0x2a8   : > { %v4748_v7 = vpop.permute.xlu1 %4747  ;;  %4510 = vrot.lane.b32.xlu0 %v5194_v34, %s9965_s30 }
 0x2a9   : > { %4831 = vst.msk [vmem:[#allocation4 + $0xd0] sm:$0xff] %vm4817_vm8, %v4748_v7  ;;  %v5774_v2 = vld [vmem:[#allocation4 + $0xc0] sm:$0xff] }
 0x2aa   : > { %4253 = vrot.lane.b32.xlu1 %v4936_v46, %s9963_s10  ;;  %5088 = vst.msk [vmem:[#allocation4 + $0xd0] sm:$0xff] %vm5074_vm9, %v5005_v0  ;;  %6118 = vmatmul.mubr.bf16.gmra.mrb[48].mxu0 %v5774_v2  ;;  %v5520_v35 = vpop.permute.xlu0 %5519  ;;  %v4903_v46 = vld [vmem:[#allocation2 + $0x2c2] sm:$0xff]  ;;  %v5418_v7 = vld [vmem:[#allocation2 + $0x2d9] sm:$0xff]  ;;  %v5198_v0 = vpack.c.bf16 %v5161_v41, %v5160_v17 }
 0x2ab   : > { %9556 = vmatprep.mubr.msk.bf16.mxu0 %vm286_vm3, %v5777_v54  ;;  %v4940_v34 = vpack.c.bf16 %v4903_v46, %v4902_v22  ;;  %v4909_v22 = vld [vmem:[#allocation2 + $0x30a] sm:$0xff] }
 0x2ac   : > { %v5263_v3 = vpop.permute.xlu1 %5262  ;;  %5024 = vrot.lane.b32.xlu0 %v4937_v53, %s9967_s12 }
 0x2ad   : > { %5346 = vst.msk [vmem:[#allocation4 + $0xd0] sm:$0xff] %vm5332_vm10, %v5263_v3 }
 0x2ae   : > { %4767 = vrot.lane.b32.xlu1 %v5451_v63, %s9966_s7  ;;  %5603 = vst.msk [vmem:[#allocation4 + $0xd0] sm:$0xff] %vm5589_vm11, %v5520_v35  ;;  %v4493_v55 = vpop.permute.xlu0 %4492  ;;  %v5417_v63 = vld [vmem:[#allocation2 + $0x2d1] sm:$0xff] }
 0x2af   : > { %v5455_v54 = vpack.c.bf16 %v5418_v7, %v5417_v63  ;;  %v4904_v35 = vld [vmem:[#allocation2 + $0x2d2] sm:$0xff]  ;;  %v5167_v63 = vld [vmem:[#allocation2 + $0x320] sm:$0xff] }
 0x2b0   : > { %v4236_v39 = vpop.permute.xlu1 %4235  ;;  %5539 = vrot.lane.b32.xlu0 %v5452_v31, %s9969_s14 }
 0x2b1   : > { %4318 = vst.msk [vmem:[#allocation4 + $0xe0] sm:$0xff] %vm4303_vm6, %v4236_v39 }
 0x2b2   : > { %5282 = vrot.lane.b32.xlu1 %v5195_v47, %s9968_s13  ;;  %4575 = vst.msk [vmem:[#allocation4 + $0xe0] sm:$0xff] %vm4560_vm7, %v4493_v55  ;;  %v5007_v21 = vpop.permute.xlu0 %5006 }
 0x2b4   : > { %v4750_v26 = vpop.permute.xlu1 %4749  ;;  %4512 = vrot.lane.b32.xlu0 %v5195_v47, %s9965_s30  ;;  %v5163_v47 = vld [vmem:[#allocation2 + $0x2f0] sm:$0xff] }
 0x2b5   : > { %4832 = vst.msk [vmem:[#allocation4 + $0xe0] sm:$0xff] %vm4817_vm8, %v4750_v26  ;;  %v5776_v36 = vld [vmem:[#allocation4 + $0xd0] sm:$0xff] }
 0x2b6   : > { %4255 = vrot.lane.b32.xlu1 %v4937_v53, %s9963_s10  ;;  %5089 = vst.msk [vmem:[#allocation4 + $0xe0] sm:$0xff] %vm5074_vm9, %v5007_v21  ;;  %6126 = vmatmul.mubr.bf16.gmra.mrb[52].mxu0 %v5776_v36  ;;  %v5522_v25 = vpop.permute.xlu0 %5521  ;;  %v4905_v53 = vld [vmem:[#allocation2 + $0x2da] sm:$0xff]  ;;  %v5420_v26 = vld [vmem:[#allocation2 + $0x2f1] sm:$0xff]  ;;  %v5199_v36 = vpack.c.bf16 %v5163_v47, %v5162_v43  ;;  %v5791_v47 = vld [vmem:[#allocation4 + $0x148] sm:$0xff] }
 0x2b7   : > { %9557 = vmatprep.mubr.msk.bf16.mxu0 %vm286_vm3, %v5779_v44  ;;  %v4941_v55 = vpack.c.bf16 %v4905_v53, %v4904_v35 }
 0x2b8   : > { %v5265_v20 = vpop.permute.xlu1 %5264  ;;  %5026 = vrot.lane.b32.xlu0 %v4938_v27, %s9967_s12 }
 0x2b9   : > { %5347 = vst.msk [vmem:[#allocation4 + $0xe0] sm:$0xff] %vm5332_vm10, %v5265_v20 }
 0x2ba   : > { %4769 = vrot.lane.b32.xlu1 %v5452_v31, %s9966_s7  ;;  %5604 = vst.msk [vmem:[#allocation4 + $0xe0] sm:$0xff] %vm5589_vm11, %v5522_v25  ;;  %v4495_v56 = vpop.permute.xlu0 %4494  ;;  %v5419_v31 = vld [vmem:[#allocation2 + $0x2e9] sm:$0xff] }
 0x2bb   : > { %v5456_v20 = vpack.c.bf16 %v5420_v26, %v5419_v31 }
 0x2bc   : > { %v4238_v15 = vpop.permute.xlu1 %4237  ;;  %5541 = vrot.lane.b32.xlu0 %v5453_v45, %s9969_s14 }
 0x2bd   : > { %4319 = vst.msk [vmem:[#allocation4 + $0xf0] sm:$0xff] %vm4303_vm6, %v4238_v15  ;;  %v4906_v15 = vld [vmem:[#allocation2 + $0x2ea] sm:$0xff] }
 0x2be   : > { %5284 = vrot.lane.b32.xlu1 %v5196_v4, %s9968_s13  ;;  %4576 = vst.msk [vmem:[#allocation4 + $0xf0] sm:$0xff] %vm4560_vm7, %v4495_v56  ;;  %v5009_v51 = vpop.permute.xlu0 %5008  ;;  %v5165_v56 = vld [vmem:[#allocation2 + $0x308] sm:$0xff] }
 0x2c0   : > { %v4752_v50 = vpop.permute.xlu1 %4751  ;;  %4514 = vrot.lane.b32.xlu0 %v5196_v4, %s9965_s30  ;;  %v5164_v4 = vld [vmem:[#allocation2 + $0x300] sm:$0xff] }
 0x2c1   : > { %4833 = vst.msk [vmem:[#allocation4 + $0xf0] sm:$0xff] %vm4817_vm8, %v4752_v50  ;;  %v5778_v57 = vld [vmem:[#allocation4 + $0xe0] sm:$0xff]  ;;  %v5200_v37 = vpack.c.bf16 %v5165_v56, %v5164_v4  ;;  %v5169_v4 = vld [vmem:[#allocation2 + $0x338] sm:$0xff] }
 0x2c2   : > { %4257 = vrot.lane.b32.xlu1 %v4938_v27, %s9963_s10  ;;  %5090 = vst.msk [vmem:[#allocation4 + $0xf0] sm:$0xff] %vm5074_vm9, %v5009_v51  ;;  %6134 = vmatmul.mubr.bf16.gmra.mrb[56].mxu0 %v5778_v57  ;;  %v5524_v23 = vpop.permute.xlu0 %5523  ;;  %v4942_v51 = vpack.c.bf16 %v4907_v49, %v4906_v15 }
 0x2c3   : > { %9558 = vmatprep.mubr.msk.bf16.mxu0 %vm286_vm3, %v11674_v14 }
 0x2c4   : > { %v5267_v32 = vpop.permute.xlu1 %5266  ;;  %5028 = vrot.lane.b32.xlu0 %v4939_v61, %s9967_s12 }
 0x2c5   : > { %5348 = vst.msk [vmem:[#allocation4 + $0xf0] sm:$0xff] %vm5332_vm10, %v5267_v32 }
 0x2c6   : > { %4771 = vrot.lane.b32.xlu1 %v5453_v45, %s9966_s7  ;;  %5605 = vst.msk [vmem:[#allocation4 + $0xf0] sm:$0xff] %vm5589_vm11, %v5524_v23  ;;  %v4497_v12 = vpop.permute.xlu0 %4496 }
 0x2c8   : > { %v4240_v6 = vpop.permute.xlu1 %4239  ;;  %5543 = vrot.lane.b32.xlu0 %v5454_v52, %s9969_s14 }
 0x2c9   : > { %4320 = vst.msk [vmem:[#allocation4 + $0x100] sm:$0xff] %vm4303_vm6, %v4240_v6 }
 0x2ca   : > { %5286 = vrot.lane.b32.xlu1 %v5197_v1, %s9968_s13  ;;  %4577 = vst.msk [vmem:[#allocation4 + $0x100] sm:$0xff] %vm4560_vm7, %v4497_v12  ;;  %v5011_v19 = vpop.permute.xlu0 %5010 }
 0x2cc   : > { %v4754_v14 = vpop.permute.xlu1 %4753  ;;  %4516 = vrot.lane.b32.xlu0 %v5197_v1, %s9965_s30  ;;  %v5457_v1 = vpack.c.bf16 %v5422_v42, %v5421_v24 }
 0x2cd   : > { %4834 = vst.msk [vmem:[#allocation4 + $0x100] sm:$0xff] %vm4817_vm8, %v4754_v14  ;;  %v5780_v13 = vld [vmem:[#allocation4 + $0xf0] sm:$0xff]  ;;  %v5789_v14 = vld [vmem:[#allocation4 + $0x138] sm:$0xff] }
 0x2ce   : > { %4259 = vrot.lane.b32.xlu1 %v4939_v61, %s9963_s10  ;;  %5091 = vst.msk [vmem:[#allocation4 + $0x100] sm:$0xff] %vm5074_vm9, %v5011_v19  ;;  %6142 = vmatmul.mubr.bf16.gmra.mrb[60].mxu0 %v5780_v13  ;;  %v5526_v8 = vpop.permute.xlu0 %5525 }
 0x2cf   : > { %9559 = vmatprep.mubr.msk.bf16.mxu0 %vm286_vm3, %v5783_v29 }
 0x2d0   : > { %v5269_v5 = vpop.permute.xlu1 %5268  ;;  %5030 = vrot.lane.b32.xlu0 %v4940_v34, %s9967_s12 }
 0x2d1   : > { %5349 = vst.msk [vmem:[#allocation4 + $0x100] sm:$0xff] %vm5332_vm10, %v5269_v5  ;;  %v4908_v5 = vld [vmem:[#allocation2 + $0x302] sm:$0xff] }
 0x2d2   : > { %4773 = vrot.lane.b32.xlu1 %v5454_v52, %s9966_s7  ;;  %5606 = vst.msk [vmem:[#allocation4 + $0x100] sm:$0xff] %vm5589_vm11, %v5526_v8  ;;  %v4499_v2 = vpop.permute.xlu0 %4498  ;;  %v4943_v7 = vpack.c.bf16 %v4909_v22, %v4908_v5 }
 0x2d4   : > { %v4242_v10 = vpop.permute.xlu1 %4241  ;;  %5545 = vrot.lane.b32.xlu0 %v5455_v54, %s9969_s14 }
 0x2d5   : > { %4321 = vst.msk [vmem:[#allocation4 + $0x110] sm:$0xff] %vm4303_vm6, %v4242_v10  ;;  %v5166_v10 = vld [vmem:[#allocation2 + $0x318] sm:$0xff] }
 0x2d6   : > { %5288 = vrot.lane.b32.xlu1 %v5198_v0, %s9968_s13  ;;  %4578 = vst.msk [vmem:[#allocation4 + $0x110] sm:$0xff] %vm4560_vm7, %v4499_v2  ;;  %v5013_v58 = vpop.permute.xlu0 %5012  ;;  %v5423_v2 = vld [vmem:[#allocation2 + $0x319] sm:$0xff]  ;;  %v5201_v53 = vpack.c.bf16 %v5167_v63, %v5166_v10 }
 0x2d8   : > { %v4756_v3 = vpop.permute.xlu1 %4755  ;;  %4261 = vrot.lane.b32.xlu0 %v4940_v34, %s9963_s10 }
 0x2d9   : > { %4835 = vst.msk [vmem:[#allocation4 + $0x110] sm:$0xff] %vm4817_vm8, %v4756_v3  ;;  %v5782_v38 = vld [vmem:[#allocation4 + $0x100] sm:$0xff] }
 0x2da   : > { %4004 = vrot.lane.b32.xlu1 %v5454_v52, %s9962_s9  ;;  %5092 = vst.msk [vmem:[#allocation4 + $0x110] sm:$0xff] %vm5074_vm9, %v5013_v58  ;;  %6150 = vmatmul.mubr.bf16.gmra.mrb[64].mxu0 %v5782_v38  ;;  %v5528_v39 = vpop.permute.xlu0 %5527 }
 0x2db   : > { %9560 = vmatprep.mubr.msk.bf16.mxu0 %vm286_vm3, %v5785_v18 }
 0x2dc   : > { %v5271_v30 = vpop.permute.xlu1 %5270  ;;  %4775 = vrot.lane.b32.xlu0 %v5455_v54, %s9966_s7 }
 0x2dd   : > { %5350 = vst.msk [vmem:[#allocation4 + $0x110] sm:$0xff] %vm5332_vm10, %v5271_v30 }
 0x2de   : > { %4518 = vrot.lane.b32.xlu1 %v5198_v0, %s9965_s30  ;;  %5607 = vst.msk [vmem:[#allocation4 + $0x110] sm:$0xff] %vm5589_vm11, %v5528_v39  ;;  %v4501_v21 = vpop.permute.xlu0 %4500 }
 0x2e0   : > { %v4244_v62 = vpop.permute.xlu1 %4243  ;;  %5290 = vrot.lane.b32.xlu0 %v5199_v36, %s9968_s13 }
 0x2e1   : > { %4322 = vst.msk [vmem:[#allocation4 + $0x120] sm:$0xff] %vm4303_vm6, %v4244_v62 }
 0x2e2   : > { %5032 = vrot.lane.b32.xlu1 %v4941_v55, %s9967_s12  ;;  %4579 = vst.msk [vmem:[#allocation4 + $0x120] sm:$0xff] %vm4560_vm7, %v4501_v21  ;;  %v5015_v11 = vpop.permute.xlu0 %5014 }
 0x2e4   : > { %v4758_v44 = vpop.permute.xlu1 %4757  ;;  %4006 = vrot.lane.b32.xlu0 %v5455_v54, %s9962_s9  ;;  %v5424_v54 = vld [vmem:[#allocation2 + $0x321] sm:$0xff] }
 0x2e5   : > { %4836 = vst.msk [vmem:[#allocation4 + $0x120] sm:$0xff] %vm4817_vm8, %v4758_v44  ;;  %v5784_v60 = vld [vmem:[#allocation4 + $0x110] sm:$0xff]  ;;  %v5458_v31 = vpack.c.bf16 %v5424_v54, %v5423_v2 }
 0x2e6   : > { %5547 = vrot.lane.b32.xlu1 %v5456_v20, %s9969_s14  ;;  %5093 = vst.msk [vmem:[#allocation4 + $0x120] sm:$0xff] %vm5074_vm9, %v5015_v11  ;;  %6158 = vmatmul.mubr.bf16.gmra.mrb[68].mxu0 %v5784_v60  ;;  %v5530_v25 = vpop.permute.xlu0 %5529 }
 0x2e7   : > { %9561 = vmatprep.mubr.msk.bf16.mxu0 %vm286_vm3, %v5787_v40  ;;  %v4910_v40 = vld [vmem:[#allocation2 + $0x31a] sm:$0xff] }
 0x2e8   : > { %v5273_v33 = vpop.permute.xlu1 %5272  ;;  %4520 = vrot.lane.b32.xlu0 %v5199_v36, %s9965_s30 }
 0x2e9   : > { %5351 = vst.msk [vmem:[#allocation4 + $0x120] sm:$0xff] %vm5332_vm10, %v5273_v33  ;;  %v4911_v33 = vld [vmem:[#allocation2 + $0x322] sm:$0xff] }
 0x2ea   : > { %4263 = vrot.lane.b32.xlu1 %v4941_v55, %s9963_s10  ;;  %5608 = vst.msk [vmem:[#allocation4 + $0x120] sm:$0xff] %vm5589_vm11, %v5530_v25  ;;  %v4503_v45 = vpop.permute.xlu0 %4502  ;;  %v5168_v25 = vld [vmem:[#allocation2 + $0x330] sm:$0xff]  ;;  %v4944_v24 = vpack.c.bf16 %v4911_v33, %v4910_v40  ;;  %v6791_v40 = vld [vmem:[#allocation3 + $0x2] sm:$0xff] }
 0x2eb   : > { %v6792_v33 = vld [vmem:[#allocation3 + $0xa] sm:$0xff] }
 0x2ec   : > { %v4246_v27 = vpop.permute.xlu1 %4245  ;;  %5034 = vrot.lane.b32.xlu0 %v4942_v51, %s9967_s12 }
 0x2ed   : > { %4323 = vst.msk [vmem:[#allocation4 + $0x130] sm:$0xff] %vm4303_vm6, %v4246_v27  ;;  %v6023_v50 = vpop.f32.mrb[0].mxu0 }
 0x2ee   : > { %4777 = vrot.lane.b32.xlu1 %v5456_v20, %s9966_s7  ;;  %4580 = vst.msk [vmem:[#allocation4 + $0x130] sm:$0xff] %vm4560_vm7, %v4503_v45  ;;  %v6024_v57 = vadd.f32 %v11848_v16, %v6023_v50  ;;  %v6025_v32 = vpop.f32.mrb[1].mxu0  ;;  %v5017_v9 = vpop.permute.xlu0 %5016 }
 0x2ef   : > { %v6026_v23 = vpop.f32.mrb[2].mxu0 }
 0x2f0   : > { %v4760_v48 = vpop.permute.xlu1 %4759  ;;  %v6278_v61 = vmax.f32 %v6024_v57, 0.0  ;;  %v6027_v6 = vadd.f32 %v11848_v16, %v6026_v23  ;;  %v6028_v59 = vpop.f32.mrb[3].mxu0  ;;  %5549 = vrot.lane.b32.xlu0 %v5457_v1, %s9969_s14 }
 0x2f1   : > { %4837 = vst.msk [vmem:[#allocation4 + $0x130] sm:$0xff] %vm4817_vm8, %v4760_v48  ;;  %v5786_v12 = vld [vmem:[#allocation4 + $0x120] sm:$0xff]  ;;  %v5425_v59 = vld [vmem:[#allocation2 + $0x331] sm:$0xff] }
 0x2f2   : > { %5292 = vrot.lane.b32.xlu1 %v5200_v37, %s9968_s13  ;;  %6343 = vst.msk [vmem:[#allocation3 + $0x19] sm:$0xff] %vm286_vm3, %v6278_v61  ;;  %v6279_v52 = vmax.f32 %v6027_v6, 0.0  ;;  %6166 = vmatmul.mubr.bf16.gmra.mrb[72].mxu0 %v5786_v12  ;;  %v5532_v13 = vpop.permute.xlu0 %5531  ;;  %v5793_v61 = vld [vmem:[#allocation4 + $0x158] sm:$0xff] }
 0x2f3   : > { %5094 = vst.msk [vmem:[#allocation4 + $0x130] sm:$0xff] %vm5074_vm9, %v5017_v9  ;;  %9562 = vmatprep.mubr.msk.bf16.mxu0 %vm286_vm3, %v5789_v14  ;;  %v5426_v9 = vld [vmem:[#allocation2 + $0x339] sm:$0xff] }
 0x2f4   : > { %v5275_v19 = vpop.permute.xlu1 %5274  ;;  %6344 = vst.msk [vmem:[#allocation3 + $0x21] sm:$0xff] %vm286_vm3, %v6279_v52  ;;  %4265 = vrot.lane.b32.xlu0 %v4942_v51, %s9963_s10  ;;  %v5459_v52 = vpack.c.bf16 %v5426_v9, %v5425_v59 }
 0x2f5   : > { %5352 = vst.msk [vmem:[#allocation4 + $0x130] sm:$0xff] %vm5332_vm10, %v5275_v19  ;;  %v9938_v19 = vld [vmem:[%s13152_s4] sm:$0xff]  }
 0x2f6   : > { %4008 = vrot.lane.b32.xlu1 %v5456_v20, %s9962_s9  ;;  %5609 = vst.msk [vmem:[#allocation4 + $0x130] sm:$0xff] %vm5589_vm11, %v5532_v13  ;;  %v4505_v46 = vpop.permute.xlu0 %4504  ;;  %8696 = vmatpush1.bf16.msra.mxu1 %v9938_v19  ;;  %v9939_v13 = vld [vmem:[%s13152_s4 + $0x8] sm:$0xff]  }
 0x2f7   : > { %8697 = vmatprep.subr.bf16.mxu1 %v9964_v28 }
 0x2f8   : > { %v4248_v29 = vpop.permute.xlu1 %4247  ;;  %4779 = vrot.lane.b32.xlu0 %v5457_v1, %s9966_s7 }
 0x2f9   : > { %4324 = vst.msk [vmem:[#allocation4 + $0x140] sm:$0xff] %vm4303_vm6, %v4248_v29  ;;  %v6031_v17 = vpop.f32.mrb[4].mxu0  ;;  %v6409_v18 = vld [vmem:[#allocation3 + $0x18] sm:$0xff] }
 0x2fa   : > { %4522 = vrot.lane.b32.xlu1 %v5200_v37, %s9965_s30  ;;  %4581 = vst.msk [vmem:[#allocation4 + $0x140] sm:$0xff] %vm4560_vm7, %v4505_v46  ;;  %v6032_v41 = vadd.f32 %v11848_v16, %v6031_v17  ;;  %v6033_v8 = vpop.f32.mrb[5].mxu0  ;;  %v5019_v35 = vpop.permute.xlu0 %5018  ;;  %8698 = vmatpush1.bf16.msra.mxu1 %v9939_v13 }
 0x2fb   : > { %v6034_v0 = vpop.f32.mrb[6].mxu0  ;;  %v6410_v30 = vld [vmem:[#allocation3 + $0x20] sm:$0xff]  ;;  %v4912_v8 = vld [vmem:[#allocation2 + $0x332] sm:$0xff]  ;;  %8699 = vmatprep.subr.bf16.mxu1 %v9964_v28 }
 0x2fc   : > { %v4762_v34 = vpop.permute.xlu1 %4761  ;;  %v6280_v3 = vmax.f32 %v6032_v41, 0.0  ;;  %v6035_v58 = vadd.f32 %v11848_v16, %v6034_v0  ;;  %v6036_v38 = vpop.f32.mrb[7].mxu0  ;;  %v6472_v62 = vpack.c.bf16 %v6410_v30, %v6409_v18  ;;  %5294 = vrot.lane.b32.xlu0 %v5201_v53, %s9968_s13  ;;  %v5170_v0 = vld [vmem:[#allocation2 + $0x348] sm:$0xff] }
 0x2fd   : > { %4838 = vst.msk [vmem:[#allocation4 + $0x140] sm:$0xff] %vm4817_vm8, %v4762_v34  ;;  %v5788_v39 = vld [vmem:[#allocation4 + $0x130] sm:$0xff]  ;;  %v4913_v34 = vld [vmem:[#allocation2 + $0x33a] sm:$0xff] }
 0x2fe   : > { %5036 = vrot.lane.b32.xlu1 %v4943_v7, %s9967_s12  ;;  %6345 = vst.msk [vmem:[#allocation3 + $0x31] sm:$0xff] %vm286_vm3, %v6280_v3  ;;  %v6281_v43 = vmax.f32 %v6035_v58, 0.0  ;;  %6174 = vmatmul.mubr.bf16.gmra.mrb[76].mxu0 %v5788_v39  ;;  %6504 = vst.msk [vmem:[#allocation4 + $0x10] sm:$0xff] %vm286_vm3, %v6472_v62  ;;  %v5534_v26 = vpop.permute.xlu0 %5533  ;;  %v5171_v38 = vld [vmem:[#allocation2 + $0x350] sm:$0xff] }
 0x2ff   : > { %5095 = vst.msk [vmem:[#allocation4 + $0x140] sm:$0xff] %vm5074_vm9, %v5019_v35  ;;  %9563 = vmatprep.mubr.msk.bf16.mxu0 %vm286_vm3, %v5791_v47  ;;  %v5427_v39 = vld [vmem:[#allocation2 + $0x349] sm:$0xff]  ;;  %v5428_v62 = vld [vmem:[#allocation2 + $0x351] sm:$0xff] }
 0x300   : > { %v5277_v55 = vpop.permute.xlu1 %5276  ;;  %6346 = vst.msk [vmem:[#allocation3 + $0x39] sm:$0xff] %vm286_vm3, %v6281_v43  ;;  %4010 = vrot.lane.b32.xlu0 %v5457_v1, %s9962_s9  ;;  %v5202_v1 = vpack.c.bf16 %v5169_v4, %v5168_v25 }
 0x301   : > { %5353 = vst.msk [vmem:[#allocation4 + $0x140] sm:$0xff] %vm5332_vm10, %v5277_v55  ;;  %v5795_v55 = vld [vmem:[#allocation4 + $0x168] sm:$0xff] }
 0x302   : > { %5551 = vrot.lane.b32.xlu1 %v5458_v31, %s9969_s14  ;;  %5610 = vst.msk [vmem:[#allocation4 + $0x140] sm:$0xff] %vm5589_vm11, %v5534_v26  ;;  %v4507_v36 = vpop.permute.xlu0 %4506  ;;  %v4945_v26 = vpack.c.bf16 %v4913_v34, %v4912_v8  ;;  %v5797_v8 = vld [vmem:[#allocation4 + $0x178] sm:$0xff] }
 0x303   : > { %v7303_v34 = vld [vmem:[#allocation3 + $0x19] sm:$0xff] }
 0x304   : > { %v4250_v21 = vpop.permute.xlu1 %4249  ;;  %4524 = vrot.lane.b32.xlu0 %v5201_v53, %s9965_s30 }
 0x305   : > { %4325 = vst.msk [vmem:[#allocation4 + $0x150] sm:$0xff] %vm4303_vm6, %v4250_v21  ;;  %v6039_v44 = vpop.f32.mrb[8].mxu0  ;;  %v6411_v57 = vld [vmem:[#allocation3 + $0x30] sm:$0xff] }
 0x306   : > { %4267 = vrot.lane.b32.xlu1 %v4943_v7, %s9963_s10  ;;  %4582 = vst.msk [vmem:[#allocation4 + $0x150] sm:$0xff] %vm4560_vm7, %v4507_v36  ;;  %v6040_v20 = vadd.f32 %v11848_v16, %v6039_v44  ;;  %v6041_v11 = vpop.f32.mrb[9].mxu0  ;;  %v5021_v48 = vpop.permute.xlu0 %5020  ;;  %v9940_v21 = vld [vmem:[%s13152_s4 + $0x10] sm:$0xff]   ;;  %v5203_v36 = vpack.c.bf16 %v5171_v38, %v5170_v0  ;;  %v6535_v44 = vld [vmem:[#allocation3 + $0x1] sm:$0xff] }
 0x307   : > { %v8328_v27 = vld [vmem:[#allocation3 + $0x32] sm:$0xff]  ;;  %v8329_v15 = vld [vmem:[#allocation3 + $0x3a] sm:$0xff]  ;;  %v6042_v49 = vpop.f32.mrb[10].mxu0  ;;  %v5460_v11 = vpack.c.bf16 %v5428_v62, %v5427_v39  ;;  %8700 = vmatpush1.bf16.msra.mxu1 %v9940_v21 }
 0x308   : > { %v4764_v60 = vpop.permute.xlu1 %4763  ;;  %v11890_v56 = vpack.c.bf16 %v8329_v15, %v8328_v27  ;;  %v6282_v45 = vmax.f32 %v6040_v20, 0.0  ;;  %v6043_v50 = vadd.f32 %v11848_v16, %v6042_v49  ;;  %v6044_v51 = vpop.f32.mrb[11].mxu0  ;;  %v6412_v32 = vld [vmem:[#allocation3 + $0x38] sm:$0xff]  ;;  %5038 = vrot.lane.b32.xlu0 %v4944_v24, %s9967_s12  ;;  %v6536_v20 = vld [vmem:[#allocation3 + $0x9] sm:$0xff]  ;;  %8701 = vmatprep.subr.bf16.mxu1 %v9964_v28  ;;  %v6407_v15 = vld [vmem:[#allocation3] sm:$0xff] }
 0x309   : > { %4839 = vst.msk [vmem:[#allocation4 + $0x150] sm:$0xff] %vm4817_vm8, %v4764_v60  ;;  %v5790_v42 = vld [vmem:[#allocation4 + $0x140] sm:$0xff]  ;;  %v6473_v37 = vpack.c.bf16 %v6412_v32, %v6411_v57  ;;  %v9941_v27 = vld [vmem:[%s13152_s4 + $0x18] sm:$0xff]   ;;  %v6408_v49 = vld [vmem:[#allocation3 + $0x8] sm:$0xff]  ;;  %v6599_v4 = vpack.c.bf16 %v6536_v20, %v6535_v44  ;;  %v6855_v57 = vpack.c.bf16 %v6792_v33, %v6791_v40 }
 0x30a   : > { %4781 = vrot.lane.b32.xlu1 %v5458_v31, %s9966_s7  ;;  %8424 = vst.msk [vmem:[#allocation4 + $0x8] sm:$0xff] %vm286_vm3, %v11890_v56  ;;  %6347 = vst.msk [vmem:[#allocation3 + $0x49] sm:$0xff] %vm286_vm3, %v6282_v45  ;;  %v6283_v23 = vmax.f32 %v6043_v50, 0.0  ;;  %6182 = vmatmul.mubr.bf16.gmra.mrb[80].mxu0 %v5790_v42  ;;  %v5536_v12 = vpop.permute.xlu0 %5535  ;;  %v6471_v45 = vpack.c.bf16 %v6408_v49, %v6407_v15  ;;  %v5684_v50 = vld [vmem:[#allocation2 + $0x34a] sm:$0xff]  ;;  %v5685_v51 = vld [vmem:[#allocation2 + $0x352] sm:$0xff] }
 0x30b   : > { %5096 = vst.msk [vmem:[#allocation4 + $0x150] sm:$0xff] %vm5074_vm9, %v5021_v48  ;;  %9564 = vmatprep.mubr.msk.bf16.mxu0 %vm286_vm3, %v5793_v61  ;;  %8702 = vmatpush1.bf16.msra.mxu1 %v9941_v27  ;;  %v9942_v32 = vld [vmem:[%s13152_s4 + $0x20] sm:$0xff]   ;;  %v5717_v48 = vpack.c.bf16 %v5685_v51, %v5684_v50  ;;  %v7817_v38 = vld [vmem:[#allocation3 + $0x38] sm:$0xff] }
 0x30c   : > { %v5279_v6 = vpop.permute.xlu1 %5278  ;;  %6505 = vst.msk [vmem:[#allocation4 + $0x20] sm:$0xff] %vm286_vm3, %v6473_v37  ;;  %6348 = vst.msk [vmem:[#allocation3 + $0x51] sm:$0xff] %vm286_vm3, %v6283_v23  ;;  %5553 = vrot.lane.b32.xlu0 %v5459_v52, %s9969_s14  ;;  %8703 = vmatprep.subr.bf16.mxu1 %v9964_v28  ;;  %v7559_v0 = vld [vmem:[#allocation3 + $0x1a] sm:$0xff] }
 0x30d   : > { %5354 = vst.msk [vmem:[#allocation4 + $0x150] sm:$0xff] %vm5332_vm10, %v5279_v6  ;;  %v7048_v6 = vld [vmem:[#allocation3 + $0x20] sm:$0xff] }
 0x30e   : > { %5296 = vrot.lane.b32.xlu1 %v5202_v1, %s9968_s13  ;;  %5611 = vst.msk [vmem:[#allocation4 + $0x150] sm:$0xff] %vm5589_vm11, %v5536_v12  ;;  %v4509_v29 = vpop.permute.xlu0 %4508  ;;  %v7304_v12 = vld [vmem:[#allocation3 + $0x21] sm:$0xff] }
 0x30f   : > { %6503 = vst.msk [vmem:[#allocation4] sm:$0xff] %vm286_vm3, %v6471_v45  ;;  %5749 = vst.msk [vmem:[#allocation4 + $0x1f8] sm:$0xff] %vm286_vm3, %v5717_v48  ;;  %8704 = vmatpush1.bf16.msra.mxu1 %v9942_v32 }
 0x310   : > { %v4252_v14 = vpop.permute.xlu1 %4251  ;;  %4269 = vrot.lane.b32.xlu0 %v4944_v24, %s9963_s10  ;;  %8705 = vmatprep.subr.bf16.mxu1 %v9964_v28 }
 0x311   : > { %4326 = vst.msk [vmem:[#allocation4 + $0x160] sm:$0xff] %vm4303_vm6, %v4252_v14  ;;  %v6047_v5 = vpop.f32.mrb[12].mxu0  ;;  %v8457_v22 = vld [vmem:[#allocation4 + $0x8] sm:$0xff] }
 0x312   : > { %4012 = vrot.lane.b32.xlu1 %v5458_v31, %s9962_s9  ;;  %4583 = vst.msk [vmem:[#allocation4 + $0x160] sm:$0xff] %vm4560_vm7, %v4509_v29  ;;  %v6048_v46 = vadd.f32 %v11848_v16, %v6047_v5  ;;  %v6049_v17 = vpop.f32.mrb[13].mxu0  ;;  %9585 = vmatprep.mubr.msk.bf16.mxu1 %vm286_vm3, %v8457_v22  ;;  %v6413_v18 = vld [vmem:[#allocation3 + $0x48] sm:$0xff]  ;;  %v5023_v35 = vpop.permute.xlu0 %5022  ;;  %v7047_v29 = vld [vmem:[#allocation3 + $0x18] sm:$0xff] }
 0x313   : > { %v8330_v10 = vld [vmem:[#allocation3 + $0x4a] sm:$0xff]  ;;  %v8331_v63 = vld [vmem:[#allocation3 + $0x52] sm:$0xff]  ;;  %v6050_v7 = vpop.f32.mrb[14].mxu0  ;;  %v7111_v17 = vpack.c.bf16 %v7048_v6, %v7047_v29 }
 0x314   : > { %v4766_v41 = vpop.permute.xlu1 %4765  ;;  %v11920_v2 = vpack.c.bf16 %v8331_v63, %v8330_v10  ;;  %v6284_v54 = vmax.f32 %v6048_v46, 0.0  ;;  %v6051_v3 = vadd.f32 %v11848_v16, %v6050_v7  ;;  %v6052_v58 = vpop.f32.mrb[15].mxu0  ;;  %v6414_v30 = vld [vmem:[#allocation3 + $0x50] sm:$0xff]  ;;  %4783 = vrot.lane.b32.xlu0 %v5459_v52, %s9966_s7 }
 0x315   : > { %4840 = vst.msk [vmem:[#allocation4 + $0x160] sm:$0xff] %vm4817_vm8, %v4766_v41  ;;  %v5792_v53 = vld [vmem:[#allocation4 + $0x150] sm:$0xff]  ;;  %v6474_v43 = vpack.c.bf16 %v6414_v30, %v6413_v18  ;;  %v9943_v58 = vld [vmem:[%s13152_s4 + $0x28] sm:$0xff]  }
 0x316   : > { %4526 = vrot.lane.b32.xlu1 %v5202_v1, %s9965_s30  ;;  %8425 = vst.msk [vmem:[#allocation4 + $0x18] sm:$0xff] %vm286_vm3, %v11920_v2  ;;  %6349 = vst.msk [vmem:[#allocation3 + $0x61] sm:$0xff] %vm286_vm3, %v6284_v54  ;;  %v6285_v47 = vmax.f32 %v6051_v3, 0.0  ;;  %6190 = vmatmul.mubr.bf16.gmra.mrb[84].mxu0 %v5792_v53  ;;  %v5538_v60 = vpop.permute.xlu0 %5537  ;;  %v7560_v54 = vld [vmem:[#allocation3 + $0x22] sm:$0xff]  ;;  %v7367_v3 = vpack.c.bf16 %v7304_v12, %v7303_v34  ;;  %v7816_v53 = vld [vmem:[#allocation3 + $0x30] sm:$0xff] }
 0x317   : > { %5097 = vst.msk [vmem:[#allocation4 + $0x160] sm:$0xff] %vm5074_vm9, %v5023_v35  ;;  %9565 = vmatprep.mubr.msk.bf16.mxu0 %vm286_vm3, %v5795_v55  ;;  %8706 = vmatpush1.bf16.msra.mxu1 %v9943_v58  ;;  %v7623_v30 = vpack.c.bf16 %v7560_v54, %v7559_v0  ;;  %v8073_v35 = vld [vmem:[#allocation3 + $0x39] sm:$0xff]  ;;  %v7880_v62 = vpack.c.bf16 %v7817_v38, %v7816_v53  ;;  %v9944_v55 = vld [vmem:[%s13152_s4 + $0x30] sm:$0xff]  }
 0x318   : > { %v5281_v31 = vpop.permute.xlu1 %5280  ;;  %6506 = vst.msk [vmem:[#allocation4 + $0x30] sm:$0xff] %vm286_vm3, %v6474_v43  ;;  %6350 = vst.msk [vmem:[#allocation3 + $0x69] sm:$0xff] %vm286_vm3, %v6285_v47  ;;  %5298 = vrot.lane.b32.xlu0 %v5203_v36, %s9968_s13  ;;  %8707 = vmatprep.subr.bf16.mxu1 %v9964_v28  ;;  %v8390_v43 = vld [vmem:[#allocation3 + $0x34a] sm:$0xff]  ;;  %v8391_v47 = vld [vmem:[#allocation3 + $0x352] sm:$0xff] }
 0x319   : > { %5355 = vst.msk [vmem:[#allocation4 + $0x160] sm:$0xff] %vm5332_vm10, %v5281_v31  ;;  %v8423_v31 = vpack.c.bf16 %v8391_v47, %v8390_v43  ;;  %v11982_v21 = vld [vmem:[#allocation4 + $0x1f8] sm:$0xff] }
 0x31a   : > { %5040 = vrot.lane.b32.xlu1 %v4945_v26, %s9967_s12  ;;  %5612 = vst.msk [vmem:[#allocation4 + $0x160] sm:$0xff] %vm5589_vm11, %v5538_v60  ;;  %v4511_v24 = vpop.permute.xlu0 %4510  ;;  %v8072_v26 = vld [vmem:[#allocation3 + $0x31] sm:$0xff] }
 0x31b   : > { %8708 = vmatpush1.bf16.msra.mxu1 %v9944_v55  ;;  %v9945_v36 = vld [vmem:[%s13152_s4 + $0x38] sm:$0xff]   ;;  %8455 = vst.msk [vmem:[#allocation4 + $0x1f8] sm:$0xff] %vm286_vm3, %v8423_v31 }
 0x31c   : > { %v4254_v25 = vpop.permute.xlu1 %4253  ;;  %6663 = vrot.lane.b32.xlu0 %v6599_v4, %s9962_s9  ;;  %8709 = vmatprep.subr.bf16.mxu1 %v9964_v28 }
 0x31d   : > { %4327 = vst.msk [vmem:[#allocation4 + $0x170] sm:$0xff] %vm4303_vm6, %v4254_v25  ;;  %v6055_v42 = vpop.f32.mrb[16].mxu0  ;;  %v6415_v5 = vld [vmem:[#allocation3 + $0x60] sm:$0xff] }
 0x31e   : > { %5555 = vrot.lane.b32.xlu1 %v5460_v11, %s9969_s14  ;;  %4584 = vst.msk [vmem:[#allocation4 + $0x170] sm:$0xff] %vm4560_vm7, %v4511_v24  ;;  %v6056_v37 = vadd.f32 %v11848_v16, %v6055_v42  ;;  %v6057_v23 = vpop.f32.mrb[17].mxu0  ;;  %v5025_v46 = vpop.permute.xlu0 %5024  ;;  %v11987_v11 = vpack.c.bf16 %v8073_v35, %v8072_v26  ;;  %v7820_v55 = vld [vmem:[#allocation3 + $0x60] sm:$0xff] }
 0x31f   : > { %v8332_v59 = vld [vmem:[#allocation3 + $0x62] sm:$0xff]  ;;  %v8333_v9 = vld [vmem:[#allocation3 + $0x6a] sm:$0xff]  ;;  %v6058_v1 = vpop.f32.mrb[18].mxu0  ;;  %8710 = vmatpush1.bf16.msra.mxu1 %v9945_v36 }
 0x320   : > { %v4768_v61 = vpop.permute.xlu1 %4767  ;;  %v11956_v52 = vpack.c.bf16 %v8333_v9, %v8332_v59  ;;  %v6286_v14 = vmax.f32 %v6056_v37, 0.0  ;;  %v6059_v19 = vadd.f32 %v11848_v16, %v6058_v1  ;;  %v6060_v13 = vpop.f32.mrb[19].mxu0  ;;  %v6416_v22 = vld [vmem:[#allocation3 + $0x68] sm:$0xff]  ;;  %7175 = vrot.lane.b32.xlu0 %v7111_v17, %s9965_s30  ;;  %8711 = vmatprep.subr.bf16.mxu1 %v9964_v28  ;;  %v7819_v59 = vld [vmem:[#allocation3 + $0x50] sm:$0xff] }
 0x321   : > { %4841 = vst.msk [vmem:[#allocation4 + $0x170] sm:$0xff] %vm4817_vm8, %v4768_v61  ;;  %v5794_v41 = vld [vmem:[#allocation4 + $0x160] sm:$0xff]  ;;  %v6475_v10 = vpack.c.bf16 %v6416_v22, %v6415_v5  ;;  %v5799_v37 = vld [vmem:[#allocation4 + $0x188] sm:$0xff]  ;;  %v8075_v9 = vld [vmem:[#allocation3 + $0x51] sm:$0xff] }
 0x322   : > { %6919 = vrot.lane.b32.xlu1 %v6855_v57, %s9963_s10  ;;  %8426 = vst.msk [vmem:[#allocation4 + $0x28] sm:$0xff] %vm286_vm3, %v11956_v52  ;;  %6351 = vst.msk [vmem:[#allocation3 + $0x79] sm:$0xff] %vm286_vm3, %v6286_v14  ;;  %v6287_v63 = vmax.f32 %v6059_v19, 0.0  ;;  %6198 = vmatmul.mubr.bf16.gmra.mrb[88].mxu0 %v5794_v41  ;;  %v5540_v18 = vpop.permute.xlu0 %5539  ;;  %v9946_v61 = vld [vmem:[%s13152_s4 + $0x40] sm:$0xff]   ;;  %v7818_v1 = vld [vmem:[#allocation3 + $0x48] sm:$0xff] }
 0x323   : > { %5098 = vst.msk [vmem:[#allocation4 + $0x170] sm:$0xff] %vm5074_vm9, %v5025_v46  ;;  %9566 = vmatprep.mubr.msk.bf16.mxu0 %vm286_vm3, %v5797_v8  ;;  %8712 = vmatpush1.bf16.msra.mxu1 %v9946_v61  ;;  %v7881_v19 = vpack.c.bf16 %v7819_v59, %v7818_v1  ;;  %v8074_v13 = vld [vmem:[#allocation3 + $0x49] sm:$0xff] }
 0x324   : > { %v5283_v7 = vpop.permute.xlu1 %5282  ;;  %6507 = vst.msk [vmem:[#allocation4 + $0x40] sm:$0xff] %vm286_vm3, %v6475_v10  ;;  %6352 = vst.msk [vmem:[#allocation3 + $0x81] sm:$0xff] %vm286_vm3, %v6287_v63  ;;  %7687 = vrot.lane.b32.xlu0 %v7623_v30, %s9967_s12  ;;  %v12022_v46 = vpack.c.bf16 %v8075_v9, %v8074_v13 }
 0x325   : > { %5356 = vst.msk [vmem:[#allocation4 + $0x170] sm:$0xff] %vm5332_vm10, %v5283_v7 }
 0x326   : > { %7431 = vrot.lane.b32.xlu1 %v7367_v3, %s9966_s7  ;;  %5613 = vst.msk [vmem:[#allocation4 + $0x170] sm:$0xff] %vm5589_vm11, %v5540_v18  ;;  %v4513_v44 = vpop.permute.xlu0 %4512 }
 0x328   : > { %v4256_v39 = vpop.permute.xlu1 %4255  ;;  %8200 = vrot.lane.b32.xlu0 %v11987_v11, %s9969_s14 }
 0x329   : > { %4328 = vst.msk [vmem:[#allocation4 + $0x180] sm:$0xff] %vm4303_vm6, %v4256_v39  ;;  %v6063_v20 = vpop.f32.mrb[20].mxu0  ;;  %v6417_v51 = vld [vmem:[#allocation3 + $0x78] sm:$0xff] }
 0x32a   : > { %7944 = vrot.lane.b32.xlu1 %v7880_v62, %s9968_s13  ;;  %4585 = vst.msk [vmem:[#allocation4 + $0x180] sm:$0xff] %vm4560_vm7, %v4513_v44  ;;  %v6064_v60 = vadd.f32 %v11848_v16, %v6063_v20  ;;  %v6065_v40 = vpop.f32.mrb[21].mxu0  ;;  %v5027_v32 = vpop.permute.xlu0 %5026  ;;  %v8077_v44 = vld [vmem:[#allocation3 + $0x69] sm:$0xff] }
 0x32b   : > { %v8334_v25 = vld [vmem:[#allocation3 + $0x7a] sm:$0xff]  ;;  %v8335_v27 = vld [vmem:[#allocation3 + $0x82] sm:$0xff]  ;;  %v6066_v15 = vpop.f32.mrb[22].mxu0 }
 0x32c   : > { %v4770_v33 = vpop.permute.xlu1 %4769  ;;  %v11996_v49 = vpack.c.bf16 %v8335_v27, %v8334_v25  ;;  %v6288_v4 = vmax.f32 %v6064_v60, 0.0  ;;  %v6067_v45 = vadd.f32 %v11848_v16, %v6066_v15  ;;  %v6068_v50 = vpop.f32.mrb[23].mxu0  ;;  %v6418_v57 = vld [vmem:[#allocation3 + $0x80] sm:$0xff]  ;;  %6921 = vrot.lane.b32.xlu0 %v7623_v30, %s9963_s10  ;;  %v5801_v30 = vld [vmem:[#allocation4 + $0x198] sm:$0xff] }
 0x32d   : > { %4842 = vst.msk [vmem:[#allocation4 + $0x180] sm:$0xff] %vm4817_vm8, %v4770_v33  ;;  %v5796_v48 = vld [vmem:[#allocation4 + $0x170] sm:$0xff]  ;;  %v6476_v24 = vpack.c.bf16 %v6418_v57, %v6417_v51  ;;  %v8076_v15 = vld [vmem:[#allocation3 + $0x61] sm:$0xff] }
 0x32e   : > { %6665 = vrot.lane.b32.xlu1 %v7367_v3, %s9962_s9  ;;  %8427 = vst.msk [vmem:[#allocation4 + $0x38] sm:$0xff] %vm286_vm3, %v11996_v49  ;;  %6353 = vst.msk [vmem:[#allocation3 + $0x91] sm:$0xff] %vm286_vm3, %v6288_v4  ;;  %v6289_v42 = vmax.f32 %v6067_v45, 0.0  ;;  %6206 = vmatmul.mubr.bf16.gmra.mrb[92].mxu0 %v5796_v48  ;;  %v5542_v28 = vpop.permute.xlu0 %5541  ;;  %v12057_v57 = vpack.c.bf16 %v8077_v44, %v8076_v15  ;;  %v7823_v1 = vld [vmem:[#allocation3 + $0x80] sm:$0xff] }
 0x32f   : > { %5099 = vst.msk [vmem:[#allocation4 + $0x180] sm:$0xff] %vm5074_vm9, %v5027_v32  ;;  %9567 = vmatprep.mubr.msk.bf16.mxu0 %vm286_vm3, %v5799_v37 }
 0x330   : > { %v5285_v23 = vpop.permute.xlu1 %5284  ;;  %6508 = vst.msk [vmem:[#allocation4 + $0x50] sm:$0xff] %vm286_vm3, %v6476_v24  ;;  %6354 = vst.msk [vmem:[#allocation3 + $0x99] sm:$0xff] %vm286_vm3, %v6289_v42  ;;  %7433 = vrot.lane.b32.xlu0 %v11987_v11, %s9966_s7  ;;  %v5803_v24 = vld [vmem:[#allocation4 + $0x1a8] sm:$0xff] }
 0x331   : > { %5357 = vst.msk [vmem:[#allocation4 + $0x180] sm:$0xff] %vm5332_vm10, %v5285_v23 }
 0x332   : > { %7177 = vrot.lane.b32.xlu1 %v7880_v62, %s9965_s30  ;;  %5614 = vst.msk [vmem:[#allocation4 + $0x180] sm:$0xff] %vm5589_vm11, %v5542_v28  ;;  %v4515_v12 = vpop.permute.xlu0 %4514  ;;  %v7821_v62 = vld [vmem:[#allocation3 + $0x68] sm:$0xff] }
 0x333   : > { %v7882_v36 = vpack.c.bf16 %v7821_v62, %v7820_v55 }
 0x334   : > { %v4258_v6 = vpop.permute.xlu1 %4257  ;;  %7946 = vrot.lane.b32.xlu0 %v7881_v19, %s9968_s13 }
 0x335   : > { %4329 = vst.msk [vmem:[#allocation4 + $0x190] sm:$0xff] %vm4303_vm6, %v4258_v6  ;;  %v6071_v14 = vpop.f32.mrb[24].mxu0  ;;  %v6419_v0 = vld [vmem:[#allocation3 + $0x90] sm:$0xff] }
 0x336   : > { %7689 = vrot.lane.b32.xlu1 %v11890_v56, %s9967_s12  ;;  %4586 = vst.msk [vmem:[#allocation4 + $0x190] sm:$0xff] %vm4560_vm7, %v4515_v12  ;;  %v6072_v29 = vadd.f32 %v11848_v16, %v6071_v14  ;;  %v6073_v5 = vpop.f32.mrb[25].mxu0  ;;  %v5029_v3 = vpop.permute.xlu0 %5028 }
 0x337   : > { %v8336_v17 = vld [vmem:[#allocation3 + $0x92] sm:$0xff]  ;;  %v8337_v41 = vld [vmem:[#allocation3 + $0x9a] sm:$0xff]  ;;  %v6074_v8 = vpop.f32.mrb[26].mxu0 }
 0x338   : > { %v4772_v22 = vpop.permute.xlu1 %4771  ;;  %v12026_v34 = vpack.c.bf16 %v8337_v41, %v8336_v17  ;;  %v6290_v10 = vmax.f32 %v6072_v29, 0.0  ;;  %v6075_v63 = vadd.f32 %v11848_v16, %v6074_v8  ;;  %v6076_v7 = vpop.f32.mrb[27].mxu0  ;;  %v6420_v54 = vld [vmem:[#allocation3 + $0x98] sm:$0xff]  ;;  %6667 = vrot.lane.b32.xlu0 %v11987_v11, %s9962_s9 }
 0x339   : > { %4843 = vst.msk [vmem:[#allocation4 + $0x190] sm:$0xff] %vm4817_vm8, %v4772_v22  ;;  %v5798_v58 = vld [vmem:[#allocation4 + $0x180] sm:$0xff]  ;;  %v6477_v38 = vpack.c.bf16 %v6420_v54, %v6419_v0 }
 0x33a   : > { %8202 = vrot.lane.b32.xlu1 %v12022_v46, %s9969_s14  ;;  %8428 = vst.msk [vmem:[#allocation4 + $0x48] sm:$0xff] %vm286_vm3, %v12026_v34  ;;  %6355 = vst.msk [vmem:[#allocation3 + $0xa9] sm:$0xff] %vm286_vm3, %v6290_v10  ;;  %v6291_v18 = vmax.f32 %v6075_v63, 0.0  ;;  %6214 = vmatmul.mubr.bf16.gmra.mrb[96].mxu0 %v5798_v58  ;;  %v5544_v53 = vpop.permute.xlu0 %5543  ;;  %v8078_v7 = vld [vmem:[#allocation3 + $0x79] sm:$0xff] }
 0x33b   : > { %5100 = vst.msk [vmem:[#allocation4 + $0x190] sm:$0xff] %vm5074_vm9, %v5029_v3  ;;  %9568 = vmatprep.mubr.msk.bf16.mxu0 %vm286_vm3, %v5801_v30  ;;  %v5805_v3 = vld [vmem:[#allocation4 + $0x1b8] sm:$0xff] }
 0x33c   : > { %v5287_v35 = vpop.permute.xlu1 %5286  ;;  %6509 = vst.msk [vmem:[#allocation4 + $0x60] sm:$0xff] %vm286_vm3, %v6477_v38  ;;  %6356 = vst.msk [vmem:[#allocation3 + $0xb1] sm:$0xff] %vm286_vm3, %v6291_v18  ;;  %7179 = vrot.lane.b32.xlu0 %v7881_v19, %s9965_s30 }
 0x33d   : > { %5358 = vst.msk [vmem:[#allocation4 + $0x190] sm:$0xff] %vm5332_vm10, %v5287_v35 }
 0x33e   : > { %6923 = vrot.lane.b32.xlu1 %v11890_v56, %s9963_s10  ;;  %5615 = vst.msk [vmem:[#allocation4 + $0x190] sm:$0xff] %vm5589_vm11, %v5544_v53  ;;  %v4517_v43 = vpop.permute.xlu0 %4516 }
 0x340   : > { %v4260_v39 = vpop.permute.xlu1 %4259  ;;  %7691 = vrot.lane.b32.xlu0 %v11920_v2, %s9967_s12 }
 0x341   : > { %4330 = vst.msk [vmem:[#allocation4 + $0x1a0] sm:$0xff] %vm4303_vm6, %v4260_v39  ;;  %v6079_v47 = vpop.f32.mrb[28].mxu0  ;;  %v6421_v4 = vld [vmem:[#allocation3 + $0xa8] sm:$0xff] }
 0x342   : > { %7435 = vrot.lane.b32.xlu1 %v12022_v46, %s9966_s7  ;;  %4587 = vst.msk [vmem:[#allocation4 + $0x1a0] sm:$0xff] %vm4560_vm7, %v4517_v43  ;;  %v6080_v31 = vadd.f32 %v11848_v16, %v6079_v47  ;;  %v6081_v56 = vpop.f32.mrb[29].mxu0  ;;  %v5031_v50 = vpop.permute.xlu0 %5030 }
 0x343   : > { %v8338_v20 = vld [vmem:[#allocation3 + $0xaa] sm:$0xff]  ;;  %v8339_v11 = vld [vmem:[#allocation3 + $0xb2] sm:$0xff]  ;;  %v6082_v60 = vpop.f32.mrb[30].mxu0 }
 0x344   : > { %v4774_v26 = vpop.permute.xlu1 %4773  ;;  %v12053_v40 = vpack.c.bf16 %v8339_v11, %v8338_v20  ;;  %v6292_v33 = vmax.f32 %v6080_v31, 0.0  ;;  %v6083_v25 = vadd.f32 %v11848_v16, %v6082_v60  ;;  %v6084_v27 = vpop.f32.mrb[31].mxu0  ;;  %v6422_v45 = vld [vmem:[#allocation3 + $0xb0] sm:$0xff]  ;;  %8204 = vrot.lane.b32.xlu0 %v12057_v57, %s9969_s14  ;;  %v7825_v56 = vld [vmem:[#allocation3 + $0x98] sm:$0xff] }
 0x345   : > { %4844 = vst.msk [vmem:[#allocation4 + $0x1a0] sm:$0xff] %vm4817_vm8, %v4774_v26  ;;  %v5800_v51 = vld [vmem:[#allocation4 + $0x190] sm:$0xff]  ;;  %v6478_v32 = vpack.c.bf16 %v6422_v45, %v6421_v4 }
 0x346   : > { %7948 = vrot.lane.b32.xlu1 %v7882_v36, %s9968_s13  ;;  %8429 = vst.msk [vmem:[#allocation4 + $0x58] sm:$0xff] %vm286_vm3, %v12053_v40  ;;  %6357 = vst.msk [vmem:[#allocation3 + $0xc1] sm:$0xff] %vm286_vm3, %v6292_v33  ;;  %v6293_v48 = vmax.f32 %v6083_v25, 0.0  ;;  %6222 = vmatmul.mubr.bf16.gmra.mrb[100].mxu0 %v5800_v51  ;;  %v5546_v37 = vpop.permute.xlu0 %5545  ;;  %v7824_v33 = vld [vmem:[#allocation3 + $0x90] sm:$0xff] }
 0x347   : > { %5101 = vst.msk [vmem:[#allocation4 + $0x1a0] sm:$0xff] %vm5074_vm9, %v5031_v50  ;;  %9569 = vmatprep.mubr.msk.bf16.mxu0 %vm286_vm3, %v5803_v24  ;;  %v7884_v45 = vpack.c.bf16 %v7825_v56, %v7824_v33  ;;  %v5807_v50 = vld [vmem:[#allocation4 + $0x1c8] sm:$0xff]  ;;  %v8080_v51 = vld [vmem:[#allocation3 + $0x91] sm:$0xff] }
 0x348   : > { %v5289_v42 = vpop.permute.xlu1 %5288  ;;  %6510 = vst.msk [vmem:[#allocation4 + $0x70] sm:$0xff] %vm286_vm3, %v6478_v32  ;;  %6358 = vst.msk [vmem:[#allocation3 + $0xc9] sm:$0xff] %vm286_vm3, %v6293_v48  ;;  %6925 = vrot.lane.b32.xlu0 %v11920_v2, %s9963_s10  ;;  %v8079_v2 = vld [vmem:[#allocation3 + $0x81] sm:$0xff] }
 0x349   : > { %5359 = vst.msk [vmem:[#allocation4 + $0x1a0] sm:$0xff] %vm5332_vm10, %v5289_v42  ;;  %v8139_v38 = vpack.c.bf16 %v8079_v2, %v8078_v7 }
 0x34a   : > { %6669 = vrot.lane.b32.xlu1 %v12022_v46, %s9962_s9  ;;  %5616 = vst.msk [vmem:[#allocation4 + $0x1a0] sm:$0xff] %vm5589_vm11, %v5546_v37  ;;  %v4262_v61 = vpop.permute.xlu0 %4261  ;;  %v7822_v46 = vld [vmem:[#allocation3 + $0x78] sm:$0xff]  ;;  %v12129_v37 = vld [vmem:[%s13151_s3] ss:$0 sm:$0xff] }
 0x34b   : > { %v7883_v63 = vpack.c.bf16 %v7823_v1, %v7822_v46 }
 0x34c   : > { %v4005_v23 = vpop.permute.xlu1 %4004  ;;  %7437 = vrot.lane.b32.xlu0 %v12057_v57, %s9966_s7 }
 0x34d   : > { %4074 = vst.msk [vmem:[#allocation4 + $0x1b0] sm:$0xff] %vm4046_vm5, %v4005_v23  ;;  %v6087_v28 = vpop.f32.mrb[32].mxu0  ;;  %v6423_v17 = vld [vmem:[#allocation3 + $0xc0] sm:$0xff] }
 0x34e   : > { %7181 = vrot.lane.b32.xlu1 %v7882_v36, %s9965_s30  ;;  %4331 = vst.msk [vmem:[#allocation4 + $0x1b0] sm:$0xff] %vm4303_vm6, %v4262_v61  ;;  %v6088_v6 = vadd.f32 %v11848_v16, %v6087_v28  ;;  %v6089_v59 = vpop.f32.mrb[33].mxu0  ;;  %v4776_v8 = vpop.permute.xlu0 %4775 }
 0x34f   : > { %v8340_v12 = vld [vmem:[#allocation3 + $0xc2] sm:$0xff]  ;;  %v8341_v14 = vld [vmem:[#allocation3 + $0xca] sm:$0xff]  ;;  %v6090_v19 = vpop.f32.mrb[34].mxu0 }
 0x350   : > { %v4519_v9 = vpop.permute.xlu1 %4518  ;;  %v12081_v13 = vpack.c.bf16 %v8341_v14, %v8340_v12  ;;  %v6294_v29 = vmax.f32 %v6088_v6, 0.0  ;;  %v6091_v5 = vadd.f32 %v11848_v16, %v6090_v19  ;;  %v6092_v22 = vpop.f32.mrb[35].mxu0  ;;  %v6424_v41 = vld [vmem:[#allocation3 + $0xc8] sm:$0xff]  ;;  %7950 = vrot.lane.b32.xlu0 %v7883_v63, %s9968_s13 }
 0x351   : > { %4588 = vst.msk [vmem:[#allocation4 + $0x1b0] sm:$0xff] %vm4560_vm7, %v4519_v9  ;;  %v5802_v10 = vld [vmem:[#allocation4 + $0x1a0] sm:$0xff]  ;;  %v6479_v0 = vpack.c.bf16 %v6424_v41, %v6423_v17  ;;  %v7827_v17 = vld [vmem:[#allocation3 + $0xb0] sm:$0xff]  ;;  %v7829_v33 = vld [vmem:[#allocation3 + $0xc8] sm:$0xff] }
 0x352   : > { %7693 = vrot.lane.b32.xlu1 %v11956_v52, %s9967_s12  ;;  %8430 = vst.msk [vmem:[#allocation4 + $0x68] sm:$0xff] %vm286_vm3, %v12081_v13  ;;  %6359 = vst.msk [vmem:[#allocation3 + $0xd9] sm:$0xff] %vm286_vm3, %v6294_v29  ;;  %v6295_v54 = vmax.f32 %v6091_v5, 0.0  ;;  %6230 = vmatmul.mubr.bf16.gmra.mrb[104].mxu0 %v5802_v10  ;;  %v5291_v18 = vpop.permute.xlu0 %5290  ;;  %v8083_v41 = vld [vmem:[#allocation3 + $0xb1] sm:$0xff] }
 0x353   : > { %4845 = vst.msk [vmem:[#allocation4 + $0x1b0] sm:$0xff] %vm4817_vm8, %v4776_v8  ;;  %9570 = vmatprep.mubr.msk.bf16.mxu0 %vm286_vm3, %v5805_v3  ;;  %v7826_v8 = vld [vmem:[#allocation3 + $0xa8] sm:$0xff] }
 0x354   : > { %v5033_v58 = vpop.permute.xlu1 %5032  ;;  %6511 = vst.msk [vmem:[#allocation4 + $0x80] sm:$0xff] %vm286_vm3, %v6479_v0  ;;  %6360 = vst.msk [vmem:[#allocation3 + $0xe1] sm:$0xff] %vm286_vm3, %v6295_v54  ;;  %6671 = vrot.lane.b32.xlu0 %v12057_v57, %s9962_s9  ;;  %v7885_v7 = vpack.c.bf16 %v7827_v17, %v7826_v8  ;;  %v8082_v0 = vld [vmem:[#allocation3 + $0xa9] sm:$0xff]  ;;  %v5809_v54 = vld [vmem:[#allocation4 + $0x1d8] sm:$0xff] }
 0x355   : > { %5102 = vst.msk [vmem:[#allocation4 + $0x1b0] sm:$0xff] %vm5074_vm9, %v5033_v58  ;;  %v12150_v58 = vpack.c.bf16 %v8083_v41, %v8082_v0 }
 0x356   : > { %8206 = vrot.lane.b32.xlu1 %v8139_v38, %s9969_s14  ;;  %5360 = vst.msk [vmem:[#allocation4 + $0x1b0] sm:$0xff] %vm5332_vm10, %v5291_v18  ;;  %v4007_v35 = vpop.permute.xlu0 %4006 }
 0x357   : > { %4075 = vst.msk [vmem:[#allocation4 + $0x1c0] sm:$0xff] %vm4046_vm5, %v4007_v35 }
 0x358   : > { %v5548_v30 = vpop.permute.xlu1 %5547  ;;  %7183 = vrot.lane.b32.xlu0 %v7883_v63, %s9965_s30 }
 0x359   : > { %5617 = vst.msk [vmem:[#allocation4 + $0x1b0] sm:$0xff] %vm5589_vm11, %v5548_v30  ;;  %v6095_v53 = vpop.f32.mrb[36].mxu0  ;;  %v6425_v20 = vld [vmem:[#allocation3 + $0xd8] sm:$0xff] }
 0x35a   : > { %6927 = vrot.lane.b32.xlu1 %v11956_v52, %s9963_s10  ;;  %v6096_v39 = vadd.f32 %v11848_v16, %v6095_v53  ;;  %v6097_v62 = vpop.f32.mrb[37].mxu0  ;;  %v4521_v60 = vpop.permute.xlu0 %4520  ;;  %v8086_v0 = vld [vmem:[#allocation3 + $0xd9] sm:$0xff] }
 0x35b   : > { %v8342_v47 = vld [vmem:[#allocation3 + $0xda] sm:$0xff]  ;;  %v8343_v55 = vld [vmem:[#allocation3 + $0xe2] sm:$0xff]  ;;  %v6098_v31 = vpop.f32.mrb[38].mxu0 }
 0x35c   : > { %v4264_v43 = vpop.permute.xlu1 %4263  ;;  %v12106_v26 = vpack.c.bf16 %v8343_v55, %v8342_v47  ;;  %v6296_v36 = vmax.f32 %v6096_v39, 0.0  ;;  %v6099_v52 = vadd.f32 %v11848_v16, %v6098_v31  ;;  %v6100_v44 = vpop.f32.mrb[39].mxu0  ;;  %v6426_v11 = vld [vmem:[#allocation3 + $0xe0] sm:$0xff]  ;;  %7695 = vrot.lane.b32.xlu0 %v11996_v49, %s9967_s12 }
 0x35d   : > { %4332 = vst.msk [vmem:[#allocation4 + $0x1c0] sm:$0xff] %vm4303_vm6, %v4264_v43  ;;  %v6480_v25 = vpack.c.bf16 %v6426_v11, %v6425_v20  ;;  %v8081_v16 = vld [vmem:[#allocation3 + $0x99] sm:$0xff]  ;;  %v8087_v41 = vld [vmem:[#allocation3 + $0xe1] sm:$0xff] }
 0x35e   : > { %7439 = vrot.lane.b32.xlu1 %v8139_v38, %s9966_s7  ;;  %8431 = vst.msk [vmem:[#allocation4 + $0x78] sm:$0xff] %vm286_vm3, %v12106_v26  ;;  %6361 = vst.msk [vmem:[#allocation3 + $0xf1] sm:$0xff] %vm286_vm3, %v6296_v36  ;;  %v6297_v27 = vmax.f32 %v6099_v52, 0.0  ;;  %v5035_v57 = vpop.permute.xlu0 %5034  ;;  %v8140_v32 = vpack.c.bf16 %v8081_v16, %v8080_v51  ;;  %v5811_v16 = vld [vmem:[#allocation4 + $0x1e8] sm:$0xff]  ;;  %v7831_v17 = vld [vmem:[#allocation3 + $0xe0] sm:$0xff] }
 0x35f   : > { %4589 = vst.msk [vmem:[#allocation4 + $0x1c0] sm:$0xff] %vm4560_vm7, %v4521_v60 }
 0x360   : > { %v4778_v15 = vpop.permute.xlu1 %4777  ;;  %v5804_v4 = vld [vmem:[#allocation4 + $0x1b0] sm:$0xff]  ;;  %6512 = vst.msk [vmem:[#allocation4 + $0x90] sm:$0xff] %vm286_vm3, %v6480_v25  ;;  %6362 = vst.msk [vmem:[#allocation3 + $0xf9] sm:$0xff] %vm286_vm3, %v6297_v27  ;;  %8208 = vrot.lane.b32.xlu0 %v8140_v32, %s9969_s14  ;;  %v7828_v25 = vld [vmem:[#allocation3 + $0xc0] sm:$0xff] }
 0x361   : > { %4846 = vst.msk [vmem:[#allocation4 + $0x1c0] sm:$0xff] %vm4817_vm8, %v4778_v15  ;;  %6238 = vmatmul.mubr.bf16.gmra.mrb[108].mxu0 %v5804_v4  ;;  %v7886_v4 = vpack.c.bf16 %v7829_v33, %v7828_v25 }
 0x362   : > { %9571 = vmatprep.mubr.msk.bf16.mxu0 %vm286_vm3, %v5807_v50  ;;  %7952 = vrot.lane.b32.xlu1 %v7884_v45, %s9968_s13  ;;  %5103 = vst.msk [vmem:[#allocation4 + $0x1c0] sm:$0xff] %vm5074_vm9, %v5035_v57  ;;  %v5550_v24 = vpop.permute.xlu0 %5549  ;;  %v8084_v50 = vld [vmem:[#allocation3 + $0xc1] sm:$0xff] }
 0x364   : > { %v5293_v48 = vpop.permute.xlu1 %5292  ;;  %6929 = vrot.lane.b32.xlu0 %v11996_v49, %s9963_s10 }
 0x365   : > { %5361 = vst.msk [vmem:[#allocation4 + $0x1c0] sm:$0xff] %vm5332_vm10, %v5293_v48  ;;  %v6103_v42 = vpop.f32.mrb[40].mxu0  ;;  %v6427_v2 = vld [vmem:[#allocation3 + $0xf0] sm:$0xff] }
 0x366   : > { %6673 = vrot.lane.b32.xlu1 %v8139_v38, %s9962_s9  ;;  %5618 = vst.msk [vmem:[#allocation4 + $0x1c0] sm:$0xff] %vm5589_vm11, %v5550_v24  ;;  %v6104_v23 = vadd.f32 %v12129_v37, %v6103_v42  ;;  %v6105_v61 = vpop.f32.mrb[41].mxu0  ;;  %v4266_v5 = vpop.permute.xlu0 %4265 }
 0x367   : > { %v8344_v6 = vld [vmem:[#allocation3 + $0xf2] sm:$0xff]  ;;  %v8345_v59 = vld [vmem:[#allocation3 + $0xfa] sm:$0xff]  ;;  %v6106_v9 = vpop.f32.mrb[42].mxu0 }
 0x368   : > { %v4009_v28 = vpop.permute.xlu1 %4008  ;;  %v12135_v1 = vpack.c.bf16 %v8345_v59, %v8344_v6  ;;  %v6298_v12 = vmax.f32 %v6104_v23, 0.0  ;;  %v6107_v14 = vadd.f32 %v12129_v37, %v6106_v9  ;;  %v6108_v19 = vpop.f32.mrb[43].mxu0  ;;  %v6428_v29 = vld [vmem:[#allocation3 + $0xf8] sm:$0xff]  ;;  %7441 = vrot.lane.b32.xlu0 %v8140_v32, %s9966_s7 }
 0x369   : > { %4076 = vst.msk [vmem:[#allocation4 + $0x1d0] sm:$0xff] %vm4046_vm5, %v4009_v28  ;;  %v6481_v22 = vpack.c.bf16 %v6428_v29, %v6427_v2 }
 0x36a   : > { %7185 = vrot.lane.b32.xlu1 %v7884_v45, %s9965_s30  ;;  %8432 = vst.msk [vmem:[#allocation4 + $0x88] sm:$0xff] %vm286_vm3, %v12135_v1  ;;  %6363 = vst.msk [vmem:[#allocation3 + $0x109] sm:$0xff] %vm286_vm3, %v6298_v12  ;;  %v6299_v49 = vmax.f32 %v6107_v14, 0.0  ;;  %v4780_v10 = vpop.permute.xlu0 %4779  ;;  %v8085_v45 = vld [vmem:[#allocation3 + $0xc9] sm:$0xff] }
 0x36b   : > { %4333 = vst.msk [vmem:[#allocation4 + $0x1d0] sm:$0xff] %vm4303_vm6, %v4266_v5 }
 0x36c   : > { %v4523_v46 = vpop.permute.xlu1 %4522  ;;  %6513 = vst.msk [vmem:[#allocation4 + $0xa0] sm:$0xff] %vm286_vm3, %v6481_v22  ;;  %6364 = vst.msk [vmem:[#allocation3 + $0x111] sm:$0xff] %vm286_vm3, %v6299_v49  ;;  %7954 = vrot.lane.b32.xlu0 %v7885_v7, %s9968_s13 }
 0x36d   : > { %4590 = vst.msk [vmem:[#allocation4 + $0x1d0] sm:$0xff] %vm4560_vm7, %v4523_v46  ;;  %v5806_v63 = vld [vmem:[#allocation4 + $0x1c0] sm:$0xff] }
 0x36e   : > { %7697 = vrot.lane.b32.xlu1 %v12026_v34, %s9967_s12  ;;  %4847 = vst.msk [vmem:[#allocation4 + $0x1d0] sm:$0xff] %vm4817_vm8, %v4780_v10  ;;  %6246 = vmatmul.mubr.bf16.gmra.mrb[112].mxu0 %v5806_v63  ;;  %v5295_v38 = vpop.permute.xlu0 %5294 }
 0x36f   : > { %9572 = vmatprep.mubr.msk.bf16.mxu0 %vm286_vm3, %v5809_v54 }
 0x370   : > { %v5037_v3 = vpop.permute.xlu1 %5036  ;;  %6675 = vrot.lane.b32.xlu0 %v8140_v32, %s9962_s9  ;;  %v12182_v32 = vpack.c.bf16 %v8085_v45, %v8084_v50  ;;  %v8089_v45 = vld [vmem:[#allocation3 + $0xf9] sm:$0xff] }
 0x371   : > { %5104 = vst.msk [vmem:[#allocation4 + $0x1d0] sm:$0xff] %vm5074_vm9, %v5037_v3  ;;  %v6111_v18 = vpop.f32.mrb[44].mxu0  ;;  %v6429_v36 = vld [vmem:[#allocation3 + $0x108] sm:$0xff] }
 0x372   : > { %8210 = vrot.lane.b32.xlu1 %v12150_v58, %s9969_s14  ;;  %5362 = vst.msk [vmem:[#allocation4 + $0x1d0] sm:$0xff] %vm5332_vm10, %v5295_v38  ;;  %v6112_v30 = vadd.f32 %v12129_v37, %v6111_v18  ;;  %v6113_v35 = vpop.f32.mrb[45].mxu0  ;;  %v4011_v44 = vpop.permute.xlu0 %4010  ;;  %v12212_v38 = vpack.c.bf16 %v8087_v41, %v8086_v0 }
 0x373   : > { %v8346_v39 = vld [vmem:[#allocation3 + $0x10a] sm:$0xff]  ;;  %v8347_v62 = vld [vmem:[#allocation3 + $0x112] sm:$0xff]  ;;  %v6114_v43 = vpop.f32.mrb[46].mxu0  ;;  %4077 = vst.msk [vmem:[#allocation4 + $0x1e0] sm:$0xff] %vm4046_vm5, %v4011_v44 }
 0x374   : > { %v5552_v53 = vpop.permute.xlu1 %5551  ;;  %v12161_v47 = vpack.c.bf16 %v8347_v62, %v8346_v39  ;;  %v6300_v55 = vmax.f32 %v6112_v30, 0.0  ;;  %v6115_v31 = vadd.f32 %v12129_v37, %v6114_v43  ;;  %v6116_v56 = vpop.f32.mrb[47].mxu0  ;;  %v6430_v52 = vld [vmem:[#allocation3 + $0x110] sm:$0xff]  ;;  %7187 = vrot.lane.b32.xlu0 %v7885_v7, %s9965_s30 }
 0x375   : > { %5619 = vst.msk [vmem:[#allocation4 + $0x1d0] sm:$0xff] %vm5589_vm11, %v5552_v53  ;;  %v6482_v20 = vpack.c.bf16 %v6430_v52, %v6429_v36 }
 0x376   : > { %6931 = vrot.lane.b32.xlu1 %v12026_v34, %s9963_s10  ;;  %8433 = vst.msk [vmem:[#allocation4 + $0x98] sm:$0xff] %vm286_vm3, %v12161_v47  ;;  %6365 = vst.msk [vmem:[#allocation3 + $0x121] sm:$0xff] %vm286_vm3, %v6300_v55  ;;  %v6301_v11 = vmax.f32 %v6115_v31, 0.0  ;;  %v4525_v34 = vpop.permute.xlu0 %4524 }
 0x377   : > { %6514 = vst.msk [vmem:[#allocation4 + $0xb0] sm:$0xff] %vm286_vm3, %v6482_v20 }
 0x378   : > { %v4268_v60 = vpop.permute.xlu1 %4267  ;;  %6366 = vst.msk [vmem:[#allocation3 + $0x129] sm:$0xff] %vm286_vm3, %v6301_v11  ;;  %7699 = vrot.lane.b32.xlu0 %v12053_v40, %s9967_s12  ;;  %v7833_v11 = vld [vmem:[#allocation3 + $0xf8] sm:$0xff] }
 0x379   : > { %4334 = vst.msk [vmem:[#allocation4 + $0x1e0] sm:$0xff] %vm4303_vm6, %v4268_v60 }
 0x37a   : > { %7443 = vrot.lane.b32.xlu1 %v12150_v58, %s9966_s7  ;;  %4591 = vst.msk [vmem:[#allocation4 + $0x1e0] sm:$0xff] %vm4560_vm7, %v4525_v34  ;;  %v5039_v51 = vpop.permute.xlu0 %5038  ;;  %v7832_v34 = vld [vmem:[#allocation3 + $0xf0] sm:$0xff] }
 0x37c   : > { %v4782_v27 = vpop.permute.xlu1 %4781  ;;  %v5808_v15 = vld [vmem:[#allocation4 + $0x1d0] sm:$0xff]  ;;  %8212 = vrot.lane.b32.xlu0 %v12182_v32, %s9969_s14 }
 0x37d   : > { %4848 = vst.msk [vmem:[#allocation4 + $0x1e0] sm:$0xff] %vm4817_vm8, %v4782_v27  ;;  %6254 = vmatmul.mubr.bf16.gmra.mrb[116].mxu0 %v5808_v15  ;;  %v6119_v57 = vpop.f32.mrb[48].mxu0  ;;  %v6431_v14 = vld [vmem:[#allocation3 + $0x120] sm:$0xff] }
 0x37e   : > { %9573 = vmatprep.mubr.msk.bf16.mxu0 %vm286_vm3, %v5811_v16  ;;  %7956 = vrot.lane.b32.xlu1 %v7886_v4, %s9968_s13  ;;  %5105 = vst.msk [vmem:[#allocation4 + $0x1e0] sm:$0xff] %vm5074_vm9, %v5039_v51  ;;  %v6120_v48 = vadd.f32 %v12129_v37, %v6119_v57  ;;  %v6121_v24 = vpop.f32.mrb[49].mxu0  ;;  %v5554_v2 = vpop.permute.xlu0 %5553 }
 0x37f   : > { %v8348_v23 = vld [vmem:[#allocation3 + $0x122] sm:$0xff]  ;;  %v8349_v61 = vld [vmem:[#allocation3 + $0x12a] sm:$0xff]  ;;  %v6122_v28 = vpop.f32.mrb[50].mxu0 }
 0x380   : > { %v5297_v42 = vpop.permute.xlu1 %5296  ;;  %v12189_v6 = vpack.c.bf16 %v8349_v61, %v8348_v23  ;;  %v6302_v59 = vmax.f32 %v6120_v48, 0.0  ;;  %v6123_v9 = vadd.f32 %v12129_v37, %v6122_v28  ;;  %v6124_v12 = vpop.f32.mrb[51].mxu0  ;;  %v6432_v19 = vld [vmem:[#allocation3 + $0x128] sm:$0xff]  ;;  %6933 = vrot.lane.b32.xlu0 %v12053_v40, %s9963_s10  ;;  %v7830_v40 = vld [vmem:[#allocation3 + $0xd8] sm:$0xff] }
 0x381   : > { %5363 = vst.msk [vmem:[#allocation4 + $0x1e0] sm:$0xff] %vm5332_vm10, %v5297_v42  ;;  %v6483_v29 = vpack.c.bf16 %v6432_v19, %v6431_v14  ;;  %v7887_v7 = vpack.c.bf16 %v7831_v17, %v7830_v40  ;;  %v8088_v42 = vld [vmem:[#allocation3 + $0xf1] sm:$0xff] }
 0x382   : > { %6677 = vrot.lane.b32.xlu1 %v12150_v58, %s9962_s9  ;;  %8434 = vst.msk [vmem:[#allocation4 + $0xa8] sm:$0xff] %vm286_vm3, %v12189_v6  ;;  %6367 = vst.msk [vmem:[#allocation3 + $0x139] sm:$0xff] %vm286_vm3, %v6302_v59  ;;  %v6303_v5 = vmax.f32 %v6123_v9, 0.0  ;;  %v4270_v49 = vpop.permute.xlu0 %4269  ;;  %v8144_v59 = vpack.c.bf16 %v8089_v45, %v8088_v42  ;;  %v7835_v17 = vld [vmem:[#allocation3 + $0x110] sm:$0xff]  ;;  %v7836_v45 = vld [vmem:[#allocation3 + $0x120] sm:$0xff] }
 0x383   : > { %5620 = vst.msk [vmem:[#allocation4 + $0x1e0] sm:$0xff] %vm5589_vm11, %v5554_v2  ;;  %v8092_v42 = vld [vmem:[#allocation3 + $0x121] sm:$0xff] }
 0x384   : > { %v4013_v22 = vpop.permute.xlu1 %4012  ;;  %6515 = vst.msk [vmem:[#allocation4 + $0xc0] sm:$0xff] %vm286_vm3, %v6483_v29  ;;  %6368 = vst.msk [vmem:[#allocation3 + $0x141] sm:$0xff] %vm286_vm3, %v6303_v5  ;;  %7445 = vrot.lane.b32.xlu0 %v12182_v32, %s9966_s7 }
 0x385   : > { %4078 = vst.msk [vmem:[#allocation4 + $0x1f0] sm:$0xff] %vm4046_vm5, %v4013_v22 }
 0x386   : > { %7189 = vrot.lane.b32.xlu1 %v7886_v4, %s9965_s30  ;;  %4335 = vst.msk [vmem:[#allocation4 + $0x1f0] sm:$0xff] %vm4303_vm6, %v4270_v49  ;;  %v4784_v8 = vpop.permute.xlu0 %4783  ;;  %v7888_v4 = vpack.c.bf16 %v7833_v11, %v7832_v34 }
 0x388   : > { %v4527_v46 = vpop.permute.xlu1 %4526  ;;  %7958 = vrot.lane.b32.xlu0 %v7887_v7, %s9968_s13 }
 0x389   : > { %4592 = vst.msk [vmem:[#allocation4 + $0x1f0] sm:$0xff] %vm4560_vm7, %v4527_v46  ;;  %v6127_v10 = vpop.f32.mrb[52].mxu0  ;;  %v6433_v55 = vld [vmem:[#allocation3 + $0x138] sm:$0xff] }
 0x38a   : > { %7701 = vrot.lane.b32.xlu1 %v12081_v13, %s9967_s12  ;;  %v5810_v63 = vld [vmem:[#allocation4 + $0x1e0] sm:$0xff]  ;;  %4849 = vst.msk [vmem:[#allocation4 + $0x1f0] sm:$0xff] %vm4817_vm8, %v4784_v8  ;;  %v6128_v54 = vadd.f32 %v12129_v37, %v6127_v10  ;;  %v6129_v3 = vpop.f32.mrb[53].mxu0  ;;  %v5299_v56 = vpop.permute.xlu0 %5298 }
 0x38b   : > { %6262 = vmatmul.mubr.bf16.gmra.mrb[120].mxu0 %v5810_v63  ;;  %v8350_v18 = vld [vmem:[#allocation3 + $0x13a] sm:$0xff]  ;;  %v8351_v30 = vld [vmem:[#allocation3 + $0x142] sm:$0xff]  ;;  %v6130_v35 = vpop.f32.mrb[54].mxu0 }
 0x38c   : > { %v5041_v58 = vpop.permute.xlu1 %5040  ;;  %9574 = vmatprep.mubr.msk.bf16.mxu0 %vm286_vm3, %v11982_v21  ;;  %v12218_v53 = vpack.c.bf16 %v8351_v30, %v8350_v18  ;;  %v6304_v39 = vmax.f32 %v6128_v54, 0.0  ;;  %v6131_v62 = vadd.f32 %v12129_v37, %v6130_v35  ;;  %v6132_v43 = vpop.f32.mrb[55].mxu0  ;;  %v6434_v31 = vld [vmem:[#allocation3 + $0x140] sm:$0xff]  ;;  %6679 = vrot.lane.b32.xlu0 %v12182_v32, %s9962_s9  ;;  %v7834_v54 = vld [vmem:[#allocation3 + $0x108] sm:$0xff] }
 0x38d   : > { %5106 = vst.msk [vmem:[#allocation4 + $0x1f0] sm:$0xff] %vm5074_vm9, %v5041_v58  ;;  %v6484_v36 = vpack.c.bf16 %v6434_v31, %v6433_v55  ;;  %v7889_v30 = vpack.c.bf16 %v7835_v17, %v7834_v54  ;;  %v8090_v35 = vld [vmem:[#allocation3 + $0x109] sm:$0xff]  ;;  %v8459_v43 = vld [vmem:[#allocation4 + $0x18] sm:$0xff] }
 0x38e   : > { %8214 = vrot.lane.b32.xlu1 %v12212_v38, %s9969_s14  ;;  %8435 = vst.msk [vmem:[#allocation4 + $0xb8] sm:$0xff] %vm286_vm3, %v12218_v53  ;;  %6369 = vst.msk [vmem:[#allocation3 + $0x151] sm:$0xff] %vm286_vm3, %v6304_v39  ;;  %v6305_v52 = vmax.f32 %v6131_v62, 0.0  ;;  %v6664_v44 = vpop.permute.xlu0 %6663 }
 0x38f   : > { %5364 = vst.msk [vmem:[#allocation4 + $0x1f0] sm:$0xff] %vm5332_vm10, %v5299_v56 }
 0x390   : > { %v5556_v21 = vpop.permute.xlu1 %5555  ;;  %6516 = vst.msk [vmem:[#allocation4 + $0xd0] sm:$0xff] %vm286_vm3, %v6484_v36  ;;  %6370 = vst.msk [vmem:[#allocation3 + $0x159] sm:$0xff] %vm286_vm3, %v6305_v52  ;;  %7191 = vrot.lane.b32.xlu0 %v7887_v7, %s9965_s30 }
 0x391   : > { %5621 = vst.msk [vmem:[#allocation4 + $0x1f0] sm:$0xff] %vm5589_vm11, %v5556_v21 }
 0x392   : > { %6935 = vrot.lane.b32.xlu1 %v12081_v13, %s9963_s10  ;;  %6759 = vst.msk [vmem:[#allocation4] sm:$0xff] %vm4046_vm5, %v6664_v44  ;;  %v7176_v60 = vpop.permute.xlu0 %7175 }
 0x394   : > { %v6920_v20 = vpop.permute.xlu1 %6919  ;;  %7703 = vrot.lane.b32.xlu0 %v12106_v26, %s9967_s12 }
 0x395   : > { %7015 = vst.msk [vmem:[#allocation4] sm:$0xff] %vm4303_vm6, %v6920_v20  ;;  %v6135_v33 = vpop.f32.mrb[56].mxu0  ;;  %v6435_v23 = vld [vmem:[#allocation3 + $0x150] sm:$0xff] }
 0x396   : > { %7447 = vrot.lane.b32.xlu1 %v12212_v38, %s9966_s7  ;;  %7271 = vst.msk [vmem:[#allocation4] sm:$0xff] %vm4560_vm7, %v7176_v60  ;;  %v6136_v25 = vadd.f32 %v12129_v37, %v6135_v33  ;;  %v6137_v13 = vpop.f32.mrb[57].mxu0  ;;  %v7688_v28 = vpop.permute.xlu0 %7687 }
 0x397   : > { %v8352_v16 = vld [vmem:[#allocation3 + $0x152] sm:$0xff]  ;;  %v8353_v50 = vld [vmem:[#allocation3 + $0x15a] sm:$0xff]  ;;  %v6138_v51 = vpop.f32.mrb[58].mxu0 }
 0x398   : > { %v7432_v27 = vpop.permute.xlu1 %7431  ;;  %v5812_v15 = vld [vmem:[#allocation4 + $0x1f0] sm:$0xff]  ;;  %v12244_v57 = vpack.c.bf16 %v8353_v50, %v8352_v16  ;;  %v6306_v32 = vmax.f32 %v6136_v25, 0.0  ;;  %v6139_v48 = vadd.f32 %v12129_v37, %v6138_v51  ;;  %v6140_v24 = vpop.f32.mrb[59].mxu0  ;;  %v6436_v61 = vld [vmem:[#allocation3 + $0x158] sm:$0xff]  ;;  %8216 = vrot.lane.b32.xlu0 %v8144_v59, %s9969_s14  ;;  %v7837_v25 = vld [vmem:[#allocation3 + $0x128] sm:$0xff] }
 0x399   : > { %7527 = vst.msk [vmem:[#allocation4] sm:$0xff] %vm4817_vm8, %v7432_v27  ;;  %6270 = vmatmul.mubr.bf16.gmra.mrb[124].mxu0 %v5812_v15  ;;  %v6485_v9 = vpack.c.bf16 %v6436_v61, %v6435_v23  ;;  %v8461_v24 = vld [vmem:[#allocation4 + $0x28] sm:$0xff] }
 0x39a   : > { %7960 = vrot.lane.b32.xlu1 %v7888_v4, %s9968_s13  ;;  %8436 = vst.msk [vmem:[#allocation4 + $0xc8] sm:$0xff] %vm286_vm3, %v12244_v57  ;;  %6371 = vst.msk [vmem:[#allocation3 + $0x169] sm:$0xff] %vm286_vm3, %v6306_v32  ;;  %v6307_v12 = vmax.f32 %v6139_v48, 0.0  ;;  %v8201_v19 = vpop.permute.xlu0 %8200  ;;  %v7890_v32 = vpack.c.bf16 %v7837_v25, %v7836_v45  ;;  %v8093_v48 = vld [vmem:[#allocation3 + $0x129] sm:$0xff] }
 0x39b   : > { %7783 = vst.msk [vmem:[#allocation4] sm:$0xff] %vm5074_vm9, %v7688_v28  ;;  %v8146_v61 = vpack.c.bf16 %v8093_v48, %v8092_v42 }
 0x39c   : > { %v7945_v14 = vpop.permute.xlu1 %7944  ;;  %6517 = vst.msk [vmem:[#allocation4 + $0xe0] sm:$0xff] %vm286_vm3, %v6485_v9  ;;  %6372 = vst.msk [vmem:[#allocation3 + $0x171] sm:$0xff] %vm286_vm3, %v6307_v12  ;;  %6937 = vrot.lane.b32.xlu0 %v12106_v26, %s9963_s10  ;;  %v8091_v26 = vld [vmem:[#allocation3 + $0x111] sm:$0xff] }
 0x39d   : > { %8040 = vst.msk [vmem:[#allocation4] sm:$0xff] %vm5332_vm10, %v7945_v14  ;;  %v8145_v31 = vpack.c.bf16 %v8091_v26, %v8090_v35  ;;  %v8095_v26 = vld [vmem:[#allocation3 + $0x141] sm:$0xff] }
 0x39e   : > { %6681 = vrot.lane.b32.xlu1 %v12212_v38, %s9962_s9  ;;  %8296 = vst.msk [vmem:[#allocation4] sm:$0xff] %vm5589_vm11, %v8201_v19  ;;  %v6922_v29 = vpop.permute.xlu0 %6921 }
 0x3a0   : > { %v6666_v2 = vpop.permute.xlu1 %6665  ;;  %7449 = vrot.lane.b32.xlu0 %v8144_v59, %s9966_s7 }
 0x3a1   : > { %6760 = vst.msk [vmem:[#allocation4 + $0x10] sm:$0xff] %vm4046_vm5, %v6666_v2  ;;  %v6143_v5 = vpop.f32.mrb[60].mxu0  ;;  %v6437_v3 = vld [vmem:[#allocation3 + $0x168] sm:$0xff] }
 0x3a2   : > { %7193 = vrot.lane.b32.xlu1 %v7888_v4, %s9965_s30  ;;  %7016 = vst.msk [vmem:[#allocation4 + $0x10] sm:$0xff] %vm4303_vm6, %v6922_v29  ;;  %v6144_v22 = vadd.f32 %v12129_v37, %v6143_v5  ;;  %v6145_v49 = vpop.f32.mrb[61].mxu0  ;;  %v7434_v38 = vpop.permute.xlu0 %7433 }
 0x3a3   : > { %v8354_v41 = vld [vmem:[#allocation3 + $0x16a] sm:$0xff]  ;;  %v8355_v40 = vld [vmem:[#allocation3 + $0x172] sm:$0xff]  ;;  %v6146_v8 = vpop.f32.mrb[62].mxu0 }
 0x3a4   : > { %v7178_v46 = vpop.permute.xlu1 %7177  ;;  %v12267_v10 = vpack.c.bf16 %v8355_v40, %v8354_v41  ;;  %v6308_v63 = vmax.f32 %v6144_v22, 0.0  ;;  %v6147_v7 = vadd.f32 %v12129_v37, %v6146_v8  ;;  %v6148_v0 = vpop.f32.mrb[63].mxu0  ;;  %v6438_v58 = vld [vmem:[#allocation3 + $0x170] sm:$0xff]  ;;  %7962 = vrot.lane.b32.xlu0 %v7889_v30, %s9968_s13 }
 0x3a5   : > { %7272 = vst.msk [vmem:[#allocation4 + $0x10] sm:$0xff] %vm4560_vm7, %v7178_v46  ;;  %v8456_v18 = vld [vmem:[#allocation4] sm:$0xff]  ;;  %v6486_v39 = vpack.c.bf16 %v6438_v58, %v6437_v3  ;;  %v8463_v58 = vld [vmem:[#allocation4 + $0x38] sm:$0xff] }
 0x3a6   : > { %7705 = vrot.lane.b32.xlu1 %v12135_v1, %s9967_s12  ;;  %8437 = vst.msk [vmem:[#allocation4 + $0xd8] sm:$0xff] %vm286_vm3, %v12267_v10  ;;  %6373 = vst.msk [vmem:[#allocation3 + $0x181] sm:$0xff] %vm286_vm3, %v6308_v63  ;;  %v6309_v62 = vmax.f32 %v6147_v7, 0.0  ;;  %8728 = vmatmul.mubr.bf16.vlgmr.msra.gmra.mrb[0].mxu1 %v8456_v18  ;;  %v7947_v56 = vpop.permute.xlu0 %7946  ;;  %v7838_v63 = vld [vmem:[#allocation3 + $0x138] sm:$0xff] }
 0x3a7   : > { %7528 = vst.msk [vmem:[#allocation4 + $0x10] sm:$0xff] %vm4817_vm8, %v7434_v38  ;;  %9586 = vmatprep.mubr.msk.bf16.mxu1 %vm286_vm3, %v8459_v43  ;;  %v8094_v3 = vld [vmem:[#allocation3 + $0x139] sm:$0xff] }
 0x3a8   : > { %v7690_v55 = vpop.permute.xlu1 %7689  ;;  %6518 = vst.msk [vmem:[#allocation4 + $0xf0] sm:$0xff] %vm286_vm3, %v6486_v39  ;;  %6374 = vst.msk [vmem:[#allocation3 + $0x189] sm:$0xff] %vm286_vm3, %v6309_v62  ;;  %6683 = vrot.lane.b32.xlu0 %v8144_v59, %s9962_s9  ;;  %v12325_v18 = vpack.c.bf16 %v8095_v26, %v8094_v3 }
 0x3a9   : > { %7784 = vst.msk [vmem:[#allocation4 + $0x10] sm:$0xff] %vm5074_vm9, %v7690_v55 }
 0x3aa   : > { %8218 = vrot.lane.b32.xlu1 %v8145_v31, %s9969_s14  ;;  %8041 = vst.msk [vmem:[#allocation4 + $0x10] sm:$0xff] %vm5332_vm10, %v7947_v56  ;;  %v6668_v52 = vpop.permute.xlu0 %6667 }
 0x3ab   : > { %6761 = vst.msk [vmem:[#allocation4 + $0x20] sm:$0xff] %vm4046_vm5, %v6668_v52 }
 0x3ac   : > { %v8203_v36 = vpop.permute.xlu1 %8202  ;;  %7195 = vrot.lane.b32.xlu0 %v7889_v30, %s9965_s30 }
 0x3ad   : > { %8297 = vst.msk [vmem:[#allocation4 + $0x10] sm:$0xff] %vm5589_vm11, %v8203_v36  ;;  %v6151_v21 = vpop.f32.mrb[64].mxu0 }
 0x3ae   : > { %6939 = vrot.lane.b32.xlu1 %v12135_v1, %s9963_s10  ;;  %v6152_v44 = vadd.f32 %v12129_v37, %v6151_v21  ;;  %v6153_v20 = vpop.f32.mrb[65].mxu0  ;;  %v7180_v4 = vpop.permute.xlu0 %7179 }
 0x3af   : > { %v8356_v60 = vld [vmem:[#allocation3 + $0x182] sm:$0xff]  ;;  %v8357_v33 = vld [vmem:[#allocation3 + $0x18a] sm:$0xff]  ;;  %v6154_v34 = vpop.f32.mrb[66].mxu0 }
 0x3b0   : > { %v6924_v11 = vpop.permute.xlu1 %6923  ;;  %v12291_v13 = vpack.c.bf16 %v8357_v33, %v8356_v60  ;;  %v6310_v27 = vmax.f32 %v6152_v44, 0.0  ;;  %v6155_v1 = vadd.f32 %v12129_v37, %v6154_v34  ;;  %v6156_v15 = vpop.f32.mrb[67].mxu0  ;;  %7707 = vrot.lane.b32.xlu0 %v12161_v47, %s9967_s12 }
 0x3b1   : > { %7017 = vst.msk [vmem:[#allocation4 + $0x20] sm:$0xff] %vm4303_vm6, %v6924_v11 }
 0x3b2   : > { %7451 = vrot.lane.b32.xlu1 %v8145_v31, %s9966_s7  ;;  %8438 = vst.msk [vmem:[#allocation4 + $0xe8] sm:$0xff] %vm286_vm3, %v12291_v13  ;;  %6375 = vst.msk [vmem:[#allocation3 + $0x1c9] sm:$0xff] %vm286_vm3, %v6310_v27  ;;  %v6311_v16 = vmax.f32 %v6155_v1, 0.0  ;;  %v7692_v23 = vpop.permute.xlu0 %7691  ;;  %v7841_v27 = vld [vmem:[#allocation3 + $0x158] sm:$0xff]  ;;  %v7840_v1 = vld [vmem:[#allocation3 + $0x150] sm:$0xff] }
 0x3b3   : > { %7273 = vst.msk [vmem:[#allocation4 + $0x20] sm:$0xff] %vm4560_vm7, %v7180_v4  ;;  %v7892_v45 = vpack.c.bf16 %v7841_v27, %v7840_v1  ;;  %v7845_v27 = vld [vmem:[#allocation3 + $0x188] sm:$0xff] }
 0x3b4   : > { %v7436_v50 = vpop.permute.xlu1 %7435  ;;  %v8458_v51 = vld [vmem:[#allocation4 + $0x10] sm:$0xff]  ;;  %6376 = vst.msk [vmem:[#allocation3 + $0x1d1] sm:$0xff] %vm286_vm3, %v6311_v16  ;;  %8220 = vrot.lane.b32.xlu0 %v8146_v61, %s9969_s14  ;;  %v8097_v16 = vld [vmem:[#allocation3 + $0x159] sm:$0xff] }
 0x3b5   : > { %7529 = vst.msk [vmem:[#allocation4 + $0x20] sm:$0xff] %vm4817_vm8, %v7436_v50  ;;  %8736 = vmatmul.mubr.bf16.gmra.mrb[4].mxu1 %v8458_v51  ;;  %v8465_v50 = vld [vmem:[#allocation4 + $0x48] sm:$0xff]  ;;  %v8096_v51 = vld [vmem:[#allocation3 + $0x151] sm:$0xff] }
 0x3b6   : > { %9587 = vmatprep.mubr.msk.bf16.mxu1 %vm286_vm3, %v8461_v24  ;;  %7964 = vrot.lane.b32.xlu1 %v7890_v32, %s9968_s13  ;;  %7785 = vst.msk [vmem:[#allocation4 + $0x20] sm:$0xff] %vm5074_vm9, %v7692_v23  ;;  %v8205_v59 = vpop.permute.xlu0 %8204  ;;  %v12357_v24 = vpack.c.bf16 %v8097_v16, %v8096_v51  ;;  %v8101_v51 = vld [vmem:[#allocation3 + $0x189] sm:$0xff] }
 0x3b8   : > { %v7949_v28 = vpop.permute.xlu1 %7948  ;;  %6941 = vrot.lane.b32.xlu0 %v12161_v47, %s9963_s10  ;;  %v7839_v47 = vld [vmem:[#allocation3 + $0x140] sm:$0xff] }
 0x3b9   : > { %8042 = vst.msk [vmem:[#allocation4 + $0x20] sm:$0xff] %vm5332_vm10, %v7949_v28  ;;  %v6159_v9 = vpop.f32.mrb[68].mxu0  ;;  %v6441_v49 = vld [vmem:[#allocation3 + $0x1c8] sm:$0xff]  ;;  %v7891_v0 = vpack.c.bf16 %v7839_v47, %v7838_v63  ;;  %v8099_v47 = vld [vmem:[#allocation3 + $0x171] sm:$0xff] }
 0x3ba   : > { %6685 = vrot.lane.b32.xlu1 %v8145_v31, %s9962_s9  ;;  %8298 = vst.msk [vmem:[#allocation4 + $0x20] sm:$0xff] %vm5589_vm11, %v8205_v59  ;;  %v6160_v12 = vadd.f32 %v12129_v37, %v6159_v9  ;;  %v6161_v14 = vpop.f32.mrb[69].mxu0  ;;  %v6926_v17 = vpop.permute.xlu0 %6925 }
 0x3bb   : > { %v6162_v2 = vpop.f32.mrb[70].mxu0  ;;  %v6442_v46 = vld [vmem:[#allocation3 + $0x1d0] sm:$0xff] }
 0x3bc   : > { %v6670_v19 = vpop.permute.xlu1 %6669  ;;  %v6312_v29 = vmax.f32 %v6160_v12, 0.0  ;;  %v6163_v5 = vadd.f32 %v12129_v37, %v6162_v2  ;;  %v6164_v22 = vpop.f32.mrb[71].mxu0  ;;  %v6488_v41 = vpack.c.bf16 %v6442_v46, %v6441_v49  ;;  %7453 = vrot.lane.b32.xlu0 %v8146_v61, %s9966_s7 }
 0x3bd   : > { %6762 = vst.msk [vmem:[#allocation4 + $0x30] sm:$0xff] %vm4046_vm5, %v6670_v19 }
 0x3be   : > { %7197 = vrot.lane.b32.xlu1 %v7890_v32, %s9965_s30  ;;  %6377 = vst.msk [vmem:[#allocation3 + $0x1e1] sm:$0xff] %vm286_vm3, %v6312_v29  ;;  %v6313_v40 = vmax.f32 %v6163_v5, 0.0  ;;  %6520 = vst.msk [vmem:[#allocation4 + $0x110] sm:$0xff] %vm286_vm3, %v6488_v41  ;;  %v7438_v7 = vpop.permute.xlu0 %7437 }
 0x3bf   : > { %7018 = vst.msk [vmem:[#allocation4 + $0x30] sm:$0xff] %vm4303_vm6, %v6926_v17 }
 0x3c0   : > { %v7182_v8 = vpop.permute.xlu1 %7181  ;;  %6378 = vst.msk [vmem:[#allocation3 + $0x1e9] sm:$0xff] %vm286_vm3, %v6313_v40  ;;  %7966 = vrot.lane.b32.xlu0 %v7891_v0, %s9968_s13 }
 0x3c1   : > { %7274 = vst.msk [vmem:[#allocation4 + $0x30] sm:$0xff] %vm4560_vm7, %v7182_v8  ;;  %v8460_v54 = vld [vmem:[#allocation4 + $0x20] sm:$0xff]  ;;  %v7843_v8 = vld [vmem:[#allocation3 + $0x170] sm:$0xff] }
 0x3c2   : > { %7709 = vrot.lane.b32.xlu1 %v12189_v6, %s9967_s12  ;;  %7530 = vst.msk [vmem:[#allocation4 + $0x30] sm:$0xff] %vm4817_vm8, %v7438_v7  ;;  %8744 = vmatmul.mubr.bf16.gmra.mrb[8].mxu1 %v8460_v54  ;;  %v7951_v30 = vpop.permute.xlu0 %7950  ;;  %v8098_v54 = vld [vmem:[#allocation3 + $0x169] sm:$0xff] }
 0x3c3   : > { %9588 = vmatprep.mubr.msk.bf16.mxu1 %vm286_vm3, %v8463_v58 }
 0x3c4   : > { %v7694_v38 = vpop.permute.xlu1 %7693  ;;  %6687 = vrot.lane.b32.xlu0 %v8146_v61, %s9962_s9 }
 0x3c5   : > { %7786 = vst.msk [vmem:[#allocation4 + $0x30] sm:$0xff] %vm5074_vm9, %v7694_v38  ;;  %v6167_v35 = vpop.f32.mrb[72].mxu0  ;;  %v6443_v20 = vld [vmem:[#allocation3 + $0x1e0] sm:$0xff]  ;;  %v8467_v38 = vld [vmem:[#allocation4 + $0x58] sm:$0xff] }
 0x3c6   : > { %8222 = vrot.lane.b32.xlu1 %v12325_v18, %s9969_s14  ;;  %8043 = vst.msk [vmem:[#allocation4 + $0x30] sm:$0xff] %vm5332_vm10, %v7951_v30  ;;  %v6168_v39 = vadd.f32 %v12129_v37, %v6167_v35  ;;  %v6169_v62 = vpop.f32.mrb[73].mxu0  ;;  %v6672_v60 = vpop.permute.xlu0 %6671  ;;  %v12387_v30 = vpack.c.bf16 %v8099_v47, %v8098_v54  ;;  %v8103_v47 = vld [vmem:[#allocation3 + $0x1a1] sm:$0xff] }
 0x3c7   : > { %v8360_v55 = vld [vmem:[#allocation3 + $0x1e2] sm:$0xff]  ;;  %v8361_v31 = vld [vmem:[#allocation3 + $0x1ea] sm:$0xff]  ;;  %v6170_v56 = vpop.f32.mrb[74].mxu0  ;;  %6763 = vst.msk [vmem:[#allocation4 + $0x40] sm:$0xff] %vm4046_vm5, %v6672_v60 }
 0x3c8   : > { %v8207_v43 = vpop.permute.xlu1 %8206  ;;  %v12336_v36 = vpack.c.bf16 %v8361_v31, %v8360_v55  ;;  %v6314_v52 = vmax.f32 %v6168_v39, 0.0  ;;  %v6171_v21 = vadd.f32 %v12129_v37, %v6170_v56  ;;  %v6172_v44 = vpop.f32.mrb[75].mxu0  ;;  %v6444_v11 = vld [vmem:[#allocation3 + $0x1e8] sm:$0xff]  ;;  %7199 = vrot.lane.b32.xlu0 %v7891_v0, %s9965_s30 }
 0x3c9   : > { %8299 = vst.msk [vmem:[#allocation4 + $0x30] sm:$0xff] %vm5589_vm11, %v8207_v43  ;;  %v6489_v33 = vpack.c.bf16 %v6444_v11, %v6443_v20 }
 0x3ca   : > { %6943 = vrot.lane.b32.xlu1 %v12189_v6, %s9963_s10  ;;  %8440 = vst.msk [vmem:[#allocation4 + $0x108] sm:$0xff] %vm286_vm3, %v12336_v36  ;;  %6379 = vst.msk [vmem:[#allocation3 + $0x1f9] sm:$0xff] %vm286_vm3, %v6314_v52  ;;  %v6315_v34 = vmax.f32 %v6171_v21, 0.0  ;;  %v7184_v6 = vpop.permute.xlu0 %7183 }
 0x3cb   : > { %6521 = vst.msk [vmem:[#allocation4 + $0x120] sm:$0xff] %vm286_vm3, %v6489_v33 }
 0x3cc   : > { %v6928_v25 = vpop.permute.xlu1 %6927  ;;  %6380 = vst.msk [vmem:[#allocation3 + $0x201] sm:$0xff] %vm286_vm3, %v6315_v34  ;;  %7711 = vrot.lane.b32.xlu0 %v12218_v53, %s9967_s12 }
 0x3cd   : > { %7019 = vst.msk [vmem:[#allocation4 + $0x40] sm:$0xff] %vm4303_vm6, %v6928_v25  ;;  %v7844_v25 = vld [vmem:[#allocation3 + $0x180] sm:$0xff] }
 0x3ce   : > { %7455 = vrot.lane.b32.xlu1 %v12325_v18, %s9966_s7  ;;  %7275 = vst.msk [vmem:[#allocation4 + $0x40] sm:$0xff] %vm4560_vm7, %v7184_v6  ;;  %v7696_v32 = vpop.permute.xlu0 %7695  ;;  %v7894_v16 = vpack.c.bf16 %v7845_v27, %v7844_v25  ;;  %v6440_v25 = vld [vmem:[#allocation3 + $0x1b8] sm:$0xff] }
 0x3d0   : > { %v7440_v15 = vpop.permute.xlu1 %7439  ;;  %v8462_v4 = vld [vmem:[#allocation4 + $0x30] sm:$0xff]  ;;  %8224 = vrot.lane.b32.xlu0 %v12357_v24, %s9969_s14 }
 0x3d1   : > { %7531 = vst.msk [vmem:[#allocation4 + $0x40] sm:$0xff] %vm4817_vm8, %v7440_v15  ;;  %8752 = vmatmul.mubr.bf16.gmra.mrb[12].mxu1 %v8462_v4  ;;  %v6175_v48 = vpop.f32.mrb[76].mxu0  ;;  %v6445_v29 = vld [vmem:[#allocation3 + $0x1f8] sm:$0xff] }
 0x3d2   : > { %7968 = vrot.lane.b32.xlu1 %v7892_v45, %s9968_s13  ;;  %9589 = vmatprep.mubr.msk.bf16.mxu1 %vm286_vm3, %v8465_v50  ;;  %7787 = vst.msk [vmem:[#allocation4 + $0x40] sm:$0xff] %vm5074_vm9, %v7696_v32  ;;  %v6176_v42 = vadd.f32 %v12129_v37, %v6175_v48  ;;  %v6177_v23 = vpop.f32.mrb[77].mxu0  ;;  %v8209_v22 = vpop.permute.xlu0 %8208  ;;  %v8100_v50 = vld [vmem:[#allocation3 + $0x181] sm:$0xff] }
 0x3d3   : > { %v8362_v28 = vld [vmem:[#allocation3 + $0x1fa] sm:$0xff]  ;;  %v8363_v59 = vld [vmem:[#allocation3 + $0x202] sm:$0xff]  ;;  %v6178_v9 = vpop.f32.mrb[78].mxu0 }
 0x3d4   : > { %v7953_v61 = vpop.permute.xlu1 %7952  ;;  %v12364_v12 = vpack.c.bf16 %v8363_v59, %v8362_v28  ;;  %v6316_v14 = vmax.f32 %v6176_v42, 0.0  ;;  %v6179_v19 = vadd.f32 %v12129_v37, %v6178_v9  ;;  %v6180_v2 = vpop.f32.mrb[79].mxu0  ;;  %v6446_v5 = vld [vmem:[#allocation3 + $0x200] sm:$0xff]  ;;  %6945 = vrot.lane.b32.xlu0 %v12218_v53, %s9963_s10  ;;  %v7842_v53 = vld [vmem:[#allocation3 + $0x168] sm:$0xff] }
 0x3d5   : > { %8044 = vst.msk [vmem:[#allocation4 + $0x40] sm:$0xff] %vm5332_vm10, %v7953_v61  ;;  %v6490_v49 = vpack.c.bf16 %v6446_v5, %v6445_v29  ;;  %v7893_v7 = vpack.c.bf16 %v7843_v8, %v7842_v53  ;;  %v8469_v42 = vld [vmem:[#allocation4 + $0x68] sm:$0xff]  ;;  %v8150_v2 = vpack.c.bf16 %v8101_v51, %v8100_v50  ;;  %v8102_v8 = vld [vmem:[#allocation3 + $0x199] sm:$0xff] }
 0x3d6   : > { %6689 = vrot.lane.b32.xlu1 %v12325_v18, %s9962_s9  ;;  %8441 = vst.msk [vmem:[#allocation4 + $0x118] sm:$0xff] %vm286_vm3, %v12364_v12  ;;  %6381 = vst.msk [vmem:[#allocation3 + $0x211] sm:$0xff] %vm286_vm3, %v6316_v14  ;;  %v6317_v46 = vmax.f32 %v6179_v19, 0.0  ;;  %v6930_v41 = vpop.permute.xlu0 %6929  ;;  %v12442_v53 = vld [vmem:[%s13151_s3] ss:$0 sm:$0xff] }
 0x3d7   : > { %8300 = vst.msk [vmem:[#allocation4 + $0x40] sm:$0xff] %vm5589_vm11, %v8209_v22 }
 0x3d8   : > { %v6674_v17 = vpop.permute.xlu1 %6673  ;;  %6522 = vst.msk [vmem:[#allocation4 + $0x130] sm:$0xff] %vm286_vm3, %v6490_v49  ;;  %6382 = vst.msk [vmem:[#allocation3 + $0x219] sm:$0xff] %vm286_vm3, %v6317_v46  ;;  %7457 = vrot.lane.b32.xlu0 %v12357_v24, %s9966_s7  ;;  %v7846_v46 = vld [vmem:[#allocation3 + $0x198] sm:$0xff] }
 0x3d9   : > { %6764 = vst.msk [vmem:[#allocation4 + $0x50] sm:$0xff] %vm4046_vm5, %v6674_v17  ;;  %v7847_v17 = vld [vmem:[#allocation3 + $0x1a0] sm:$0xff] }
 0x3da   : > { %7201 = vrot.lane.b32.xlu1 %v7892_v45, %s9965_s30  ;;  %7020 = vst.msk [vmem:[#allocation4 + $0x50] sm:$0xff] %vm4303_vm6, %v6930_v41  ;;  %v7442_v26 = vpop.permute.xlu0 %7441 }
 0x3dc   : > { %v7186_v40 = vpop.permute.xlu1 %7185  ;;  %7970 = vrot.lane.b32.xlu0 %v7893_v7, %s9968_s13 }
 0x3dd   : > { %7276 = vst.msk [vmem:[#allocation4 + $0x50] sm:$0xff] %vm4560_vm7, %v7186_v40  ;;  %v6183_v63 = vpop.f32.mrb[80].mxu0  ;;  %v6447_v52 = vld [vmem:[#allocation3 + $0x210] sm:$0xff] }
 0x3de   : > { %7713 = vrot.lane.b32.xlu1 %v12244_v57, %s9967_s12  ;;  %v8464_v0 = vld [vmem:[#allocation4 + $0x40] sm:$0xff]  ;;  %7532 = vst.msk [vmem:[#allocation4 + $0x50] sm:$0xff] %vm4817_vm8, %v7442_v26  ;;  %v6184_v3 = vadd.f32 %v12129_v37, %v6183_v63  ;;  %v6185_v58 = vpop.f32.mrb[81].mxu0  ;;  %v7955_v44 = vpop.permute.xlu0 %7954 }
 0x3df   : > { %8760 = vmatmul.mubr.bf16.gmra.mrb[16].mxu1 %v8464_v0  ;;  %v8364_v35 = vld [vmem:[#allocation3 + $0x212] sm:$0xff]  ;;  %v8365_v39 = vld [vmem:[#allocation3 + $0x21a] sm:$0xff]  ;;  %v6186_v62 = vpop.f32.mrb[82].mxu0 }
 0x3e0   : > { %v7698_v18 = vpop.permute.xlu1 %7697  ;;  %9590 = vmatprep.mubr.msk.bf16.mxu1 %vm286_vm3, %v8467_v38  ;;  %v12392_v43 = vpack.c.bf16 %v8365_v39, %v8364_v35  ;;  %v6318_v55 = vmax.f32 %v6184_v3, 0.0  ;;  %v6187_v31 = vadd.f32 %v12129_v37, %v6186_v62  ;;  %v6188_v56 = vpop.f32.mrb[83].mxu0  ;;  %v6448_v21 = vld [vmem:[#allocation3 + $0x218] sm:$0xff]  ;;  %6691 = vrot.lane.b32.xlu0 %v12357_v24, %s9962_s9  ;;  %v7895_v3 = vpack.c.bf16 %v7847_v17, %v7846_v46 }
 0x3e1   : > { %7788 = vst.msk [vmem:[#allocation4 + $0x50] sm:$0xff] %vm5074_vm9, %v7698_v18  ;;  %v6491_v20 = vpack.c.bf16 %v6448_v21, %v6447_v52  ;;  %v6567_v58 = vld [vmem:[#allocation3 + $0x1b1] sm:$0xff]  ;;  %v8151_v39 = vpack.c.bf16 %v8103_v47, %v8102_v8  ;;  %v6568_v62 = vld [vmem:[#allocation3 + $0x1b9] sm:$0xff] }
 0x3e2   : > { %8226 = vrot.lane.b32.xlu1 %v12387_v30, %s9969_s14  ;;  %8442 = vst.msk [vmem:[#allocation4 + $0x128] sm:$0xff] %vm286_vm3, %v12392_v43  ;;  %6383 = vst.msk [vmem:[#allocation3 + $0x229] sm:$0xff] %vm286_vm3, %v6318_v55  ;;  %v6319_v11 = vmax.f32 %v6187_v31, 0.0  ;;  %v6676_v33 = vpop.permute.xlu0 %6675  ;;  %v6823_v21 = vld [vmem:[#allocation3 + $0x1b2] sm:$0xff] }
 0x3e3   : > { %8045 = vst.msk [vmem:[#allocation4 + $0x50] sm:$0xff] %vm5332_vm10, %v7955_v44  ;;  %v6824_v44 = vld [vmem:[#allocation3 + $0x1ba] sm:$0xff] }
 0x3e4   : > { %v8211_v60 = vpop.permute.xlu1 %8210  ;;  %6523 = vst.msk [vmem:[#allocation4 + $0x140] sm:$0xff] %vm286_vm3, %v6491_v20  ;;  %6384 = vst.msk [vmem:[#allocation3 + $0x231] sm:$0xff] %vm286_vm3, %v6319_v11  ;;  %7203 = vrot.lane.b32.xlu0 %v7893_v7, %s9965_s30  ;;  %v6871_v27 = vpack.c.bf16 %v6824_v44, %v6823_v21 }
 0x3e5   : > { %8301 = vst.msk [vmem:[#allocation4 + $0x50] sm:$0xff] %vm5589_vm11, %v8211_v60  ;;  %v8471_v60 = vld [vmem:[#allocation4 + $0x78] sm:$0xff] }
 0x3e6   : > { %6947 = vrot.lane.b32.xlu1 %v12244_v57, %s9963_s10  ;;  %6765 = vst.msk [vmem:[#allocation4 + $0x60] sm:$0xff] %vm4046_vm5, %v6676_v33  ;;  %v7188_v6 = vpop.permute.xlu0 %7187  ;;  %v6615_v33 = vpack.c.bf16 %v6568_v62, %v6567_v58 }
 0x3e8   : > { %v6932_v34 = vpop.permute.xlu1 %6931  ;;  %7715 = vrot.lane.b32.xlu0 %v12267_v10, %s9967_s12 }
 0x3e9   : > { %7021 = vst.msk [vmem:[#allocation4 + $0x60] sm:$0xff] %vm4303_vm6, %v6932_v34  ;;  %v6191_v1 = vpop.f32.mrb[84].mxu0  ;;  %v6449_v9 = vld [vmem:[#allocation3 + $0x228] sm:$0xff]  ;;  %v6439_v34 = vld [vmem:[#allocation3 + $0x1b0] sm:$0xff] }
 0x3ea   : > { %7459 = vrot.lane.b32.xlu1 %v12387_v30, %s9966_s7  ;;  %7277 = vst.msk [vmem:[#allocation4 + $0x60] sm:$0xff] %vm4560_vm7, %v7188_v6  ;;  %v6192_v15 = vadd.f32 %v12129_v37, %v6191_v1  ;;  %v6193_v57 = vpop.f32.mrb[85].mxu0  ;;  %v7700_v19 = vpop.permute.xlu0 %7699  ;;  %v6487_v6 = vpack.c.bf16 %v6440_v25, %v6439_v34 }
 0x3eb   : > { %v8366_v32 = vld [vmem:[#allocation3 + $0x22a] sm:$0xff]  ;;  %v8367_v48 = vld [vmem:[#allocation3 + $0x232] sm:$0xff]  ;;  %v6194_v24 = vpop.f32.mrb[86].mxu0 }
 0x3ec   : > { %v7444_v4 = vpop.permute.xlu1 %7443  ;;  %v8466_v45 = vld [vmem:[#allocation4 + $0x50] sm:$0xff]  ;;  %v12418_v23 = vpack.c.bf16 %v8367_v48, %v8366_v32  ;;  %v6320_v61 = vmax.f32 %v6192_v15, 0.0  ;;  %v6195_v28 = vadd.f32 %v12129_v37, %v6194_v24  ;;  %v6196_v59 = vpop.f32.mrb[87].mxu0  ;;  %8228 = vrot.lane.b32.xlu0 %v8150_v2, %s9969_s14  ;;  %6519 = vst.msk [vmem:[#allocation4 + $0x100] sm:$0xff] %vm286_vm3, %v6487_v6  ;;  %v7851_v6 = vld [vmem:[#allocation3 + $0x200] sm:$0xff] }
 0x3ed   : > { %7533 = vst.msk [vmem:[#allocation4 + $0x60] sm:$0xff] %vm4817_vm8, %v7444_v4  ;;  %8768 = vmatmul.mubr.bf16.gmra.mrb[20].mxu1 %v8466_v45  ;;  %v6450_v14 = vld [vmem:[#allocation3 + $0x230] sm:$0xff]  ;;  %v7079_v45 = vld [vmem:[#allocation3 + $0x1c8] sm:$0xff] }
 0x3ee   : > { %7972 = vrot.lane.b32.xlu1 %v7894_v16, %s9968_s13  ;;  %9591 = vmatprep.mubr.msk.bf16.mxu1 %vm286_vm3, %v8469_v42  ;;  %v6492_v29 = vpack.c.bf16 %v6450_v14, %v6449_v9  ;;  %8443 = vst.msk [vmem:[#allocation4 + $0x138] sm:$0xff] %vm286_vm3, %v12418_v23  ;;  %6385 = vst.msk [vmem:[#allocation3 + $0x241] sm:$0xff] %vm286_vm3, %v6320_v61  ;;  %v6321_v5 = vmax.f32 %v6195_v28, 0.0  ;;  %v8213_v37 = vpop.permute.xlu0 %8212  ;;  %v7080_v57 = vld [vmem:[#allocation3 + $0x1d0] sm:$0xff] }
 0x3ef   : > { %7789 = vst.msk [vmem:[#allocation4 + $0x60] sm:$0xff] %vm5074_vm9, %v7700_v19  ;;  %v7336_v4 = vld [vmem:[#allocation3 + $0x1d1] sm:$0xff]  ;;  %v7127_v51 = vpack.c.bf16 %v7080_v57, %v7079_v45  ;;  %v7335_v32 = vld [vmem:[#allocation3 + $0x1c9] sm:$0xff] }
 0x3f0   : > { %v7957_v22 = vpop.permute.xlu1 %7956  ;;  %6524 = vst.msk [vmem:[#allocation4 + $0x150] sm:$0xff] %vm286_vm3, %v6492_v29  ;;  %6386 = vst.msk [vmem:[#allocation3 + $0x249] sm:$0xff] %vm286_vm3, %v6321_v5  ;;  %6949 = vrot.lane.b32.xlu0 %v12267_v10, %s9963_s10  ;;  %v7383_v61 = vpack.c.bf16 %v7336_v4, %v7335_v32  ;;  %v7591_v28 = vld [vmem:[#allocation3 + $0x1ca] sm:$0xff]  ;;  %v7592_v59 = vld [vmem:[#allocation3 + $0x1d2] sm:$0xff] }
 0x3f1   : > { %8046 = vst.msk [vmem:[#allocation4 + $0x60] sm:$0xff] %vm5332_vm10, %v7957_v22 }
 0x3f2   : > { %6693 = vrot.lane.b32.xlu1 %v12387_v30, %s9962_s9  ;;  %8302 = vst.msk [vmem:[#allocation4 + $0x60] sm:$0xff] %vm5589_vm11, %v8213_v37  ;;  %v6934_v41 = vpop.permute.xlu0 %6933 }
 0x3f4   : > { %v6678_v49 = vpop.permute.xlu1 %6677  ;;  %7461 = vrot.lane.b32.xlu0 %v8150_v2, %s9966_s7  ;;  %v7849_v2 = vld [vmem:[#allocation3 + $0x1e8] sm:$0xff] }
 0x3f5   : > { %6766 = vst.msk [vmem:[#allocation4 + $0x70] sm:$0xff] %vm4046_vm5, %v6678_v49  ;;  %v6199_v40 = vpop.f32.mrb[88].mxu0  ;;  %v6451_v55 = vld [vmem:[#allocation3 + $0x240] sm:$0xff] }
 0x3f6   : > { %7205 = vrot.lane.b32.xlu1 %v7894_v16, %s9965_s30  ;;  %7022 = vst.msk [vmem:[#allocation4 + $0x70] sm:$0xff] %vm4303_vm6, %v6934_v41  ;;  %v6200_v26 = vadd.f32 %v12442_v53, %v6199_v40  ;;  %v6201_v10 = vpop.f32.mrb[89].mxu0  ;;  %v7446_v56 = vpop.permute.xlu0 %7445  ;;  %v7639_v41 = vpack.c.bf16 %v7592_v59, %v7591_v28  ;;  %v7848_v40 = vld [vmem:[#allocation3 + $0x1e0] sm:$0xff] }
 0x3f7   : > { %v8368_v7 = vld [vmem:[#allocation3 + $0x242] sm:$0xff]  ;;  %v8369_v0 = vld [vmem:[#allocation3 + $0x24a] sm:$0xff]  ;;  %v6202_v54 = vpop.f32.mrb[90].mxu0 }
 0x3f8   : > { %v7190_v63 = vpop.permute.xlu1 %7189  ;;  %v12447_v38 = vpack.c.bf16 %v8369_v0, %v8368_v7  ;;  %v6322_v18 = vmax.f32 %v6200_v26, 0.0  ;;  %v6203_v30 = vadd.f32 %v12442_v53, %v6202_v54  ;;  %v6204_v35 = vpop.f32.mrb[91].mxu0  ;;  %v6452_v31 = vld [vmem:[#allocation3 + $0x248] sm:$0xff]  ;;  %7974 = vrot.lane.b32.xlu0 %v7895_v3, %s9968_s13 }
 0x3f9   : > { %7278 = vst.msk [vmem:[#allocation4 + $0x70] sm:$0xff] %vm4560_vm7, %v7190_v63  ;;  %v8468_v52 = vld [vmem:[#allocation4 + $0x60] sm:$0xff]  ;;  %v6493_v20 = vpack.c.bf16 %v6452_v31, %v6451_v55  ;;  %v7896_v63 = vpack.c.bf16 %v7849_v2, %v7848_v40  ;;  %v8105_v7 = vld [vmem:[#allocation3 + $0x1e9] sm:$0xff] }
 0x3fa   : > { %7717 = vrot.lane.b32.xlu1 %v12291_v13, %s9967_s12  ;;  %8444 = vst.msk [vmem:[#allocation4 + $0x148] sm:$0xff] %vm286_vm3, %v12447_v38  ;;  %6387 = vst.msk [vmem:[#allocation3 + $0x259] sm:$0xff] %vm286_vm3, %v6322_v18  ;;  %v6323_v11 = vmax.f32 %v6203_v30, 0.0  ;;  %8776 = vmatmul.mubr.bf16.gmra.mrb[24].mxu1 %v8468_v52  ;;  %v7959_v1 = vpop.permute.xlu0 %7958  ;;  %v8473_v0 = vld [vmem:[#allocation4 + $0x88] sm:$0xff] }
 0x3fb   : > { %7534 = vst.msk [vmem:[#allocation4 + $0x70] sm:$0xff] %vm4817_vm8, %v7446_v56  ;;  %9592 = vmatprep.mubr.msk.bf16.mxu1 %vm286_vm3, %v8471_v60  ;;  %v8104_v54 = vld [vmem:[#allocation3 + $0x1e1] sm:$0xff] }
 0x3fc   : > { %v7702_v13 = vpop.permute.xlu1 %7701  ;;  %6525 = vst.msk [vmem:[#allocation4 + $0x160] sm:$0xff] %vm286_vm3, %v6493_v20  ;;  %6388 = vst.msk [vmem:[#allocation3 + $0x261] sm:$0xff] %vm286_vm3, %v6323_v11  ;;  %6695 = vrot.lane.b32.xlu0 %v6615_v33, %s9962_s9  ;;  %v8152_v58 = vpack.c.bf16 %v8105_v7, %v8104_v54  ;;  %v8109_v7 = vld [vmem:[#allocation3 + $0x219] sm:$0xff]  ;;  %v8108_v54 = vld [vmem:[#allocation3 + $0x211] sm:$0xff] }
 0x3fd   : > { %7790 = vst.msk [vmem:[#allocation4 + $0x70] sm:$0xff] %vm5074_vm9, %v7702_v13 }
 0x3fe   : > { %8230 = vrot.lane.b32.xlu1 %v8151_v39, %s9969_s14  ;;  %8047 = vst.msk [vmem:[#allocation4 + $0x70] sm:$0xff] %vm5332_vm10, %v7959_v1  ;;  %v6680_v16 = vpop.permute.xlu0 %6679  ;;  %v8107_v1 = vld [vmem:[#allocation3 + $0x201] sm:$0xff] }
 0x3ff   : > { %6767 = vst.msk [vmem:[#allocation4 + $0x80] sm:$0xff] %vm4046_vm5, %v6680_v16  ;;  %v8106_v16 = vld [vmem:[#allocation3 + $0x1f9] sm:$0xff] }
 0x400   : > { %v8215_v15 = vpop.permute.xlu1 %8214  ;;  %7207 = vrot.lane.b32.xlu0 %v7127_v51, %s9965_s30  ;;  %v12508_v32 = vpack.c.bf16 %v8107_v1, %v8106_v16  ;;  %v7855_v1 = vld [vmem:[#allocation3 + $0x230] sm:$0xff] }
 0x401   : > { %8303 = vst.msk [vmem:[#allocation4 + $0x70] sm:$0xff] %vm5589_vm11, %v8215_v15  ;;  %v6207_v50 = vpop.f32.mrb[92].mxu0  ;;  %v6453_v49 = vld [vmem:[#allocation3 + $0x258] sm:$0xff]  ;;  %v8110_v16 = vld [vmem:[#allocation3 + $0x229] sm:$0xff] }
 0x402   : > { %6951 = vrot.lane.b32.xlu1 %v6871_v27, %s9963_s10  ;;  %v6208_v48 = vadd.f32 %v12442_v53, %v6207_v50  ;;  %v6209_v24 = vpop.f32.mrb[93].mxu0  ;;  %v7192_v17 = vpop.permute.xlu0 %7191  ;;  %v7850_v15 = vld [vmem:[#allocation3 + $0x1f8] sm:$0xff] }
 0x403   : > { %v8370_v9 = vld [vmem:[#allocation3 + $0x25a] sm:$0xff]  ;;  %v8371_v14 = vld [vmem:[#allocation3 + $0x262] sm:$0xff]  ;;  %v6210_v19 = vpop.f32.mrb[94].mxu0  ;;  %v7897_v4 = vpack.c.bf16 %v7851_v6, %v7850_v15  ;;  %v8111_v15 = vld [vmem:[#allocation3 + $0x231] sm:$0xff] }
 0x404   : > { %v6936_v42 = vpop.permute.xlu1 %6935  ;;  %v12471_v29 = vpack.c.bf16 %v8371_v14, %v8370_v9  ;;  %v6324_v5 = vmax.f32 %v6208_v48, 0.0  ;;  %v6211_v22 = vadd.f32 %v12442_v53, %v6210_v19  ;;  %v6212_v37 = vpop.f32.mrb[95].mxu0  ;;  %v6454_v46 = vld [vmem:[#allocation3 + $0x260] sm:$0xff]  ;;  %7719 = vrot.lane.b32.xlu0 %v7639_v41, %s9967_s12  ;;  %v8475_v50 = vld [vmem:[#allocation4 + $0x98] sm:$0xff] }
 0x405   : > { %7023 = vst.msk [vmem:[#allocation4 + $0x80] sm:$0xff] %vm4303_vm6, %v6936_v42  ;;  %v6494_v8 = vpack.c.bf16 %v6454_v46, %v6453_v49 }
 0x406   : > { %7463 = vrot.lane.b32.xlu1 %v7383_v61, %s9966_s7  ;;  %8445 = vst.msk [vmem:[#allocation4 + $0x158] sm:$0xff] %vm286_vm3, %v12471_v29  ;;  %6389 = vst.msk [vmem:[#allocation3 + $0x271] sm:$0xff] %vm286_vm3, %v6324_v5  ;;  %v6325_v47 = vmax.f32 %v6211_v22, 0.0  ;;  %v7704_v3 = vpop.permute.xlu0 %7703 }
 0x407   : > { %7279 = vst.msk [vmem:[#allocation4 + $0x80] sm:$0xff] %vm4560_vm7, %v7192_v17 }
 0x408   : > { %v7448_v26 = vpop.permute.xlu1 %7447  ;;  %v8470_v10 = vld [vmem:[#allocation4 + $0x70] sm:$0xff]  ;;  %6526 = vst.msk [vmem:[#allocation4 + $0x170] sm:$0xff] %vm286_vm3, %v6494_v8  ;;  %6390 = vst.msk [vmem:[#allocation3 + $0x279] sm:$0xff] %vm286_vm3, %v6325_v47  ;;  %8232 = vrot.lane.b32.xlu0 %v8152_v58, %s9969_s14  ;;  %v7853_v8 = vld [vmem:[#allocation3 + $0x218] sm:$0xff] }
 0x409   : > { %7535 = vst.msk [vmem:[#allocation4 + $0x80] sm:$0xff] %vm4817_vm8, %v7448_v26  ;;  %8784 = vmatmul.mubr.bf16.gmra.mrb[28].mxu1 %v8470_v10  ;;  %v7852_v47 = vld [vmem:[#allocation3 + $0x210] sm:$0xff] }
 0x40a   : > { %7976 = vrot.lane.b32.xlu1 %v7896_v63, %s9968_s13  ;;  %9593 = vmatprep.mubr.msk.bf16.mxu1 %vm286_vm3, %v8473_v0  ;;  %7791 = vst.msk [vmem:[#allocation4 + $0x80] sm:$0xff] %vm5074_vm9, %v7704_v3  ;;  %v8217_v30 = vpop.permute.xlu0 %8216  ;;  %v8477_v0 = vld [vmem:[#allocation4 + $0xa8] sm:$0xff] }
 0x40c   : > { %v7961_v18 = vpop.permute.xlu1 %7960  ;;  %6953 = vrot.lane.b32.xlu0 %v7639_v41, %s9963_s10 }
 0x40d   : > { %8048 = vst.msk [vmem:[#allocation4 + $0x80] sm:$0xff] %vm5332_vm10, %v7961_v18  ;;  %v6215_v35 = vpop.f32.mrb[96].mxu0  ;;  %v6455_v60 = vld [vmem:[#allocation3 + $0x270] sm:$0xff]  ;;  %v12540_v18 = vpack.c.bf16 %v8109_v7, %v8108_v54  ;;  %v8481_v54 = vld [vmem:[#allocation4 + $0xc8] sm:$0xff] }
 0x40e   : > { %6697 = vrot.lane.b32.xlu1 %v7383_v61, %s9962_s9  ;;  %8304 = vst.msk [vmem:[#allocation4 + $0x80] sm:$0xff] %vm5589_vm11, %v8217_v30  ;;  %v6216_v39 = vadd.f32 %v12442_v53, %v6215_v35  ;;  %v6217_v62 = vpop.f32.mrb[97].mxu0  ;;  %v6938_v33 = vpop.permute.xlu0 %6937  ;;  %v8113_v7 = vld [vmem:[#allocation3 + $0x249] sm:$0xff] }
 0x40f   : > { %v8372_v31 = vld [vmem:[#allocation3 + $0x272] sm:$0xff]  ;;  %v8373_v56 = vld [vmem:[#allocation3 + $0x27a] sm:$0xff]  ;;  %v6218_v52 = vpop.f32.mrb[98].mxu0 }
 0x410   : > { %v6682_v55 = vpop.permute.xlu1 %6681  ;;  %v12493_v21 = vpack.c.bf16 %v8373_v56, %v8372_v31  ;;  %v6326_v44 = vmax.f32 %v6216_v39, 0.0  ;;  %v6219_v20 = vadd.f32 %v12442_v53, %v6218_v52  ;;  %v6220_v11 = vpop.f32.mrb[99].mxu0  ;;  %v6456_v13 = vld [vmem:[#allocation3 + $0x278] sm:$0xff]  ;;  %7465 = vrot.lane.b32.xlu0 %v8152_v58, %s9966_s7 }
 0x411   : > { %6768 = vst.msk [vmem:[#allocation4 + $0x90] sm:$0xff] %vm4046_vm5, %v6682_v55  ;;  %v6495_v34 = vpack.c.bf16 %v6456_v13, %v6455_v60 }
 0x412   : > { %7209 = vrot.lane.b32.xlu1 %v7896_v63, %s9965_s30  ;;  %8446 = vst.msk [vmem:[#allocation4 + $0x168] sm:$0xff] %vm286_vm3, %v12493_v21  ;;  %6391 = vst.msk [vmem:[#allocation3 + $0x289] sm:$0xff] %vm286_vm3, %v6326_v44  ;;  %v6327_v25 = vmax.f32 %v6219_v20, 0.0  ;;  %v7450_v57 = vpop.permute.xlu0 %7449  ;;  %v7898_v63 = vpack.c.bf16 %v7853_v8, %v7852_v47 }
 0x413   : > { %7024 = vst.msk [vmem:[#allocation4 + $0x90] sm:$0xff] %vm4303_vm6, %v6938_v33 }
 0x414   : > { %v7194_v27 = vpop.permute.xlu1 %7193  ;;  %6527 = vst.msk [vmem:[#allocation4 + $0x180] sm:$0xff] %vm286_vm3, %v6495_v34  ;;  %6392 = vst.msk [vmem:[#allocation3 + $0x291] sm:$0xff] %vm286_vm3, %v6327_v25  ;;  %7978 = vrot.lane.b32.xlu0 %v7897_v4, %s9968_s13 }
 0x415   : > { %7280 = vst.msk [vmem:[#allocation4 + $0x90] sm:$0xff] %vm4560_vm7, %v7194_v27  ;;  %v8472_v45 = vld [vmem:[#allocation4 + $0x80] sm:$0xff] }
 0x416   : > { %7721 = vrot.lane.b32.xlu1 %v12336_v36, %s9967_s12  ;;  %7536 = vst.msk [vmem:[#allocation4 + $0x90] sm:$0xff] %vm4817_vm8, %v7450_v57  ;;  %8792 = vmatmul.mubr.bf16.gmra.mrb[32].mxu1 %v8472_v45  ;;  %v7963_v48 = vpop.permute.xlu0 %7962 }
 0x417   : > { %9594 = vmatprep.mubr.msk.bf16.mxu1 %vm286_vm3, %v8475_v50  ;;  %v8479_v50 = vld [vmem:[#allocation4 + $0xb8] sm:$0xff] }
 0x418   : > { %v7706_v51 = vpop.permute.xlu1 %7705  ;;  %6699 = vrot.lane.b32.xlu0 %v8152_v58, %s9962_s9 }
 0x419   : > { %7792 = vst.msk [vmem:[#allocation4 + $0x90] sm:$0xff] %vm5074_vm9, %v7706_v51  ;;  %v6223_v24 = vpop.f32.mrb[100].mxu0  ;;  %v6457_v49 = vld [vmem:[#allocation3 + $0x288] sm:$0xff] }
 0x41a   : > { %8234 = vrot.lane.b32.xlu1 %v12508_v32, %s9969_s14  ;;  %8049 = vst.msk [vmem:[#allocation4 + $0x90] sm:$0xff] %vm5332_vm10, %v7963_v48  ;;  %v6224_v42 = vadd.f32 %v12442_v53, %v6223_v24  ;;  %v6225_v61 = vpop.f32.mrb[101].mxu0  ;;  %v6684_v37 = vpop.permute.xlu0 %6683  ;;  %v12569_v48 = vpack.c.bf16 %v8111_v15, %v8110_v16  ;;  %v7859_v15 = vld [vmem:[#allocation3 + $0x260] sm:$0xff] }
 0x41b   : > { %v8374_v59 = vld [vmem:[#allocation3 + $0x28a] sm:$0xff]  ;;  %v8375_v9 = vld [vmem:[#allocation3 + $0x292] sm:$0xff]  ;;  %v6226_v14 = vpop.f32.mrb[102].mxu0  ;;  %6769 = vst.msk [vmem:[#allocation4 + $0xa0] sm:$0xff] %vm4046_vm5, %v6684_v37 }
 0x41c   : > { %v8219_v28 = vpop.permute.xlu1 %8218  ;;  %v12519_v19 = vpack.c.bf16 %v8375_v9, %v8374_v59  ;;  %v6328_v2 = vmax.f32 %v6224_v42, 0.0  ;;  %v6227_v5 = vadd.f32 %v12442_v53, %v6226_v14  ;;  %v6228_v22 = vpop.f32.mrb[103].mxu0  ;;  %v6458_v46 = vld [vmem:[#allocation3 + $0x290] sm:$0xff]  ;;  %7211 = vrot.lane.b32.xlu0 %v7897_v4, %s9965_s30  ;;  %v8114_v16 = vld [vmem:[#allocation3 + $0x259] sm:$0xff] }
 0x41d   : > { %8305 = vst.msk [vmem:[#allocation4 + $0x90] sm:$0xff] %vm5589_vm11, %v8219_v28  ;;  %v6496_v40 = vpack.c.bf16 %v6458_v46, %v6457_v49 }
 0x41e   : > { %6955 = vrot.lane.b32.xlu1 %v12336_v36, %s9963_s10  ;;  %8447 = vst.msk [vmem:[#allocation4 + $0x178] sm:$0xff] %vm286_vm3, %v12519_v19  ;;  %6393 = vst.msk [vmem:[#allocation3 + $0x2a1] sm:$0xff] %vm286_vm3, %v6328_v2  ;;  %v6329_v17 = vmax.f32 %v6227_v5, 0.0  ;;  %v7196_v36 = vpop.permute.xlu0 %7195 }
 0x41f   : > { %6528 = vst.msk [vmem:[#allocation4 + $0x190] sm:$0xff] %vm286_vm3, %v6496_v40 }
 0x420   : > { %v6940_v41 = vpop.permute.xlu1 %6939  ;;  %6394 = vst.msk [vmem:[#allocation3 + $0x2a9] sm:$0xff] %vm286_vm3, %v6329_v17  ;;  %7723 = vrot.lane.b32.xlu0 %v12364_v12, %s9967_s12 }
 0x421   : > { %7025 = vst.msk [vmem:[#allocation4 + $0xa0] sm:$0xff] %vm4303_vm6, %v6940_v41 }
 0x422   : > { %7467 = vrot.lane.b32.xlu1 %v12508_v32, %s9966_s7  ;;  %7281 = vst.msk [vmem:[#allocation4 + $0xa0] sm:$0xff] %vm4560_vm7, %v7196_v36  ;;  %v7708_v3 = vpop.permute.xlu0 %7707  ;;  %v7857_v36 = vld [vmem:[#allocation3 + $0x248] sm:$0xff] }
 0x424   : > { %v7452_v26 = vpop.permute.xlu1 %7451  ;;  %v8474_v10 = vld [vmem:[#allocation4 + $0x90] sm:$0xff]  ;;  %8236 = vrot.lane.b32.xlu0 %v12540_v18, %s9969_s14 }
 0x425   : > { %7537 = vst.msk [vmem:[#allocation4 + $0xa0] sm:$0xff] %vm4817_vm8, %v7452_v26  ;;  %8800 = vmatmul.mubr.bf16.gmra.mrb[36].mxu1 %v8474_v10  ;;  %v6231_v58 = vpop.f32.mrb[104].mxu0  ;;  %v6459_v60 = vld [vmem:[#allocation3 + $0x2a0] sm:$0xff] }
 0x426   : > { %7980 = vrot.lane.b32.xlu1 %v7898_v63, %s9968_s13  ;;  %9595 = vmatprep.mubr.msk.bf16.mxu1 %vm286_vm3, %v8477_v0  ;;  %7793 = vst.msk [vmem:[#allocation4 + $0xa0] sm:$0xff] %vm5074_vm9, %v7708_v3  ;;  %v6232_v30 = vadd.f32 %v12442_v53, %v6231_v58  ;;  %v6233_v35 = vpop.f32.mrb[105].mxu0  ;;  %v8221_v11 = vpop.permute.xlu0 %8220  ;;  %v7856_v26 = vld [vmem:[#allocation3 + $0x240] sm:$0xff] }
 0x427   : > { %v8376_v62 = vld [vmem:[#allocation3 + $0x2a2] sm:$0xff]  ;;  %v8377_v55 = vld [vmem:[#allocation3 + $0x2aa] sm:$0xff]  ;;  %v6234_v31 = vpop.f32.mrb[106].mxu0 }
 0x428   : > { %v7965_v39 = vpop.permute.xlu1 %7964  ;;  %v12547_v56 = vpack.c.bf16 %v8377_v55, %v8376_v62  ;;  %v6330_v52 = vmax.f32 %v6232_v30, 0.0  ;;  %v6235_v44 = vadd.f32 %v12442_v53, %v6234_v31  ;;  %v6236_v20 = vpop.f32.mrb[107].mxu0  ;;  %v6460_v13 = vld [vmem:[#allocation3 + $0x2a8] sm:$0xff]  ;;  %6957 = vrot.lane.b32.xlu0 %v12364_v12, %s9963_s10 }
 0x429   : > { %8050 = vst.msk [vmem:[#allocation4 + $0xa0] sm:$0xff] %vm5332_vm10, %v7965_v39  ;;  %v6497_v25 = vpack.c.bf16 %v6460_v13, %v6459_v60  ;;  %v7854_v12 = vld [vmem:[#allocation3 + $0x228] sm:$0xff] }
 0x42a   : > { %6701 = vrot.lane.b32.xlu1 %v12508_v32, %s9962_s9  ;;  %8448 = vst.msk [vmem:[#allocation4 + $0x188] sm:$0xff] %vm286_vm3, %v12547_v56  ;;  %6395 = vst.msk [vmem:[#allocation3 + $0x2b9] sm:$0xff] %vm286_vm3, %v6330_v52  ;;  %v6331_v33 = vmax.f32 %v6235_v44, 0.0  ;;  %v6942_v27 = vpop.permute.xlu0 %6941  ;;  %v7899_v4 = vpack.c.bf16 %v7855_v1, %v7854_v12  ;;  %v8112_v0 = vld [vmem:[#allocation3 + $0x241] sm:$0xff] }
 0x42b   : > { %8306 = vst.msk [vmem:[#allocation4 + $0xa0] sm:$0xff] %vm5589_vm11, %v8221_v11  ;;  %v12607_v55 = vpack.c.bf16 %v8113_v7, %v8112_v0  ;;  %v8115_v12 = vld [vmem:[#allocation3 + $0x261] sm:$0xff]  ;;  %v8117_v0 = vld [vmem:[#allocation3 + $0x279] sm:$0xff] }
 0x42c   : > { %v6686_v34 = vpop.permute.xlu1 %6685  ;;  %6396 = vst.msk [vmem:[#allocation3 + $0x2c1] sm:$0xff] %vm286_vm3, %v6331_v33  ;;  %6529 = vst.msk [vmem:[#allocation4 + $0x1a0] sm:$0xff] %vm286_vm3, %v6497_v25  ;;  %7469 = vrot.lane.b32.xlu0 %v12540_v18, %s9966_s7 }
 0x42d   : > { %6770 = vst.msk [vmem:[#allocation4 + $0xb0] sm:$0xff] %vm4046_vm5, %v6686_v34 }
 0x42e   : > { %7213 = vrot.lane.b32.xlu1 %v7898_v63, %s9965_s30  ;;  %7026 = vst.msk [vmem:[#allocation4 + $0xb0] sm:$0xff] %vm4303_vm6, %v6942_v27  ;;  %v7454_v57 = vpop.permute.xlu0 %7453  ;;  %v7900_v63 = vpack.c.bf16 %v7857_v36, %v7856_v26  ;;  %v7861_v26 = vld [vmem:[#allocation3 + $0x278] sm:$0xff] }
 0x430   : > { %v7198_v6 = vpop.permute.xlu1 %7197  ;;  %7982 = vrot.lane.b32.xlu0 %v7899_v4, %s9968_s13 }
 0x431   : > { %7282 = vst.msk [vmem:[#allocation4 + $0xb0] sm:$0xff] %vm4560_vm7, %v7198_v6  ;;  %v7866_v24 = vld [vmem:[#allocation3 + $0x2b8] sm:$0xff] }
 0x432   : > { %7725 = vrot.lane.b32.xlu1 %v12392_v43, %s9967_s12  ;;  %v8476_v45 = vld [vmem:[#allocation4 + $0xa0] sm:$0xff]  ;;  %7538 = vst.msk [vmem:[#allocation4 + $0xb0] sm:$0xff] %vm4817_vm8, %v7454_v57  ;;  %v7967_v37 = vpop.permute.xlu0 %7966 }
 0x433   : > { %8808 = vmatmul.mubr.bf16.gmra.mrb[40].mxu1 %v8476_v45  ;;  %v8378_v42 = vld [vmem:[#allocation3 + $0x2ba] sm:$0xff]  ;;  %v8379_v61 = vld [vmem:[#allocation3 + $0x2c2] sm:$0xff] }
 0x434   : > { %v6239_v51 = vpop.f32.mrb[108].mxu0  ;;  %v7710_v32 = vpop.permute.xlu1 %7709  ;;  %9596 = vmatprep.mubr.msk.bf16.mxu1 %vm286_vm3, %v8479_v50  ;;  %v7867_v9 = vld [vmem:[#allocation3 + $0x2c0] sm:$0xff]  ;;  %v12575_v14 = vpack.c.bf16 %v8379_v61, %v8378_v42  ;;  %6703 = vrot.lane.b32.xlu0 %v12540_v18, %s9962_s9  ;;  %v8483_v50 = vld [vmem:[#allocation4 + $0xd8] sm:$0xff] }
 0x435   : > { %v6240_v28 = vadd.f32 %v12442_v53, %v6239_v51  ;;  %7794 = vst.msk [vmem:[#allocation4 + $0xb0] sm:$0xff] %vm5074_vm9, %v7710_v32  ;;  %v6241_v59 = vpop.f32.mrb[109].mxu0  ;;  %v12579_v5 = vpack.c.bf16 %v7867_v9, %v7866_v24 }
 0x436   : > { %v6242_v2 = vpop.f32.mrb[110].mxu0  ;;  %8238 = vrot.lane.b32.xlu1 %v12569_v48, %s9969_s14  ;;  %8449 = vst.msk [vmem:[#allocation4 + $0x198] sm:$0xff] %vm286_vm3, %v12575_v14  ;;  %v6688_v40 = vpop.permute.xlu0 %6687 }
 0x437   : > { %v6332_v22 = vmax.f32 %v6240_v28, 0.0  ;;  %v6243_v49 = vadd.f32 %v12442_v53, %v6242_v2  ;;  %v6244_v46 = vpop.f32.mrb[111].mxu0  ;;  %8051 = vst.msk [vmem:[#allocation4 + $0xb0] sm:$0xff] %vm5332_vm10, %v7967_v37 }
 0x438   : > { %v8223_v17 = vpop.permute.xlu1 %8222  ;;  %6530 = vst.msk [vmem:[#allocation4 + $0x1b0] sm:$0xff] %vm286_vm3, %v12579_v5  ;;  %7215 = vrot.lane.b32.xlu0 %v7899_v4, %s9965_s30 }
 0x439   : > { %6397 = vst.msk [vmem:[#allocation3 + $0x2d1] sm:$0xff] %vm286_vm3, %v6332_v22  ;;  %v6333_v41 = vmax.f32 %v6243_v49, 0.0 }
 0x43a   : > { %8307 = vst.msk [vmem:[#allocation4 + $0xb0] sm:$0xff] %vm5589_vm11, %v8223_v17  ;;  %6959 = vrot.lane.b32.xlu1 %v12392_v43, %s9963_s10  ;;  %v7200_v47 = vpop.permute.xlu0 %7199 }
 0x43b   : > { %6398 = vst.msk [vmem:[#allocation3 + $0x2d9] sm:$0xff] %vm286_vm3, %v6333_v41 }
 0x43c   : > { %6771 = vst.msk [vmem:[#allocation4 + $0xc0] sm:$0xff] %vm4046_vm5, %v6688_v40  ;;  %v6944_v8 = vpop.permute.xlu1 %6943  ;;  %7727 = vrot.lane.b32.xlu0 %v12418_v23, %s9967_s12 }
 0x43d   : > { %7027 = vst.msk [vmem:[#allocation4 + $0xc0] sm:$0xff] %vm4303_vm6, %v6944_v8 }
 0x43e   : > { %7471 = vrot.lane.b32.xlu1 %v12569_v48, %s9966_s7  ;;  %7283 = vst.msk [vmem:[#allocation4 + $0xc0] sm:$0xff] %vm4560_vm7, %v7200_v47  ;;  %v7712_v39 = vpop.permute.xlu0 %7711 }
 0x440   : > { %v7456_v10 = vpop.permute.xlu1 %7455  ;;  %v7868_v3 = vld [vmem:[#allocation3 + $0x2d0] sm:$0xff]  ;;  %8240 = vrot.lane.b32.xlu0 %v12607_v55, %s9969_s14 }
 0x441   : > { %v8478_v43 = vld [vmem:[#allocation4 + $0xb0] sm:$0xff]  ;;  %7539 = vst.msk [vmem:[#allocation4 + $0xc0] sm:$0xff] %vm4817_vm8, %v7456_v10  ;;  %v6247_v62 = vpop.f32.mrb[112].mxu0 }
 0x442   : > { %8816 = vmatmul.mubr.bf16.gmra.mrb[44].mxu1 %v8478_v43  ;;  %v8380_v58 = vld [vmem:[#allocation3 + $0x2d2] sm:$0xff]  ;;  %v8381_v18 = vld [vmem:[#allocation3 + $0x2da] sm:$0xff]  ;;  %7984 = vrot.lane.b32.xlu1 %v7900_v63, %s9968_s13  ;;  %7795 = vst.msk [vmem:[#allocation4 + $0xc0] sm:$0xff] %vm5074_vm9, %v7712_v39  ;;  %v6248_v52 = vadd.f32 %v12442_v53, %v6247_v62  ;;  %v6249_v44 = vpop.f32.mrb[113].mxu0  ;;  %v8225_v34 = vpop.permute.xlu0 %8224 }
 0x443   : > { %9597 = vmatprep.mubr.msk.bf16.mxu1 %vm286_vm3, %v8481_v54  ;;  %v7869_v30 = vld [vmem:[#allocation3 + $0x2d8] sm:$0xff]  ;;  %v12605_v35 = vpack.c.bf16 %v8381_v18, %v8380_v58  ;;  %v6250_v11 = vpop.f32.mrb[114].mxu0  ;;  %v7860_v43 = vld [vmem:[#allocation3 + $0x270] sm:$0xff] }
 0x444   : > { %v12609_v31 = vpack.c.bf16 %v7869_v30, %v7868_v3  ;;  %v7969_v20 = vpop.permute.xlu1 %7968  ;;  %v6334_v60 = vmax.f32 %v6248_v52, 0.0  ;;  %v6251_v13 = vadd.f32 %v12442_v53, %v6250_v11  ;;  %v6252_v33 = vpop.f32.mrb[115].mxu0  ;;  %6961 = vrot.lane.b32.xlu0 %v12418_v23, %s9963_s10  ;;  %v7858_v23 = vld [vmem:[#allocation3 + $0x258] sm:$0xff]  ;;  %v7902_v7 = vpack.c.bf16 %v7861_v26, %v7860_v43  ;;  %v8485_v3 = vld [vmem:[#allocation4 + $0xe8] sm:$0xff] }
 0x445   : > { %8450 = vst.msk [vmem:[#allocation4 + $0x1a8] sm:$0xff] %vm286_vm3, %v12605_v35  ;;  %v7901_v4 = vpack.c.bf16 %v7859_v15, %v7858_v23  ;;  %v8116_v54 = vld [vmem:[#allocation3 + $0x271] sm:$0xff] }
 0x446   : > { %8052 = vst.msk [vmem:[#allocation4 + $0xc0] sm:$0xff] %vm5332_vm10, %v7969_v20  ;;  %6705 = vrot.lane.b32.xlu1 %v12569_v48, %s9962_s9  ;;  %v6335_v25 = vmax.f32 %v6251_v13, 0.0  ;;  %v6946_v6 = vpop.permute.xlu0 %6945  ;;  %v12637_v48 = vpack.c.bf16 %v8115_v12, %v8114_v16  ;;  %v12675_v44 = vpack.c.bf16 %v8117_v0, %v8116_v54 }
 0x447   : > { %6531 = vst.msk [vmem:[#allocation4 + $0x1c0] sm:$0xff] %vm286_vm3, %v12609_v31  ;;  %6399 = vst.msk [vmem:[#allocation3 + $0x2e9] sm:$0xff] %vm286_vm3, %v6334_v60 }
 0x448   : > { %8308 = vst.msk [vmem:[#allocation4 + $0xc0] sm:$0xff] %vm5589_vm11, %v8225_v34  ;;  %v6690_v27 = vpop.permute.xlu1 %6689  ;;  %7473 = vrot.lane.b32.xlu0 %v12607_v55, %s9966_s7 }
 0x449   : > { %6772 = vst.msk [vmem:[#allocation4 + $0xd0] sm:$0xff] %vm4046_vm5, %v6690_v27 }
 0x44a   : > { %6400 = vst.msk [vmem:[#allocation3 + $0x2f1] sm:$0xff] %vm286_vm3, %v6335_v25  ;;  %7217 = vrot.lane.b32.xlu1 %v7900_v63, %s9965_s30  ;;  %v7458_v57 = vpop.permute.xlu0 %7457 }
 0x44b   : > { %7028 = vst.msk [vmem:[#allocation4 + $0xd0] sm:$0xff] %vm4303_vm6, %v6946_v6 }
 0x44c   : > { %v7202_v1 = vpop.permute.xlu1 %7201  ;;  %7986 = vrot.lane.b32.xlu0 %v7901_v4, %s9968_s13 }
 0x44d   : > { %7284 = vst.msk [vmem:[#allocation4 + $0xd0] sm:$0xff] %vm4560_vm7, %v7202_v1 }
 0x44e   : > { %7729 = vrot.lane.b32.xlu1 %v12447_v38, %s9967_s12  ;;  %7540 = vst.msk [vmem:[#allocation4 + $0xd0] sm:$0xff] %vm4817_vm8, %v7458_v57  ;;  %v7870_v24 = vld [vmem:[#allocation3 + $0x2e8] sm:$0xff]  ;;  %v7971_v46 = vpop.permute.xlu0 %7970  ;;  %v7863_v57 = vld [vmem:[#allocation3 + $0x290] sm:$0xff] }
 0x44f   : > { %v8480_v45 = vld [vmem:[#allocation4 + $0xc0] sm:$0xff] }
 0x450   : > { %8824 = vmatmul.mubr.bf16.gmra.mrb[48].mxu1 %v8480_v45  ;;  %v6255_v51 = vpop.f32.mrb[116].mxu0  ;;  %v7714_v32 = vpop.permute.xlu1 %7713  ;;  %6707 = vrot.lane.b32.xlu0 %v12607_v55, %s9962_s9  ;;  %v8487_v45 = vld [vmem:[#allocation4 + $0xf8] sm:$0xff] }
 0x451   : > { %v8382_v42 = vld [vmem:[#allocation3 + $0x2ea] sm:$0xff]  ;;  %v8383_v61 = vld [vmem:[#allocation3 + $0x2f2] sm:$0xff]  ;;  %9598 = vmatprep.mubr.msk.bf16.mxu1 %vm286_vm3, %v8483_v50  ;;  %v6256_v28 = vadd.f32 %v12442_v53, %v6255_v51  ;;  %7796 = vst.msk [vmem:[#allocation4 + $0xd0] sm:$0xff] %vm5074_vm9, %v7714_v32  ;;  %v6257_v59 = vpop.f32.mrb[117].mxu0 }
 0x452   : > { %v7871_v9 = vld [vmem:[#allocation3 + $0x2f0] sm:$0xff]  ;;  %v12643_v2 = vpack.c.bf16 %v8383_v61, %v8382_v42  ;;  %v6258_v22 = vpop.f32.mrb[118].mxu0  ;;  %8242 = vrot.lane.b32.xlu1 %v12637_v48, %s9969_s14  ;;  %8053 = vst.msk [vmem:[#allocation4 + $0xd0] sm:$0xff] %vm5332_vm10, %v7971_v46  ;;  %v6692_v36 = vpop.permute.xlu0 %6691 }
 0x453   : > { %v12647_v37 = vpack.c.bf16 %v7871_v9, %v7870_v24  ;;  %v6336_v49 = vmax.f32 %v6256_v28, 0.0  ;;  %v6259_v17 = vadd.f32 %v12442_v53, %v6258_v22  ;;  %v6260_v41 = vpop.f32.mrb[119].mxu0  ;;  %6773 = vst.msk [vmem:[#allocation4 + $0xe0] sm:$0xff] %vm4046_vm5, %v6692_v36  ;;  %v8118_v32 = vld [vmem:[#allocation3 + $0x289] sm:$0xff] }
 0x454   : > { %8451 = vst.msk [vmem:[#allocation4 + $0x1b8] sm:$0xff] %vm286_vm3, %v12643_v2  ;;  %v8227_v40 = vpop.permute.xlu1 %8226  ;;  %7219 = vrot.lane.b32.xlu0 %v7901_v4, %s9965_s30  ;;  %v8119_v4 = vld [vmem:[#allocation3 + $0x291] sm:$0xff] }
 0x455   : > { %6532 = vst.msk [vmem:[#allocation4 + $0x1d0] sm:$0xff] %vm286_vm3, %v12647_v37  ;;  %6401 = vst.msk [vmem:[#allocation3 + $0x301] sm:$0xff] %vm286_vm3, %v6336_v49  ;;  %v6337_v8 = vmax.f32 %v6259_v17, 0.0  ;;  %v12705_v42 = vpack.c.bf16 %v8119_v4, %v8118_v32 }
 0x456   : > { %8309 = vst.msk [vmem:[#allocation4 + $0xd0] sm:$0xff] %vm5589_vm11, %v8227_v40  ;;  %6963 = vrot.lane.b32.xlu1 %v12447_v38, %s9963_s10  ;;  %v7204_v10 = vpop.permute.xlu0 %7203 }
 0x457   : > { %6402 = vst.msk [vmem:[#allocation3 + $0x309] sm:$0xff] %vm286_vm3, %v6337_v8 }
 0x458   : > { %v6948_v47 = vpop.permute.xlu1 %6947  ;;  %7731 = vrot.lane.b32.xlu0 %v12471_v29, %s9967_s12 }
 0x459   : > { %7029 = vst.msk [vmem:[#allocation4 + $0xe0] sm:$0xff] %vm4303_vm6, %v6948_v47 }
 0x45a   : > { %7475 = vrot.lane.b32.xlu1 %v12637_v48, %s9966_s7  ;;  %7285 = vst.msk [vmem:[#allocation4 + $0xe0] sm:$0xff] %vm4560_vm7, %v7204_v10  ;;  %v7716_v55 = vpop.permute.xlu0 %7715 }
 0x45c   : > { %v7460_v63 = vpop.permute.xlu1 %7459  ;;  %v7872_v58 = vld [vmem:[#allocation3 + $0x300] sm:$0xff]  ;;  %8244 = vrot.lane.b32.xlu0 %v12675_v44, %s9969_s14 }
 0x45d   : > { %v8482_v38 = vld [vmem:[#allocation4 + $0xd0] sm:$0xff]  ;;  %7541 = vst.msk [vmem:[#allocation4 + $0xe0] sm:$0xff] %vm4817_vm8, %v7460_v63  ;;  %v7865_v63 = vld [vmem:[#allocation3 + $0x2a8] sm:$0xff] }
 0x45e   : > { %8832 = vmatmul.mubr.bf16.gmra.mrb[52].mxu1 %v8482_v38  ;;  %v8384_v18 = vld [vmem:[#allocation3 + $0x302] sm:$0xff]  ;;  %v8385_v30 = vld [vmem:[#allocation3 + $0x30a] sm:$0xff]  ;;  %7988 = vrot.lane.b32.xlu1 %v7902_v7, %s9968_s13  ;;  %v6263_v52 = vpop.f32.mrb[120].mxu0  ;;  %7797 = vst.msk [vmem:[#allocation4 + $0xe0] sm:$0xff] %vm5074_vm9, %v7716_v55  ;;  %v8229_v6 = vpop.permute.xlu0 %8228 }
 0x45f   : > { %9599 = vmatprep.mubr.msk.bf16.mxu1 %vm286_vm3, %v8485_v3  ;;  %v7873_v39 = vld [vmem:[#allocation3 + $0x308] sm:$0xff]  ;;  %v12673_v62 = vpack.c.bf16 %v8385_v30, %v8384_v18  ;;  %v6264_v11 = vadd.f32 %v12442_v53, %v6263_v52  ;;  %v6265_v60 = vpop.f32.mrb[121].mxu0 }
 0x460   : > { %v12677_v20 = vpack.c.bf16 %v7873_v39, %v7872_v58  ;;  %v7973_v13 = vpop.permute.xlu1 %7972  ;;  %v6266_v33 = vpop.f32.mrb[122].mxu0  ;;  %6965 = vrot.lane.b32.xlu0 %v12471_v29, %s9963_s10  ;;  %v7862_v29 = vld [vmem:[#allocation3 + $0x288] sm:$0xff]  ;;  %v12742_v58 = vld [vmem:[%s13153_s5] ss:$0 sm:$0xff] }
 0x461   : > { %8452 = vst.msk [vmem:[#allocation4 + $0x1c8] sm:$0xff] %vm286_vm3, %v12673_v62  ;;  %v6338_v34 = vmax.f32 %v6264_v11, 0.0  ;;  %v6267_v25 = vadd.f32 %v12442_v53, %v6266_v33  ;;  %v6268_v27 = vpop.f32.mrb[123].mxu0  ;;  %v7903_v50 = vpack.c.bf16 %v7863_v57, %v7862_v29  ;;  %v8121_v3 = vld [vmem:[#allocation3 + $0x2a9] sm:$0xff]  ;;  %v8120_v55 = vld [vmem:[#allocation3 + $0x2a1] sm:$0xff] }
 0x462   : > { %8054 = vst.msk [vmem:[#allocation4 + $0xe0] sm:$0xff] %vm5332_vm10, %v7973_v13  ;;  %6709 = vrot.lane.b32.xlu1 %v12637_v48, %s9962_s9  ;;  %v6950_v12 = vpop.permute.xlu0 %6949  ;;  %v8489_v18 = vld [vmem:[#allocation4 + $0x108] sm:$0xff]  ;;  %v8160_v11 = vpack.c.bf16 %v8121_v3, %v8120_v55  ;;  %v8125_v3 = vld [vmem:[#allocation3 + $0x2d9] sm:$0xff] }
 0x463   : > { %6533 = vst.msk [vmem:[#allocation4 + $0x1e0] sm:$0xff] %vm286_vm3, %v12677_v20  ;;  %6403 = vst.msk [vmem:[#allocation3 + $0x319] sm:$0xff] %vm286_vm3, %v6338_v34  ;;  %v6339_v1 = vmax.f32 %v6267_v25, 0.0  ;;  %v6841_v34 = vld [vmem:[#allocation3 + $0x28a] sm:$0xff]  ;;  %v6842_v25 = vld [vmem:[#allocation3 + $0x292] sm:$0xff] }
 0x464   : > { %8310 = vst.msk [vmem:[#allocation4 + $0xe0] sm:$0xff] %vm5589_vm11, %v8229_v6  ;;  %v6694_v15 = vpop.permute.xlu1 %6693  ;;  %7477 = vrot.lane.b32.xlu0 %v12675_v44, %s9966_s7 }
 0x465   : > { %6774 = vst.msk [vmem:[#allocation4 + $0xf0] sm:$0xff] %vm4046_vm5, %v6694_v15 }
 0x466   : > { %6404 = vst.msk [vmem:[#allocation3 + $0x321] sm:$0xff] %vm286_vm3, %v6339_v1  ;;  %7221 = vrot.lane.b32.xlu1 %v7902_v7, %s9965_s30  ;;  %v7462_v16 = vpop.permute.xlu0 %7461  ;;  %v7864_v7 = vld [vmem:[#allocation3 + $0x2a0] sm:$0xff] }
 0x467   : > { %7030 = vst.msk [vmem:[#allocation4 + $0xf0] sm:$0xff] %vm4303_vm6, %v6950_v12  ;;  %v7904_v54 = vpack.c.bf16 %v7865_v63, %v7864_v7 }
 0x468   : > { %v7206_v23 = vpop.permute.xlu1 %7205  ;;  %7990 = vrot.lane.b32.xlu0 %v7903_v50, %s9968_s13 }
 0x469   : > { %7286 = vst.msk [vmem:[#allocation4 + $0xf0] sm:$0xff] %vm4560_vm7, %v7206_v23  ;;  %v6880_v23 = vpack.c.bf16 %v6842_v25, %v6841_v34 }
 0x46a   : > { %7733 = vrot.lane.b32.xlu1 %v12493_v21, %s9967_s12  ;;  %7542 = vst.msk [vmem:[#allocation4 + $0xf0] sm:$0xff] %vm4817_vm8, %v7462_v16  ;;  %v7874_v61 = vld [vmem:[#allocation3 + $0x318] sm:$0xff]  ;;  %v7975_v8 = vpop.permute.xlu0 %7974 }
 0x46b   : > { %v8484_v51 = vld [vmem:[#allocation4 + $0xe0] sm:$0xff] }
 0x46c   : > { %8840 = vmatmul.mubr.bf16.gmra.mrb[56].mxu1 %v8484_v51  ;;  %v6271_v48 = vpop.f32.mrb[124].mxu0  ;;  %v7718_v24 = vpop.permute.xlu1 %7717  ;;  %6711 = vrot.lane.b32.xlu0 %v12675_v44, %s9962_s9  ;;  %v8123_v51 = vld [vmem:[#allocation3 + $0x2c1] sm:$0xff] }
 0x46d   : > { %v8386_v28 = vld [vmem:[#allocation3 + $0x31a] sm:$0xff]  ;;  %v8387_v59 = vld [vmem:[#allocation3 + $0x322] sm:$0xff]  ;;  %v6272_v9 = vadd.f32 %v12442_v53, %v6271_v48  ;;  %7798 = vst.msk [vmem:[#allocation4 + $0xf0] sm:$0xff] %vm5074_vm9, %v7718_v24  ;;  %v6273_v22 = vpop.f32.mrb[125].mxu0  ;;  %9600 = vmatprep.mubr.msk.bf16.mxu1 %vm286_vm3, %v8487_v45 }
 0x46e   : > { %v7875_v49 = vld [vmem:[#allocation3 + $0x320] sm:$0xff]  ;;  %v12711_v46 = vpack.c.bf16 %v8387_v59, %v8386_v28  ;;  %v6274_v17 = vpop.f32.mrb[126].mxu0  ;;  %8246 = vrot.lane.b32.xlu1 %v12705_v42, %s9969_s14  ;;  %8055 = vst.msk [vmem:[#allocation4 + $0xf0] sm:$0xff] %vm5332_vm10, %v7975_v8 }
 0x46f   : > { %v12715_v41 = vpack.c.bf16 %v7875_v49, %v7874_v61  ;;  %v6340_v40 = vmax.f32 %v6272_v9, 0.0  ;;  %v6275_v36 = vadd.f32 %v12442_v53, %v6274_v17  ;;  %v6276_v47 = vpop.f32.mrb[127].mxu0  ;;  %v6696_v53 = vpop.permute.xlu0 %6695  ;;  %v8122_v24 = vld [vmem:[#allocation3 + $0x2b9] sm:$0xff]  ;;  %v6843_v22 = vld [vmem:[#allocation3 + $0x2a2] sm:$0xff]  ;;  %v6844_v49 = vld [vmem:[#allocation3 + $0x2aa] sm:$0xff] }
 0x470   : > { %8453 = vst.msk [vmem:[#allocation4 + $0x1d8] sm:$0xff] %vm286_vm3, %v12711_v46  ;;  %v8231_v26 = vpop.permute.xlu1 %8230  ;;  %7223 = vrot.lane.b32.xlu0 %v7903_v50, %s9965_s30  ;;  %v8161_v59 = vpack.c.bf16 %v8123_v51, %v8122_v24 }
 0x471   : > { %6534 = vst.msk [vmem:[#allocation4 + $0x1f0] sm:$0xff] %vm286_vm3, %v12715_v41  ;;  %6405 = vst.msk [vmem:[#allocation3 + $0x331] sm:$0xff] %vm286_vm3, %v6340_v40  ;;  %v6341_v10 = vmax.f32 %v6275_v36, 0.0 }
 0x472   : > { %8311 = vst.msk [vmem:[#allocation4 + $0xf0] sm:$0xff] %vm5589_vm11, %v8231_v26  ;;  %6967 = vrot.lane.b32.xlu1 %v12493_v21, %s9963_s10 }
 0x473   : > { %6406 = vst.msk [vmem:[#allocation3 + $0x339] sm:$0xff] %vm286_vm3, %v6341_v10  ;;  %v7208_v38 = vpop.permute.xlu0 %7207  ;;  %v6881_v10 = vpack.c.bf16 %v6844_v49, %v6843_v22 }
 0x474   : > { %6775 = vst.msk [vmem:[#allocation4 + $0x100] sm:$0xff] %vm4046_vm5, %v6696_v53  ;;  %v6952_v43 = vpop.permute.xlu1 %6951  ;;  %7735 = vrot.lane.b32.xlu0 %v12519_v19, %s9967_s12 }
 0x475   : > { %7031 = vst.msk [vmem:[#allocation4 + $0x100] sm:$0xff] %vm4303_vm6, %v6952_v43 }
 0x476   : > { %7479 = vrot.lane.b32.xlu1 %v12705_v42, %s9966_s7  ;;  %7287 = vst.msk [vmem:[#allocation4 + $0x100] sm:$0xff] %vm4560_vm7, %v7208_v38 }
 0x477   : > { %v7720_v44 = vpop.permute.xlu0 %7719 }
 0x478   : > { %v7464_v0 = vpop.permute.xlu1 %7463  ;;  %8248 = vrot.lane.b32.xlu0 %v8160_v11, %s9969_s14 }
 0x479   : > { %v8486_v21 = vld [vmem:[#allocation4 + $0xf0] sm:$0xff]  ;;  %7543 = vst.msk [vmem:[#allocation4 + $0x100] sm:$0xff] %vm4817_vm8, %v7464_v0  ;;  %v8729_v19 = vpop.f32.mrb[0].mxu1 }
 0x47a   : > { %8848 = vmatmul.mubr.bf16.gmra.mrb[60].mxu1 %v8486_v21  ;;  %v8388_v30 = vld [vmem:[#allocation3 + $0x332] sm:$0xff]  ;;  %v8389_v39 = vld [vmem:[#allocation3 + $0x33a] sm:$0xff]  ;;  %7992 = vrot.lane.b32.xlu1 %v7904_v54, %s9968_s13  ;;  %7799 = vst.msk [vmem:[#allocation4 + $0x100] sm:$0xff] %vm5074_vm9, %v7720_v44  ;;  %v8730_v60 = vadd.f32 %v12742_v58, %v8729_v19  ;;  %v8731_v13 = vpop.f32.mrb[1].mxu1 }
 0x47b   : > { %9601 = vmatprep.mubr.msk.bf16.mxu1 %vm286_vm3, %v8489_v18  ;;  %v12746_v52 = vpack.c.bf16 %v8389_v39, %v8388_v30  ;;  %v8732_v27 = vpop.f32.mrb[2].mxu1  ;;  %v8233_v12 = vpop.permute.xlu0 %8232  ;;  %v8493_v18 = vld [vmem:[#allocation4 + $0x128] sm:$0xff] }
 0x47c   : > { %v7977_v33 = vpop.permute.xlu1 %7976  ;;  %v8984_v6 = vmax.f32 %v8730_v60, 0.0  ;;  %v8733_v1 = vadd.f32 %v12742_v58, %v8732_v27  ;;  %v8734_v15 = vpop.f32.mrb[3].mxu1  ;;  %6969 = vrot.lane.b32.xlu0 %v6880_v23, %s9963_s10  ;;  %v6846_v60 = vld [vmem:[#allocation3 + $0x2c2] sm:$0xff] }
 0x47d   : > { %8454 = vst.msk [vmem:[#allocation4 + $0x1e8] sm:$0xff] %vm286_vm3, %v12746_v52 }
 0x47e   : > { %8056 = vst.msk [vmem:[#allocation4 + $0x100] sm:$0xff] %vm5332_vm10, %v7977_v33  ;;  %6713 = vrot.lane.b32.xlu1 %v12705_v42, %s9962_s9  ;;  %v9686_v57 = vpack.c.bf16 %v8984_v6, %v8984_v6  ;;  %v8985_v4 = vmax.f32 %v8733_v1, 0.0  ;;  %v8491_v42 = vld [vmem:[#allocation4 + $0x118] sm:$0xff] }
 0x47f   : > { %8312 = vst.msk [vmem:[#allocation4 + $0x100] sm:$0xff] %vm5589_vm11, %v8233_v12  ;;  %v6954_v16 = vpop.permute.xlu0 %6953 }
 0x480   : > { %v6698_v29 = vpop.permute.xlu1 %6697  ;;  %9305 = vst.msk [vmem:[%s12762_s15] sm:$0xf] %vm9304_vm12, %v9686_v57  ;;  %v9687_v45 = vpack.c.bf16 %v8985_v4, %v8985_v4  ;;  %7481 = vrot.lane.b32.xlu0 %v8160_v11, %s9966_s7 }
 0x481   : > { %6776 = vst.msk [vmem:[#allocation4 + $0x110] sm:$0xff] %vm4046_vm5, %v6698_v29  ;;  %v8127_v29 = vld [vmem:[#allocation3 + $0x2f1] sm:$0xff] }
 0x482   : > { %7225 = vrot.lane.b32.xlu1 %v7904_v54, %s9965_s30  ;;  %9306 = vst.msk [vmem:[%s12762_s15 + $0x4] sm:$0xf] %vm9304_vm12, %v9687_v45 }
 0x483   : > { %7032 = vst.msk [vmem:[#allocation4 + $0x110] sm:$0xff] %vm4303_vm6, %v6954_v16  ;;  %v7466_v32 = vpop.permute.xlu0 %7465 }
 0x484   : > { %v7210_v50 = vpop.permute.xlu1 %7209  ;;  %7994 = vrot.lane.b32.xlu0 %v12579_v5, %s9968_s13 }
 0x485   : > { %7288 = vst.msk [vmem:[#allocation4 + $0x110] sm:$0xff] %vm4560_vm7, %v7210_v50  ;;  %v8126_v50 = vld [vmem:[#allocation3 + $0x2e9] sm:$0xff] }
 0x486   : > { %7737 = vrot.lane.b32.xlu1 %v12547_v56, %s9967_s12  ;;  %v8488_v48 = vld [vmem:[#allocation4 + $0x100] sm:$0xff]  ;;  %7544 = vst.msk [vmem:[#allocation4 + $0x110] sm:$0xff] %vm4817_vm8, %v7466_v32 }
 0x487   : > { %8856 = vmatmul.mubr.bf16.gmra.mrb[64].mxu1 %v8488_v48  ;;  %v7979_v8 = vpop.permute.xlu0 %7978  ;;  %v8163_v48 = vpack.c.bf16 %v8127_v29, %v8126_v50  ;;  %v6851_v29 = vld [vmem:[#allocation3 + $0x302] sm:$0xff] }
 0x488   : > { %v8737_v61 = vpop.f32.mrb[4].mxu1  ;;  %v7722_v28 = vpop.permute.xlu1 %7721  ;;  %9602 = vmatprep.mubr.msk.bf16.mxu1 %vm286_vm3, %v8491_v42  ;;  %6715 = vrot.lane.b32.xlu0 %v8160_v11, %s9962_s9  ;;  %v6847_v42 = vld [vmem:[#allocation3 + $0x2d2] sm:$0xff] }
 0x489   : > { %v8738_v9 = vadd.f32 %v12742_v58, %v8737_v61  ;;  %7800 = vst.msk [vmem:[#allocation4 + $0x110] sm:$0xff] %vm5074_vm9, %v7722_v28  ;;  %v8739_v56 = vpop.f32.mrb[5].mxu1  ;;  %v6848_v61 = vld [vmem:[#allocation3 + $0x2da] sm:$0xff] }
 0x48a   : > { %v8740_v17 = vpop.f32.mrb[6].mxu1  ;;  %8250 = vrot.lane.b32.xlu1 %v8161_v59, %s9969_s14  ;;  %8057 = vst.msk [vmem:[#allocation4 + $0x110] sm:$0xff] %vm5332_vm10, %v7979_v8 }
 0x48b   : > { %v8986_v40 = vmax.f32 %v8738_v9, 0.0  ;;  %v8741_v36 = vadd.f32 %v12742_v58, %v8740_v17  ;;  %v8742_v47 = vpop.f32.mrb[7].mxu1  ;;  %v6700_v38 = vpop.permute.xlu0 %6699  ;;  %v6883_v17 = vpack.c.bf16 %v6848_v61, %v6847_v42 }
 0x48c   : > { %v8235_v26 = vpop.permute.xlu1 %8234  ;;  %6777 = vst.msk [vmem:[#allocation4 + $0x120] sm:$0xff] %vm4046_vm5, %v6700_v38  ;;  %7227 = vrot.lane.b32.xlu0 %v12579_v5, %s9965_s30  ;;  %v8124_v5 = vld [vmem:[#allocation3 + $0x2d1] sm:$0xff]  ;;  %v8497_v38 = vld [vmem:[#allocation4 + $0x148] sm:$0xff] }
 0x48d   : > { %v9688_v53 = vpack.c.bf16 %v8986_v40, %v8986_v40  ;;  %v8987_v43 = vmax.f32 %v8741_v36, 0.0  ;;  %8313 = vst.msk [vmem:[#allocation4 + $0x110] sm:$0xff] %vm5589_vm11, %v8235_v26  ;;  %v8162_v55 = vpack.c.bf16 %v8125_v3, %v8124_v5  ;;  %v6850_v5 = vld [vmem:[#allocation3 + $0x2f2] sm:$0xff] }
 0x48e   : > { %6971 = vrot.lane.b32.xlu1 %v6881_v10, %s9963_s10 }
 0x48f   : > { %9307 = vst.msk [vmem:[%s12762_s15 + $0x8] sm:$0xf] %vm9304_vm12, %v9688_v53  ;;  %v9689_v63 = vpack.c.bf16 %v8987_v43, %v8987_v43  ;;  %v7212_v0 = vpop.permute.xlu0 %7211 }
 0x490   : > { %v6956_v7 = vpop.permute.xlu1 %6955  ;;  %7739 = vrot.lane.b32.xlu0 %v12575_v14, %s9967_s12  ;;  %v6845_v14 = vld [vmem:[#allocation3 + $0x2ba] sm:$0xff] }
 0x491   : > { %9308 = vst.msk [vmem:[%s12762_s15 + $0xc] sm:$0xf] %vm9304_vm12, %v9689_v63  ;;  %v6882_v6 = vpack.c.bf16 %v6846_v60, %v6845_v14  ;;  %v8129_v63 = vld [vmem:[#allocation3 + $0x309] sm:$0xff] }
 0x492   : > { %7033 = vst.msk [vmem:[#allocation4 + $0x120] sm:$0xff] %vm4303_vm6, %v6956_v7  ;;  %7483 = vrot.lane.b32.xlu1 %v8161_v59, %s9966_s7 }
 0x493   : > { %7289 = vst.msk [vmem:[#allocation4 + $0x120] sm:$0xff] %vm4560_vm7, %v7212_v0  ;;  %v7724_v30 = vpop.permute.xlu0 %7723 }
 0x494   : > { %v7468_v21 = vpop.permute.xlu1 %7467  ;;  %v8490_v54 = vld [vmem:[#allocation4 + $0x110] sm:$0xff]  ;;  %8252 = vrot.lane.b32.xlu0 %v8162_v55, %s9969_s14 }
 0x495   : > { %7545 = vst.msk [vmem:[#allocation4 + $0x120] sm:$0xff] %vm4817_vm8, %v7468_v21  ;;  %8864 = vmatmul.mubr.bf16.gmra.mrb[68].mxu1 %v8490_v54  ;;  %v8745_v39 = vpop.f32.mrb[8].mxu1 }
 0x496   : > { %7996 = vrot.lane.b32.xlu1 %v12609_v31, %s9968_s13  ;;  %9603 = vmatprep.mubr.msk.bf16.mxu1 %vm286_vm3, %v8493_v18  ;;  %7801 = vst.msk [vmem:[#allocation4 + $0x120] sm:$0xff] %vm5074_vm9, %v7724_v30  ;;  %v8746_v44 = vadd.f32 %v12742_v58, %v8745_v39  ;;  %v8747_v19 = vpop.f32.mrb[9].mxu1 }
 0x497   : > { %v8748_v13 = vpop.f32.mrb[10].mxu1  ;;  %v8237_v27 = vpop.permute.xlu0 %8236 }
 0x498   : > { %v7981_v11 = vpop.permute.xlu1 %7980  ;;  %v8988_v33 = vmax.f32 %v8746_v44, 0.0  ;;  %v8749_v34 = vadd.f32 %v12742_v58, %v8748_v13  ;;  %v8750_v25 = vpop.f32.mrb[11].mxu1  ;;  %6973 = vrot.lane.b32.xlu0 %v6882_v6, %s9963_s10 }
 0x499   : > { %8058 = vst.msk [vmem:[#allocation4 + $0x120] sm:$0xff] %vm5332_vm10, %v7981_v11 }
 0x49a   : > { %6717 = vrot.lane.b32.xlu1 %v8161_v59, %s9962_s9  ;;  %v9690_v1 = vpack.c.bf16 %v8988_v33, %v8988_v33  ;;  %v8989_v15 = vmax.f32 %v8749_v34, 0.0  ;;  %8314 = vst.msk [vmem:[#allocation4 + $0x120] sm:$0xff] %vm5589_vm11, %v8237_v27  ;;  %v8131_v27 = vld [vmem:[#allocation3 + $0x321] sm:$0xff] }
 0x49b   : > { %v6958_v57 = vpop.permute.xlu0 %6957 }
 0x49c   : > { %v6702_v12 = vpop.permute.xlu1 %6701  ;;  %9309 = vst.msk [vmem:[%s12762_s15 + $0x10] sm:$0xf] %vm9304_vm12, %v9690_v1  ;;  %v9691_v23 = vpack.c.bf16 %v8989_v15, %v8989_v15  ;;  %7485 = vrot.lane.b32.xlu0 %v8162_v55, %s9966_s7  ;;  %v8130_v15 = vld [vmem:[#allocation3 + $0x319] sm:$0xff] }
 0x49d   : > { %6778 = vst.msk [vmem:[#allocation4 + $0x130] sm:$0xff] %vm4046_vm5, %v6702_v12 }
 0x49e   : > { %7229 = vrot.lane.b32.xlu1 %v12609_v31, %s9965_s30  ;;  %9310 = vst.msk [vmem:[%s12762_s15 + $0x14] sm:$0xf] %vm9304_vm12, %v9691_v23  ;;  %v8495_v31 = vld [vmem:[#allocation4 + $0x138] sm:$0xff] }
 0x49f   : > { %7034 = vst.msk [vmem:[#allocation4 + $0x130] sm:$0xff] %vm4303_vm6, %v6958_v57  ;;  %v7470_v45 = vpop.permute.xlu0 %7469  ;;  %v8165_v57 = vpack.c.bf16 %v8131_v27, %v8130_v15 }
 0x4a0   : > { %v7214_v4 = vpop.permute.xlu1 %7213  ;;  %7998 = vrot.lane.b32.xlu0 %v12647_v37, %s9968_s13 }
 0x4a1   : > { %7290 = vst.msk [vmem:[#allocation4 + $0x130] sm:$0xff] %vm4560_vm7, %v7214_v4  ;;  %v8492_v16 = vld [vmem:[#allocation4 + $0x120] sm:$0xff] }
 0x4a2   : > { %7741 = vrot.lane.b32.xlu1 %v12605_v35, %s9967_s12  ;;  %7546 = vst.msk [vmem:[#allocation4 + $0x130] sm:$0xff] %vm4817_vm8, %v7470_v45  ;;  %8872 = vmatmul.mubr.bf16.gmra.mrb[72].mxu1 %v8492_v16  ;;  %v6852_v45 = vld [vmem:[#allocation3 + $0x30a] sm:$0xff] }
 0x4a3   : > { %9604 = vmatprep.mubr.msk.bf16.mxu1 %vm286_vm3, %v8495_v31  ;;  %v7983_v59 = vpop.permute.xlu0 %7982 }
 0x4a4   : > { %v7726_v51 = vpop.permute.xlu1 %7725  ;;  %v8753_v32 = vpop.f32.mrb[12].mxu1  ;;  %6719 = vrot.lane.b32.xlu0 %v8162_v55, %s9962_s9 }
 0x4a5   : > { %7802 = vst.msk [vmem:[#allocation4 + $0x130] sm:$0xff] %vm5074_vm9, %v7726_v51  ;;  %v8754_v24 = vadd.f32 %v12742_v58, %v8753_v32  ;;  %v8755_v35 = vpop.f32.mrb[13].mxu1 }
 0x4a6   : > { %8254 = vrot.lane.b32.xlu1 %v8163_v48, %s9969_s14  ;;  %v8756_v28 = vpop.f32.mrb[14].mxu1  ;;  %8059 = vst.msk [vmem:[#allocation4 + $0x130] sm:$0xff] %vm5332_vm10, %v7983_v59 }
 0x4a7   : > { %v8990_v9 = vmax.f32 %v8754_v24, 0.0  ;;  %v8757_v56 = vadd.f32 %v12742_v58, %v8756_v28  ;;  %v8758_v22 = vpop.f32.mrb[15].mxu1  ;;  %v6704_v47 = vpop.permute.xlu0 %6703  ;;  %v6885_v24 = vpack.c.bf16 %v6852_v45, %v6851_v29 }
 0x4a8   : > { %v8239_v49 = vpop.permute.xlu1 %8238  ;;  %6779 = vst.msk [vmem:[#allocation4 + $0x140] sm:$0xff] %vm4046_vm5, %v6704_v47  ;;  %7231 = vrot.lane.b32.xlu0 %v12647_v37, %s9965_s30  ;;  %v8128_v37 = vld [vmem:[#allocation3 + $0x301] sm:$0xff]  ;;  %v7876_v22 = vld [vmem:[#allocation3 + $0x330] sm:$0xff] }
 0x4a9   : > { %v9692_v40 = vpack.c.bf16 %v8990_v9, %v8990_v9  ;;  %v8991_v8 = vmax.f32 %v8757_v56, 0.0  ;;  %8315 = vst.msk [vmem:[#allocation4 + $0x130] sm:$0xff] %vm5589_vm11, %v8239_v49  ;;  %v8164_v21 = vpack.c.bf16 %v8129_v63, %v8128_v37  ;;  %v7877_v9 = vld [vmem:[#allocation3 + $0x338] sm:$0xff] }
 0x4aa   : > { %6975 = vrot.lane.b32.xlu1 %v6883_v17, %s9963_s10 }
 0x4ab   : > { %9311 = vst.msk [vmem:[%s12762_s15 + $0x18] sm:$0xf] %vm9304_vm12, %v9692_v40  ;;  %v9693_v36 = vpack.c.bf16 %v8991_v8, %v8991_v8  ;;  %v7216_v10 = vpop.permute.xlu0 %7215  ;;  %v7910_v40 = vpack.c.bf16 %v7877_v9, %v7876_v22  ;;  %v8133_v8 = vld [vmem:[#allocation3 + $0x339] sm:$0xff] }
 0x4ac   : > { %v6960_v26 = vpop.permute.xlu1 %6959  ;;  %7743 = vrot.lane.b32.xlu0 %v12643_v2, %s9967_s12  ;;  %v6849_v2 = vld [vmem:[#allocation3 + $0x2ea] sm:$0xff] }
 0x4ad   : > { %9312 = vst.msk [vmem:[%s12762_s15 + $0x1c] sm:$0xf] %vm9304_vm12, %v9693_v36  ;;  %v6884_v11 = vpack.c.bf16 %v6850_v5, %v6849_v2  ;;  %v8132_v36 = vld [vmem:[#allocation3 + $0x331] sm:$0xff] }
 0x4ae   : > { %7035 = vst.msk [vmem:[#allocation4 + $0x140] sm:$0xff] %vm4303_vm6, %v6960_v26  ;;  %7487 = vrot.lane.b32.xlu1 %v8163_v48, %s9966_s7 }
 0x4af   : > { %7291 = vst.msk [vmem:[#allocation4 + $0x140] sm:$0xff] %vm4560_vm7, %v7216_v10  ;;  %v7728_v7 = vpop.permute.xlu0 %7727  ;;  %v8166_v10 = vpack.c.bf16 %v8133_v8, %v8132_v36 }
 0x4b0   : > { %v7472_v53 = vpop.permute.xlu1 %7471  ;;  %v8494_v43 = vld [vmem:[#allocation4 + $0x130] sm:$0xff]  ;;  %8256 = vrot.lane.b32.xlu0 %v8164_v21, %s9969_s14 }
 0x4b1   : > { %7547 = vst.msk [vmem:[#allocation4 + $0x140] sm:$0xff] %vm4817_vm8, %v7472_v53  ;;  %8880 = vmatmul.mubr.bf16.gmra.mrb[76].mxu1 %v8494_v43 }
 0x4b2   : > { %8000 = vrot.lane.b32.xlu1 %v12677_v20, %s9968_s13  ;;  %9605 = vmatprep.mubr.msk.bf16.mxu1 %vm286_vm3, %v8497_v38  ;;  %v8761_v0 = vpop.f32.mrb[16].mxu1  ;;  %7803 = vst.msk [vmem:[#allocation4 + $0x140] sm:$0xff] %vm5074_vm9, %v7728_v7  ;;  %v6853_v38 = vld [vmem:[#allocation3 + $0x31a] sm:$0xff] }
 0x4b3   : > { %v8762_v54 = vadd.f32 %v12742_v58, %v8761_v0  ;;  %v8763_v3 = vpop.f32.mrb[17].mxu1  ;;  %v8241_v19 = vpop.permute.xlu0 %8240 }
 0x4b4   : > { %v7985_v18 = vpop.permute.xlu1 %7984  ;;  %v8764_v30 = vpop.f32.mrb[18].mxu1  ;;  %6977 = vrot.lane.b32.xlu0 %v6884_v11, %s9963_s10  ;;  %v8135_v11 = vld [vmem:[#allocation3 + $0x351] sm:$0xff] }
 0x4b5   : > { %8060 = vst.msk [vmem:[#allocation4 + $0x140] sm:$0xff] %vm5332_vm10, %v7985_v18  ;;  %v8992_v39 = vmax.f32 %v8762_v54, 0.0  ;;  %v8765_v55 = vadd.f32 %v12742_v58, %v8764_v30  ;;  %v8766_v44 = vpop.f32.mrb[19].mxu1 }
 0x4b6   : > { %6721 = vrot.lane.b32.xlu1 %v8163_v48, %s9962_s9  ;;  %8316 = vst.msk [vmem:[#allocation4 + $0x140] sm:$0xff] %vm5589_vm11, %v8241_v19  ;;  %v8134_v19 = vld [vmem:[#allocation3 + $0x349] sm:$0xff] }
 0x4b7   : > { %v9694_v14 = vpack.c.bf16 %v8992_v39, %v8992_v39  ;;  %v8993_v60 = vmax.f32 %v8765_v55, 0.0  ;;  %v6962_v34 = vpop.permute.xlu0 %6961  ;;  %v7878_v39 = vld [vmem:[#allocation3 + $0x348] sm:$0xff]  ;;  %v7879_v55 = vld [vmem:[#allocation3 + $0x350] sm:$0xff] }
 0x4b8   : > { %v6706_v13 = vpop.permute.xlu1 %6705  ;;  %7489 = vrot.lane.b32.xlu0 %v8164_v21, %s9966_s7 }
 0x4b9   : > { %6780 = vst.msk [vmem:[#allocation4 + $0x150] sm:$0xff] %vm4046_vm5, %v6706_v13  ;;  %v9695_v33 = vpack.c.bf16 %v8993_v60, %v8993_v60  ;;  %v7911_v60 = vpack.c.bf16 %v7879_v55, %v7878_v39  ;;  %v8167_v13 = vpack.c.bf16 %v8135_v11, %v8134_v19  ;;  %v8509_v11 = vld [vmem:[#allocation4 + $0x1a8] sm:$0xff] }
 0x4ba   : > { %9313 = vst.msk [vmem:[%s12762_s15 + $0x20] sm:$0xf] %vm9304_vm12, %v9694_v14  ;;  %7233 = vrot.lane.b32.xlu1 %v12677_v20, %s9965_s30  ;;  %v8499_v20 = vld [vmem:[#allocation4 + $0x158] sm:$0xff] }
 0x4bb   : > { %9314 = vst.msk [vmem:[%s12762_s15 + $0x24] sm:$0xf] %vm9304_vm12, %v9695_v33  ;;  %v7474_v6 = vpop.permute.xlu0 %7473 }
 0x4bc   : > { %7036 = vst.msk [vmem:[#allocation4 + $0x150] sm:$0xff] %vm4303_vm6, %v6962_v34  ;;  %v7218_v25 = vpop.permute.xlu1 %7217  ;;  %8002 = vrot.lane.b32.xlu0 %v12715_v41, %s9968_s13 }
 0x4bd   : > { %7292 = vst.msk [vmem:[#allocation4 + $0x150] sm:$0xff] %vm4560_vm7, %v7218_v25  ;;  %v8496_v1 = vld [vmem:[#allocation4 + $0x140] sm:$0xff]  ;;  %v8503_v25 = vld [vmem:[#allocation4 + $0x178] sm:$0xff] }
 0x4be   : > { %7745 = vrot.lane.b32.xlu1 %v12673_v62, %s9967_s12  ;;  %7548 = vst.msk [vmem:[#allocation4 + $0x150] sm:$0xff] %vm4817_vm8, %v7474_v6  ;;  %8888 = vmatmul.mubr.bf16.gmra.mrb[80].mxu1 %v8496_v1 }
 0x4bf   : > { %9606 = vmatprep.mubr.msk.bf16.mxu1 %vm286_vm3, %v8499_v20  ;;  %v7987_v50 = vpop.permute.xlu0 %7986 }
 0x4c0   : > { %v7730_v12 = vpop.permute.xlu1 %7729  ;;  %v8769_v23 = vpop.f32.mrb[20].mxu1  ;;  %6723 = vrot.lane.b32.xlu0 %v8164_v21, %s9962_s9 }
 0x4c1   : > { %7804 = vst.msk [vmem:[#allocation4 + $0x150] sm:$0xff] %vm5074_vm9, %v7730_v12  ;;  %v8770_v4 = vadd.f32 %v12742_v58, %v8769_v23  ;;  %v8771_v62 = vpop.f32.mrb[21].mxu1 }
 0x4c2   : > { %8258 = vrot.lane.b32.xlu1 %v8165_v57, %s9969_s14  ;;  %v8772_v16 = vpop.f32.mrb[22].mxu1  ;;  %8061 = vst.msk [vmem:[#allocation4 + $0x150] sm:$0xff] %vm5332_vm10, %v7987_v50 }
 0x4c3   : > { %v8994_v31 = vmax.f32 %v8770_v4, 0.0  ;;  %v8773_v51 = vadd.f32 %v12742_v58, %v8772_v16  ;;  %v8774_v32 = vpop.f32.mrb[23].mxu1  ;;  %v6708_v28 = vpop.permute.xlu0 %6707 }
 0x4c4   : > { %v8243_v48 = vpop.permute.xlu1 %8242  ;;  %6781 = vst.msk [vmem:[#allocation4 + $0x160] sm:$0xff] %vm4046_vm5, %v6708_v28  ;;  %7235 = vrot.lane.b32.xlu0 %v12715_v41, %s9965_s30  ;;  %v8501_v41 = vld [vmem:[#allocation4 + $0x168] sm:$0xff] }
 0x4c5   : > { %v9696_v35 = vpack.c.bf16 %v8994_v31, %v8994_v31  ;;  %v8995_v42 = vmax.f32 %v8773_v51, 0.0  ;;  %8317 = vst.msk [vmem:[#allocation4 + $0x150] sm:$0xff] %vm5589_vm11, %v8243_v48  ;;  %v8505_v48 = vld [vmem:[#allocation4 + $0x188] sm:$0xff] }
 0x4c6   : > { %6979 = vrot.lane.b32.xlu1 %v6885_v24, %s9963_s10 }
 0x4c7   : > { %9315 = vst.msk [vmem:[%s12762_s15 + $0x28] sm:$0xf] %vm9304_vm12, %v9696_v35  ;;  %v9697_v61 = vpack.c.bf16 %v8995_v42, %v8995_v42  ;;  %v7220_v56 = vpop.permute.xlu0 %7219 }
 0x4c8   : > { %v6964_v59 = vpop.permute.xlu1 %6963  ;;  %7747 = vrot.lane.b32.xlu0 %v12711_v46, %s9967_s12  ;;  %v6854_v46 = vld [vmem:[#allocation3 + $0x322] sm:$0xff] }
 0x4c9   : > { %9316 = vst.msk [vmem:[%s12762_s15 + $0x2c] sm:$0xf] %vm9304_vm12, %v9697_v61  ;;  %v6886_v3 = vpack.c.bf16 %v6854_v46, %v6853_v38 }
 0x4ca   : > { %7037 = vst.msk [vmem:[#allocation4 + $0x160] sm:$0xff] %vm4303_vm6, %v6964_v59  ;;  %7491 = vrot.lane.b32.xlu1 %v8165_v57, %s9966_s7 }
 0x4cb   : > { %7293 = vst.msk [vmem:[#allocation4 + $0x160] sm:$0xff] %vm4560_vm7, %v7220_v56  ;;  %v7732_v47 = vpop.permute.xlu0 %7731 }
 0x4cc   : > { %v7476_v49 = vpop.permute.xlu1 %7475  ;;  %v8498_v17 = vld [vmem:[#allocation4 + $0x150] sm:$0xff]  ;;  %8260 = vrot.lane.b32.xlu0 %v8166_v10, %s9969_s14 }
 0x4cd   : > { %7549 = vst.msk [vmem:[#allocation4 + $0x160] sm:$0xff] %vm4817_vm8, %v7476_v49  ;;  %8896 = vmatmul.mubr.bf16.gmra.mrb[84].mxu1 %v8498_v17  ;;  %v8777_v26 = vpop.f32.mrb[24].mxu1 }
 0x4ce   : > { %8004 = vrot.lane.b32.xlu1 %v7910_v40, %s9968_s13  ;;  %9607 = vmatprep.mubr.msk.bf16.mxu1 %vm286_vm3, %v8501_v41  ;;  %7805 = vst.msk [vmem:[#allocation4 + $0x160] sm:$0xff] %vm5074_vm9, %v7732_v47  ;;  %v8778_v53 = vadd.f32 %v12742_v58, %v8777_v26  ;;  %v8779_v43 = vpop.f32.mrb[25].mxu1 }
 0x4cf   : > { %v8780_v37 = vpop.f32.mrb[26].mxu1  ;;  %v8245_v54 = vpop.permute.xlu0 %8244 }
 0x4d0   : > { %v7989_v63 = vpop.permute.xlu1 %7988  ;;  %v8996_v7 = vmax.f32 %v8778_v53, 0.0  ;;  %v8781_v0 = vadd.f32 %v12742_v58, %v8780_v37  ;;  %v8782_v21 = vpop.f32.mrb[27].mxu1  ;;  %6981 = vrot.lane.b32.xlu0 %v6886_v3, %s9963_s10  ;;  %v8507_v53 = vld [vmem:[#allocation4 + $0x198] sm:$0xff] }
 0x4d1   : > { %8062 = vst.msk [vmem:[#allocation4 + $0x160] sm:$0xff] %vm5332_vm10, %v7989_v63 }
 0x4d2   : > { %6725 = vrot.lane.b32.xlu1 %v8165_v57, %s9962_s9  ;;  %v9698_v18 = vpack.c.bf16 %v8996_v7, %v8996_v7  ;;  %v8997_v2 = vmax.f32 %v8781_v0, 0.0  ;;  %8318 = vst.msk [vmem:[#allocation4 + $0x160] sm:$0xff] %vm5589_vm11, %v8245_v54 }
 0x4d3   : > { %v6966_v44 = vpop.permute.xlu0 %6965 }
 0x4d4   : > { %v6710_v5 = vpop.permute.xlu1 %6709  ;;  %9317 = vst.msk [vmem:[%s12762_s15 + $0x30] sm:$0xf] %vm9304_vm12, %v9698_v18  ;;  %v9699_v30 = vpack.c.bf16 %v8997_v2, %v8997_v2  ;;  %7493 = vrot.lane.b32.xlu0 %v8166_v10, %s9966_s7 }
 0x4d5   : > { %6782 = vst.msk [vmem:[#allocation4 + $0x170] sm:$0xff] %vm4046_vm5, %v6710_v5 }
 0x4d6   : > { %7237 = vrot.lane.b32.xlu1 %v7910_v40, %s9965_s30  ;;  %9318 = vst.msk [vmem:[%s12762_s15 + $0x34] sm:$0xf] %vm9304_vm12, %v9699_v30 }
 0x4d7   : > { %7038 = vst.msk [vmem:[#allocation4 + $0x170] sm:$0xff] %vm4303_vm6, %v6966_v44  ;;  %v7478_v33 = vpop.permute.xlu0 %7477 }
 0x4d8   : > { %v7222_v14 = vpop.permute.xlu1 %7221  ;;  %8006 = vrot.lane.b32.xlu0 %v7911_v60, %s9968_s13 }
 0x4d9   : > { %7294 = vst.msk [vmem:[#allocation4 + $0x170] sm:$0xff] %vm4560_vm7, %v7222_v14  ;;  %v8500_v34 = vld [vmem:[#allocation4 + $0x160] sm:$0xff] }
 0x4da   : > { %7749 = vrot.lane.b32.xlu1 %v12746_v52, %s9967_s12  ;;  %7550 = vst.msk [vmem:[#allocation4 + $0x170] sm:$0xff] %vm4817_vm8, %v7478_v33  ;;  %8904 = vmatmul.mubr.bf16.gmra.mrb[88].mxu1 %v8500_v34 }
 0x4db   : > { %9608 = vmatprep.mubr.msk.bf16.mxu1 %vm286_vm3, %v8503_v25  ;;  %v7991_v20 = vpop.permute.xlu0 %7990 }
 0x4dc   : > { %v7734_v27 = vpop.permute.xlu1 %7733  ;;  %v8785_v6 = vpop.f32.mrb[28].mxu1 }
 0x4dd   : > { %7806 = vst.msk [vmem:[#allocation4 + $0x170] sm:$0xff] %vm5074_vm9, %v7734_v27  ;;  %v8786_v1 = vadd.f32 %v12742_v58, %v8785_v6  ;;  %v8787_v15 = vpop.f32.mrb[29].mxu1 }
 0x4de   : > { %8262 = vrot.lane.b32.xlu1 %v8167_v13, %s9969_s14  ;;  %v8788_v52 = vpop.f32.mrb[30].mxu1  ;;  %8063 = vst.msk [vmem:[#allocation4 + $0x170] sm:$0xff] %vm5332_vm10, %v7991_v20 }
 0x4df   : > { %v8998_v12 = vmax.f32 %v8786_v1, 0.0  ;;  %v8789_v23 = vadd.f32 %v12742_v58, %v8788_v52  ;;  %v8790_v57 = vpop.f32.mrb[31].mxu1  ;;  %v6712_v16 = vpop.permute.xlu0 %6711 }
 0x4e0   : > { %v8247_v4 = vpop.permute.xlu1 %8246  ;;  %6783 = vst.msk [vmem:[#allocation4 + $0x180] sm:$0xff] %vm4046_vm5, %v6712_v16 }
 0x4e1   : > { %v9700_v62 = vpack.c.bf16 %v8998_v12, %v8998_v12  ;;  %v8999_v29 = vmax.f32 %v8789_v23, 0.0  ;;  %8319 = vst.msk [vmem:[#allocation4 + $0x170] sm:$0xff] %vm5589_vm11, %v8247_v4 }
 0x4e3   : > { %9319 = vst.msk [vmem:[%s12762_s15 + $0x38] sm:$0xf] %vm9304_vm12, %v9700_v62  ;;  %v9701_v45 = vpack.c.bf16 %v8999_v29, %v8999_v29  ;;  %v7224_v31 = vpop.permute.xlu0 %7223 }
 0x4e4   : > { %v6968_v50 = vpop.permute.xlu1 %6967 }
 0x4e5   : > { %9320 = vst.msk [vmem:[%s12762_s15 + $0x3c] sm:$0xf] %vm9304_vm12, %v9701_v45  ;;  %v8511_v45 = vld [vmem:[#allocation4 + $0x1b8] sm:$0xff] }
 0x4e6   : > { %7039 = vst.msk [vmem:[#allocation4 + $0x180] sm:$0xff] %vm4303_vm6, %v6968_v50 }
 0x4e7   : > { %7295 = vst.msk [vmem:[#allocation4 + $0x180] sm:$0xff] %vm4560_vm7, %v7224_v31  ;;  %v7736_v24 = vpop.permute.xlu0 %7735 }
 0x4e8   : > { %v7480_v51 = vpop.permute.xlu1 %7479  ;;  %v8502_v32 = vld [vmem:[#allocation4 + $0x170] sm:$0xff] }
 0x4e9   : > { %7551 = vst.msk [vmem:[#allocation4 + $0x180] sm:$0xff] %vm4817_vm8, %v7480_v51  ;;  %8912 = vmatmul.mubr.bf16.gmra.mrb[92].mxu1 %v8502_v32  ;;  %v8793_v35 = vpop.f32.mrb[32].mxu1 }
 0x4ea   : > { %9609 = vmatprep.mubr.msk.bf16.mxu1 %vm286_vm3, %v8505_v48  ;;  %7807 = vst.msk [vmem:[#allocation4 + $0x180] sm:$0xff] %vm5074_vm9, %v7736_v24  ;;  %v8794_v42 = vadd.f32 %v12742_v58, %v8793_v35  ;;  %v8795_v61 = vpop.f32.mrb[33].mxu1 }
 0x4eb   : > { %v8796_v59 = vpop.f32.mrb[34].mxu1  ;;  %v8249_v49 = vpop.permute.xlu0 %8248 }
 0x4ec   : > { %v7993_v28 = vpop.permute.xlu1 %7992  ;;  %v9000_v9 = vmax.f32 %v8794_v42, 0.0  ;;  %v8797_v56 = vadd.f32 %v12742_v58, %v8796_v59  ;;  %v8798_v22 = vpop.f32.mrb[35].mxu1 }
 0x4ed   : > { %8064 = vst.msk [vmem:[#allocation4 + $0x180] sm:$0xff] %vm5332_vm10, %v7993_v28 }
 0x4ee   : > { %v9702_v17 = vpack.c.bf16 %v9000_v9, %v9000_v9  ;;  %v9001_v40 = vmax.f32 %v8797_v56, 0.0  ;;  %8320 = vst.msk [vmem:[#allocation4 + $0x180] sm:$0xff] %vm5589_vm11, %v8249_v49 }
 0x4ef   : > { %v6970_v36 = vpop.permute.xlu0 %6969 }
 0x4f0   : > { %v6714_v8 = vpop.permute.xlu1 %6713  ;;  %9321 = vst.msk [vmem:[%s12762_s15 + $0x40] sm:$0xf] %vm9304_vm12, %v9702_v17  ;;  %v9703_v41 = vpack.c.bf16 %v9001_v40, %v9001_v40 }
 0x4f1   : > { %6784 = vst.msk [vmem:[#allocation4 + $0x190] sm:$0xff] %vm4046_vm5, %v6714_v8  ;;  %v8513_v8 = vld [vmem:[#allocation4 + $0x1c8] sm:$0xff] }
 0x4f2   : > { %9322 = vst.msk [vmem:[%s12762_s15 + $0x44] sm:$0xf] %vm9304_vm12, %v9703_v41 }
 0x4f3   : > { %7040 = vst.msk [vmem:[#allocation4 + $0x190] sm:$0xff] %vm4303_vm6, %v6970_v36  ;;  %v7482_v26 = vpop.permute.xlu0 %7481 }
 0x4f4   : > { %v7226_v47 = vpop.permute.xlu1 %7225 }
 0x4f5   : > { %7296 = vst.msk [vmem:[#allocation4 + $0x190] sm:$0xff] %vm4560_vm7, %v7226_v47  ;;  %v8504_v10 = vld [vmem:[#allocation4 + $0x180] sm:$0xff] }
 0x4f6   : > { %7552 = vst.msk [vmem:[#allocation4 + $0x190] sm:$0xff] %vm4817_vm8, %v7482_v26  ;;  %8920 = vmatmul.mubr.bf16.gmra.mrb[96].mxu1 %v8504_v10 }
 0x4f7   : > { %9610 = vmatprep.mubr.msk.bf16.mxu1 %vm286_vm3, %v8507_v53  ;;  %v7995_v7 = vpop.permute.xlu0 %7994 }
 0x4f8   : > { %v7738_v43 = vpop.permute.xlu1 %7737  ;;  %v8801_v63 = vpop.f32.mrb[36].mxu1 }
 0x4f9   : > { %7808 = vst.msk [vmem:[#allocation4 + $0x190] sm:$0xff] %vm5074_vm9, %v7738_v43  ;;  %v8802_v38 = vadd.f32 %v12742_v58, %v8801_v63  ;;  %v8803_v46 = vpop.f32.mrb[37].mxu1 }
 0x4fa   : > { %v8804_v37 = vpop.f32.mrb[38].mxu1  ;;  %8065 = vst.msk [vmem:[#allocation4 + $0x190] sm:$0xff] %vm5332_vm10, %v7995_v7 }
 0x4fb   : > { %v9002_v0 = vmax.f32 %v8802_v38, 0.0  ;;  %v8805_v21 = vadd.f32 %v12742_v58, %v8804_v37  ;;  %v8806_v54 = vpop.f32.mrb[39].mxu1  ;;  %v6716_v30 = vpop.permute.xlu0 %6715 }
 0x4fc   : > { %v8251_v3 = vpop.permute.xlu1 %8250  ;;  %6785 = vst.msk [vmem:[#allocation4 + $0x1a0] sm:$0xff] %vm4046_vm5, %v6716_v30 }
 0x4fd   : > { %v9704_v18 = vpack.c.bf16 %v9002_v0, %v9002_v0  ;;  %v9003_v2 = vmax.f32 %v8805_v21, 0.0  ;;  %8321 = vst.msk [vmem:[#allocation4 + $0x190] sm:$0xff] %vm5589_vm11, %v8251_v3 }
 0x4ff   : > { %9323 = vst.msk [vmem:[%s12762_s15 + $0x48] sm:$0xf] %vm9304_vm12, %v9704_v18  ;;  %v9705_v5 = vpack.c.bf16 %v9003_v2, %v9003_v2  ;;  %v7228_v55 = vpop.permute.xlu0 %7227 }
 0x500   : > { %v6972_v39 = vpop.permute.xlu1 %6971 }
 0x501   : > { %9324 = vst.msk [vmem:[%s12762_s15 + $0x4c] sm:$0xf] %vm9304_vm12, %v9705_v5  ;;  %v8515_v5 = vld [vmem:[#allocation4 + $0x1d8] sm:$0xff] }
 0x502   : > { %7041 = vst.msk [vmem:[#allocation4 + $0x1a0] sm:$0xff] %vm4303_vm6, %v6972_v39 }
 0x503   : > { %7297 = vst.msk [vmem:[#allocation4 + $0x1a0] sm:$0xff] %vm4560_vm7, %v7228_v55  ;;  %v7740_v14 = vpop.permute.xlu0 %7739 }
 0x504   : > { %v7484_v44 = vpop.permute.xlu1 %7483  ;;  %v8506_v19 = vld [vmem:[#allocation4 + $0x190] sm:$0xff] }
 0x505   : > { %7553 = vst.msk [vmem:[#allocation4 + $0x1a0] sm:$0xff] %vm4817_vm8, %v7484_v44  ;;  %8928 = vmatmul.mubr.bf16.gmra.mrb[100].mxu1 %v8506_v19 }
 0x506   : > { %9611 = vmatprep.mubr.msk.bf16.mxu1 %vm286_vm3, %v8509_v11  ;;  %v8809_v60 = vpop.f32.mrb[40].mxu1  ;;  %7809 = vst.msk [vmem:[#allocation4 + $0x1a0] sm:$0xff] %vm5074_vm9, %v7740_v14 }
 0x507   : > { %v8810_v13 = vadd.f32 %v12742_v58, %v8809_v60  ;;  %v8811_v33 = vpop.f32.mrb[41].mxu1  ;;  %v8253_v15 = vpop.permute.xlu0 %8252 }
 0x508   : > { %v7997_v34 = vpop.permute.xlu1 %7996  ;;  %v8812_v25 = vpop.f32.mrb[42].mxu1 }
 0x509   : > { %8066 = vst.msk [vmem:[#allocation4 + $0x1a0] sm:$0xff] %vm5332_vm10, %v7997_v34  ;;  %v9004_v27 = vmax.f32 %v8810_v13, 0.0  ;;  %v8813_v6 = vadd.f32 %v12742_v58, %v8812_v25  ;;  %v8814_v1 = vpop.f32.mrb[43].mxu1 }
 0x50a   : > { %8322 = vst.msk [vmem:[#allocation4 + $0x1a0] sm:$0xff] %vm5589_vm11, %v8253_v15 }
 0x50b   : > { %v9706_v52 = vpack.c.bf16 %v9004_v27, %v9004_v27  ;;  %v9005_v20 = vmax.f32 %v8813_v6, 0.0  ;;  %v6974_v57 = vpop.permute.xlu0 %6973 }
 0x50c   : > { %v6718_v12 = vpop.permute.xlu1 %6717 }
 0x50d   : > { %6786 = vst.msk [vmem:[#allocation4 + $0x1b0] sm:$0xff] %vm4046_vm5, %v6718_v12  ;;  %v9707_v23 = vpack.c.bf16 %v9005_v20, %v9005_v20  ;;  %v8517_v20 = vld [vmem:[#allocation4 + $0x1e8] sm:$0xff] }
 0x50e   : > { %9325 = vst.msk [vmem:[%s12762_s15 + $0x50] sm:$0xf] %vm9304_vm12, %v9706_v52 }
 0x50f   : > { %9326 = vst.msk [vmem:[%s12762_s15 + $0x54] sm:$0xf] %vm9304_vm12, %v9707_v23  ;;  %v7486_v62 = vpop.permute.xlu0 %7485 }
 0x510   : > { %7042 = vst.msk [vmem:[#allocation4 + $0x1b0] sm:$0xff] %vm4303_vm6, %v6974_v57  ;;  %v7230_v4 = vpop.permute.xlu1 %7229  ;;  %v13025_v57 = vld [vmem:[%s13153_s5] ss:$0 sm:$0xff] }
 0x511   : > { %7298 = vst.msk [vmem:[#allocation4 + $0x1b0] sm:$0xff] %vm4560_vm7, %v7230_v4  ;;  %v8508_v29 = vld [vmem:[#allocation4 + $0x1a0] sm:$0xff] }
 0x512   : > { %7554 = vst.msk [vmem:[#allocation4 + $0x1b0] sm:$0xff] %vm4817_vm8, %v7486_v62  ;;  %8936 = vmatmul.mubr.bf16.gmra.mrb[104].mxu1 %v8508_v29 }
 0x513   : > { %9612 = vmatprep.mubr.msk.bf16.mxu1 %vm286_vm3, %v8511_v45  ;;  %v7999_v48 = vpop.permute.xlu0 %7998 }
 0x514   : > { %v7742_v16 = vpop.permute.xlu1 %7741 }
 0x515   : > { %v8817_v50 = vpop.f32.mrb[44].mxu1  ;;  %7810 = vst.msk [vmem:[#allocation4 + $0x1b0] sm:$0xff] %vm5074_vm9, %v7742_v16 }
 0x516   : > { %v8818_v31 = vadd.f32 %v12742_v58, %v8817_v50  ;;  %v8819_v51 = vpop.f32.mrb[45].mxu1  ;;  %8067 = vst.msk [vmem:[#allocation4 + $0x1b0] sm:$0xff] %vm5332_vm10, %v7999_v48 }
 0x517   : > { %v8820_v32 = vpop.f32.mrb[46].mxu1  ;;  %v6720_v56 = vpop.permute.xlu0 %6719 }
 0x518   : > { %v9006_v24 = vmax.f32 %v8818_v31, 0.0  ;;  %v8821_v35 = vadd.f32 %v12742_v58, %v8820_v32  ;;  %v8822_v42 = vpop.f32.mrb[47].mxu1  ;;  %v8255_v61 = vpop.permute.xlu1 %8254  ;;  %6787 = vst.msk [vmem:[#allocation4 + $0x1c0] sm:$0xff] %vm4046_vm5, %v6720_v56 }
 0x519   : > { %8323 = vst.msk [vmem:[#allocation4 + $0x1b0] sm:$0xff] %vm5589_vm11, %v8255_v61 }
 0x51a   : > { %v9708_v28 = vpack.c.bf16 %v9006_v24, %v9006_v24  ;;  %v9007_v59 = vmax.f32 %v8821_v35, 0.0 }
 0x51b   : > { %v7232_v49 = vpop.permute.xlu0 %7231 }
 0x51c   : > { %9327 = vst.msk [vmem:[%s12762_s15 + $0x58] sm:$0xf] %vm9304_vm12, %v9708_v28  ;;  %v9709_v9 = vpack.c.bf16 %v9007_v59, %v9007_v59  ;;  %v6976_v22 = vpop.permute.xlu1 %6975  ;;  %v8519_v28 = vld [vmem:[#allocation4 + $0x1f8] sm:$0xff] }
 0x51d   : > { %7043 = vst.msk [vmem:[#allocation4 + $0x1c0] sm:$0xff] %vm4303_vm6, %v6976_v22 }
 0x51e   : > { %9328 = vst.msk [vmem:[%s12762_s15 + $0x5c] sm:$0xf] %vm9304_vm12, %v9709_v9 }
 0x51f   : > { %7299 = vst.msk [vmem:[#allocation4 + $0x1c0] sm:$0xff] %vm4560_vm7, %v7232_v49  ;;  %v7744_v41 = vpop.permute.xlu0 %7743 }
 0x520   : > { %v7488_v17 = vpop.permute.xlu1 %7487  ;;  %v8510_v40 = vld [vmem:[#allocation4 + $0x1b0] sm:$0xff] }
 0x521   : > { %7555 = vst.msk [vmem:[#allocation4 + $0x1c0] sm:$0xff] %vm4817_vm8, %v7488_v17  ;;  %8944 = vmatmul.mubr.bf16.gmra.mrb[108].mxu1 %v8510_v40 }
 0x522   : > { %9613 = vmatprep.mubr.msk.bf16.mxu1 %vm286_vm3, %v8513_v8  ;;  %7811 = vst.msk [vmem:[#allocation4 + $0x1c0] sm:$0xff] %vm5074_vm9, %v7744_v41 }
 0x523   : > { %v8825_v36 = vpop.f32.mrb[48].mxu1  ;;  %v8257_v46 = vpop.permute.xlu0 %8256 }
 0x524   : > { %v8826_v47 = vadd.f32 %v12742_v58, %v8825_v36  ;;  %v8827_v26 = vpop.f32.mrb[49].mxu1  ;;  %v8001_v10 = vpop.permute.xlu1 %8000 }
 0x525   : > { %v8828_v53 = vpop.f32.mrb[50].mxu1  ;;  %8068 = vst.msk [vmem:[#allocation4 + $0x1c0] sm:$0xff] %vm5332_vm10, %v8001_v10 }
 0x526   : > { %v9008_v43 = vmax.f32 %v8826_v47, 0.0  ;;  %v8829_v63 = vadd.f32 %v12742_v58, %v8828_v53  ;;  %v8830_v38 = vpop.f32.mrb[51].mxu1  ;;  %8324 = vst.msk [vmem:[#allocation4 + $0x1c0] sm:$0xff] %vm5589_vm11, %v8257_v46 }
 0x527   : > { %v6978_v54 = vpop.permute.xlu0 %6977 }
 0x528   : > { %v9710_v37 = vpack.c.bf16 %v9008_v43, %v9008_v43  ;;  %v9009_v7 = vmax.f32 %v8829_v63, 0.0  ;;  %v6722_v0 = vpop.permute.xlu1 %6721 }
 0x529   : > { %6788 = vst.msk [vmem:[#allocation4 + $0x1d0] sm:$0xff] %vm4046_vm5, %v6722_v0 }
 0x52a   : > { %9329 = vst.msk [vmem:[%s12762_s15 + $0x60] sm:$0xf] %vm9304_vm12, %v9710_v37  ;;  %v9711_v21 = vpack.c.bf16 %v9009_v7, %v9009_v7 }
 0x52b   : > { %7044 = vst.msk [vmem:[#allocation4 + $0x1d0] sm:$0xff] %vm4303_vm6, %v6978_v54  ;;  %v7490_v18 = vpop.permute.xlu0 %7489 }
 0x52c   : > { %9330 = vst.msk [vmem:[%s12762_s15 + $0x64] sm:$0xf] %vm9304_vm12, %v9711_v21  ;;  %v7234_v3 = vpop.permute.xlu1 %7233 }
 0x52d   : > { %7300 = vst.msk [vmem:[#allocation4 + $0x1d0] sm:$0xff] %vm4560_vm7, %v7234_v3  ;;  %v8512_v2 = vld [vmem:[#allocation4 + $0x1c0] sm:$0xff] }
 0x52e   : > { %7556 = vst.msk [vmem:[#allocation4 + $0x1d0] sm:$0xff] %vm4817_vm8, %v7490_v18  ;;  %8952 = vmatmul.mubr.bf16.gmra.mrb[112].mxu1 %v8512_v2 }
 0x52f   : > { %9614 = vmatprep.mubr.msk.bf16.mxu1 %vm286_vm3, %v8515_v5  ;;  %v8003_v11 = vpop.permute.xlu0 %8002 }
 0x530   : > { %v7746_v30 = vpop.permute.xlu1 %7745 }
 0x531   : > { %v8833_v39 = vpop.f32.mrb[52].mxu1  ;;  %7812 = vst.msk [vmem:[#allocation4 + $0x1d0] sm:$0xff] %vm5074_vm9, %v7746_v30 }
 0x532   : > { %v8834_v55 = vadd.f32 %v12742_v58, %v8833_v39  ;;  %v8835_v44 = vpop.f32.mrb[53].mxu1  ;;  %8069 = vst.msk [vmem:[#allocation4 + $0x1d0] sm:$0xff] %vm5332_vm10, %v8003_v11 }
 0x533   : > { %v8836_v19 = vpop.f32.mrb[54].mxu1  ;;  %v6724_v6 = vpop.permute.xlu0 %6723 }
 0x534   : > { %v9010_v14 = vmax.f32 %v8834_v55, 0.0  ;;  %v8837_v60 = vadd.f32 %v12742_v58, %v8836_v19  ;;  %v8838_v13 = vpop.f32.mrb[55].mxu1  ;;  %v8259_v33 = vpop.permute.xlu1 %8258  ;;  %6789 = vst.msk [vmem:[#allocation4 + $0x1e0] sm:$0xff] %vm4046_vm5, %v6724_v6 }
 0x535   : > { %8325 = vst.msk [vmem:[#allocation4 + $0x1d0] sm:$0xff] %vm5589_vm11, %v8259_v33 }
 0x536   : > { %v9712_v34 = vpack.c.bf16 %v9010_v14, %v9010_v14  ;;  %v9011_v25 = vmax.f32 %v8837_v60, 0.0 }
 0x537   : > { %v7236_v58 = vpop.permute.xlu0 %7235 }
 0x538   : > { %9331 = vst.msk [vmem:[%s12762_s15 + $0x68] sm:$0xf] %vm9304_vm12, %v9712_v34  ;;  %v9713_v27 = vpack.c.bf16 %v9011_v25, %v9011_v25  ;;  %v6980_v1 = vpop.permute.xlu1 %6979 }
 0x539   : > { %7045 = vst.msk [vmem:[#allocation4 + $0x1e0] sm:$0xff] %vm4303_vm6, %v6980_v1 }
 0x53a   : > { %9332 = vst.msk [vmem:[%s12762_s15 + $0x6c] sm:$0xf] %vm9304_vm12, %v9713_v27 }
 0x53b   : > { %7301 = vst.msk [vmem:[#allocation4 + $0x1e0] sm:$0xff] %vm4560_vm7, %v7236_v58  ;;  %v7748_v12 = vpop.permute.xlu0 %7747 }
 0x53c   : > { %v7492_v15 = vpop.permute.xlu1 %7491  ;;  %v8514_v52 = vld [vmem:[#allocation4 + $0x1d0] sm:$0xff] }
 0x53d   : > { %7557 = vst.msk [vmem:[#allocation4 + $0x1e0] sm:$0xff] %vm4817_vm8, %v7492_v15  ;;  %8960 = vmatmul.mubr.bf16.gmra.mrb[116].mxu1 %v8514_v52 }
 0x53e   : > { %9615 = vmatprep.mubr.msk.bf16.mxu1 %vm286_vm3, %v8517_v20  ;;  %7813 = vst.msk [vmem:[#allocation4 + $0x1e0] sm:$0xff] %vm5074_vm9, %v7748_v12 }
 0x53f   : > { %v8841_v23 = vpop.f32.mrb[56].mxu1  ;;  %v8261_v51 = vpop.permute.xlu0 %8260 }
 0x540   : > { %v8842_v4 = vadd.f32 %v13025_v57, %v8841_v23  ;;  %v8843_v62 = vpop.f32.mrb[57].mxu1  ;;  %v8005_v29 = vpop.permute.xlu1 %8004 }
 0x541   : > { %v8844_v45 = vpop.f32.mrb[58].mxu1  ;;  %8070 = vst.msk [vmem:[#allocation4 + $0x1e0] sm:$0xff] %vm5332_vm10, %v8005_v29 }
 0x542   : > { %v9012_v16 = vmax.f32 %v8842_v4, 0.0  ;;  %v8845_v50 = vadd.f32 %v13025_v57, %v8844_v45  ;;  %v8846_v31 = vpop.f32.mrb[59].mxu1  ;;  %8326 = vst.msk [vmem:[#allocation4 + $0x1e0] sm:$0xff] %vm5589_vm11, %v8261_v51 }
 0x543   : > { %v6982_v42 = vpop.permute.xlu0 %6981 }
 0x544   : > { %v9714_v32 = vpack.c.bf16 %v9012_v16, %v9012_v16  ;;  %v9013_v48 = vmax.f32 %v8845_v50, 0.0  ;;  %v6726_v24 = vpop.permute.xlu1 %6725 }
 0x545   : > { %6790 = vst.msk [vmem:[#allocation4 + $0x1f0] sm:$0xff] %vm4046_vm5, %v6726_v24 }
 0x546   : > { %9333 = vst.msk [vmem:[%s12762_s15 + $0x70] sm:$0xf] %vm9304_vm12, %v9714_v32  ;;  %v9715_v35 = vpack.c.bf16 %v9013_v48, %v9013_v48 }
 0x547   : > { %7046 = vst.msk [vmem:[#allocation4 + $0x1f0] sm:$0xff] %vm4303_vm6, %v6982_v42  ;;  %v7494_v59 = vpop.permute.xlu0 %7493 }
 0x548   : > { %9334 = vst.msk [vmem:[%s12762_s15 + $0x74] sm:$0xf] %vm9304_vm12, %v9715_v35  ;;  %v7238_v61 = vpop.permute.xlu1 %7237 }
 0x549   : > { %7302 = vst.msk [vmem:[#allocation4 + $0x1f0] sm:$0xff] %vm4560_vm7, %v7238_v61  ;;  %v8516_v9 = vld [vmem:[#allocation4 + $0x1e0] sm:$0xff] }
 0x54a   : > { %7558 = vst.msk [vmem:[#allocation4 + $0x1f0] sm:$0xff] %vm4817_vm8, %v7494_v59  ;;  %8968 = vmatmul.mubr.bf16.gmra.mrb[120].mxu1 %v8516_v9 }
 0x54b   : > { %9616 = vmatprep.mubr.msk.bf16.mxu1 %vm286_vm3, %v8519_v28  ;;  %v8007_v36 = vpop.permute.xlu0 %8006 }
 0x54c   : > { %v7750_v56 = vpop.permute.xlu1 %7749 }
 0x54d   : > { %v8849_v22 = vpop.f32.mrb[60].mxu1  ;;  %7814 = vst.msk [vmem:[#allocation4 + $0x1f0] sm:$0xff] %vm5074_vm9, %v7750_v56 }
 0x54e   : > { %v8850_v49 = vadd.f32 %v13025_v57, %v8849_v22  ;;  %v8851_v17 = vpop.f32.mrb[61].mxu1  ;;  %8071 = vst.msk [vmem:[#allocation4 + $0x1f0] sm:$0xff] %vm5332_vm10, %v8007_v36 }
 0x54f   : > { %v8852_v40 = vpop.f32.mrb[62].mxu1 }
 0x550   : > { %v9014_v8 = vmax.f32 %v8850_v49, 0.0  ;;  %v8853_v41 = vadd.f32 %v13025_v57, %v8852_v40  ;;  %v8854_v47 = vpop.f32.mrb[63].mxu1  ;;  %v8263_v26 = vpop.permute.xlu1 %8262 }
 0x551   : > { %8327 = vst.msk [vmem:[#allocation4 + $0x1f0] sm:$0xff] %vm5589_vm11, %v8263_v26 }
 0x552   : > { %v9716_v10 = vpack.c.bf16 %v9014_v8, %v9014_v8  ;;  %v9015_v53 = vmax.f32 %v8853_v41, 0.0 }
 0x554   : > { %9335 = vst.msk [vmem:[%s12762_s15 + $0x78] sm:$0xf] %vm9304_vm12, %v9716_v10  ;;  %v9717_v43 = vpack.c.bf16 %v9015_v53, %v9015_v53 }
 0x556   : > { %9336 = vst.msk [vmem:[%s12762_s15 + $0x7c] sm:$0xf] %vm9304_vm12, %v9717_v43 }
 0x558   : > { %v8518_v63 = vld [vmem:[#allocation4 + $0x1f0] sm:$0xff] }
 0x559   : > { %8976 = vmatmul.mubr.bf16.gmra.mrb[124].mxu1 %v8518_v63 }
 0x55a   : > { %v8857_v38 = vpop.f32.mrb[64].mxu1 }
 0x55b   : > { %v8858_v46 = vadd.f32 %v13025_v57, %v8857_v38  ;;  %v8859_v37 = vpop.f32.mrb[65].mxu1 }
 0x55c   : > { %v8860_v7 = vpop.f32.mrb[66].mxu1 }
 0x55d   : > { %v9016_v0 = vmax.f32 %v8858_v46, 0.0  ;;  %v8861_v21 = vadd.f32 %v13025_v57, %v8860_v7  ;;  %v8862_v54 = vpop.f32.mrb[67].mxu1 }
 0x55f   : > { %v9718_v3 = vpack.c.bf16 %v9016_v0, %v9016_v0  ;;  %v9017_v18 = vmax.f32 %v8861_v21, 0.0 }
 0x561   : > { %9337 = vst.msk [vmem:[%s12762_s15 + $0x80] sm:$0xf] %vm9304_vm12, %v9718_v3  ;;  %v9719_v2 = vpack.c.bf16 %v9017_v18, %v9017_v18 }
 0x563   : > { %9338 = vst.msk [vmem:[%s12762_s15 + $0x84] sm:$0xf] %vm9304_vm12, %v9719_v2 }
 0x568   : > { %v8865_v5 = vpop.f32.mrb[68].mxu1 }
 0x569   : > { %v8866_v30 = vadd.f32 %v13025_v57, %v8865_v5  ;;  %v8867_v39 = vpop.f32.mrb[69].mxu1 }
 0x56a   : > { %v8868_v55 = vpop.f32.mrb[70].mxu1 }
 0x56b   : > { %v9018_v44 = vmax.f32 %v8866_v30, 0.0  ;;  %v8869_v19 = vadd.f32 %v13025_v57, %v8868_v55  ;;  %v8870_v11 = vpop.f32.mrb[71].mxu1 }
 0x56d   : > { %v9720_v14 = vpack.c.bf16 %v9018_v44, %v9018_v44  ;;  %v9019_v60 = vmax.f32 %v8869_v19, 0.0 }
 0x56f   : > { %9339 = vst.msk [vmem:[%s12762_s15 + $0x88] sm:$0xf] %vm9304_vm12, %v9720_v14  ;;  %v9721_v13 = vpack.c.bf16 %v9019_v60, %v9019_v60 }
 0x571   : > { %9340 = vst.msk [vmem:[%s12762_s15 + $0x8c] sm:$0xf] %vm9304_vm12, %v9721_v13 }
 0x575   : > { %v8873_v33 = vpop.f32.mrb[72].mxu1 }
 0x576   : > { %v8874_v34 = vadd.f32 %v13025_v57, %v8873_v33  ;;  %v8875_v25 = vpop.f32.mrb[73].mxu1 }
 0x577   : > { %v8876_v27 = vpop.f32.mrb[74].mxu1 }
 0x578   : > { %v9020_v6 = vmax.f32 %v8874_v34, 0.0  ;;  %v8877_v1 = vadd.f32 %v13025_v57, %v8876_v27  ;;  %v8878_v58 = vpop.f32.mrb[75].mxu1 }
 0x57a   : > { %v9722_v15 = vpack.c.bf16 %v9020_v6, %v9020_v6  ;;  %v9021_v52 = vmax.f32 %v8877_v1, 0.0 }
 0x57c   : > { %9341 = vst.msk [vmem:[%s12762_s15 + $0x90] sm:$0xf] %vm9304_vm12, %v9722_v15  ;;  %v9723_v20 = vpack.c.bf16 %v9021_v52, %v9021_v52 }
 0x57e   : > { %9342 = vst.msk [vmem:[%s12762_s15 + $0x94] sm:$0xf] %vm9304_vm12, %v9723_v20 }
 0x584   : > { %v8881_v12 = vpop.f32.mrb[76].mxu1 }
 0x585   : > { %v8882_v23 = vadd.f32 %v13025_v57, %v8881_v12  ;;  %v8883_v4 = vpop.f32.mrb[77].mxu1 }
 0x586   : > { %v8884_v62 = vpop.f32.mrb[78].mxu1 }
 0x587   : > { %v9022_v29 = vmax.f32 %v8882_v23, 0.0  ;;  %v8885_v45 = vadd.f32 %v13025_v57, %v8884_v62  ;;  %v8886_v16 = vpop.f32.mrb[79].mxu1 }
 0x589   : > { %v9724_v50 = vpack.c.bf16 %v9022_v29, %v9022_v29  ;;  %v9023_v31 = vmax.f32 %v8885_v45, 0.0 }
 0x58b   : > { %9343 = vst.msk [vmem:[%s12762_s15 + $0x98] sm:$0xf] %vm9304_vm12, %v9724_v50  ;;  %v9725_v51 = vpack.c.bf16 %v9023_v31, %v9023_v31 }
 0x58d   : > { %9344 = vst.msk [vmem:[%s12762_s15 + $0x9c] sm:$0xf] %vm9304_vm12, %v9725_v51 }
 0x591   : > { %v8889_v32 = vpop.f32.mrb[80].mxu1 }
 0x592   : > { %v8890_v48 = vadd.f32 %v13025_v57, %v8889_v32  ;;  %v8891_v24 = vpop.f32.mrb[81].mxu1 }
 0x593   : > { %v8892_v35 = vpop.f32.mrb[82].mxu1 }
 0x594   : > { %v9024_v42 = vmax.f32 %v8890_v48, 0.0  ;;  %v8893_v61 = vadd.f32 %v13025_v57, %v8892_v35  ;;  %v8894_v28 = vpop.f32.mrb[83].mxu1 }
 0x596   : > { %v9726_v59 = vpack.c.bf16 %v9024_v42, %v9024_v42  ;;  %v9025_v9 = vmax.f32 %v8893_v61, 0.0 }
 0x598   : > { %9345 = vst.msk [vmem:[%s12762_s15 + $0xa0] sm:$0xf] %vm9304_vm12, %v9726_v59  ;;  %v9727_v56 = vpack.c.bf16 %v9025_v9, %v9025_v9 }
 0x59a   : > { %9346 = vst.msk [vmem:[%s12762_s15 + $0xa4] sm:$0xf] %vm9304_vm12, %v9727_v56 }
 0x5a0   : > { %v8897_v22 = vpop.f32.mrb[84].mxu1 }
 0x5a1   : > { %v8898_v49 = vadd.f32 %v13025_v57, %v8897_v22  ;;  %v8899_v17 = vpop.f32.mrb[85].mxu1 }
 0x5a2   : > { %v8900_v40 = vpop.f32.mrb[86].mxu1 }
 0x5a3   : > { %v9026_v8 = vmax.f32 %v8898_v49, 0.0  ;;  %v8901_v41 = vadd.f32 %v13025_v57, %v8900_v40  ;;  %v8902_v36 = vpop.f32.mrb[87].mxu1 }
 0x5a5   : > { %v9728_v47 = vpack.c.bf16 %v9026_v8, %v9026_v8  ;;  %v9027_v26 = vmax.f32 %v8901_v41, 0.0 }
 0x5a7   : > { %9347 = vst.msk [vmem:[%s12762_s15 + $0xa8] sm:$0xf] %vm9304_vm12, %v9728_v47  ;;  %v9729_v10 = vpack.c.bf16 %v9027_v26, %v9027_v26 }
 0x5a9   : > { %9348 = vst.msk [vmem:[%s12762_s15 + $0xac] sm:$0xf] %vm9304_vm12, %v9729_v10 }
 0x5ad   : > { %v8905_v53 = vpop.f32.mrb[88].mxu1 }
 0x5ae   : > { %v8906_v43 = vadd.f32 %v13025_v57, %v8905_v53  ;;  %v8907_v63 = vpop.f32.mrb[89].mxu1 }
 0x5af   : > { %v8908_v38 = vpop.f32.mrb[90].mxu1 }
 0x5b0   : > { %v9028_v46 = vmax.f32 %v8906_v43, 0.0  ;;  %v8909_v37 = vadd.f32 %v13025_v57, %v8908_v38  ;;  %v8910_v7 = vpop.f32.mrb[91].mxu1 }
 0x5b2   : > { %v9730_v0 = vpack.c.bf16 %v9028_v46, %v9028_v46  ;;  %v9029_v21 = vmax.f32 %v8909_v37, 0.0 }
 0x5b4   : > { %9349 = vst.msk [vmem:[%s12762_s15 + $0xb0] sm:$0xf] %vm9304_vm12, %v9730_v0  ;;  %v9731_v54 = vpack.c.bf16 %v9029_v21, %v9029_v21 }
 0x5b6   : > { %9350 = vst.msk [vmem:[%s12762_s15 + $0xb4] sm:$0xf] %vm9304_vm12, %v9731_v54 }
 0x5bc   : > { %v8913_v3 = vpop.f32.mrb[92].mxu1 }
 0x5bd   : > { %v8914_v18 = vadd.f32 %v13025_v57, %v8913_v3  ;;  %v8915_v2 = vpop.f32.mrb[93].mxu1 }
 0x5be   : > { %v8916_v5 = vpop.f32.mrb[94].mxu1 }
 0x5bf   : > { %v9030_v30 = vmax.f32 %v8914_v18, 0.0  ;;  %v8917_v39 = vadd.f32 %v13025_v57, %v8916_v5  ;;  %v8918_v55 = vpop.f32.mrb[95].mxu1 }
 0x5c1   : > { %v9732_v44 = vpack.c.bf16 %v9030_v30, %v9030_v30  ;;  %v9031_v19 = vmax.f32 %v8917_v39, 0.0 }
 0x5c3   : > { %9351 = vst.msk [vmem:[%s12762_s15 + $0xb8] sm:$0xf] %vm9304_vm12, %v9732_v44  ;;  %v9733_v11 = vpack.c.bf16 %v9031_v19, %v9031_v19 }
 0x5c5   : > { %9352 = vst.msk [vmem:[%s12762_s15 + $0xbc] sm:$0xf] %vm9304_vm12, %v9733_v11 }
 0x5c9   : > { %v8921_v14 = vpop.f32.mrb[96].mxu1 }
 0x5ca   : > { %v8922_v60 = vadd.f32 %v13025_v57, %v8921_v14  ;;  %v8923_v13 = vpop.f32.mrb[97].mxu1 }
 0x5cb   : > { %v8924_v33 = vpop.f32.mrb[98].mxu1 }
 0x5cc   : > { %v9032_v34 = vmax.f32 %v8922_v60, 0.0  ;;  %v8925_v25 = vadd.f32 %v13025_v57, %v8924_v33  ;;  %v8926_v27 = vpop.f32.mrb[99].mxu1 }
 0x5ce   : > { %v9734_v6 = vpack.c.bf16 %v9032_v34, %v9032_v34  ;;  %v9033_v1 = vmax.f32 %v8925_v25, 0.0 }
 0x5d0   : > { %9353 = vst.msk [vmem:[%s12762_s15 + $0xc0] sm:$0xf] %vm9304_vm12, %v9734_v6  ;;  %v9735_v58 = vpack.c.bf16 %v9033_v1, %v9033_v1 }
 0x5d2   : > { %9354 = vst.msk [vmem:[%s12762_s15 + $0xc4] sm:$0xf] %vm9304_vm12, %v9735_v58 }
 0x5d8   : > { %v8929_v15 = vpop.f32.mrb[100].mxu1 }
 0x5d9   : > { %v8930_v52 = vadd.f32 %v13025_v57, %v8929_v15  ;;  %v8931_v20 = vpop.f32.mrb[101].mxu1 }
 0x5da   : > { %v8932_v12 = vpop.f32.mrb[102].mxu1 }
 0x5db   : > { %v9034_v23 = vmax.f32 %v8930_v52, 0.0  ;;  %v8933_v4 = vadd.f32 %v13025_v57, %v8932_v12  ;;  %v8934_v62 = vpop.f32.mrb[103].mxu1 }
 0x5dd   : > { %v9736_v29 = vpack.c.bf16 %v9034_v23, %v9034_v23  ;;  %v9035_v45 = vmax.f32 %v8933_v4, 0.0 }
 0x5df   : > { %9355 = vst.msk [vmem:[%s12762_s15 + $0xc8] sm:$0xf] %vm9304_vm12, %v9736_v29  ;;  %v9737_v16 = vpack.c.bf16 %v9035_v45, %v9035_v45 }
 0x5e1   : > { %9356 = vst.msk [vmem:[%s12762_s15 + $0xcc] sm:$0xf] %vm9304_vm12, %v9737_v16 }
 0x5e5   : > { %v8937_v50 = vpop.f32.mrb[104].mxu1 }
 0x5e6   : > { %v8938_v31 = vadd.f32 %v13025_v57, %v8937_v50  ;;  %v8939_v51 = vpop.f32.mrb[105].mxu1 }
 0x5e7   : > { %v8940_v32 = vpop.f32.mrb[106].mxu1 }
 0x5e8   : > { %v9036_v48 = vmax.f32 %v8938_v31, 0.0  ;;  %v8941_v24 = vadd.f32 %v13025_v57, %v8940_v32  ;;  %v8942_v35 = vpop.f32.mrb[107].mxu1 }
 0x5ea   : > { %v9738_v42 = vpack.c.bf16 %v9036_v48, %v9036_v48  ;;  %v9037_v61 = vmax.f32 %v8941_v24, 0.0 }
 0x5ec   : > { %9357 = vst.msk [vmem:[%s12762_s15 + $0xd0] sm:$0xf] %vm9304_vm12, %v9738_v42  ;;  %v9739_v28 = vpack.c.bf16 %v9037_v61, %v9037_v61 }
 0x5ee   : > { %9358 = vst.msk [vmem:[%s12762_s15 + $0xd4] sm:$0xf] %vm9304_vm12, %v9739_v28 }
 0x5f4   : > { %v8945_v59 = vpop.f32.mrb[108].mxu1 }
 0x5f5   : > { %v8946_v9 = vadd.f32 %v13025_v57, %v8945_v59  ;;  %v8947_v56 = vpop.f32.mrb[109].mxu1 }
 0x5f6   : > { %v8948_v22 = vpop.f32.mrb[110].mxu1 }
 0x5f7   : > { %v9038_v49 = vmax.f32 %v8946_v9, 0.0  ;;  %v8949_v17 = vadd.f32 %v13025_v57, %v8948_v22  ;;  %v8950_v40 = vpop.f32.mrb[111].mxu1 }
 0x5f9   : > { %v9740_v8 = vpack.c.bf16 %v9038_v49, %v9038_v49  ;;  %v9039_v41 = vmax.f32 %v8949_v17, 0.0 }
 0x5fb   : > { %9359 = vst.msk [vmem:[%s12762_s15 + $0xd8] sm:$0xf] %vm9304_vm12, %v9740_v8  ;;  %v9741_v36 = vpack.c.bf16 %v9039_v41, %v9039_v41 }
 0x5fd   : > { %9360 = vst.msk [vmem:[%s12762_s15 + $0xdc] sm:$0xf] %vm9304_vm12, %v9741_v36 }
 0x601   : > { %v8953_v47 = vpop.f32.mrb[112].mxu1 }
 0x602   : > { %v8954_v26 = vadd.f32 %v13025_v57, %v8953_v47  ;;  %v8955_v10 = vpop.f32.mrb[113].mxu1 }
 0x603   : > { %v8956_v53 = vpop.f32.mrb[114].mxu1 }
 0x604   : > { %v9040_v43 = vmax.f32 %v8954_v26, 0.0  ;;  %v8957_v63 = vadd.f32 %v13025_v57, %v8956_v53  ;;  %v8958_v38 = vpop.f32.mrb[115].mxu1 }
 0x606   : > { %v9742_v46 = vpack.c.bf16 %v9040_v43, %v9040_v43  ;;  %v9041_v37 = vmax.f32 %v8957_v63, 0.0 }
 0x608   : > { %9361 = vst.msk [vmem:[%s12762_s15 + $0xe0] sm:$0xf] %vm9304_vm12, %v9742_v46  ;;  %v9743_v7 = vpack.c.bf16 %v9041_v37, %v9041_v37 }
 0x60a   : > { %9362 = vst.msk [vmem:[%s12762_s15 + $0xe4] sm:$0xf] %vm9304_vm12, %v9743_v7 }
 0x610   : > { %v8961_v0 = vpop.f32.mrb[116].mxu1 }
 0x611   : > { %v8962_v21 = vadd.f32 %v13025_v57, %v8961_v0  ;;  %v8963_v54 = vpop.f32.mrb[117].mxu1 }
 0x612   : > { %v8964_v3 = vpop.f32.mrb[118].mxu1 }
 0x613   : > { %v9042_v18 = vmax.f32 %v8962_v21, 0.0  ;;  %v8965_v2 = vadd.f32 %v13025_v57, %v8964_v3  ;;  %v8966_v5 = vpop.f32.mrb[119].mxu1 }
 0x615   : > { %v9744_v30 = vpack.c.bf16 %v9042_v18, %v9042_v18  ;;  %v9043_v39 = vmax.f32 %v8965_v2, 0.0 }
 0x617   : > { %9363 = vst.msk [vmem:[%s12762_s15 + $0xe8] sm:$0xf] %vm9304_vm12, %v9744_v30  ;;  %v9745_v55 = vpack.c.bf16 %v9043_v39, %v9043_v39 }
 0x619   : > { %9364 = vst.msk [vmem:[%s12762_s15 + $0xec] sm:$0xf] %vm9304_vm12, %v9745_v55 }
 0x61d   : > { %v8969_v44 = vpop.f32.mrb[120].mxu1 }
 0x61e   : > { %v8970_v19 = vadd.f32 %v13025_v57, %v8969_v44  ;;  %v8971_v11 = vpop.f32.mrb[121].mxu1 }
 0x61f   : > { %v8972_v14 = vpop.f32.mrb[122].mxu1 }
 0x620   : > { %v9044_v60 = vmax.f32 %v8970_v19, 0.0  ;;  %v8973_v13 = vadd.f32 %v13025_v57, %v8972_v14  ;;  %v8974_v33 = vpop.f32.mrb[123].mxu1 }
 0x622   : > { %v9746_v34 = vpack.c.bf16 %v9044_v60, %v9044_v60  ;;  %v9045_v25 = vmax.f32 %v8973_v13, 0.0 }
 0x624   : > { %9365 = vst.msk [vmem:[%s12762_s15 + $0xf0] sm:$0xf] %vm9304_vm12, %v9746_v34  ;;  %v9747_v27 = vpack.c.bf16 %v9045_v25, %v9045_v25 }
 0x626   : > { %9366 = vst.msk [vmem:[%s12762_s15 + $0xf4] sm:$0xf] %vm9304_vm12, %v9747_v27 }
 0x62c   : > { %v8977_v6 = vpop.f32.mrb[124].mxu1 }
 0x62d   : > { %v8978_v1 = vadd.f32 %v13025_v57, %v8977_v6  ;;  %v8979_v58 = vpop.f32.mrb[125].mxu1 }
 0x62e   : > { %v8980_v15 = vpop.f32.mrb[126].mxu1 }
 0x62f   : > { %v9046_v52 = vmax.f32 %v8978_v1, 0.0  ;;  %v8981_v20 = vadd.f32 %v13025_v57, %v8980_v15  ;;  %v8982_v12 = vpop.f32.mrb[127].mxu1 }
 0x631   : > { %v9748_v23 = vpack.c.bf16 %v9046_v52, %v9046_v52  ;;  %v9047_v4 = vmax.f32 %v8981_v20, 0.0 }
 0x633   : > { %9367 = vst.msk [vmem:[%s12762_s15 + $0xf8] sm:$0xf] %vm9304_vm12, %v9748_v23  ;;  %v9749_v62 = vpack.c.bf16 %v9047_v4, %v9047_v4 }
 0x635   : > { %9368 = vst.msk [vmem:[%s12762_s15 + $0xfc] sm:$0xf] %vm9304_vm12, %v9749_v62 }
 0x636 PF: > { %s16_s21 = sadd.s32 1, %s9956_s21  }
 0x637   : > { %p13_p4 = scmp.ge.s32.totalorder %s16_s21, 6  }
 0x639   :  { %15 = sbr.rel (!%p13_p4) target bundleno = 1 (0x1), region = 83 }

</bundles_post_ra>
